<compile_context>
chip_gen: v5e
topology: v5e:2x2
jax: 0.10.0
libtpu: 0.0.40
codegen_flags: <defaults>
</compile_context>

<pallas_src>
import jax
import jax.numpy as jnp
from jax.experimental import pallas as pl
from jax.experimental.pallas import tpu as pltpu

NEG_SLOPE = 0.01   # F.leaky_relu default negative_slope
BN_EPS = 1e-5      # nn.BatchNorm1d default eps


def _round_up(x, m):
    return ((x + m - 1) // m) * m


def _cdiv(a, b):
    return -(-a // b)


def _max_batch_tile():
    """256-row tiles match the v6e/v7x 2x256^2 MXU; keep 128 on v5e."""
    try:
        kind = jax.devices()[0].device_kind.lower()
    except Exception:
        return 256
    if "v5 lite" in kind or "v5e" in kind or "v5litepod" in kind:
        return 128
    return 256


def _pick_batch_tile(b, max_tile):
    """Batch tile: multiple of 16 (bf16 sublane packing), >= 2 grid steps when
    possible (v7x megacore), padding spread across tiles, capped at max_tile."""
    b = max(int(b), 1)
    if b <= 16:
        return 16                               # one fully-packed bf16 tile
    n_tiles = max(2, _cdiv(b, max_tile))
    return _round_up(_cdiv(b, n_tiles), 16)


def mlp_head_kernel(x_ref, w1_ref, b1_ref, w2_ref, b2_ref, w3_ref, b3_ref,
                    out_ref):
    # fc1 -> leaky_relu   (bn1 is folded into fc2; dropout1 identity in eval)
    h = jnp.dot(x_ref[...], w1_ref[...],
                preferred_element_type=jnp.float32) + b1_ref[...]
    h = jnp.maximum(h, NEG_SLOPE * h)

    # fc2 (bn1 folded in) -> leaky_relu  (bn2 folded into output_layer)
    h = jnp.dot(h.astype(jnp.bfloat16), w2_ref[...],
                preferred_element_type=jnp.float32) + b2_ref[...]
    h = jnp.maximum(h, NEG_SLOPE * h)

    # output_layer (bn2 folded in), zero-padded to a lane-dense 128-wide block
    out_ref[...] = jnp.dot(h.astype(jnp.bfloat16), w3_ref[...],
                           preferred_element_type=jnp.float32) + b3_ref[...]


def init_params(key, classes):
    """PyTorch-equivalent parameter init (shapes implied by CNN.__init__)."""
    ks = jax.random.split(key, 14)

    def linear(kw, kb, fan_in, fan_out):
        # PyTorch Linear stores weight as (out, in); we keep it transposed
        # (in, out) so the kernel does y = x @ W + b.
        bound = 1.0 / jnp.sqrt(fan_in)
        w = jax.random.uniform(kw, (fan_in, fan_out), jnp.float32, -bound, bound)
        b = jax.random.uniform(kb, (1, fan_out), jnp.float32, -bound, bound)
        return w, b

    w1, b1 = linear(ks[0], ks[1], 1280, 512)
    w2, b2 = linear(ks[2], ks[3], 512, 256)
    w3, b3 = linear(ks[4], ks[5], 256, classes)

    # Non-trivial BN stats/affine so the folding math is actually exercised.
    def bn(kg, kb_, km, kv, n):
        gamma = jax.random.uniform(kg, (1, n), jnp.float32, 0.5, 1.5)
        beta = jax.random.uniform(kb_, (1, n), jnp.float32, -0.5, 0.5)
        mean = 0.1 * jax.random.normal(km, (1, n), jnp.float32)
        var = jax.random.uniform(kv, (1, n), jnp.float32, 0.5, 1.5)
        return gamma, beta, mean, var

    g1, be1, m1, v1 = bn(ks[6], ks[7], ks[8], ks[9], 512)
    g2, be2, m2, v2 = bn(ks[10], ks[11], ks[12], ks[13], 256)

    return dict(w1=w1, b1=b1, w2=w2, b2=b2, w3=w3, b3=b3,
                g1=g1, be1=be1, m1=m1, v1=v1,
                g2=g2, be2=be2, m2=m2, v2=v2)


def fold_params(p, out_pad):
    """Fold eval-mode BN affines into the following linear layers, pad the
    output layer to a lane-dense width, and cast weights to bf16."""
    s1 = p["g1"] / jnp.sqrt(p["v1"] + BN_EPS)          # (1, 512)
    t1 = p["be1"] - p["m1"] * s1
    s2 = p["g2"] / jnp.sqrt(p["v2"] + BN_EPS)          # (1, 256)
    t2 = p["be2"] - p["m2"] * s2

    w2f = p["w2"] * s1.reshape(-1, 1)                  # diag(s1) @ W2
    b2f = t1 @ p["w2"] + p["b2"]
    w3f = p["w3"] * s2.reshape(-1, 1)                  # diag(s2) @ W3
    b3f = t2 @ p["w3"] + p["b3"]

    classes = p["w3"].shape[1]
    w3f = jnp.pad(w3f, ((0, 0), (0, out_pad - classes)))
    b3f = jnp.pad(b3f, ((0, 0), (0, out_pad - classes)))

    return dict(
        w1=p["w1"].astype(jnp.bfloat16), b1=p["b1"],
        w2=w2f.astype(jnp.bfloat16), b2=b2f,
        w3=w3f.astype(jnp.bfloat16), b3=b3f,
    )


def _call_head(pooled_bf16, folded, *, tb, b_pad, out_pad, single_buffer_weights):
    """Build + run the fused MLP-head pallas_call."""
    res_pm = pl.Buffered(1) if single_buffer_weights else None

    def resident(shape):
        # Weights / biases: same block every grid step -> stay resident in
        # VMEM; single-buffer them (they never re-DMA) when supported.
        if res_pm is None:
            return pl.BlockSpec(shape, lambda i: (0, 0))
        return pl.BlockSpec(shape, lambda i: (0, 0), pipeline_mode=res_pm)

    flops = 2 * b_pad * (1280 * 512 + 512 * 256 + 256 * out_pad)
    bytes_accessed = (
        int(pooled_bf16.size) * pooled_bf16.dtype.itemsize
        + sum(int(v.size) * v.dtype.itemsize for v in folded.values())
        + b_pad * out_pad * 4)

    return pl.pallas_call(
        mlp_head_kernel,
        out_shape=jax.ShapeDtypeStruct((b_pad, out_pad), jnp.float32),
        grid_spec=pltpu.PrefetchScalarGridSpec(
            num_scalar_prefetch=0,
            grid=(b_pad // tb,),
            in_specs=[
                pl.BlockSpec((tb, 1280), lambda i: (i, 0)),        # activations
                resident((1280, 512)), resident((1, 512)),          # fc1
                resident((512, 256)), resident((1, 256)),           # fc2 (+bn1)
                resident((256, out_pad)), resident((1, out_pad)),   # out (+bn2)
            ],
            out_specs=pl.BlockSpec((tb, out_pad), lambda i: (i, 0)),
        ),
        compiler_params=pltpu.CompilerParams(
            dimension_semantics=("parallel",),        # megacore split on v7x
            vmem_limit_bytes=16 * 1024 * 1024,        # true footprint ~5-6 MiB
        ),
        cost_estimate=pl.CostEstimate(
            flops=flops, transcendentals=0, bytes_accessed=bytes_accessed),
    )(pooled_bf16,
      folded["w1"], folded["b1"],
      folded["w2"], folded["b2"],
      folded["w3"], folded["b3"])


def cnn_head_forward(features, folded, classes, *, channels_last=False):
    """features: backbone feature map, (B, 1280, H, W) if channels_last=False
    (PyTorch NCHW), else (B, H, W, 1280).  NHWC is preferred when available:
    the spatial mean then reduces over sublanes with channels lane-dense."""
    if channels_last:
        B = features.shape[0]
        assert features.shape[-1] == 1280, "fc1 expects 1280 backbone channels"
        pooled = jnp.mean(features, axis=(1, 2))                    # (B, 1280)
    else:
        B, C, H, W = features.shape
        assert C == 1280, "fc1 expects 1280 backbone channels"
        # AdaptiveAvgPool2d(1) + flatten: plain XLA reduction, no HBM transpose.
        pooled = jnp.mean(features, axis=(2, 3))                    # (B, 1280)

    out_pad = folded["w3"].shape[1]                                 # >= 128
    tb = _pick_batch_tile(B, _max_batch_tile())
    b_pad = _round_up(B, tb)
    if b_pad != B:
        pooled = jnp.pad(pooled, ((0, b_pad - B), (0, 0)))
    pooled = pooled.astype(jnp.bfloat16)

    try:
        out = _call_head(pooled, folded, tb=tb, b_pad=b_pad, out_pad=out_pad,
                         single_buffer_weights=True)
    except Exception:
        # pipeline_mode=pl.Buffered(1) is a pure VMEM-hygiene hint; fall back
        # to default double buffering if this jax/libtpu combo rejects it.
        out = _call_head(pooled, folded, tb=tb, b_pad=b_pad, out_pad=out_pad,
                         single_buffer_weights=False)

    return out[:B, :classes]


def reference_forward(features_nchw, p):
    """Pure-JAX f32 reference matching the PyTorch eval-mode forward."""
    pooled = jnp.mean(features_nchw, axis=(2, 3))
    s1 = p["g1"] / jnp.sqrt(p["v1"] + BN_EPS)
    t1 = p["be1"] - p["m1"] * s1
    s2 = p["g2"] / jnp.sqrt(p["v2"] + BN_EPS)
    t2 = p["be2"] - p["m2"] * s2

    h = pooled @ p["w1"] + p["b1"]
    h = jnp.where(h >= 0, h, NEG_SLOPE * h)
    h = h * s1 + t1
    h = h @ p["w2"] + p["b2"]
    h = jnp.where(h >= 0, h, NEG_SLOPE * h)
    h = h * s2 + t2
    return h @ p["w3"] + p["b3"]


if __name__ == "__main__":
    key = jax.random.PRNGKey(0)
    k_feat, k_param = jax.random.split(key)

    B, C, H, W = 2, 1280, 4, 4   # small spatial feature map from the backbone
    classes = 10

    features = jax.random.normal(k_feat, (B, C, H, W), jnp.float32)
    params = init_params(k_param, classes)
    folded = fold_params(params, out_pad=_round_up(max(classes, 128), 128))

    out = cnn_head_forward(features, folded, classes)
    out = jax.block_until_ready(out)

    ref = reference_forward(features, params)
    assert out.shape == (B, classes)
    # bf16 matmul operands (f32 accumulation) -> looser tolerance than pure f32.
    assert jnp.allclose(out, ref, atol=3e-2, rtol=3e-2), float(jnp.max(jnp.abs(out - ref)))

    print("KERNEL_OK")
</pallas_src>

<mosaic_0001>
module attributes {stable_mosaic.version = 11 : i64} {
  func.func @mlp_head_kernel(%arg0: i32, %arg1: memref<16x1280xbf16, #tpu.memory_space<vmem>>, %arg2: memref<1280x512xbf16, #tpu.memory_space<vmem>>, %arg3: memref<1x512xf32, #tpu.memory_space<vmem>>, %arg4: memref<512x256xbf16, #tpu.memory_space<vmem>>, %arg5: memref<1x256xf32, #tpu.memory_space<vmem>>, %arg6: memref<256x128xbf16, #tpu.memory_space<vmem>>, %arg7: memref<1x128xf32, #tpu.memory_space<vmem>>, %arg8: memref<16x128xf32, #tpu.memory_space<vmem>>) attributes {dimension_semantics = [#tpu.dimension_semantics<parallel>], iteration_bounds = array<i64: 1>, scalar_prefetch = 0 : i64, scratch_operands = 0 : i64, tpu.core_type = #tpu.core_type<tc>, window_params = [{transform_indices = @transform_0, window_bounds = array<i64: 16, 1280>}, {pipeline_mode = #tpu.pipeline_mode<synchronous>, transform_indices = @transform_1, window_bounds = array<i64: 1280, 512>}, {pipeline_mode = #tpu.pipeline_mode<synchronous>, transform_indices = @transform_2, window_bounds = array<i64: 1, 512>}, {pipeline_mode = #tpu.pipeline_mode<synchronous>, transform_indices = @transform_3, window_bounds = array<i64: 512, 256>}, {pipeline_mode = #tpu.pipeline_mode<synchronous>, transform_indices = @transform_4, window_bounds = array<i64: 1, 256>}, {pipeline_mode = #tpu.pipeline_mode<synchronous>, transform_indices = @transform_5, window_bounds = array<i64: 256, 128>}, {pipeline_mode = #tpu.pipeline_mode<synchronous>, transform_indices = @transform_6, window_bounds = array<i64: 1, 128>}, {transform_indices = @transform_7, window_bounds = array<i64: 16, 128>}]} {
    %c0 = arith.constant 0 : index
    %c0_0 = arith.constant 0 : index
    %0 = vector.load %arg1[%c0, %c0_0] : memref<16x1280xbf16, #tpu.memory_space<vmem>>, vector<16x1280xbf16>
    %c0_1 = arith.constant 0 : index
    %c0_2 = arith.constant 0 : index
    %1 = vector.load %arg2[%c0_1, %c0_2] : memref<1280x512xbf16, #tpu.memory_space<vmem>>, vector<1280x512xbf16>
    %cst = arith.constant dense<0.000000e+00> : vector<16x512xf32>
    %2 = tpu.matmul %0, %1, %cst {dimension_numbers = #tpu.dot_dimension_numbers<[1], [0], [0], [1], [0, 0, 1, 1], [], []>} : vector<16x1280xbf16>, vector<1280x512xbf16>, vector<16x512xf32> -> vector<16x512xf32>
    %c0_3 = arith.constant 0 : index
    %c0_4 = arith.constant 0 : index
    %3 = vector.load %arg3[%c0_3, %c0_4] : memref<1x512xf32, #tpu.memory_space<vmem>>, vector<1x512xf32>
    %4 = vector.broadcast %3 : vector<1x512xf32> to vector<16x512xf32>
    %5 = arith.addf %2, %4 : vector<16x512xf32>
    %cst_5 = arith.constant 0.00999999977 : f32
    %6 = vector.broadcast %cst_5 : f32 to vector<16x512xf32>
    %7 = arith.mulf %6, %5 : vector<16x512xf32>
    %8 = arith.maximumf %5, %7 : vector<16x512xf32>
    %9 = arith.truncf %8 : vector<16x512xf32> to vector<16x512xbf16>
    %c0_6 = arith.constant 0 : index
    %c0_7 = arith.constant 0 : index
    %10 = vector.load %arg4[%c0_6, %c0_7] : memref<512x256xbf16, #tpu.memory_space<vmem>>, vector<512x256xbf16>
    %cst_8 = arith.constant dense<0.000000e+00> : vector<16x256xf32>
    %11 = tpu.matmul %9, %10, %cst_8 {dimension_numbers = #tpu.dot_dimension_numbers<[1], [0], [0], [1], [0, 0, 1, 1], [], []>} : vector<16x512xbf16>, vector<512x256xbf16>, vector<16x256xf32> -> vector<16x256xf32>
    %c0_9 = arith.constant 0 : index
    %c0_10 = arith.constant 0 : index
    %12 = vector.load %arg5[%c0_9, %c0_10] : memref<1x256xf32, #tpu.memory_space<vmem>>, vector<1x256xf32>
    %13 = vector.broadcast %12 : vector<1x256xf32> to vector<16x256xf32>
    %14 = arith.addf %11, %13 : vector<16x256xf32>
    %cst_11 = arith.constant 0.00999999977 : f32
    %15 = vector.broadcast %cst_11 : f32 to vector<16x256xf32>
    %16 = arith.mulf %15, %14 : vector<16x256xf32>
    %17 = arith.maximumf %14, %16 : vector<16x256xf32>
    %18 = arith.truncf %17 : vector<16x256xf32> to vector<16x256xbf16>
    %c0_12 = arith.constant 0 : index
    %c0_13 = arith.constant 0 : index
    %19 = vector.load %arg6[%c0_12, %c0_13] : memref<256x128xbf16, #tpu.memory_space<vmem>>, vector<256x128xbf16>
    %cst_14 = arith.constant dense<0.000000e+00> : vector<16x128xf32>
    %20 = tpu.matmul %18, %19, %cst_14 {dimension_numbers = #tpu.dot_dimension_numbers<[1], [0], [0], [1], [0, 0, 1, 1], [], []>} : vector<16x256xbf16>, vector<256x128xbf16>, vector<16x128xf32> -> vector<16x128xf32>
    %c0_15 = arith.constant 0 : index
    %c0_16 = arith.constant 0 : index
    %21 = vector.load %arg7[%c0_15, %c0_16] : memref<1x128xf32, #tpu.memory_space<vmem>>, vector<1x128xf32>
    %22 = vector.broadcast %21 : vector<1x128xf32> to vector<16x128xf32>
    %23 = arith.addf %20, %22 : vector<16x128xf32>
    %c0_17 = arith.constant 0 : index
    %c0_18 = arith.constant 0 : index
    %24 = vector.load %arg8[%c0_17, %c0_18] : memref<16x128xf32, #tpu.memory_space<vmem>>, vector<16x128xf32>
    tpu.vector_store %arg8[%c0_17, %c0_18], %23 {strides = array<i32>} : memref<16x128xf32, #tpu.memory_space<vmem>>, vector<16x128xf32>,
    return
  }
  func.func @transform_0(%arg0: i32) -> (i32, i32) {
    %c0_i32 = arith.constant 0 : i32
    %c0_i32_0 = arith.constant 0 : i32
    return %arg0, %c0_i32 : i32, i32
  }
  func.func @transform_1(%arg0: i32) -> (i32, i32) {
    %c0_i32 = arith.constant 0 : i32
    %c0_i32_0 = arith.constant 0 : i32
    %c0_i32_1 = arith.constant 0 : i32
    return %c0_i32, %c0_i32_0 : i32, i32
  }
  func.func @transform_2(%arg0: i32) -> (i32, i32) {
    %c0_i32 = arith.constant 0 : i32
    %c0_i32_0 = arith.constant 0 : i32
    %c0_i32_1 = arith.constant 0 : i32
    return %c0_i32, %c0_i32_0 : i32, i32
  }
  func.func @transform_3(%arg0: i32) -> (i32, i32) {
    %c0_i32 = arith.constant 0 : i32
    %c0_i32_0 = arith.constant 0 : i32
    %c0_i32_1 = arith.constant 0 : i32
    return %c0_i32, %c0_i32_0 : i32, i32
  }
  func.func @transform_4(%arg0: i32) -> (i32, i32) {
    %c0_i32 = arith.constant 0 : i32
    %c0_i32_0 = arith.constant 0 : i32
    %c0_i32_1 = arith.constant 0 : i32
    return %c0_i32, %c0_i32_0 : i32, i32
  }
  func.func @transform_5(%arg0: i32) -> (i32, i32) {
    %c0_i32 = arith.constant 0 : i32
    %c0_i32_0 = arith.constant 0 : i32
    %c0_i32_1 = arith.constant 0 : i32
    return %c0_i32, %c0_i32_0 : i32, i32
  }
  func.func @transform_6(%arg0: i32) -> (i32, i32) {
    %c0_i32 = arith.constant 0 : i32
    %c0_i32_0 = arith.constant 0 : i32
    %c0_i32_1 = arith.constant 0 : i32
    return %c0_i32, %c0_i32_0 : i32, i32
  }
  func.func @transform_7(%arg0: i32) -> (i32, i32) {
    %c0_i32 = arith.constant 0 : i32
    %c0_i32_0 = arith.constant 0 : i32
    return %arg0, %c0_i32 : i32, i32
  }
}

module attributes {stable_mosaic.version = 11 : i64} {
  func.func @mlp_head_kernel(%arg0: i32, %arg1: memref<16x1280xbf16, #tpu.memory_space<vmem>>, %arg2: memref<1280x512xbf16, #tpu.memory_space<vmem>>, %arg3: memref<1x512xf32, #tpu.memory_space<vmem>>, %arg4: memref<512x256xbf16, #tpu.memory_space<vmem>>, %arg5: memref<1x256xf32, #tpu.memory_space<vmem>>, %arg6: memref<256x128xbf16, #tpu.memory_space<vmem>>, %arg7: memref<1x128xf32, #tpu.memory_space<vmem>>, %arg8: memref<16x128xf32, #tpu.memory_space<vmem>>) attributes {dimension_semantics = [#tpu.dimension_semantics<parallel>], iteration_bounds = array<i64: 1>, scalar_prefetch = 0 : i64, scratch_operands = 0 : i64, tpu.core_type = #tpu.core_type<tc>, window_params = [{transform_indices = @transform_0, window_bounds = array<i64: 16, 1280>}, {pipeline_mode = #tpu.pipeline_mode<synchronous>, transform_indices = @transform_1, window_bounds = array<i64: 1280, 512>}, {pipeline_mode = #tpu.pipeline_mode<synchronous>, transform_indices = @transform_2, window_bounds = array<i64: 1, 512>}, {pipeline_mode = #tpu.pipeline_mode<synchronous>, transform_indices = @transform_3, window_bounds = array<i64: 512, 256>}, {pipeline_mode = #tpu.pipeline_mode<synchronous>, transform_indices = @transform_4, window_bounds = array<i64: 1, 256>}, {pipeline_mode = #tpu.pipeline_mode<synchronous>, transform_indices = @transform_5, window_bounds = array<i64: 256, 128>}, {pipeline_mode = #tpu.pipeline_mode<synchronous>, transform_indices = @transform_6, window_bounds = array<i64: 1, 128>}, {transform_indices = @transform_7, window_bounds = array<i64: 16, 128>}]} {
    %c0 = arith.constant 0 : index
    %c0_0 = arith.constant 0 : index
    %0 = vector.load %arg1[%c0, %c0_0] : memref<16x1280xbf16, #tpu.memory_space<vmem>>, vector<16x1280xbf16>
    %c0_1 = arith.constant 0 : index
    %c0_2 = arith.constant 0 : index
    %1 = vector.load %arg2[%c0_1, %c0_2] : memref<1280x512xbf16, #tpu.memory_space<vmem>>, vector<1280x512xbf16>
    %cst = arith.constant dense<0.000000e+00> : vector<16x512xf32>
    %2 = tpu.matmul %0, %1, %cst {dimension_numbers = #tpu.dot_dimension_numbers<[1], [0], [0], [1], [0, 0, 1, 1], [], []>} : vector<16x1280xbf16>, vector<1280x512xbf16>, vector<16x512xf32> -> vector<16x512xf32>
    %c0_3 = arith.constant 0 : index
    %c0_4 = arith.constant 0 : index
    %3 = vector.load %arg3[%c0_3, %c0_4] : memref<1x512xf32, #tpu.memory_space<vmem>>, vector<1x512xf32>
    %4 = vector.broadcast %3 : vector<1x512xf32> to vector<16x512xf32>
    %5 = arith.addf %2, %4 : vector<16x512xf32>
    %cst_5 = arith.constant 0.00999999977 : f32
    %6 = vector.broadcast %cst_5 : f32 to vector<16x512xf32>
    %7 = arith.mulf %6, %5 : vector<16x512xf32>
    %8 = arith.maximumf %5, %7 : vector<16x512xf32>
    %9 = arith.truncf %8 : vector<16x512xf32> to vector<16x512xbf16>
    %c0_6 = arith.constant 0 : index
    %c0_7 = arith.constant 0 : index
    %10 = vector.load %arg4[%c0_6, %c0_7] : memref<512x256xbf16, #tpu.memory_space<vmem>>, vector<512x256xbf16>
    %cst_8 = arith.constant dense<0.000000e+00> : vector<16x256xf32>
    %11 = tpu.matmul %9, %10, %cst_8 {dimension_numbers = #tpu.dot_dimension_numbers<[1], [0], [0], [1], [0, 0, 1, 1], [], []>} : vector<16x512xbf16>, vector<512x256xbf16>, vector<16x256xf32> -> vector<16x256xf32>
    %c0_9 = arith.constant 0 : index
    %c0_10 = arith.constant 0 : index
    %12 = vector.load %arg5[%c0_9, %c0_10] : memref<1x256xf32, #tpu.memory_space<vmem>>, vector<1x256xf32>
    %13 = vector.broadcast %12 : vector<1x256xf32> to vector<16x256xf32>
    %14 = arith.addf %11, %13 : vector<16x256xf32>
    %cst_11 = arith.constant 0.00999999977 : f32
    %15 = vector.broadcast %cst_11 : f32 to vector<16x256xf32>
    %16 = arith.mulf %15, %14 : vector<16x256xf32>
    %17 = arith.maximumf %14, %16 : vector<16x256xf32>
    %18 = arith.truncf %17 : vector<16x256xf32> to vector<16x256xbf16>
    %c0_12 = arith.constant 0 : index
    %c0_13 = arith.constant 0 : index
    %19 = vector.load %arg6[%c0_12, %c0_13] : memref<256x128xbf16, #tpu.memory_space<vmem>>, vector<256x128xbf16>
    %cst_14 = arith.constant dense<0.000000e+00> : vector<16x128xf32>
    %20 = tpu.matmul %18, %19, %cst_14 {dimension_numbers = #tpu.dot_dimension_numbers<[1], [0], [0], [1], [0, 0, 1, 1], [], []>} : vector<16x256xbf16>, vector<256x128xbf16>, vector<16x128xf32> -> vector<16x128xf32>
    %c0_15 = arith.constant 0 : index
    %c0_16 = arith.constant 0 : index
    %21 = vector.load %arg7[%c0_15, %c0_16] : memref<1x128xf32, #tpu.memory_space<vmem>>, vector<1x128xf32>
    %22 = vector.broadcast %21 : vector<1x128xf32> to vector<16x128xf32>
    %23 = arith.addf %20, %22 : vector<16x128xf32>
    %c0_17 = arith.constant 0 : index
    %c0_18 = arith.constant 0 : index
    %24 = vector.load %arg8[%c0_17, %c0_18] : memref<16x128xf32, #tpu.memory_space<vmem>>, vector<16x128xf32>
    tpu.vector_store %arg8[%c0_17, %c0_18], %23 {strides = array<i32>} : memref<16x128xf32, #tpu.memory_space<vmem>>, vector<16x128xf32>,
    return
  }
  func.func @transform_0(%arg0: i32) -> (i32, i32) {
    %c0_i32 = arith.constant 0 : i32
    %c0_i32_0 = arith.constant 0 : i32
    return %arg0, %c0_i32 : i32, i32
  }
  func.func @transform_1(%arg0: i32) -> (i32, i32) {
    %c0_i32 = arith.constant 0 : i32
    %c0_i32_0 = arith.constant 0 : i32
    %c0_i32_1 = arith.constant 0 : i32
    return %c0_i32, %c0_i32_0 : i32, i32
  }
  func.func @transform_2(%arg0: i32) -> (i32, i32) {
    %c0_i32 = arith.constant 0 : i32
    %c0_i32_0 = arith.constant 0 : i32
    %c0_i32_1 = arith.constant 0 : i32
    return %c0_i32, %c0_i32_0 : i32, i32
  }
  func.func @transform_3(%arg0: i32) -> (i32, i32) {
    %c0_i32 = arith.constant 0 : i32
    %c0_i32_0 = arith.constant 0 : i32
    %c0_i32_1 = arith.constant 0 : i32
    return %c0_i32, %c0_i32_0 : i32, i32
  }
  func.func @transform_4(%arg0: i32) -> (i32, i32) {
    %c0_i32 = arith.constant 0 : i32
    %c0_i32_0 = arith.constant 0 : i32
    %c0_i32_1 = arith.constant 0 : i32
    return %c0_i32, %c0_i32_0 : i32, i32
  }
  func.func @transform_5(%arg0: i32) -> (i32, i32) {
    %c0_i32 = arith.constant 0 : i32
    %c0_i32_0 = arith.constant 0 : i32
    %c0_i32_1 = arith.constant 0 : i32
    return %c0_i32, %c0_i32_0 : i32, i32
  }
  func.func @transform_6(%arg0: i32) -> (i32, i32) {
    %c0_i32 = arith.constant 0 : i32
    %c0_i32_0 = arith.constant 0 : i32
    %c0_i32_1 = arith.constant 0 : i32
    return %c0_i32, %c0_i32_0 : i32, i32
  }
  func.func @transform_7(%arg0: i32) -> (i32, i32) {
    %c0_i32 = arith.constant 0 : i32
    %c0_i32_0 = arith.constant 0 : i32
    return %arg0, %c0_i32 : i32, i32
  }
}

</mosaic_0001>

<bundles_post_ra>
// kernel: tpu_custom_call.1
= control target key start
LH: loop header
LB: loop body
LE: loop exit
PB: predicated region body
PF: predicated region fallthrough
CT: control target
= control target key end

     0   :  { %12 = vsyncpa [#allocation3], 0  ;;  %s5918_s0 = inlined_call_operand.hbm [shape: bf16[16,1280], index: 0, kind: input, shape index: {}]   ;;  %s5919_s1 = inlined_call_operand.hbm [shape: bf16[1280,512], index: 1, kind: input, shape index: {}]   ;;  %s5920_s2 = inlined_call_operand.hbm [shape: f32[1,512], index: 2, kind: input, shape index: {}]   ;;  %s5921_s3 = inlined_call_operand.hbm [shape: bf16[512,256], index: 3, kind: input, shape index: {}]   ;;  %s5922_s4 = inlined_call_operand.hbm [shape: f32[1,256], index: 4, kind: input, shape index: {}]   ;;  %s5923_s5 = inlined_call_operand.hbm [shape: bf16[256,128], index: 5, kind: input, shape index: {}]   ;;  %s5924_s6 = inlined_call_operand.hbm [shape: f32[1,128], index: 6, kind: input, shape index: {}]   ;;  %s5925_s7 = inlined_call_operand.hbm [shape: f32[16,128], index: 7, kind: output, shape index: {}]  }
   0x1   :  { %13 = vsyncpa [#allocation6], 0 }
   0x2   :  { %14 = vsyncpa [#allocation9], 0 }
   0x3   :  { %15 = vsyncpa [#allocation12], 0  ;;  %s34_s26 = sshll.u32 %s5919_s1, 4  ;;  %s35_s26 = int_to_ptr.hbm [resolvable:$true] %s34_s26 }
   0x4   :  { %16 = vsyncpa [#allocation4], 0  ;;  %s5665_s27 = smov [#allocation5]   ;;  %s58_s8 = sshll.u32 %s5921_s3, 4  ;;  %s59_s8 = int_to_ptr.hbm [resolvable:$true] %s58_s8 }
   0x5   :  { %s36_s28 = sshll.u32 %s5665_s27, 4  ;;  %s5666_s9 = smov 256   ;;  %s37_s28 = int_to_ptr.vmem [resolvable:$true] %s36_s28 }
   0x6   :  { %s5667_s10 = smov 16   ;;  %s5668_s11 = smov [#allocation8]  }
   0x7   :  { %42 = dma.hbm_to_vmem [thread:$0]  %s35_s26, 40960, %s37_s28, [#allocation6], %s5666_s9, %s5666_s9, %s5667_s10  }
   0x8   :  { %s60_s12 = sshll.u32 %s5668_s11, 4  ;;  %s5669_s13 = smov 128   ;;  %s61_s12 = int_to_ptr.vmem [resolvable:$true] %s60_s12 }
   0x9   :  { %s5670_s14 = smov 8   ;;  %s82_s16 = sshll.u32 %s5923_s5, 4  ;;  %s83_s16 = int_to_ptr.hbm [resolvable:$true] %s82_s16 }
   0xa   :  { %66 = dma.hbm_to_vmem [thread:$0]  %s59_s8, 8192, %s61_s12, [#allocation9], %s5669_s13, %s5669_s13, %s5670_s14  }
   0xb   :  { %s5671_s17 = smov [#allocation11]   ;;  %s21_s20 = sshll.u32 %s5918_s0, 4  ;;  %s22_s20 = int_to_ptr.hbm [resolvable:$true] %s21_s20 }
   0xc   :  { %s84_s3 = sshll.u32 %s5671_s17, 4  ;;  %s5672_s21 = smov 64   ;;  %s85_s3 = int_to_ptr.vmem [resolvable:$true] %s84_s3 }
   0xd   :  { %s5673_s22 = smov 4   ;;  %s5674_s23 = smov [#allocation2]  }
   0xe   :  { %90 = dma.hbm_to_vmem [thread:$0]  %s83_s16, 2048, %s85_s3, [#allocation12], %s5672_s21, %s5672_s21, %s5673_s22  }
   0xf   :  { %s23_s24 = sshll.u32 %s5674_s23, 4  ;;  %s5675_s25 = smov 640   ;;  %s24_s24 = int_to_ptr.vmem [resolvable:$true] %s23_s24 }
  0x10   :  { %s5676_s26 = smov 40   ;;  %s48_s28 = sshll.u32 %s5920_s2, 4  ;;  %s49_s28 = int_to_ptr.hbm [resolvable:$true] %s48_s28 }
  0x11   :  { %29 = dma.hbm_to_vmem [thread:$0]  %s22_s20, 1280, %s24_s24, [#allocation3], %s5675_s25, %s5675_s25, %s5676_s26  }
  0x12   :  { %s5677_s29 = smov [#allocation7]   ;;  %s72_s9 = sshll.u32 %s5922_s4, 4  ;;  %s73_s9 = int_to_ptr.hbm [resolvable:$true] %s72_s9 }
  0x13   :  { %s50_s30 = sshll.u32 %s5677_s29, 4  ;;  %s5678_s10 = smov [#allocation10]   ;;  %s51_s30 = int_to_ptr.vmem [resolvable:$true] %s50_s30 }
  0x14   :  { %53 = dma.hbm_to_vmem [thread:$0]  %s49_s28, 64, %s51_s30, [#allocation6]  }
  0x15   :  { %s74_s11 = sshll.u32 %s5678_s10, 4  ;;  %s96_s15 = sshll.u32 %s5924_s6, 4  ;;  %s75_s11 = int_to_ptr.vmem [resolvable:$true] %s74_s11  ;;  %s97_s15 = int_to_ptr.hbm [resolvable:$true] %s96_s15 }
  0x16   :  { %77 = dma.hbm_to_vmem [thread:$0]  %s73_s9, 32, %s75_s11, [#allocation9]  }
  0x17   :  { %s5679_s2 = smov [#allocation13]  }
  0x18   :  { %s98_s16 = sshll.u32 %s5679_s2, 4  ;;  %s99_s16 = int_to_ptr.vmem [resolvable:$true] %s98_s16 }
  0x19   :  { %101 = dma.hbm_to_vmem [thread:$0]  %s97_s15, 16, %s99_s16, [#allocation12]  }
  0x1a   :  { %5655 = dma.done.wait [#allocation3], 1280  }
  0x1b   :  { %5656 = vsyncadd [#allocation3], 4294966016 }
  0x1c   :  { %5657 = dma.done.wait [#allocation6], 41024  }
  0x1d   :  { %5658 = vsyncadd [#allocation6], 4294926272 }
  0x1e   :  { %5659 = dma.done.wait [#allocation9], 8224  }
  0x1f   :  { %5660 = vsyncadd [#allocation9], 4294959072 }
  0x20   :  { %5661 = dma.done.wait [#allocation12], 2064  }
  0x21   :  { %5662 = vsyncadd [#allocation12], 4294965232  ;;  %v3550_v0 = vld [vmem:[#allocation5 + $0xe0] sm:$0xf]  ;;  %v5076_v1 = vld [vmem:[#allocation5 + $0xec] sm:$0xf0] }
  0x22   :  { %v3678_v2 = vld [vmem:[#allocation5 + $0x1e0] sm:$0xf]  ;;  %v3551_v3 = vor.u32 %v5076_v1, %v3550_v0  ;;  %v5108_v4 = vld [vmem:[#allocation5 + $0x1ec] sm:$0xf0]  ;;  %s5680_s4 = smov [#allocation14]   ;;  %s3380_s18 = sshll.u32 %s5925_s7, 4  ;;  %s3381_s18 = int_to_ptr.hbm [resolvable:$true] %s3380_s18 }
  0x23   :  { %v3806_v5 = vld [vmem:[#allocation5 + $0x2e0] sm:$0xf]  ;;  %v5140_v6 = vld [vmem:[#allocation5 + $0x2ec] sm:$0xf0]  ;;  %v3679_v7 = vor.u32 %v5108_v4, %v3678_v2  ;;  %s3378_s6 = sshll.u32 %s5680_s4, 4  ;;  %s3379_s6 = int_to_ptr.vmem [resolvable:$true] %s3378_s6 }
  0x24   :  { %v3807_v8 = vor.u32 %v5140_v6, %v3806_v5  ;;  %v3934_v9 = vld [vmem:[#allocation5 + $0x3e0] sm:$0xf]  ;;  %v5172_v10 = vld [vmem:[#allocation5 + $0x3ec] sm:$0xf0]  ;;  %2120 = vmatpush.bf16.msra.mxu0 %v3551_v3 }
  0x25   :  { %v3534_v11 = vld [vmem:[#allocation5 + $0xc0] sm:$0xf]  ;;  %v3935_v12 = vor.u32 %v5172_v10, %v3934_v9  ;;  %v5072_v13 = vld [vmem:[#allocation5 + $0xcc] sm:$0xf0]  ;;  %2134 = vmatpush.bf16.msra.mxu1 %v3679_v7 }
  0x26   :  { %v3662_v14 = vld [vmem:[#allocation5 + $0x1c0] sm:$0xf]  ;;  %v5104_v15 = vld [vmem:[#allocation5 + $0x1cc] sm:$0xf0]  ;;  %2148 = vmatpush.bf16.msra.mxu2 %v3807_v8  ;;  %v3535_v16 = vor.u32 %v5072_v13, %v3534_v11 }
  0x27   :  { %v3663_v17 = vor.u32 %v5104_v15, %v3662_v14  ;;  %v3790_v18 = vld [vmem:[#allocation5 + $0x2c0] sm:$0xf]  ;;  %v5136_v19 = vld [vmem:[#allocation5 + $0x2cc] sm:$0xf0]  ;;  %2162 = vmatpush.bf16.msra.mxu3 %v3935_v12 }
  0x28   :  { %v3918_v20 = vld [vmem:[#allocation5 + $0x3c0] sm:$0xf]  ;;  %v3791_v21 = vor.u32 %v5136_v19, %v3790_v18  ;;  %v5168_v22 = vld [vmem:[#allocation5 + $0x3cc] sm:$0xf0]  ;;  %2121 = vmatpush.bf16.msra.mxu0 %v3535_v16 }
  0x29   :  { %v3518_v23 = vld [vmem:[#allocation5 + $0xa0] sm:$0xf]  ;;  %v5068_v24 = vld [vmem:[#allocation5 + $0xac] sm:$0xf0]  ;;  %v3919_v25 = vor.u32 %v5168_v22, %v3918_v20  ;;  %2135 = vmatpush.bf16.msra.mxu1 %v3663_v17 }
  0x2a   :  { %v3646_v26 = vld [vmem:[#allocation5 + $0x1a0] sm:$0xf]  ;;  %v5100_v27 = vld [vmem:[#allocation5 + $0x1ac] sm:$0xf0]  ;;  %v3519_v29 = vor.u32 %v5068_v24, %v3518_v23  ;;  %2149 = vmatpush.bf16.msra.mxu2 %v3791_v21 }
  0x2b   :  { %v3774_v28 = vld [vmem:[#allocation5 + $0x2a0] sm:$0xf]  ;;  %v5132_v30 = vld [vmem:[#allocation5 + $0x2ac] sm:$0xf0]  ;;  %v3647_v33 = vor.u32 %v5100_v27, %v3646_v26  ;;  %2163 = vmatpush.bf16.msra.mxu3 %v3919_v25 }
  0x2c   :  { %v3902_v31 = vld [vmem:[#allocation5 + $0x3a0] sm:$0xf]  ;;  %v5164_v32 = vld [vmem:[#allocation5 + $0x3ac] sm:$0xf0]  ;;  %v3775_v34 = vor.u32 %v5132_v30, %v3774_v28  ;;  %2122 = vmatpush.bf16.msra.mxu0 %v3519_v29 }
  0x2d   :  { %v3502_v35 = vld [vmem:[#allocation5 + $0x80] sm:$0xf]  ;;  %v5064_v36 = vld [vmem:[#allocation5 + $0x8c] sm:$0xf0]  ;;  %v3903_v38 = vor.u32 %v5164_v32, %v3902_v31  ;;  %2136 = vmatpush.bf16.msra.mxu1 %v3647_v33 }
  0x2e   :  { %v3630_v37 = vld [vmem:[#allocation5 + $0x180] sm:$0xf]  ;;  %v5096_v39 = vld [vmem:[#allocation5 + $0x18c] sm:$0xf0]  ;;  %v3503_v44 = vor.u32 %v5064_v36, %v3502_v35  ;;  %2150 = vmatpush.bf16.msra.mxu2 %v3775_v34 }
  0x2f   :  { %v3758_v40 = vld [vmem:[#allocation5 + $0x280] sm:$0xf]  ;;  %v5128_v41 = vld [vmem:[#allocation5 + $0x28c] sm:$0xf0]  ;;  %v3631_v45 = vor.u32 %v5096_v39, %v3630_v37  ;;  %2164 = vmatpush.bf16.msra.mxu3 %v3903_v38 }
  0x30   :  { %v3886_v42 = vld [vmem:[#allocation5 + $0x380] sm:$0xf]  ;;  %v5160_v43 = vld [vmem:[#allocation5 + $0x38c] sm:$0xf0]  ;;  %v3759_v46 = vor.u32 %v5128_v41, %v3758_v40  ;;  %2123 = vmatpush.bf16.msra.mxu0 %v3503_v44 }
  0x31   :  { %v3486_v47 = vld [vmem:[#allocation5 + $0x60] sm:$0xf]  ;;  %v5060_v48 = vld [vmem:[#allocation5 + $0x6c] sm:$0xf0]  ;;  %v3887_v50 = vor.u32 %v5160_v43, %v3886_v42  ;;  %2137 = vmatpush.bf16.msra.mxu1 %v3631_v45 }
  0x32   :  { %v3614_v49 = vld [vmem:[#allocation5 + $0x160] sm:$0xf]  ;;  %v5092_v51 = vld [vmem:[#allocation5 + $0x16c] sm:$0xf0]  ;;  %v3487_v56 = vor.u32 %v5060_v48, %v3486_v47  ;;  %2151 = vmatpush.bf16.msra.mxu2 %v3759_v46 }
  0x33   :  { %v3742_v52 = vld [vmem:[#allocation5 + $0x260] sm:$0xf]  ;;  %v5124_v53 = vld [vmem:[#allocation5 + $0x26c] sm:$0xf0]  ;;  %v3615_v57 = vor.u32 %v5092_v51, %v3614_v49  ;;  %2165 = vmatpush.bf16.msra.mxu3 %v3887_v50 }
  0x34   :  { %v3870_v54 = vld [vmem:[#allocation5 + $0x360] sm:$0xf]  ;;  %v5156_v55 = vld [vmem:[#allocation5 + $0x36c] sm:$0xf0]  ;;  %v3743_v58 = vor.u32 %v5124_v53, %v3742_v52  ;;  %2124 = vmatpush.bf16.msra.mxu0 %v3487_v56  ;;  %v5041_v53 = vld [vmem:[#allocation2 + $0x24] sm:$0xf0] }
  0x35   :  { %v3470_v59 = vld [vmem:[#allocation5 + $0x40] sm:$0xf]  ;;  %v5056_v60 = vld [vmem:[#allocation5 + $0x4c] sm:$0xf0]  ;;  %v3871_v62 = vor.u32 %v5156_v55, %v3870_v54  ;;  %2138 = vmatpush.bf16.msra.mxu1 %v3615_v57  ;;  %v3406_v54 = vld [vmem:[#allocation2 + $0x8] sm:$0xf] }
  0x36   :  { %v3598_v61 = vld [vmem:[#allocation5 + $0x140] sm:$0xf]  ;;  %v5088_v63 = vld [vmem:[#allocation5 + $0x14c] sm:$0xf0]  ;;  %v3471_v4 = vor.u32 %v5056_v60, %v3470_v59  ;;  %2152 = vmatpush.bf16.msra.mxu2 %v3743_v58 }
  0x37   :  { %v3726_v0 = vld [vmem:[#allocation5 + $0x240] sm:$0xf]  ;;  %v5120_v1 = vld [vmem:[#allocation5 + $0x24c] sm:$0xf0]  ;;  %v3599_v5 = vor.u32 %v5088_v63, %v3598_v61  ;;  %2166 = vmatpush.bf16.msra.mxu3 %v3871_v62 }
  0x38   :  { %v3854_v2 = vld [vmem:[#allocation5 + $0x340] sm:$0xf]  ;;  %v5152_v3 = vld [vmem:[#allocation5 + $0x34c] sm:$0xf0]  ;;  %v3727_v6 = vor.u32 %v5120_v1, %v3726_v0  ;;  %2125 = vmatpush.bf16.msra.mxu0 %v3471_v4 }
  0x39   :  { %v3454_v7 = vld [vmem:[#allocation5 + $0x20] sm:$0xf]  ;;  %v5052_v8 = vld [vmem:[#allocation5 + $0x2c] sm:$0xf0]  ;;  %v3855_v10 = vor.u32 %v5152_v3, %v3854_v2  ;;  %2139 = vmatpush.bf16.msra.mxu1 %v3599_v5 }
  0x3a   :  { %v3582_v9 = vld [vmem:[#allocation5 + $0x120] sm:$0xf]  ;;  %v5084_v11 = vld [vmem:[#allocation5 + $0x12c] sm:$0xf0]  ;;  %v3455_v16 = vor.u32 %v5052_v8, %v3454_v7  ;;  %2153 = vmatpush.bf16.msra.mxu2 %v3727_v6  ;;  %v5036_v6 = vld [vmem:[#allocation2 + $0x4] sm:$0xf] }
  0x3b   :  { %v3710_v12 = vld [vmem:[#allocation5 + $0x220] sm:$0xf]  ;;  %v5116_v13 = vld [vmem:[#allocation5 + $0x22c] sm:$0xf0]  ;;  %v3583_v19 = vor.u32 %v5084_v11, %v3582_v9  ;;  %2167 = vmatpush.bf16.msra.mxu3 %v3855_v10  ;;  %v3400_v7 = vld [vmem:[#allocation2 + $0x28] sm:$0xf0] }
  0x3c   :  { %v3838_v14 = vld [vmem:[#allocation5 + $0x320] sm:$0xf]  ;;  %v5148_v15 = vld [vmem:[#allocation5 + $0x32c] sm:$0xf0]  ;;  %v3711_v20 = vor.u32 %v5116_v13, %v3710_v12  ;;  %2126 = vmatpush.bf16.msra.mxu0 %v3455_v16  ;;  %v5037_v8 = vld [vmem:[#allocation2 + $0xc] sm:$0xf]  ;;  %v5751_v10 = vor.u32 %v5036_v6, %v3400_v7 }
  0x3d   :  { %v3438_v17 = vld [vmem:[#allocation5] sm:$0xf]  ;;  %v5048_v18 = vld [vmem:[#allocation5 + $0xc] sm:$0xf0]  ;;  %v3839_v24 = vor.u32 %v5148_v15, %v3838_v14  ;;  %2140 = vmatpush.bf16.msra.mxu1 %v3583_v19  ;;  %v3408_v11 = vld [vmem:[#allocation2 + $0x30] sm:$0xf0] }
  0x3e   :  { %v3566_v21 = vld [vmem:[#allocation5 + $0x100] sm:$0xf]  ;;  %v5080_v22 = vld [vmem:[#allocation5 + $0x10c] sm:$0xf0]  ;;  %v3439_v31 = vor.u32 %v5048_v18, %v3438_v17  ;;  %2154 = vmatpush.bf16.msra.mxu2 %v3711_v20  ;;  %v5753_v17 = vor.u32 %v5037_v8, %v3408_v11 }
  0x3f   :  { %v3694_v23 = vld [vmem:[#allocation5 + $0x200] sm:$0xf]  ;;  %v5112_v25 = vld [vmem:[#allocation5 + $0x20c] sm:$0xf0]  ;;  %v3567_v35 = vor.u32 %v5080_v22, %v3566_v21  ;;  %2168 = vmatpush.bf16.msra.mxu3 %v3839_v24 }
  0x40   :  { %v3822_v26 = vld [vmem:[#allocation5 + $0x300] sm:$0xf]  ;;  %v5144_v27 = vld [vmem:[#allocation5 + $0x30c] sm:$0xf0]  ;;  %v3695_v36 = vor.u32 %v5112_v25, %v3694_v23  ;;  %2127 = vmatpush.bf16.msra.mxu0 %v3439_v31 }
  0x41   :  { %v4062_v28 = vld [vmem:[#allocation5 + $0x4e0] sm:$0xf]  ;;  %v5204_v29 = vld [vmem:[#allocation5 + $0x4ec] sm:$0xf0]  ;;  %v3823_v39 = vor.u32 %v5144_v27, %v3822_v26  ;;  %2141 = vmatpush.bf16.msra.mxu1 %v3567_v35 }
  0x42   :  { %v4190_v30 = vld [vmem:[#allocation5 + $0x5e0] sm:$0xf]  ;;  %v5236_v32 = vld [vmem:[#allocation5 + $0x5ec] sm:$0xf0]  ;;  %v4063_v40 = vor.u32 %v5204_v29, %v4062_v28  ;;  %2155 = vmatpush.bf16.msra.mxu2 %v3695_v36 }
  0x43   :  { %v4318_v33 = vld [vmem:[#allocation5 + $0x6e0] sm:$0xf]  ;;  %v5268_v34 = vld [vmem:[#allocation5 + $0x6ec] sm:$0xf0]  ;;  %v4191_v43 = vor.u32 %v5236_v32, %v4190_v30  ;;  %2169 = vmatpush.bf16.msra.mxu3 %v3823_v39 }
  0x44   :  { %v4446_v37 = vld [vmem:[#allocation5 + $0x7e0] sm:$0xf]  ;;  %v5300_v38 = vld [vmem:[#allocation5 + $0x7ec] sm:$0xf0]  ;;  %v4319_v44 = vor.u32 %v5268_v34, %v4318_v33  ;;  %2176 = vmatpush.bf16.msrb.mxu0 %v4063_v40  ;;  %2142 = vmatmul.bf16.vlgmr.msra.gmra.mxu1 %v5751_v10 }
  0x45   :  { %v4046_v41 = vld [vmem:[#allocation5 + $0x4c0] sm:$0xf]  ;;  %v5200_v42 = vld [vmem:[#allocation5 + $0x4cc] sm:$0xf0]  ;;  %v4447_v48 = vor.u32 %v5300_v38, %v4446_v37  ;;  %2190 = vmatpush.bf16.msrb.mxu1 %v4191_v43 }
  0x46   :  { %v4174_v45 = vld [vmem:[#allocation5 + $0x5c0] sm:$0xf]  ;;  %v5232_v46 = vld [vmem:[#allocation5 + $0x5cc] sm:$0xf0]  ;;  %v4047_v55 = vor.u32 %v5200_v42, %v4046_v41  ;;  %2204 = vmatpush.bf16.msrb.mxu2 %v4319_v44  ;;  %2170 = vmatmul.bf16.vlgmr.msra.gmra.mxu3 %v5753_v17 }
  0x47   :  { %v4302_v47 = vld [vmem:[#allocation5 + $0x6c0] sm:$0xf]  ;;  %v5264_v49 = vld [vmem:[#allocation5 + $0x6cc] sm:$0xf0]  ;;  %v4175_v60 = vor.u32 %v5232_v46, %v4174_v45  ;;  %2218 = vmatpush.bf16.msrb.mxu3 %v4447_v48 }
  0x48   :  { %v4430_v50 = vld [vmem:[#allocation5 + $0x7c0] sm:$0xf]  ;;  %v5296_v51 = vld [vmem:[#allocation5 + $0x7cc] sm:$0xf0]  ;;  %v4303_v61 = vor.u32 %v5264_v49, %v4302_v47  ;;  %2177 = vmatpush.bf16.msrb.mxu0 %v4047_v55 }
  0x49   :  { %v3398_v52 = vld [vmem:[#allocation2] sm:$0xf]  ;;  %v4030_v56 = vld [vmem:[#allocation5 + $0x4a0] sm:$0xf]  ;;  %v4431_v2 = vor.u32 %v5296_v51, %v4430_v50  ;;  %2191 = vmatpush.bf16.msrb.mxu1 %v4175_v60 }
  0x4a   :  { %v5196_v57 = vld [vmem:[#allocation5 + $0x4ac] sm:$0xf0]  ;;  %v5745_v58 = vor.u32 %v5041_v53, %v3398_v52  ;;  %v5042_v59 = vld [vmem:[#allocation2 + $0x2c] sm:$0xf0]  ;;  %2205 = vmatpush.bf16.msrb.mxu2 %v4303_v61 }
  0x4b   :  { %v4158_v62 = vld [vmem:[#allocation5 + $0x5a0] sm:$0xf]  ;;  %v5228_v63 = vld [vmem:[#allocation5 + $0x5ac] sm:$0xf0]  ;;  %v5747_v1 = vor.u32 %v5042_v59, %v3406_v54  ;;  %v4031_v9 = vor.u32 %v5196_v57, %v4030_v56  ;;  %2219 = vmatpush.bf16.msrb.mxu3 %v4431_v2 }
  0x4c   :  { %v4286_v0 = vld [vmem:[#allocation5 + $0x6a0] sm:$0xf]  ;;  %v5260_v3 = vld [vmem:[#allocation5 + $0x6ac] sm:$0xf0]  ;;  %2128 = vmatmul.bf16.vlgmr.msra.gmra.mxu0 %v5745_v58  ;;  %v4159_v12 = vor.u32 %v5228_v63, %v4158_v62 }
  0x4d   :  { %v4414_v4 = vld [vmem:[#allocation5 + $0x7a0] sm:$0xf]  ;;  %v5292_v5 = vld [vmem:[#allocation5 + $0x7ac] sm:$0xf0]  ;;  %2156 = vmatmul.bf16.vlgmr.msra.gmra.mxu2 %v5747_v1  ;;  %v4287_v13 = vor.u32 %v5260_v3, %v4286_v0  ;;  %2178 = vmatpush.bf16.msrb.mxu0 %v4031_v9 }
  0x4e   :  { %v4014_v14 = vld [vmem:[#allocation5 + $0x480] sm:$0xf]  ;;  %v5192_v15 = vld [vmem:[#allocation5 + $0x48c] sm:$0xf0]  ;;  %v4415_v18 = vor.u32 %v5292_v5, %v4414_v4  ;;  %2192 = vmatpush.bf16.msrb.mxu1 %v4159_v12 }
  0x4f   :  { %v4142_v16 = vld [vmem:[#allocation5 + $0x580] sm:$0xf]  ;;  %v5224_v19 = vld [vmem:[#allocation5 + $0x58c] sm:$0xf0]  ;;  %v4015_v24 = vor.u32 %v5192_v15, %v4014_v14  ;;  %2206 = vmatpush.bf16.msrb.mxu2 %v4287_v13  ;;  %v5074_v15 = vld [vmem:[#allocation5 + $0xe4] sm:$0xf] }
  0x50   :  { %v4270_v20 = vld [vmem:[#allocation5 + $0x680] sm:$0xf]  ;;  %v5256_v21 = vld [vmem:[#allocation5 + $0x68c] sm:$0xf0]  ;;  %v4143_v25 = vor.u32 %v5224_v19, %v4142_v16  ;;  %2220 = vmatpush.bf16.msrb.mxu3 %v4415_v18  ;;  %v3552_v16 = vld [vmem:[#allocation5 + $0xf0] sm:$0xf0] }
  0x51   :  { %v4398_v22 = vld [vmem:[#allocation5 + $0x780] sm:$0xf]  ;;  %v5288_v23 = vld [vmem:[#allocation5 + $0x78c] sm:$0xf0]  ;;  %v4271_v26 = vor.u32 %v5256_v21, %v4270_v20  ;;  %2179 = vmatpush.bf16.msrb.mxu0 %v4015_v24  ;;  %v5106_v18 = vld [vmem:[#allocation5 + $0x1e4] sm:$0xf] }
  0x52   :  { %v3998_v27 = vld [vmem:[#allocation5 + $0x460] sm:$0xf]  ;;  %v5188_v28 = vld [vmem:[#allocation5 + $0x46c] sm:$0xf0]  ;;  %v4399_v30 = vor.u32 %v5288_v23, %v4398_v22  ;;  %2193 = vmatpush.bf16.msrb.mxu1 %v4143_v25  ;;  %v3680_v20 = vld [vmem:[#allocation5 + $0x1f0] sm:$0xf0] }
  0x53   :  { %v4126_v29 = vld [vmem:[#allocation5 + $0x560] sm:$0xf]  ;;  %v5220_v31 = vld [vmem:[#allocation5 + $0x56c] sm:$0xf0]  ;;  %v3999_v36 = vor.u32 %v5188_v28, %v3998_v27  ;;  %2207 = vmatpush.bf16.msrb.mxu2 %v4271_v26  ;;  %v5043_v22 = vld [vmem:[#allocation2 + $0x34] sm:$0xf0] }
  0x54   :  { %v4254_v32 = vld [vmem:[#allocation5 + $0x660] sm:$0xf]  ;;  %v5252_v33 = vld [vmem:[#allocation5 + $0x66c] sm:$0xf0]  ;;  %v4127_v37 = vor.u32 %v5220_v31, %v4126_v29  ;;  %2221 = vmatpush.bf16.msrb.mxu3 %v4399_v30  ;;  %v3422_v25 = vld [vmem:[#allocation2 + $0x18] sm:$0xf] }
  0x55   :  { %v4382_v34 = vld [vmem:[#allocation5 + $0x760] sm:$0xf]  ;;  %v5284_v35 = vld [vmem:[#allocation5 + $0x76c] sm:$0xf0]  ;;  %v4255_v38 = vor.u32 %v5252_v33, %v4254_v32  ;;  %2180 = vmatpush.bf16.msrb.mxu0 %v3999_v36  ;;  %v5038_v27 = vld [vmem:[#allocation2 + $0x14] sm:$0xf] }
  0x56   :  { %v3982_v39 = vld [vmem:[#allocation5 + $0x440] sm:$0xf]  ;;  %v5184_v40 = vld [vmem:[#allocation5 + $0x44c] sm:$0xf0]  ;;  %v4383_v42 = vor.u32 %v5284_v35, %v4382_v34  ;;  %2194 = vmatpush.bf16.msrb.mxu1 %v4127_v37  ;;  %v3416_v30 = vld [vmem:[#allocation2 + $0x38] sm:$0xf0]  ;;  %v3555_v34 = vor.u32 %v5074_v15, %v3552_v16 }
  0x57   :  { %v4110_v41 = vld [vmem:[#allocation5 + $0x540] sm:$0xf]  ;;  %v5216_v43 = vld [vmem:[#allocation5 + $0x54c] sm:$0xf0]  ;;  %v3983_v48 = vor.u32 %v5184_v40, %v3982_v39  ;;  %2208 = vmatpush.bf16.msrb.mxu2 %v4255_v38  ;;  %v5039_v31 = vld [vmem:[#allocation2 + $0x1c] sm:$0xf]  ;;  %v3683_v38 = vor.u32 %v5106_v18, %v3680_v20 }
  0x58   :  { %v4238_v44 = vld [vmem:[#allocation5 + $0x640] sm:$0xf]  ;;  %v5248_v45 = vld [vmem:[#allocation5 + $0x64c] sm:$0xf0]  ;;  %v4111_v50 = vor.u32 %v5216_v43, %v4110_v41  ;;  %2222 = vmatpush.bf16.msrb.mxu3 %v4383_v42  ;;  %v3424_v32 = vld [vmem:[#allocation2 + $0x40] sm:$0xf0] }
  0x59   :  { %v4366_v46 = vld [vmem:[#allocation5 + $0x740] sm:$0xf]  ;;  %v5280_v47 = vld [vmem:[#allocation5 + $0x74c] sm:$0xf0]  ;;  %v4239_v51 = vor.u32 %v5248_v45, %v4238_v44  ;;  %2181 = vmatpush.bf16.msrb.mxu0 %v3983_v48  ;;  %v5070_v41 = vld [vmem:[#allocation5 + $0xc4] sm:$0xf]  ;;  %v5761_v44 = vor.u32 %v5038_v27, %v3416_v30 }
  0x5a   :  { %v3966_v49 = vld [vmem:[#allocation5 + $0x420] sm:$0xf]  ;;  %v5180_v52 = vld [vmem:[#allocation5 + $0x42c] sm:$0xf0]  ;;  %v4367_v55 = vor.u32 %v5280_v47, %v4366_v46  ;;  %2195 = vmatpush.bf16.msrb.mxu1 %v4111_v50  ;;  %v3536_v42 = vld [vmem:[#allocation5 + $0xd0] sm:$0xf0]  ;;  %v5763_v47 = vor.u32 %v5039_v31, %v3424_v32 }
  0x5b   :  { %v4094_v53 = vld [vmem:[#allocation5 + $0x520] sm:$0xf]  ;;  %v5212_v54 = vld [vmem:[#allocation5 + $0x52c] sm:$0xf0]  ;;  %v3967_v63 = vor.u32 %v5180_v52, %v3966_v49  ;;  %2209 = vmatpush.bf16.msrb.mxu2 %v4239_v51  ;;  %v5102_v45 = vld [vmem:[#allocation5 + $0x1c4] sm:$0xf]  ;;  %v3539_v50 = vor.u32 %v5070_v41, %v3536_v42 }
  0x5c   :  { %v4222_v56 = vld [vmem:[#allocation5 + $0x620] sm:$0xf]  ;;  %v5244_v57 = vld [vmem:[#allocation5 + $0x62c] sm:$0xf0]  ;;  %v4095_v5 = vor.u32 %v5212_v54, %v4094_v53  ;;  %2223 = vmatpush.bf16.msrb.mxu3 %v4367_v55  ;;  %v3664_v46 = vld [vmem:[#allocation5 + $0x1d0] sm:$0xf0] }
  0x5d   :  { %v4350_v59 = vld [vmem:[#allocation5 + $0x720] sm:$0xf]  ;;  %v5276_v60 = vld [vmem:[#allocation5 + $0x72c] sm:$0xf0]  ;;  %v4223_v6 = vor.u32 %v5244_v57, %v4222_v56  ;;  %2182 = vmatpush.bf16.msrb.mxu0 %v3967_v63  ;;  %v3667_v54 = vor.u32 %v5102_v45, %v3664_v46  ;;  %v5066_v56 = vld [vmem:[#allocation5 + $0xa4] sm:$0xf] }
  0x5e   :  { %v3950_v61 = vld [vmem:[#allocation5 + $0x400] sm:$0xf]  ;;  %v5176_v62 = vld [vmem:[#allocation5 + $0x40c] sm:$0xf0]  ;;  %v4351_v11 = vor.u32 %v5276_v60, %v4350_v59  ;;  %2196 = vmatpush.bf16.msrb.mxu1 %v4095_v5  ;;  %v3520_v57 = vld [vmem:[#allocation5 + $0xb0] sm:$0xf0] }
  0x5f   :  { %v4078_v0 = vld [vmem:[#allocation5 + $0x500] sm:$0xf]  ;;  %v5208_v2 = vld [vmem:[#allocation5 + $0x50c] sm:$0xf0]  ;;  %v3951_v19 = vor.u32 %v5176_v62, %v3950_v61  ;;  %2210 = vmatpush.bf16.msrb.mxu2 %v4223_v6  ;;  %v5098_v59 = vld [vmem:[#allocation5 + $0x1a4] sm:$0xf]  ;;  %v3523_v63 = vor.u32 %v5066_v56, %v3520_v57 }
  0x60   :  { %v4206_v3 = vld [vmem:[#allocation5 + $0x600] sm:$0xf]  ;;  %v5240_v4 = vld [vmem:[#allocation5 + $0x60c] sm:$0xf0]  ;;  %v4079_v23 = vor.u32 %v5208_v2, %v4078_v0  ;;  %2224 = vmatpush.bf16.msrb.mxu3 %v4351_v11  ;;  %v3648_v60 = vld [vmem:[#allocation5 + $0x1b0] sm:$0xf0] }
  0x61   :  { %v4334_v7 = vld [vmem:[#allocation5 + $0x700] sm:$0xf]  ;;  %v5272_v8 = vld [vmem:[#allocation5 + $0x70c] sm:$0xf0]  ;;  %v4207_v24 = vor.u32 %v5240_v4, %v4206_v3  ;;  %2183 = vmatpush.bf16.msrb.mxu0 %v3951_v19  ;;  %v3651_v4 = vor.u32 %v5098_v59, %v3648_v60  ;;  %v5062_v6 = vld [vmem:[#allocation5 + $0x84] sm:$0xf] }
  0x62   :  { %v4574_v9 = vld [vmem:[#allocation5 + $0x8e0] sm:$0xf]  ;;  %v5332_v12 = vld [vmem:[#allocation5 + $0x8ec] sm:$0xf0]  ;;  %v4335_v28 = vor.u32 %v5272_v8, %v4334_v7  ;;  %2197 = vmatpush.bf16.msrb.mxu1 %v4079_v23  ;;  %v3504_v7 = vld [vmem:[#allocation5 + $0x90] sm:$0xf0] }
  0x63   :  { %v4702_v13 = vld [vmem:[#allocation5 + $0x9e0] sm:$0xf]  ;;  %v5364_v14 = vld [vmem:[#allocation5 + $0x9ec] sm:$0xf0]  ;;  %v4575_v29 = vor.u32 %v5332_v12, %v4574_v9  ;;  %2211 = vmatpush.bf16.msrb.mxu2 %v4207_v24  ;;  %v5094_v8 = vld [vmem:[#allocation5 + $0x184] sm:$0xf] }
  0x64   :  { %v3414_v21 = vld [vmem:[#allocation2 + $0x10] sm:$0xf]  ;;  %v5044_v26 = vld [vmem:[#allocation2 + $0x3c] sm:$0xf0]  ;;  %v4703_v33 = vor.u32 %v5364_v14, %v4702_v13  ;;  %2225 = vmatpush.bf16.msrb.mxu3 %v4335_v28  ;;  %v3632_v9 = vld [vmem:[#allocation5 + $0x190] sm:$0xf0]  ;;  %v3507_v13 = vor.u32 %v5062_v6, %v3504_v7 }
  0x65   :  { %v4558_v35 = vld [vmem:[#allocation5 + $0x8c0] sm:$0xf]  ;;  %v5328_v36 = vld [vmem:[#allocation5 + $0x8cc] sm:$0xf0]  ;;  %v5757_v39 = vor.u32 %v5043_v22, %v3414_v21  ;;  %v5759_v43 = vor.u32 %v5044_v26, %v3422_v25  ;;  %2232 = vmatpush.bf16.msra.mxu0 %v4575_v29  ;;  %2198 = vmatmul.bf16.vlgmr.msrb.gmra.mxu1 %v5761_v44  ;;  %v3635_v18 = vor.u32 %v5094_v8, %v3632_v9  ;;  %v5058_v20 = vld [vmem:[#allocation5 + $0x64] sm:$0xf] }
  0x66   :  { %v4686_v37 = vld [vmem:[#allocation5 + $0x9c0] sm:$0xf]  ;;  %v5360_v40 = vld [vmem:[#allocation5 + $0x9cc] sm:$0xf0]  ;;  %v4559_v48 = vor.u32 %v5328_v36, %v4558_v35  ;;  %2246 = vmatpush.bf16.msra.mxu1 %v4703_v33  ;;  %v3488_v21 = vld [vmem:[#allocation5 + $0x70] sm:$0xf0] }
  0x67   :  { %2260 = vmatpush.bf16.msra.mxu2 %v3555_v34  ;;  %v4687_v49 = vor.u32 %v5360_v40, %v4686_v37  ;;  %v4542_v51 = vld [vmem:[#allocation5 + $0x8a0] sm:$0xf]  ;;  %v5324_v52 = vld [vmem:[#allocation5 + $0x8ac] sm:$0xf0]  ;;  %2184 = vmatmul.bf16.vlgmr.msrb.gmra.mxu0 %v5757_v39  ;;  %v5090_v22 = vld [vmem:[#allocation5 + $0x164] sm:$0xf]  ;;  %v3491_v26 = vor.u32 %v5058_v20, %v3488_v21 }
  0x68   :  { %v4670_v53 = vld [vmem:[#allocation5 + $0x9a0] sm:$0xf]  ;;  %2274 = vmatpush.bf16.msra.mxu3 %v3683_v38  ;;  %v5356_v55 = vld [vmem:[#allocation5 + $0x9ac] sm:$0xf0]  ;;  %2212 = vmatmul.bf16.vlgmr.msrb.gmra.mxu2 %v5759_v43  ;;  %v4543_v61 = vor.u32 %v5324_v52, %v4542_v51  ;;  %v3616_v23 = vld [vmem:[#allocation5 + $0x170] sm:$0xf0] }
  0x69   :  { %2226 = vmatmul.bf16.vlgmr.msrb.gmra.mxu3 %v5763_v47  ;;  %2233 = vmatpush.bf16.msra.mxu0 %v4559_v48  ;;  %v4671_v62 = vor.u32 %v5356_v55, %v4670_v53  ;;  %v4526_v0 = vld [vmem:[#allocation5 + $0x880] sm:$0xf]  ;;  %v5320_v2 = vld [vmem:[#allocation5 + $0x88c] sm:$0xf0]  ;;  %v3619_v30 = vor.u32 %v5090_v22, %v3616_v23  ;;  %v5054_v32 = vld [vmem:[#allocation5 + $0x44] sm:$0xf] }
  0x6a   :  { %2247 = vmatpush.bf16.msra.mxu1 %v4687_v49  ;;  %v4654_v3 = vld [vmem:[#allocation5 + $0x980] sm:$0xf]  ;;  %v5352_v5 = vld [vmem:[#allocation5 + $0x98c] sm:$0xf0]  ;;  %v4527_v11 = vor.u32 %v5320_v2, %v4526_v0  ;;  %v3472_v33 = vld [vmem:[#allocation5 + $0x50] sm:$0xf0] }
  0x6b   :  { %2261 = vmatpush.bf16.msra.mxu2 %v3539_v50  ;;  %v4655_v12 = vor.u32 %v5352_v5, %v4654_v3  ;;  %v4510_v14 = vld [vmem:[#allocation5 + $0x860] sm:$0xf]  ;;  %v5316_v15 = vld [vmem:[#allocation5 + $0x86c] sm:$0xf0]  ;;  %v5086_v34 = vld [vmem:[#allocation5 + $0x144] sm:$0xf]  ;;  %v3475_v38 = vor.u32 %v5054_v32, %v3472_v33 }
  0x6c   :  { %2275 = vmatpush.bf16.msra.mxu3 %v3667_v54  ;;  %v4638_v16 = vld [vmem:[#allocation5 + $0x960] sm:$0xf]  ;;  %v5348_v19 = vld [vmem:[#allocation5 + $0x96c] sm:$0xf0]  ;;  %v4511_v24 = vor.u32 %v5316_v15, %v4510_v14  ;;  %v3600_v35 = vld [vmem:[#allocation5 + $0x150] sm:$0xf0] }
  0x6d   :  { %2234 = vmatpush.bf16.msra.mxu0 %v4543_v61  ;;  %v4639_v25 = vor.u32 %v5348_v19, %v4638_v16  ;;  %v4494_v27 = vld [vmem:[#allocation5 + $0x840] sm:$0xf]  ;;  %v5312_v28 = vld [vmem:[#allocation5 + $0x84c] sm:$0xf0]  ;;  %v3603_v45 = vor.u32 %v5086_v34, %v3600_v35  ;;  %v5050_v48 = vld [vmem:[#allocation5 + $0x24] sm:$0xf] }
  0x6e   :  { %2248 = vmatpush.bf16.msra.mxu1 %v4671_v62  ;;  %v4622_v29 = vld [vmem:[#allocation5 + $0x940] sm:$0xf]  ;;  %v5344_v31 = vld [vmem:[#allocation5 + $0x94c] sm:$0xf0]  ;;  %v4495_v36 = vor.u32 %v5312_v28, %v4494_v27  ;;  %v3456_v49 = vld [vmem:[#allocation5 + $0x30] sm:$0xf0] }
  0x6f   :  { %2262 = vmatpush.bf16.msra.mxu2 %v3523_v63  ;;  %v4623_v37 = vor.u32 %v5344_v31, %v4622_v29  ;;  %v4478_v40 = vld [vmem:[#allocation5 + $0x820] sm:$0xf]  ;;  %v5308_v41 = vld [vmem:[#allocation5 + $0x82c] sm:$0xf0]  ;;  %v5082_v50 = vld [vmem:[#allocation5 + $0x124] sm:$0xf]  ;;  %v3459_v57 = vor.u32 %v5050_v48, %v3456_v49 }
  0x70   :  { %2276 = vmatpush.bf16.msra.mxu3 %v3651_v4  ;;  %v4606_v42 = vld [vmem:[#allocation5 + $0x920] sm:$0xf]  ;;  %v5340_v46 = vld [vmem:[#allocation5 + $0x92c] sm:$0xf0]  ;;  %v3584_v51 = vld [vmem:[#allocation5 + $0x130] sm:$0xf0]  ;;  %v4479_v52 = vor.u32 %v5308_v41, %v4478_v40 }
  0x71   :  { %2235 = vmatpush.bf16.msra.mxu0 %v4527_v11  ;;  %v4462_v53 = vld [vmem:[#allocation5 + $0x800] sm:$0xf]  ;;  %v5304_v54 = vld [vmem:[#allocation5 + $0x80c] sm:$0xf0]  ;;  %v4607_v56 = vor.u32 %v5340_v46, %v4606_v42  ;;  %v5046_v60 = vld [vmem:[#allocation5 + $0x4] sm:$0xf]  ;;  %v3587_v62 = vor.u32 %v5082_v50, %v3584_v51 }
  0x72   :  { %2249 = vmatpush.bf16.msra.mxu1 %v4655_v12  ;;  %v4590_v55 = vld [vmem:[#allocation5 + $0x900] sm:$0xf]  ;;  %v5336_v59 = vld [vmem:[#allocation5 + $0x90c] sm:$0xf0]  ;;  %v3440_v61 = vld [vmem:[#allocation5 + $0x10] sm:$0xf0]  ;;  %v4463_v6 = vor.u32 %v5304_v54, %v4462_v53 }
  0x73   :  { %2263 = vmatpush.bf16.msra.mxu2 %v3507_v13  ;;  %v5078_v63 = vld [vmem:[#allocation5 + $0x104] sm:$0xf]  ;;  %v3568_v0 = vld [vmem:[#allocation5 + $0x110] sm:$0xf0]  ;;  %v4591_v11 = vor.u32 %v5336_v59, %v4590_v55  ;;  %v3443_v12 = vor.u32 %v5046_v60, %v3440_v61  ;;  %v3430_v14 = vld [vmem:[#allocation2 + $0x20] sm:$0xf] }
  0x74   :  { %2277 = vmatpush.bf16.msra.mxu3 %v3635_v18  ;;  %v5138_v2 = vld [vmem:[#allocation5 + $0x2e4] sm:$0xf]  ;;  %v3808_v3 = vld [vmem:[#allocation5 + $0x2f0] sm:$0xf0]  ;;  %v5045_v15 = vld [vmem:[#allocation2 + $0x44] sm:$0xf0]  ;;  %v3571_v16 = vor.u32 %v5078_v63, %v3568_v0 }
  0x75   :  { %2236 = vmatpush.bf16.msra.mxu0 %v4511_v24  ;;  %v5170_v4 = vld [vmem:[#allocation5 + $0x3e4] sm:$0xf]  ;;  %v3936_v5 = vld [vmem:[#allocation5 + $0x3f0] sm:$0xf0]  ;;  %v3811_v18 = vor.u32 %v5138_v2, %v3808_v3  ;;  %v3432_v20 = vld [vmem:[#allocation2 + $0x48] sm:$0xf0]  ;;  %v5769_v27 = vor.u32 %v5045_v15, %v3430_v14 }
  0x76   :  { %2250 = vmatpush.bf16.msra.mxu1 %v4639_v25  ;;  %v5202_v7 = vld [vmem:[#allocation5 + $0x4e4] sm:$0xf]  ;;  %v4064_v8 = vld [vmem:[#allocation5 + $0x4f0] sm:$0xf0]  ;;  %v3939_v21 = vor.u32 %v5170_v4, %v3936_v5 }
  0x77   :  { %2264 = vmatpush.bf16.msra.mxu2 %v3491_v26  ;;  %v5234_v9 = vld [vmem:[#allocation5 + $0x5e4] sm:$0xf]  ;;  %v4192_v13 = vld [vmem:[#allocation5 + $0x5f0] sm:$0xf0]  ;;  %v4067_v22 = vor.u32 %v5202_v7, %v4064_v8 }
  0x78   :  { %2278 = vmatpush.bf16.msra.mxu3 %v3619_v30  ;;  %v5040_v19 = vld [vmem:[#allocation2 + $0x24] sm:$0xf]  ;;  %v5134_v23 = vld [vmem:[#allocation5 + $0x2c4] sm:$0xf]  ;;  %v4195_v26 = vor.u32 %v5234_v9, %v4192_v13 }
  0x79   :  { %2237 = vmatpush.bf16.msra.mxu0 %v4495_v36  ;;  %v3792_v24 = vld [vmem:[#allocation5 + $0x2d0] sm:$0xf0]  ;;  %v5166_v25 = vld [vmem:[#allocation5 + $0x3c4] sm:$0xf]  ;;  %v5771_v31 = vor.u32 %v5040_v19, %v3432_v20 }
  0x7a   :  { %2251 = vmatpush.bf16.msra.mxu1 %v4623_v37  ;;  %v3920_v28 = vld [vmem:[#allocation5 + $0x3d0] sm:$0xf0]  ;;  %v5198_v29 = vld [vmem:[#allocation5 + $0x4c4] sm:$0xf]  ;;  %v3795_v34 = vor.u32 %v5134_v23, %v3792_v24 }
  0x7b   :  { %2265 = vmatpush.bf16.msra.mxu2 %v3475_v38  ;;  %v4048_v30 = vld [vmem:[#allocation5 + $0x4d0] sm:$0xf0]  ;;  %v5230_v32 = vld [vmem:[#allocation5 + $0x5c4] sm:$0xf]  ;;  %v3923_v35 = vor.u32 %v5166_v25, %v3920_v28 }
  0x7c   :  { %2279 = vmatpush.bf16.msra.mxu3 %v3603_v45  ;;  %v4176_v33 = vld [vmem:[#allocation5 + $0x5d0] sm:$0xf0]  ;;  %v4051_v36 = vor.u32 %v5198_v29, %v4048_v30  ;;  %v5130_v37 = vld [vmem:[#allocation5 + $0x2a4] sm:$0xf] }
  0x7d   :  { %2238 = vmatpush.bf16.msra.mxu0 %v4479_v52  ;;  %v3776_v38 = vld [vmem:[#allocation5 + $0x2b0] sm:$0xf0]  ;;  %v5162_v40 = vld [vmem:[#allocation5 + $0x3a4] sm:$0xf]  ;;  %v4179_v41 = vor.u32 %v5230_v32, %v4176_v33 }
  0x7e   :  { %2252 = vmatpush.bf16.msra.mxu1 %v4607_v56  ;;  %v3904_v42 = vld [vmem:[#allocation5 + $0x3b0] sm:$0xf0]  ;;  %v5194_v45 = vld [vmem:[#allocation5 + $0x4a4] sm:$0xf]  ;;  %v3779_v50 = vor.u32 %v5130_v37, %v3776_v38 }
  0x7f   :  { %2266 = vmatpush.bf16.msra.mxu2 %v3459_v57  ;;  %v4032_v46 = vld [vmem:[#allocation5 + $0x4b0] sm:$0xf0]  ;;  %v5226_v48 = vld [vmem:[#allocation5 + $0x5a4] sm:$0xf]  ;;  %v3907_v51 = vor.u32 %v5162_v40, %v3904_v42 }
  0x80   :  { %2280 = vmatpush.bf16.msra.mxu3 %v3587_v62  ;;  %v4160_v49 = vld [vmem:[#allocation5 + $0x5b0] sm:$0xf0]  ;;  %v4035_v52 = vor.u32 %v5194_v45, %v4032_v46  ;;  %v5126_v53 = vld [vmem:[#allocation5 + $0x284] sm:$0xf] }
  0x81   :  { %2239 = vmatpush.bf16.msra.mxu0 %v4463_v6  ;;  %v3760_v54 = vld [vmem:[#allocation5 + $0x290] sm:$0xf0]  ;;  %v5158_v55 = vld [vmem:[#allocation5 + $0x384] sm:$0xf]  ;;  %v4163_v56 = vor.u32 %v5226_v48, %v4160_v49 }
  0x82   :  { %2253 = vmatpush.bf16.msra.mxu1 %v4591_v11  ;;  %v3888_v57 = vld [vmem:[#allocation5 + $0x390] sm:$0xf0]  ;;  %v5190_v59 = vld [vmem:[#allocation5 + $0x484] sm:$0xf]  ;;  %v3763_v63 = vor.u32 %v5126_v53, %v3760_v54 }
  0x83   :  { %2267 = vmatpush.bf16.msra.mxu2 %v3443_v12  ;;  %v4016_v60 = vld [vmem:[#allocation5 + $0x490] sm:$0xf0]  ;;  %v5222_v61 = vld [vmem:[#allocation5 + $0x584] sm:$0xf]  ;;  %v3891_v0 = vor.u32 %v5158_v55, %v3888_v57 }
  0x84   :  { %2281 = vmatpush.bf16.msra.mxu3 %v3571_v16  ;;  %2240 = vmatmul.bf16.vlgmr.msra.gmra.mxu0 %v5769_v27  ;;  %v4144_v62 = vld [vmem:[#allocation5 + $0x590] sm:$0xf0]  ;;  %v4019_v2 = vor.u32 %v5190_v59, %v4016_v60  ;;  %v5122_v3 = vld [vmem:[#allocation5 + $0x264] sm:$0xf] }
  0x85   :  { %2288 = vmatpush.bf16.msrb.mxu0 %v3811_v18  ;;  %2254 = vmatmul.bf16.vlgmr.msra.gmra.mxu1 %v5771_v31  ;;  %v3744_v4 = vld [vmem:[#allocation5 + $0x270] sm:$0xf0]  ;;  %v5154_v5 = vld [vmem:[#allocation5 + $0x364] sm:$0xf]  ;;  %v4147_v6 = vor.u32 %v5222_v61, %v4144_v62 }
  0x86   :  { %2302 = vmatpush.bf16.msrb.mxu1 %v3939_v21  ;;  %2268 = vmatmul.bf16.vlgmr.msra.gmra.mxu2 %v5745_v58  ;;  %v3872_v7 = vld [vmem:[#allocation5 + $0x370] sm:$0xf0]  ;;  %v5186_v8 = vld [vmem:[#allocation5 + $0x464] sm:$0xf]  ;;  %v3747_v13 = vor.u32 %v5122_v3, %v3744_v4 }
  0x87   :  { %2316 = vmatpush.bf16.msrb.mxu2 %v4067_v22  ;;  %2282 = vmatmul.bf16.vlgmr.msra.gmra.mxu3 %v5751_v10  ;;  %v4000_v9 = vld [vmem:[#allocation5 + $0x470] sm:$0xf0]  ;;  %v5218_v11 = vld [vmem:[#allocation5 + $0x564] sm:$0xf]  ;;  %v3875_v14 = vor.u32 %v5154_v5, %v3872_v7 }
  0x88   :  { %2330 = vmatpush.bf16.msrb.mxu3 %v4195_v26  ;;  %v4128_v12 = vld [vmem:[#allocation5 + $0x570] sm:$0xf0]  ;;  %v4003_v15 = vor.u32 %v5186_v8, %v4000_v9  ;;  %v5118_v16 = vld [vmem:[#allocation5 + $0x244] sm:$0xf] }
  0x89   :  { %2289 = vmatpush.bf16.msrb.mxu0 %v3795_v34  ;;  %v3728_v18 = vld [vmem:[#allocation5 + $0x250] sm:$0xf0]  ;;  %v5150_v19 = vld [vmem:[#allocation5 + $0x344] sm:$0xf]  ;;  %v4131_v20 = vor.u32 %v5218_v11, %v4128_v12 }
  0x8a   :  { %2303 = vmatpush.bf16.msrb.mxu1 %v3923_v35  ;;  %v3856_v21 = vld [vmem:[#allocation5 + $0x350] sm:$0xf0]  ;;  %v5182_v22 = vld [vmem:[#allocation5 + $0x444] sm:$0xf]  ;;  %v3731_v26 = vor.u32 %v5118_v16, %v3728_v18 }
  0x8b   :  { %2317 = vmatpush.bf16.msrb.mxu2 %v4051_v36  ;;  %v3984_v23 = vld [vmem:[#allocation5 + $0x450] sm:$0xf0]  ;;  %v5214_v24 = vld [vmem:[#allocation5 + $0x544] sm:$0xf]  ;;  %v3859_v28 = vor.u32 %v5150_v19, %v3856_v21 }
  0x8c   :  { %2331 = vmatpush.bf16.msrb.mxu3 %v4179_v41  ;;  %v4112_v25 = vld [vmem:[#allocation5 + $0x550] sm:$0xf0]  ;;  %v3987_v29 = vor.u32 %v5182_v22, %v3984_v23  ;;  %v5114_v30 = vld [vmem:[#allocation5 + $0x224] sm:$0xf] }
  0x8d   :  { %2290 = vmatpush.bf16.msrb.mxu0 %v3779_v50  ;;  %v3712_v32 = vld [vmem:[#allocation5 + $0x230] sm:$0xf0]  ;;  %v5146_v33 = vld [vmem:[#allocation5 + $0x324] sm:$0xf]  ;;  %v4115_v34 = vor.u32 %v5214_v24, %v4112_v25 }
  0x8e   :  { %2304 = vmatpush.bf16.msrb.mxu1 %v3907_v51  ;;  %v3840_v35 = vld [vmem:[#allocation5 + $0x330] sm:$0xf0]  ;;  %v5178_v36 = vld [vmem:[#allocation5 + $0x424] sm:$0xf]  ;;  %v3715_v41 = vor.u32 %v5114_v30, %v3712_v32 }
  0x8f   :  { %2318 = vmatpush.bf16.msrb.mxu2 %v4035_v52  ;;  %v3968_v37 = vld [vmem:[#allocation5 + $0x430] sm:$0xf0]  ;;  %v5210_v38 = vld [vmem:[#allocation5 + $0x524] sm:$0xf]  ;;  %v3843_v46 = vor.u32 %v5146_v33, %v3840_v35 }
  0x90   :  { %2332 = vmatpush.bf16.msrb.mxu3 %v4163_v56  ;;  %v4096_v40 = vld [vmem:[#allocation5 + $0x530] sm:$0xf0]  ;;  %v5110_v42 = vld [vmem:[#allocation5 + $0x204] sm:$0xf]  ;;  %v3971_v48 = vor.u32 %v5178_v36, %v3968_v37 }
  0x91   :  { %2291 = vmatpush.bf16.msrb.mxu0 %v3763_v63  ;;  %v3696_v45 = vld [vmem:[#allocation5 + $0x210] sm:$0xf0]  ;;  %v5142_v49 = vld [vmem:[#allocation5 + $0x304] sm:$0xf]  ;;  %v4099_v52 = vor.u32 %v5210_v38, %v4096_v40 }
  0x92   :  { %2305 = vmatpush.bf16.msrb.mxu1 %v3891_v0  ;;  %v3824_v50 = vld [vmem:[#allocation5 + $0x310] sm:$0xf0]  ;;  %v5174_v51 = vld [vmem:[#allocation5 + $0x404] sm:$0xf]  ;;  %v3699_v60 = vor.u32 %v5110_v42, %v3696_v45 }
  0x93   :  { %2319 = vmatpush.bf16.msrb.mxu2 %v4019_v2  ;;  %v3952_v53 = vld [vmem:[#allocation5 + $0x410] sm:$0xf0]  ;;  %v5206_v54 = vld [vmem:[#allocation5 + $0x504] sm:$0xf]  ;;  %v3827_v0 = vor.u32 %v5142_v49, %v3824_v50 }
  0x94   :  { %2333 = vmatpush.bf16.msrb.mxu3 %v4147_v6  ;;  %v4080_v55 = vld [vmem:[#allocation5 + $0x510] sm:$0xf0]  ;;  %v5266_v56 = vld [vmem:[#allocation5 + $0x6e4] sm:$0xf]  ;;  %v3955_v2 = vor.u32 %v5174_v51, %v3952_v53 }
  0x95   :  { %2292 = vmatpush.bf16.msrb.mxu0 %v3747_v13  ;;  %v4320_v57 = vld [vmem:[#allocation5 + $0x6f0] sm:$0xf0]  ;;  %v5298_v59 = vld [vmem:[#allocation5 + $0x7e4] sm:$0xf]  ;;  %v4083_v5 = vor.u32 %v5206_v54, %v4080_v55 }
  0x96   :  { %2306 = vmatpush.bf16.msrb.mxu1 %v3875_v14  ;;  %v4448_v61 = vld [vmem:[#allocation5 + $0x7f0] sm:$0xf0]  ;;  %v5330_v62 = vld [vmem:[#allocation5 + $0x8e4] sm:$0xf]  ;;  %v4323_v6 = vor.u32 %v5266_v56, %v4320_v57 }
  0x97   :  { %2320 = vmatpush.bf16.msrb.mxu2 %v4003_v15  ;;  %v4576_v63 = vld [vmem:[#allocation5 + $0x8f0] sm:$0xf0]  ;;  %v5362_v3 = vld [vmem:[#allocation5 + $0x9e4] sm:$0xf]  ;;  %v4451_v7 = vor.u32 %v5298_v59, %v4448_v61 }
  0x98   :  { %2334 = vmatpush.bf16.msrb.mxu3 %v4131_v20  ;;  %v4704_v4 = vld [vmem:[#allocation5 + $0x9f0] sm:$0xf0]  ;;  %v4579_v8 = vor.u32 %v5330_v62, %v4576_v63  ;;  %v5262_v9 = vld [vmem:[#allocation5 + $0x6c4] sm:$0xf] }
  0x99   :  { %2293 = vmatpush.bf16.msrb.mxu0 %v3731_v26  ;;  %v4304_v11 = vld [vmem:[#allocation5 + $0x6d0] sm:$0xf0]  ;;  %v5294_v12 = vld [vmem:[#allocation5 + $0x7c4] sm:$0xf]  ;;  %v4707_v13 = vor.u32 %v5362_v3, %v4704_v4 }
  0x9a   :  { %2307 = vmatpush.bf16.msrb.mxu1 %v3859_v28  ;;  %v4432_v14 = vld [vmem:[#allocation5 + $0x7d0] sm:$0xf0]  ;;  %v5326_v15 = vld [vmem:[#allocation5 + $0x8c4] sm:$0xf]  ;;  %v4307_v20 = vor.u32 %v5262_v9, %v4304_v11 }
  0x9b   :  { %2321 = vmatpush.bf16.msrb.mxu2 %v3987_v29  ;;  %v4560_v16 = vld [vmem:[#allocation5 + $0x8d0] sm:$0xf0]  ;;  %v5358_v18 = vld [vmem:[#allocation5 + $0x9c4] sm:$0xf]  ;;  %v4435_v21 = vor.u32 %v5294_v12, %v4432_v14 }
  0x9c   :  { %2335 = vmatpush.bf16.msrb.mxu3 %v4115_v34  ;;  %v4688_v19 = vld [vmem:[#allocation5 + $0x9d0] sm:$0xf0]  ;;  %v4563_v22 = vor.u32 %v5326_v15, %v4560_v16  ;;  %v5258_v23 = vld [vmem:[#allocation5 + $0x6a4] sm:$0xf] }
  0x9d   :  { %2294 = vmatpush.bf16.msrb.mxu0 %v3715_v41  ;;  %v4288_v24 = vld [vmem:[#allocation5 + $0x6b0] sm:$0xf0]  ;;  %v5290_v25 = vld [vmem:[#allocation5 + $0x7a4] sm:$0xf]  ;;  %v4691_v26 = vor.u32 %v5358_v18, %v4688_v19 }
  0x9e   :  { %2308 = vmatpush.bf16.msrb.mxu1 %v3843_v46  ;;  %v4416_v28 = vld [vmem:[#allocation5 + $0x7b0] sm:$0xf0]  ;;  %v5322_v29 = vld [vmem:[#allocation5 + $0x8a4] sm:$0xf]  ;;  %v4291_v34 = vor.u32 %v5258_v23, %v4288_v24 }
  0x9f   :  { %2322 = vmatpush.bf16.msrb.mxu2 %v3971_v48  ;;  %v4544_v30 = vld [vmem:[#allocation5 + $0x8b0] sm:$0xf0]  ;;  %v5354_v32 = vld [vmem:[#allocation5 + $0x9a4] sm:$0xf]  ;;  %v4419_v35 = vor.u32 %v5290_v25, %v4416_v28 }
  0xa0   :  { %2336 = vmatpush.bf16.msrb.mxu3 %v4099_v52  ;;  %v4672_v33 = vld [vmem:[#allocation5 + $0x9b0] sm:$0xf0]  ;;  %v4547_v36 = vor.u32 %v5322_v29, %v4544_v30  ;;  %v5254_v37 = vld [vmem:[#allocation5 + $0x684] sm:$0xf] }
  0xa1   :  { %2295 = vmatpush.bf16.msrb.mxu0 %v3699_v60  ;;  %v4272_v38 = vld [vmem:[#allocation5 + $0x690] sm:$0xf0]  ;;  %v5286_v40 = vld [vmem:[#allocation5 + $0x784] sm:$0xf]  ;;  %v4675_v41 = vor.u32 %v5354_v32, %v4672_v33 }
  0xa2   :  { %2309 = vmatpush.bf16.msrb.mxu1 %v3827_v0  ;;  %v4400_v42 = vld [vmem:[#allocation5 + $0x790] sm:$0xf0]  ;;  %v5318_v45 = vld [vmem:[#allocation5 + $0x884] sm:$0xf]  ;;  %v4275_v50 = vor.u32 %v5254_v37, %v4272_v38 }
  0xa3   :  { %2323 = vmatpush.bf16.msrb.mxu2 %v3955_v2  ;;  %v4528_v46 = vld [vmem:[#allocation5 + $0x890] sm:$0xf0]  ;;  %v5350_v48 = vld [vmem:[#allocation5 + $0x984] sm:$0xf]  ;;  %v4403_v51 = vor.u32 %v5286_v40, %v4400_v42  ;;  %v5077_v42 = vld [vmem:[#allocation5 + $0xf4] sm:$0xf0] }
  0xa4   :  { %2337 = vmatpush.bf16.msrb.mxu3 %v4083_v5  ;;  %2296 = vmatmul.bf16.vlgmr.msrb.gmra.mxu0 %v5747_v1  ;;  %v4656_v49 = vld [vmem:[#allocation5 + $0x990] sm:$0xf0]  ;;  %v4531_v52 = vor.u32 %v5318_v45, %v4528_v46  ;;  %v5250_v53 = vld [vmem:[#allocation5 + $0x664] sm:$0xf]  ;;  %v3686_v45 = vld [vmem:[#allocation5 + $0x1e8] sm:$0xf] }
  0xa5   :  { %2344 = vmatpush.bf16.msra.mxu0 %v4323_v6  ;;  %2310 = vmatmul.bf16.vlgmr.msrb.gmra.mxu1 %v5753_v17  ;;  %v4256_v54 = vld [vmem:[#allocation5 + $0x670] sm:$0xf0]  ;;  %v5282_v55 = vld [vmem:[#allocation5 + $0x764] sm:$0xf]  ;;  %v4659_v56 = vor.u32 %v5350_v48, %v4656_v49  ;;  %v5109_v48 = vld [vmem:[#allocation5 + $0x1f4] sm:$0xf0] }
  0xa6   :  { %2358 = vmatpush.bf16.msra.mxu1 %v4451_v7  ;;  %2324 = vmatmul.bf16.vlgmr.msrb.gmra.mxu2 %v5757_v39  ;;  %v4384_v57 = vld [vmem:[#allocation5 + $0x770] sm:$0xf0]  ;;  %v5314_v59 = vld [vmem:[#allocation5 + $0x864] sm:$0xf]  ;;  %v4259_v63 = vor.u32 %v5250_v53, %v4256_v54  ;;  %v3814_v49 = vld [vmem:[#allocation5 + $0x2e8] sm:$0xf] }
  0xa7   :  { %2372 = vmatpush.bf16.msra.mxu2 %v4579_v8  ;;  %2338 = vmatmul.bf16.vlgmr.msrb.gmra.mxu3 %v5761_v44  ;;  %v4512_v60 = vld [vmem:[#allocation5 + $0x870] sm:$0xf0]  ;;  %v5346_v61 = vld [vmem:[#allocation5 + $0x964] sm:$0xf]  ;;  %v4387_v0 = vor.u32 %v5282_v55, %v4384_v57  ;;  %v3942_v53 = vld [vmem:[#allocation5 + $0x3e8] sm:$0xf]  ;;  %v3687_v57 = vor.u32 %v5109_v48, %v3686_v45 }
  0xa8   :  { %2386 = vmatpush.bf16.msra.mxu3 %v4707_v13  ;;  %v4640_v62 = vld [vmem:[#allocation5 + $0x970] sm:$0xf0]  ;;  %v4515_v2 = vor.u32 %v5314_v59, %v4512_v60  ;;  %v5246_v3 = vld [vmem:[#allocation5 + $0x644] sm:$0xf]  ;;  %v5173_v54 = vld [vmem:[#allocation5 + $0x3f4] sm:$0xf0] }
  0xa9   :  { %2345 = vmatpush.bf16.msra.mxu0 %v4307_v20  ;;  %v4240_v4 = vld [vmem:[#allocation5 + $0x650] sm:$0xf0]  ;;  %v5278_v5 = vld [vmem:[#allocation5 + $0x744] sm:$0xf]  ;;  %v4643_v6 = vor.u32 %v5346_v61, %v4640_v62  ;;  %v3542_v60 = vld [vmem:[#allocation5 + $0xc8] sm:$0xf] }
  0xaa   :  { %2359 = vmatpush.bf16.msra.mxu1 %v4435_v21  ;;  %v4368_v7 = vld [vmem:[#allocation5 + $0x750] sm:$0xf0]  ;;  %v5310_v8 = vld [vmem:[#allocation5 + $0x844] sm:$0xf]  ;;  %v4243_v13 = vor.u32 %v5246_v3, %v4240_v4  ;;  %v5073_v61 = vld [vmem:[#allocation5 + $0xd4] sm:$0xf0] }
  0xab   :  { %2373 = vmatpush.bf16.msra.mxu2 %v4563_v22  ;;  %v4496_v9 = vld [vmem:[#allocation5 + $0x850] sm:$0xf0]  ;;  %v5342_v11 = vld [vmem:[#allocation5 + $0x944] sm:$0xf]  ;;  %v4371_v14 = vor.u32 %v5278_v5, %v4368_v7  ;;  %v3670_v62 = vld [vmem:[#allocation5 + $0x1c8] sm:$0xf] }
  0xac   :  { %2387 = vmatpush.bf16.msra.mxu3 %v4691_v26  ;;  %v4624_v12 = vld [vmem:[#allocation5 + $0x950] sm:$0xf0]  ;;  %v4499_v15 = vor.u32 %v5310_v8, %v4496_v9  ;;  %v5242_v16 = vld [vmem:[#allocation5 + $0x624] sm:$0xf]  ;;  %v5137_v3 = vld [vmem:[#allocation5 + $0x2d4] sm:$0xf0] }
  0xad   :  { %2346 = vmatpush.bf16.msra.mxu0 %v4291_v34  ;;  %v4224_v18 = vld [vmem:[#allocation5 + $0x630] sm:$0xf0]  ;;  %v5274_v19 = vld [vmem:[#allocation5 + $0x724] sm:$0xf]  ;;  %v4627_v20 = vor.u32 %v5342_v11, %v4624_v12  ;;  %v3926_v4 = vld [vmem:[#allocation5 + $0x3c8] sm:$0xf] }
  0xae   :  { %2360 = vmatpush.bf16.msra.mxu1 %v4419_v35  ;;  %v4352_v21 = vld [vmem:[#allocation5 + $0x730] sm:$0xf0]  ;;  %v5306_v22 = vld [vmem:[#allocation5 + $0x824] sm:$0xf]  ;;  %v4227_v26 = vor.u32 %v5242_v16, %v4224_v18  ;;  %v5169_v5 = vld [vmem:[#allocation5 + $0x3d4] sm:$0xf0] }
  0xaf   :  { %2374 = vmatpush.bf16.msra.mxu2 %v4547_v36  ;;  %v4480_v23 = vld [vmem:[#allocation5 + $0x830] sm:$0xf0]  ;;  %v5338_v24 = vld [vmem:[#allocation5 + $0x924] sm:$0xf]  ;;  %v4355_v30 = vor.u32 %v5274_v19, %v4352_v21  ;;  %v3526_v9 = vld [vmem:[#allocation5 + $0xa8] sm:$0xf] }
  0xb0   :  { %2388 = vmatpush.bf16.msra.mxu3 %v4675_v41  ;;  %v4608_v25 = vld [vmem:[#allocation5 + $0x930] sm:$0xf0]  ;;  %v5238_v28 = vld [vmem:[#allocation5 + $0x604] sm:$0xf]  ;;  %v4483_v32 = vor.u32 %v5306_v22, %v4480_v23  ;;  %v3558_v41 = vld [vmem:[#allocation5 + $0xe8] sm:$0xf] }
  0xb1   :  { %2347 = vmatpush.bf16.msra.mxu0 %v4275_v50  ;;  %v4208_v29 = vld [vmem:[#allocation5 + $0x610] sm:$0xf0]  ;;  %v5270_v33 = vld [vmem:[#allocation5 + $0x704] sm:$0xf]  ;;  %v4611_v36 = vor.u32 %v5338_v24, %v4608_v25  ;;  %v5141_v50 = vld [vmem:[#allocation5 + $0x2f4] sm:$0xf0] }
  0xb2   :  { %2361 = vmatpush.bf16.msra.mxu1 %v4403_v51  ;;  %v4336_v34 = vld [vmem:[#allocation5 + $0x710] sm:$0xf0]  ;;  %v5302_v35 = vld [vmem:[#allocation5 + $0x804] sm:$0xf]  ;;  %v4211_v46 = vor.u32 %v5238_v28, %v4208_v29  ;;  %v3815_v59 = vor.u32 %v5141_v50, %v3814_v49  ;;  %v5069_v11 = vld [vmem:[#allocation5 + $0xb4] sm:$0xf0] }
  0xb3   :  { %2375 = vmatpush.bf16.msra.mxu2 %v4531_v52  ;;  %v4464_v37 = vld [vmem:[#allocation5 + $0x810] sm:$0xf0]  ;;  %v5334_v38 = vld [vmem:[#allocation5 + $0x904] sm:$0xf]  ;;  %v4339_v51 = vor.u32 %v5270_v33, %v4336_v34  ;;  %v3654_v12 = vld [vmem:[#allocation5 + $0x1a8] sm:$0xf] }
  0xb4   :  { %2389 = vmatpush.bf16.msra.mxu3 %v4659_v56  ;;  %v4592_v40 = vld [vmem:[#allocation5 + $0x910] sm:$0xf0]  ;;  %v4467_v52 = vor.u32 %v5302_v35, %v4464_v37  ;;  %v3559_v56 = vor.u32 %v5077_v42, %v3558_v41  ;;  %v5133_v16 = vld [vmem:[#allocation5 + $0x2b4] sm:$0xf0]  ;;  %v3910_v18 = vld [vmem:[#allocation5 + $0x3a8] sm:$0xf] }
  0xb5   :  { %2348 = vmatpush.bf16.msra.mxu0 %v4259_v63  ;;  %v4595_v55 = vor.u32 %v5334_v38, %v4592_v40  ;;  %v3943_v63 = vor.u32 %v5173_v54, %v3942_v53  ;;  %v5165_v19 = vld [vmem:[#allocation5 + $0x3b4] sm:$0xf0]  ;;  %v3510_v23 = vld [vmem:[#allocation5 + $0x88] sm:$0xf] }
  0xb6   :  { %2362 = vmatpush.bf16.msra.mxu1 %v4387_v0  ;;  %v5105_v0 = vld [vmem:[#allocation5 + $0x1d4] sm:$0xf0]  ;;  %v3638_v25 = vld [vmem:[#allocation5 + $0x188] sm:$0xf] }
  0xb7   :  { %2376 = vmatpush.bf16.msra.mxu2 %v4515_v2  ;;  %v3798_v2 = vld [vmem:[#allocation5 + $0x2c8] sm:$0xf]  ;;  %v3671_v7 = vor.u32 %v5105_v0, %v3670_v62  ;;  %v5065_v24 = vld [vmem:[#allocation5 + $0x94] sm:$0xf0] }
  0xb8   :  { %2390 = vmatpush.bf16.msra.mxu3 %v4643_v6  ;;  %v3543_v6 = vor.u32 %v5073_v61, %v3542_v60  ;;  %v3799_v8 = vor.u32 %v5137_v3, %v3798_v2  ;;  %v5097_v28 = vld [vmem:[#allocation5 + $0x194] sm:$0xf0]  ;;  %v3766_v29 = vld [vmem:[#allocation5 + $0x288] sm:$0xf]  ;;  %v3511_v34 = vor.u32 %v5065_v24, %v3510_v23 }
  0xb9   :  { %2349 = vmatpush.bf16.msra.mxu0 %v4243_v13  ;;  %v3927_v13 = vor.u32 %v5169_v5, %v3926_v4  ;;  %v5161_v33 = vld [vmem:[#allocation5 + $0x394] sm:$0xf0]  ;;  %v3639_v35 = vor.u32 %v5097_v28, %v3638_v25  ;;  %v3494_v37 = vld [vmem:[#allocation5 + $0x68] sm:$0xf] }
  0xba   :  { %2363 = vmatpush.bf16.msra.mxu1 %v4371_v14  ;;  %v5101_v14 = vld [vmem:[#allocation5 + $0x1b4] sm:$0xf0]  ;;  %v3622_v40 = vld [vmem:[#allocation5 + $0x168] sm:$0xf] }
  0xbb   :  { %2377 = vmatpush.bf16.msra.mxu2 %v4499_v15  ;;  %v3782_v15 = vld [vmem:[#allocation5 + $0x2a8] sm:$0xf]  ;;  %v3655_v21 = vor.u32 %v5101_v14, %v3654_v12  ;;  %v5061_v38 = vld [vmem:[#allocation5 + $0x74] sm:$0xf0] }
  0xbc   :  { %2391 = vmatpush.bf16.msra.mxu3 %v4627_v20  ;;  %v3527_v20 = vor.u32 %v5069_v11, %v3526_v9  ;;  %v3783_v22 = vor.u32 %v5133_v16, %v3782_v15  ;;  %v5093_v42 = vld [vmem:[#allocation5 + $0x174] sm:$0xf0]  ;;  %v3750_v45 = vld [vmem:[#allocation5 + $0x268] sm:$0xf]  ;;  %v3495_v50 = vor.u32 %v5061_v38, %v3494_v37 }
  0xbd   :  { %2350 = vmatpush.bf16.msra.mxu0 %v4227_v26  ;;  %v3911_v26 = vor.u32 %v5165_v19, %v3910_v18  ;;  %v3878_v48 = vld [vmem:[#allocation5 + $0x368] sm:$0xf]  ;;  %v5157_v49 = vld [vmem:[#allocation5 + $0x374] sm:$0xf0] }
  0xbe   :  { %2364 = vmatpush.bf16.msra.mxu1 %v4355_v30  ;;  %v5129_v30 = vld [vmem:[#allocation5 + $0x294] sm:$0xf0]  ;;  %v3478_v53 = vld [vmem:[#allocation5 + $0x48] sm:$0xf] }
  0xbf   :  { %2378 = vmatpush.bf16.msra.mxu2 %v4483_v32  ;;  %v3894_v32 = vld [vmem:[#allocation5 + $0x388] sm:$0xf]  ;;  %v5057_v54 = vld [vmem:[#allocation5 + $0x54] sm:$0xf0] }
  0xc0   :  { %2392 = vmatpush.bf16.msra.mxu3 %v4611_v36  ;;  %v3767_v36 = vor.u32 %v5129_v30, %v3766_v29  ;;  %v3895_v41 = vor.u32 %v5161_v33, %v3894_v32  ;;  %v5121_v60 = vld [vmem:[#allocation5 + $0x254] sm:$0xf0]  ;;  %v3862_v61 = vld [vmem:[#allocation5 + $0x348] sm:$0xf] }
  0xc1   :  { %2351 = vmatpush.bf16.msra.mxu0 %v4211_v46  ;;  %v5125_v46 = vld [vmem:[#allocation5 + $0x274] sm:$0xf0]  ;;  %v3462_v3 = vld [vmem:[#allocation5 + $0x28] sm:$0xf] }
  0xc2   :  { %2365 = vmatpush.bf16.msra.mxu1 %v4339_v51  ;;  %v3623_v51 = vor.u32 %v5093_v42, %v3622_v40  ;;  %v5153_v62 = vld [vmem:[#allocation5 + $0x354] sm:$0xf0]  ;;  %v3590_v5 = vld [vmem:[#allocation5 + $0x128] sm:$0xf] }
  0xc3   :  { %2379 = vmatpush.bf16.msra.mxu2 %v4467_v52  ;;  %v3751_v52 = vor.u32 %v5125_v46, %v3750_v45  ;;  %v5053_v4 = vld [vmem:[#allocation5 + $0x34] sm:$0xf0]  ;;  %v3846_v11 = vld [vmem:[#allocation5 + $0x328] sm:$0xf] }
  0xc4   :  { %2393 = vmatpush.bf16.msra.mxu3 %v4595_v55  ;;  %2352 = vmatmul.bf16.vlgmr.msra.gmra.mxu0 %v5759_v43  ;;  %v3606_v55 = vld [vmem:[#allocation5 + $0x148] sm:$0xf]  ;;  %v5117_v9 = vld [vmem:[#allocation5 + $0x234] sm:$0xf0] }
  0xc5   :  { %2400 = vmatpush.bf16.msrb.mxu0 %v3559_v56  ;;  %2366 = vmatmul.bf16.vlgmr.msra.gmra.mxu1 %v5763_v47  ;;  %v3879_v56 = vor.u32 %v5157_v49, %v3878_v48  ;;  %v5149_v12 = vld [vmem:[#allocation5 + $0x334] sm:$0xf0]  ;;  %v3446_v14 = vld [vmem:[#allocation5 + $0x8] sm:$0xf] }
  0xc6   :  { %2414 = vmatpush.bf16.msrb.mxu1 %v3687_v57  ;;  %2380 = vmatmul.bf16.vlgmr.msra.gmra.mxu2 %v5769_v27  ;;  %v5089_v57 = vld [vmem:[#allocation5 + $0x154] sm:$0xf0]  ;;  %v3574_v19 = vld [vmem:[#allocation5 + $0x108] sm:$0xf] }
  0xc7   :  { %2428 = vmatpush.bf16.msrb.mxu2 %v3815_v59  ;;  %2394 = vmatmul.bf16.vlgmr.msra.gmra.mxu3 %v5771_v31  ;;  %v3734_v59 = vld [vmem:[#allocation5 + $0x248] sm:$0xf]  ;;  %v3607_v0 = vor.u32 %v5089_v57, %v3606_v55  ;;  %v5049_v15 = vld [vmem:[#allocation5 + $0x14] sm:$0xf0] }
  0xc8   :  { %2442 = vmatpush.bf16.msrb.mxu3 %v3943_v63  ;;  %v3479_v63 = vor.u32 %v5057_v54, %v3478_v53  ;;  %v3735_v2 = vor.u32 %v5121_v60, %v3734_v59  ;;  %v5113_v23 = vld [vmem:[#allocation5 + $0x214] sm:$0xf0]  ;;  %v3830_v24 = vld [vmem:[#allocation5 + $0x308] sm:$0xf]  ;;  %v3447_v30 = vor.u32 %v5049_v15, %v3446_v14 }
  0xc9   :  { %2401 = vmatpush.bf16.msrb.mxu0 %v3543_v6  ;;  %v3863_v6 = vor.u32 %v5153_v62, %v3862_v61  ;;  %v5145_v25 = vld [vmem:[#allocation5 + $0x314] sm:$0xf0]  ;;  %v4198_v29 = vld [vmem:[#allocation5 + $0x5e8] sm:$0xf] }
  0xca   :  { %2415 = vmatpush.bf16.msrb.mxu1 %v3671_v7  ;;  %v5085_v7 = vld [vmem:[#allocation5 + $0x134] sm:$0xf0]  ;;  %v4326_v33 = vld [vmem:[#allocation5 + $0x6e8] sm:$0xf]  ;;  %v3831_v40 = vor.u32 %v5145_v25, %v3830_v24 }
  0xcb   :  { %2429 = vmatpush.bf16.msrb.mxu2 %v3799_v8  ;;  %v3718_v8 = vld [vmem:[#allocation5 + $0x228] sm:$0xf]  ;;  %v3591_v16 = vor.u32 %v5085_v7, %v3590_v5  ;;  %v5205_v28 = vld [vmem:[#allocation5 + $0x4f4] sm:$0xf0] }
  0xcc   :  { %2443 = vmatpush.bf16.msrb.mxu3 %v3927_v13  ;;  %v3463_v13 = vor.u32 %v5053_v4, %v3462_v3  ;;  %v3719_v18 = vor.u32 %v5117_v9, %v3718_v8  ;;  %v5237_v32 = vld [vmem:[#allocation5 + $0x5f4] sm:$0xf0]  ;;  %v4454_v37 = vld [vmem:[#allocation5 + $0x7e8] sm:$0xf] }
  0xcd   :  { %2402 = vmatpush.bf16.msrb.mxu0 %v3527_v20  ;;  %v5081_v20 = vld [vmem:[#allocation5 + $0x114] sm:$0xf0]  ;;  %v4199_v42 = vor.u32 %v5237_v32, %v4198_v29  ;;  %v4054_v46 = vld [vmem:[#allocation5 + $0x4c8] sm:$0xf] }
  0xce   :  { %2416 = vmatpush.bf16.msrb.mxu1 %v3655_v21  ;;  %v3702_v21 = vld [vmem:[#allocation5 + $0x208] sm:$0xf]  ;;  %v5301_v38 = vld [vmem:[#allocation5 + $0x7f4] sm:$0xf0] }
  0xcf   :  { %2430 = vmatpush.bf16.msrb.mxu2 %v3783_v22  ;;  %v3847_v22 = vor.u32 %v5149_v12, %v3846_v11  ;;  %v5201_v48 = vld [vmem:[#allocation5 + $0x4d4] sm:$0xf0]  ;;  %v4182_v49 = vld [vmem:[#allocation5 + $0x5c8] sm:$0xf] }
  0xd0   :  { %2444 = vmatpush.bf16.msrb.mxu3 %v3911_v26  ;;  %v4070_v26 = vld [vmem:[#allocation5 + $0x4e8] sm:$0xf]  ;;  %v5265_v53 = vld [vmem:[#allocation5 + $0x6d4] sm:$0xf0] }
  0xd1   :  { %2403 = vmatpush.bf16.msrb.mxu0 %v3511_v34  ;;  %v5269_v34 = vld [vmem:[#allocation5 + $0x6f4] sm:$0xf0]  ;;  %v4438_v54 = vld [vmem:[#allocation5 + $0x7c8] sm:$0xf] }
  0xd2   :  { %2417 = vmatpush.bf16.msrb.mxu1 %v3639_v35  ;;  %v3575_v35 = vor.u32 %v5081_v20, %v3574_v19  ;;  %v4327_v45 = vor.u32 %v5269_v34, %v4326_v33  ;;  %v5297_v55 = vld [vmem:[#allocation5 + $0x7d4] sm:$0xf0]  ;;  %v4038_v60 = vld [vmem:[#allocation5 + $0x4a8] sm:$0xf] }
  0xd3   :  { %2431 = vmatpush.bf16.msrb.mxu2 %v3767_v36  ;;  %v3703_v36 = vor.u32 %v5113_v23, %v3702_v21  ;;  %v5197_v61 = vld [vmem:[#allocation5 + $0x4b4] sm:$0xf0]  ;;  %v4166_v62 = vld [vmem:[#allocation5 + $0x5a8] sm:$0xf] }
  0xd4   :  { %2445 = vmatpush.bf16.msrb.mxu3 %v3895_v41  ;;  %v4071_v41 = vor.u32 %v5205_v28, %v4070_v26  ;;  %v5261_v3 = vld [vmem:[#allocation5 + $0x6b4] sm:$0xf0]  ;;  %v4422_v4 = vld [vmem:[#allocation5 + $0x7a8] sm:$0xf] }
  0xd5   :  { %2404 = vmatpush.bf16.msrb.mxu0 %v3495_v50  ;;  %v4455_v50 = vor.u32 %v5301_v38, %v4454_v37  ;;  %v5293_v5 = vld [vmem:[#allocation5 + $0x7b4] sm:$0xf0]  ;;  %v4022_v9 = vld [vmem:[#allocation5 + $0x488] sm:$0xf] }
  0xd6   :  { %2418 = vmatpush.bf16.msrb.mxu1 %v3623_v51  ;;  %v5233_v51 = vld [vmem:[#allocation5 + $0x5d4] sm:$0xf0]  ;;  %v4150_v12 = vld [vmem:[#allocation5 + $0x588] sm:$0xf] }
  0xd7   :  { %2432 = vmatpush.bf16.msrb.mxu2 %v3751_v52  ;;  %v4310_v52 = vld [vmem:[#allocation5 + $0x6c8] sm:$0xf]  ;;  %v4183_v57 = vor.u32 %v5233_v51, %v4182_v49  ;;  %v5193_v11 = vld [vmem:[#allocation5 + $0x494] sm:$0xf0] }
  0xd8   :  { %2446 = vmatpush.bf16.msrb.mxu3 %v3879_v56  ;;  %v4055_v56 = vor.u32 %v5201_v48, %v4054_v46  ;;  %v4311_v59 = vor.u32 %v5265_v53, %v4310_v52  ;;  %v5225_v14 = vld [vmem:[#allocation5 + $0x594] sm:$0xf0]  ;;  %v4278_v15 = vld [vmem:[#allocation5 + $0x688] sm:$0xf]  ;;  %v4023_v20 = vor.u32 %v5193_v11, %v4022_v9 }
  0xd9   :  { %2405 = vmatpush.bf16.msrb.mxu0 %v3479_v63  ;;  %v4439_v63 = vor.u32 %v5297_v55, %v4438_v54  ;;  %v5289_v19 = vld [vmem:[#allocation5 + $0x794] sm:$0xf0]  ;;  %v4151_v21 = vor.u32 %v5225_v14, %v4150_v12  ;;  %v4006_v23 = vld [vmem:[#allocation5 + $0x468] sm:$0xf] }
  0xda   :  { %2419 = vmatpush.bf16.msrb.mxu1 %v3607_v0  ;;  %v5229_v0 = vld [vmem:[#allocation5 + $0x5b4] sm:$0xf0]  ;;  %v4134_v25 = vld [vmem:[#allocation5 + $0x568] sm:$0xf] }
  0xdb   :  { %2433 = vmatpush.bf16.msrb.mxu2 %v3735_v2  ;;  %v4294_v2 = vld [vmem:[#allocation5 + $0x6a8] sm:$0xf]  ;;  %v4167_v7 = vor.u32 %v5229_v0, %v4166_v62  ;;  %v5189_v24 = vld [vmem:[#allocation5 + $0x474] sm:$0xf0] }
  0xdc   :  { %2447 = vmatpush.bf16.msrb.mxu3 %v3863_v6  ;;  %v4039_v6 = vor.u32 %v5197_v61, %v4038_v60  ;;  %v4295_v8 = vor.u32 %v5261_v3, %v4294_v2  ;;  %v5221_v28 = vld [vmem:[#allocation5 + $0x574] sm:$0xf0]  ;;  %v4262_v29 = vld [vmem:[#allocation5 + $0x668] sm:$0xf]  ;;  %v4007_v34 = vor.u32 %v5189_v24, %v4006_v23  ;;  %v5107_v23 = vld [vmem:[#allocation5 + $0x1ec] sm:$0xf] }
  0xdd   :  { %2406 = vmatpush.bf16.msrb.mxu0 %v3463_v13  ;;  %v4423_v13 = vor.u32 %v5293_v5, %v4422_v4  ;;  %v4390_v32 = vld [vmem:[#allocation5 + $0x768] sm:$0xf]  ;;  %v5285_v33 = vld [vmem:[#allocation5 + $0x774] sm:$0xf0]  ;;  %v3688_v24 = vld [vmem:[#allocation5 + $0x1f8] sm:$0xf0] }
  0xde   :  { %2420 = vmatpush.bf16.msrb.mxu1 %v3591_v16  ;;  %v5257_v16 = vld [vmem:[#allocation5 + $0x694] sm:$0xf0]  ;;  %v3990_v37 = vld [vmem:[#allocation5 + $0x448] sm:$0xf] }
  0xdf   :  { %2434 = vmatpush.bf16.msrb.mxu2 %v3719_v18  ;;  %v4406_v18 = vld [vmem:[#allocation5 + $0x788] sm:$0xf]  ;;  %v5185_v38 = vld [vmem:[#allocation5 + $0x454] sm:$0xf0] }
  0xe0   :  { %2448 = vmatpush.bf16.msrb.mxu3 %v3847_v22  ;;  %v4279_v22 = vor.u32 %v5257_v16, %v4278_v15  ;;  %v4407_v26 = vor.u32 %v5289_v19, %v4406_v18  ;;  %v5249_v46 = vld [vmem:[#allocation5 + $0x654] sm:$0xf0]  ;;  %v4374_v48 = vld [vmem:[#allocation5 + $0x748] sm:$0xf]  ;;  %v5075_v19 = vld [vmem:[#allocation5 + $0xec] sm:$0xf] }
  0xe1   :  { %2407 = vmatpush.bf16.msrb.mxu0 %v3447_v30  ;;  %v5253_v30 = vld [vmem:[#allocation5 + $0x674] sm:$0xf0]  ;;  %v3974_v53 = vld [vmem:[#allocation5 + $0x428] sm:$0xf] }
  0xe2   :  { %2421 = vmatpush.bf16.msrb.mxu1 %v3575_v35  ;;  %v4135_v35 = vor.u32 %v5221_v28, %v4134_v25  ;;  %v5281_v49 = vld [vmem:[#allocation5 + $0x754] sm:$0xf0]  ;;  %v4102_v55 = vld [vmem:[#allocation5 + $0x528] sm:$0xf] }
  0xe3   :  { %2435 = vmatpush.bf16.msrb.mxu2 %v3703_v36  ;;  %v4263_v36 = vor.u32 %v5253_v30, %v4262_v29  ;;  %v5181_v54 = vld [vmem:[#allocation5 + $0x434] sm:$0xf0]  ;;  %v4358_v61 = vld [vmem:[#allocation5 + $0x728] sm:$0xf] }
  0xe4   :  { %2449 = vmatpush.bf16.msrb.mxu3 %v3831_v40  ;;  %2408 = vmatmul.bf16.vlgmr.msrb.gmra.mxu0 %v5745_v58  ;;  %v4118_v40 = vld [vmem:[#allocation5 + $0x548] sm:$0xf]  ;;  %v5245_v60 = vld [vmem:[#allocation5 + $0x634] sm:$0xf0] }
  0xe5   :  { %2456 = vmatpush.bf16.msra.mxu0 %v4071_v41  ;;  %2422 = vmatmul.bf16.vlgmr.msrb.gmra.mxu1 %v5751_v10  ;;  %v4391_v41 = vor.u32 %v5285_v33, %v4390_v32  ;;  %v5277_v62 = vld [vmem:[#allocation5 + $0x734] sm:$0xf0]  ;;  %v3958_v0 = vld [vmem:[#allocation5 + $0x408] sm:$0xf] }
  0xe6   :  { %2470 = vmatpush.bf16.msra.mxu1 %v4199_v42  ;;  %2436 = vmatmul.bf16.vlgmr.msrb.gmra.mxu2 %v5747_v1  ;;  %v5217_v42 = vld [vmem:[#allocation5 + $0x554] sm:$0xf0]  ;;  %v4086_v5 = vld [vmem:[#allocation5 + $0x508] sm:$0xf] }
  0xe7   :  { %2484 = vmatpush.bf16.msra.mxu2 %v4327_v45  ;;  %2450 = vmatmul.bf16.vlgmr.msrb.gmra.mxu3 %v5753_v17  ;;  %v4246_v45 = vld [vmem:[#allocation5 + $0x648] sm:$0xf]  ;;  %v4119_v51 = vor.u32 %v5217_v42, %v4118_v40  ;;  %v5177_v2 = vld [vmem:[#allocation5 + $0x414] sm:$0xf0]  ;;  %v3672_v40 = vld [vmem:[#allocation5 + $0x1d8] sm:$0xf0] }
  0xe8   :  { %2498 = vmatpush.bf16.msra.mxu3 %v4455_v50  ;;  %v3991_v50 = vor.u32 %v5185_v38, %v3990_v37  ;;  %v4247_v52 = vor.u32 %v5249_v46, %v4246_v45  ;;  %v5241_v9 = vld [vmem:[#allocation5 + $0x614] sm:$0xf0]  ;;  %v4342_v11 = vld [vmem:[#allocation5 + $0x708] sm:$0xf]  ;;  %v3959_v16 = vor.u32 %v5177_v2, %v3958_v0  ;;  %v3544_v37 = vld [vmem:[#allocation5 + $0xd8] sm:$0xf0] }
  0xe9   :  { %2457 = vmatpush.bf16.msra.mxu0 %v4055_v56  ;;  %v4375_v56 = vor.u32 %v5281_v49, %v4374_v48  ;;  %v5273_v12 = vld [vmem:[#allocation5 + $0x714] sm:$0xf0]  ;;  %v4710_v15 = vld [vmem:[#allocation5 + $0x9e8] sm:$0xf]  ;;  %v5103_v38 = vld [vmem:[#allocation5 + $0x1cc] sm:$0xf] }
  0xea   :  { %2471 = vmatpush.bf16.msra.mxu1 %v4183_v57  ;;  %v5213_v57 = vld [vmem:[#allocation5 + $0x534] sm:$0xf0]  ;;  %v4343_v25 = vor.u32 %v5273_v12, %v4342_v11  ;;  %v4566_v30 = vld [vmem:[#allocation5 + $0x8c8] sm:$0xf]  ;;  %v5063_v2 = vld [vmem:[#allocation5 + $0x8c] sm:$0xf] }
  0xeb   :  { %2485 = vmatpush.bf16.msra.mxu2 %v4311_v59  ;;  %v4230_v59 = vld [vmem:[#allocation5 + $0x628] sm:$0xf]  ;;  %v4103_v3 = vor.u32 %v5213_v57, %v4102_v55  ;;  %v5333_v14 = vld [vmem:[#allocation5 + $0x8f4] sm:$0xf0]  ;;  %v3656_v55 = vld [vmem:[#allocation5 + $0x1b8] sm:$0xf0] }
  0xec   :  { %2499 = vmatpush.bf16.msra.mxu3 %v4439_v63  ;;  %v3975_v63 = vor.u32 %v5181_v54, %v3974_v53  ;;  %v4231_v4 = vor.u32 %v5245_v60, %v4230_v59  ;;  %v5365_v18 = vld [vmem:[#allocation5 + $0x9f4] sm:$0xf0]  ;;  %v4694_v33 = vld [vmem:[#allocation5 + $0x9c8] sm:$0xf]  ;;  %v3528_v53 = vld [vmem:[#allocation5 + $0xb8] sm:$0xf0] }
  0xed   :  { %2458 = vmatpush.bf16.msra.mxu0 %v4039_v6  ;;  %v5209_v6 = vld [vmem:[#allocation5 + $0x514] sm:$0xf0]  ;;  %v4711_v28 = vor.u32 %v5365_v18, %v4710_v15  ;;  %v4550_v46 = vld [vmem:[#allocation5 + $0x8a8] sm:$0xf]  ;;  %v5099_v54 = vld [vmem:[#allocation5 + $0x1ac] sm:$0xf]  ;;  %v5793_v18 = vpop.f32.mrf.mxu0 }
  0xee   :  { %2472 = vmatpush.bf16.msra.mxu1 %v4167_v7  ;;  %v4214_v7 = vld [vmem:[#allocation5 + $0x608] sm:$0xf]  ;;  %v5329_v32 = vld [vmem:[#allocation5 + $0x8d4] sm:$0xf0]  ;;  %v5059_v15 = vld [vmem:[#allocation5 + $0x6c] sm:$0xf] }
  0xef   :  { %2486 = vmatpush.bf16.msra.mxu2 %v4295_v8  ;;  %v4359_v8 = vor.u32 %v5277_v62, %v4358_v61  ;;  %v5325_v48 = vld [vmem:[#allocation5 + $0x8b4] sm:$0xf0]  ;;  %v4678_v49 = vld [vmem:[#allocation5 + $0x9a8] sm:$0xf] }
  0xf0   :  { %2500 = vmatpush.bf16.msra.mxu3 %v4423_v13  ;;  %v4582_v13 = vld [vmem:[#allocation5 + $0x8e8] sm:$0xf]  ;;  %v5321_v61 = vld [vmem:[#allocation5 + $0x894] sm:$0xf0] }
  0xf1   :  { %2459 = vmatpush.bf16.msra.mxu0 %v4023_v20  ;;  %v3560_v20 = vld [vmem:[#allocation5 + $0xf8] sm:$0xf0]  ;;  %v4534_v60 = vld [vmem:[#allocation5 + $0x888] sm:$0xf]  ;;  %v5353_v0 = vld [vmem:[#allocation5 + $0x994] sm:$0xf0] }
  0xf2   :  { %2473 = vmatpush.bf16.msra.mxu1 %v4151_v21  ;;  %v4087_v21 = vor.u32 %v5209_v6, %v4086_v5  ;;  %v3563_v29 = vor.u32 %v5075_v19, %v3560_v20  ;;  %v4662_v62 = vld [vmem:[#allocation5 + $0x988] sm:$0xf]  ;;  %v3640_v5 = vld [vmem:[#allocation5 + $0x198] sm:$0xf0]  ;;  %v4535_v6 = vor.u32 %v5321_v61, %v4534_v60  ;;  %v5317_v11 = vld [vmem:[#allocation5 + $0x874] sm:$0xf0] }
  0xf3   :  { %2487 = vmatpush.bf16.msra.mxu2 %v4279_v22  ;;  %v4215_v22 = vor.u32 %v5241_v9, %v4214_v7  ;;  %v4663_v7 = vor.u32 %v5353_v0, %v4662_v62  ;;  %v4518_v9 = vld [vmem:[#allocation5 + $0x868] sm:$0xf]  ;;  %v5091_v19 = vld [vmem:[#allocation5 + $0x16c] sm:$0xf]  ;;  %v3624_v20 = vld [vmem:[#allocation5 + $0x178] sm:$0xf0] }
  0xf4   :  { %2501 = vmatpush.bf16.msra.mxu3 %v4407_v26  ;;  %v4583_v26 = vor.u32 %v5333_v14, %v4582_v13  ;;  %v4646_v12 = vld [vmem:[#allocation5 + $0x968] sm:$0xf]  ;;  %v5349_v14 = vld [vmem:[#allocation5 + $0x974] sm:$0xf0] }
  0xf5   :  { %2460 = vmatpush.bf16.msra.mxu0 %v4007_v34  ;;  %v3691_v34 = vor.u32 %v5107_v23, %v3688_v24  ;;  %v4502_v24 = vld [vmem:[#allocation5 + $0x848] sm:$0xf]  ;;  %v5337_v62 = vld [vmem:[#allocation5 + $0x914] sm:$0xf0] }
  0xf6   :  { %2474 = vmatpush.bf16.msra.mxu1 %v4135_v35  ;;  %v5361_v35 = vld [vmem:[#allocation5 + $0x9d4] sm:$0xf0]  ;;  %v4598_v61 = vld [vmem:[#allocation5 + $0x908] sm:$0xf] }
  0xf7   :  { %2488 = vmatpush.bf16.msra.mxu2 %v4263_v36  ;;  %v5071_v36 = vld [vmem:[#allocation5 + $0xcc] sm:$0xf]  ;;  %v4695_v42 = vor.u32 %v5361_v35, %v4694_v33  ;;  %v5795_v33 = vpop.f32.mrf.mxu1 }
  0xf8   :  { %2502 = vmatpush.bf16.msra.mxu3 %v4391_v41  ;;  %v4567_v41 = vor.u32 %v5329_v32, %v4566_v30  ;;  %v3547_v45 = vor.u32 %v5071_v36, %v3544_v37  ;;  %v5055_v30 = vld [vmem:[#allocation5 + $0x4c] sm:$0xf]  ;;  %v3480_v32 = vld [vmem:[#allocation5 + $0x58] sm:$0xf0] }
  0xf9   :  { %2461 = vmatpush.bf16.msra.mxu0 %v3991_v50  ;;  %v3675_v50 = vor.u32 %v5103_v38, %v3672_v40  ;;  %v5087_v35 = vld [vmem:[#allocation5 + $0x14c] sm:$0xf]  ;;  %v3608_v36 = vld [vmem:[#allocation5 + $0x158] sm:$0xf0]  ;;  %v3483_v40 = vor.u32 %v5055_v30, %v3480_v32 }
  0xfa   :  { %2475 = vmatpush.bf16.msra.mxu1 %v4119_v51  ;;  %v5357_v51 = vld [vmem:[#allocation5 + $0x9b4] sm:$0xf0]  ;;  %v3928_v30 = vld [vmem:[#allocation5 + $0x3d8] sm:$0xf0]  ;;  %v5199_v32 = vld [vmem:[#allocation5 + $0x4cc] sm:$0xf] }
  0xfb   :  { %2489 = vmatpush.bf16.msra.mxu2 %v4247_v52  ;;  %v5067_v52 = vld [vmem:[#allocation5 + $0xac] sm:$0xf]  ;;  %v4679_v57 = vor.u32 %v5357_v51, %v4678_v49  ;;  %v5799_v51 = vpop.f32.mrf.mxu3 }
  0xfc   :  { %2503 = vmatpush.bf16.msra.mxu3 %v4375_v56  ;;  %v4551_v56 = vor.u32 %v5325_v48, %v4550_v46  ;;  %v3531_v59 = vor.u32 %v5067_v52, %v3528_v53  ;;  %v3611_v46 = vor.u32 %v5087_v35, %v3608_v36  ;;  %v5341_v48 = vld [vmem:[#allocation5 + $0x934] sm:$0xf0]  ;;  %v5051_v49 = vld [vmem:[#allocation5 + $0x2c] sm:$0xf]  ;;  %v3592_v53 = vld [vmem:[#allocation5 + $0x138] sm:$0xf0] }
  0xfd   :  { %2462 = vmatpush.bf16.msra.mxu0 %v3975_v63  ;;  %v3659_v63 = vor.u32 %v5099_v54, %v3656_v55  ;;  %v5083_v52 = vld [vmem:[#allocation5 + $0x12c] sm:$0xf]  ;;  %v4470_v55 = vld [vmem:[#allocation5 + $0x808] sm:$0xf]  ;;  %v4056_v35 = vld [vmem:[#allocation5 + $0x4d8] sm:$0xf0] }
  0xfe   :  { %2476 = vmatpush.bf16.msra.mxu1 %v4103_v3  ;;  %v3512_v3 = vld [vmem:[#allocation5 + $0x98] sm:$0xf0]  ;;  %v3595_v0 = vor.u32 %v5083_v52, %v3592_v53  ;;  %v5195_v53 = vld [vmem:[#allocation5 + $0x4ac] sm:$0xf] }
  0xff   :  { %2490 = vmatpush.bf16.msra.mxu2 %v4231_v4  ;;  %v5095_v4 = vld [vmem:[#allocation5 + $0x18c] sm:$0xf]  ;;  %v3912_v52 = vld [vmem:[#allocation5 + $0x3b8] sm:$0xf0] }
 0x100   :  { %2504 = vmatpush.bf16.msra.mxu3 %v4359_v8  ;;  %v3515_v8 = vor.u32 %v5063_v2, %v3512_v3  ;;  %v3643_v13 = vor.u32 %v5095_v4, %v3640_v5  ;;  %v3448_v2 = vld [vmem:[#allocation5 + $0x18] sm:$0xf0]  ;;  %v5079_v3 = vld [vmem:[#allocation5 + $0x10c] sm:$0xf] }
 0x101   :  { %2463 = vmatpush.bf16.msra.mxu0 %v3959_v16  ;;  %v3496_v16 = vld [vmem:[#allocation5 + $0x78] sm:$0xf0]  ;;  %v5139_v5 = vld [vmem:[#allocation5 + $0x2ec] sm:$0xf] }
 0x102   :  { %2477 = vmatpush.bf16.msra.mxu1 %v4087_v21  ;;  %v4519_v21 = vor.u32 %v5317_v11, %v4518_v9  ;;  %v3499_v23 = vor.u32 %v5059_v15, %v3496_v16  ;;  %v3576_v4 = vld [vmem:[#allocation5 + $0x118] sm:$0xf0]  ;;  %v5203_v11 = vld [vmem:[#allocation5 + $0x4ec] sm:$0xf]  ;;  %v4599_v15 = vor.u32 %v5337_v62, %v4598_v61 }
 0x103   :  { %2491 = vmatpush.bf16.msra.mxu2 %v4215_v22  ;;  %v4647_v22 = vor.u32 %v5349_v14, %v4646_v12  ;;  %v3944_v9 = vld [vmem:[#allocation5 + $0x3f8] sm:$0xf0]  ;;  %v5807_v36 = vpop.f32.mrf.mxu3 }
 0x104   :  { %2505 = vmatpush.bf16.msra.mxu3 %v4343_v25  ;;  %2464 = vmatmul.bf16.vlgmr.msra.gmra.mxu0 %v5757_v39  ;;  %v5313_v25 = vld [vmem:[#allocation5 + $0x854] sm:$0xf0]  ;;  %v4072_v12 = vld [vmem:[#allocation5 + $0x4f8] sm:$0xf0] }
 0x105   :  { %2512 = vmatpush.bf16.msrb.mxu0 %v4583_v26  ;;  %2478 = vmatmul.bf16.vlgmr.msra.gmra.mxu1 %v5761_v44  ;;  %v4630_v26 = vld [vmem:[#allocation5 + $0x948] sm:$0xf]  ;;  %v4503_v37 = vor.u32 %v5313_v25, %v4502_v24  ;;  %v4075_v24 = vor.u32 %v5203_v11, %v4072_v12  ;;  %v5135_v25 = vld [vmem:[#allocation5 + $0x2cc] sm:$0xf] }
 0x106   :  { %2526 = vmatpush.bf16.msrb.mxu1 %v4711_v28  ;;  %2492 = vmatmul.bf16.vlgmr.msra.gmra.mxu2 %v5759_v43  ;;  %v3627_v28 = vor.u32 %v5091_v19, %v3624_v20  ;;  %v5235_v19 = vld [vmem:[#allocation5 + $0x5ec] sm:$0xf]  ;;  %v4200_v20 = vld [vmem:[#allocation5 + $0x5f8] sm:$0xf0] }
 0x107   :  { %2540 = vmatpush.bf16.msrb.mxu2 %v3563_v29  ;;  %2506 = vmatmul.bf16.vlgmr.msra.gmra.mxu3 %v5763_v47  ;;  %v5345_v29 = vld [vmem:[#allocation5 + $0x954] sm:$0xf0] }
 0x108   :  { %2554 = vmatpush.bf16.msrb.mxu3 %v3691_v34  ;;  %v5797_v34 = vpop.f32.mrf.mxu2  ;;  %v4631_v38 = vor.u32 %v5345_v29, %v4630_v26  ;;  %v3800_v26 = vld [vmem:[#allocation5 + $0x2d8] sm:$0xf0]  ;;  %v4203_v29 = vor.u32 %v5235_v19, %v4200_v20  ;;  %v5155_v19 = vld [vmem:[#allocation5 + $0x36c] sm:$0xf] }
 0x109   :  { %2513 = vmatpush.bf16.msrb.mxu0 %v4567_v41  ;;  %v4486_v41 = vld [vmem:[#allocation5 + $0x828] sm:$0xf] }
 0x10a   :  { %2527 = vmatpush.bf16.msrb.mxu1 %v4695_v42  ;;  %v5309_v42 = vld [vmem:[#allocation5 + $0x834] sm:$0xf0] }
 0x10b   :  { %2541 = vmatpush.bf16.msrb.mxu2 %v3547_v45  ;;  %v4614_v45 = vld [vmem:[#allocation5 + $0x928] sm:$0xf]  ;;  %v4487_v54 = vor.u32 %v5309_v42, %v4486_v41 }
 0x10c   :  { %2555 = vmatpush.bf16.msrb.mxu3 %v3675_v50  ;;  %v3464_v50 = vld [vmem:[#allocation5 + $0x38] sm:$0xf0] }
 0x10d   :  { %2514 = vmatpush.bf16.msrb.mxu0 %v4551_v56  ;;  %v5305_v56 = vld [vmem:[#allocation5 + $0x814] sm:$0xf0]  ;;  %v3467_v60 = vor.u32 %v5051_v49, %v3464_v50  ;;  %v5163_v49 = vld [vmem:[#allocation5 + $0x3ac] sm:$0xf] }
 0x10e   :  { %2528 = vmatpush.bf16.msrb.mxu1 %v4679_v57  ;;  %v5801_v57 = vpop.f32.mrf.mxu0  ;;  %v3915_v62 = vor.u32 %v5163_v49, %v3912_v52  ;;  %v5215_v49 = vld [vmem:[#allocation5 + $0x54c] sm:$0xf] }
 0x10f   :  { %2542 = vmatpush.bf16.msrb.mxu2 %v3531_v59  ;;  %v4615_v59 = vor.u32 %v5341_v48, %v4614_v45  ;;  %v4059_v45 = vor.u32 %v5199_v32, %v4056_v35  ;;  %v3784_v48 = vld [vmem:[#allocation5 + $0x2b8] sm:$0xf0]  ;;  %v5119_v32 = vld [vmem:[#allocation5 + $0x24c] sm:$0xf] }
 0x110   :  { %2556 = vmatpush.bf16.msrb.mxu3 %v3659_v63  ;;  %v5047_v63 = vld [vmem:[#allocation5 + $0xc] sm:$0xf]  ;;  %v5805_v14 = vpop.f32.mrf.mxu2  ;;  %v3736_v35 = vld [vmem:[#allocation5 + $0x258] sm:$0xf0] }
 0x111   :  { %2515 = vmatpush.bf16.msrb.mxu0 %v4535_v6  ;;  %v3816_v6 = vld [vmem:[#allocation5 + $0x2f8] sm:$0xf0]  ;;  %v3451_v16 = vor.u32 %v5047_v63, %v3448_v2  ;;  %v3739_v52 = vor.u32 %v5119_v32, %v3736_v35  ;;  %v5331_v35 = vld [vmem:[#allocation5 + $0x8ec] sm:$0xf] }
 0x112   :  { %2529 = vmatpush.bf16.msrb.mxu1 %v4663_v7  ;;  %v5171_v7 = vld [vmem:[#allocation5 + $0x3ec] sm:$0xf]  ;;  %v3768_v2 = vld [vmem:[#allocation5 + $0x298] sm:$0xf0] }
 0x113   :  { %2543 = vmatpush.bf16.msrb.mxu2 %v3515_v8  ;;  %v4471_v8 = vor.u32 %v5305_v56, %v4470_v55  ;;  %v5227_v55 = vld [vmem:[#allocation5 + $0x5ac] sm:$0xf]  ;;  %v4168_v56 = vld [vmem:[#allocation5 + $0x5b8] sm:$0xf0] }
 0x114   :  { %2557 = vmatpush.bf16.msrb.mxu3 %v3643_v13  ;;  %v5803_v13 = vpop.f32.mrf.mxu1  ;;  %v4456_v32 = vld [vmem:[#allocation5 + $0x7f8] sm:$0xf0] }
 0x115   :  { %2516 = vmatpush.bf16.msrb.mxu0 %v4519_v21  ;;  %v3579_v21 = vor.u32 %v5079_v3, %v3576_v4  ;;  %v5159_v3 = vld [vmem:[#allocation5 + $0x38c] sm:$0xf]  ;;  %v4171_v4 = vor.u32 %v5227_v55, %v4168_v56  ;;  %v3720_v56 = vld [vmem:[#allocation5 + $0x238] sm:$0xf0] }
 0x116   :  { %2530 = vmatpush.bf16.msrb.mxu1 %v4647_v22  ;;  %v3819_v22 = vor.u32 %v5139_v5, %v3816_v6  ;;  %v5809_v41 = vpop.f32.mrf.mxu0  ;;  %v3896_v5 = vld [vmem:[#allocation5 + $0x398] sm:$0xf0]  ;;  %v5191_v6 = vld [vmem:[#allocation5 + $0x48c] sm:$0xf] }
 0x117   :  { %2544 = vmatpush.bf16.msrb.mxu2 %v3499_v23  ;;  %v3947_v23 = vor.u32 %v5171_v7, %v3944_v9  ;;  %v5223_v7 = vld [vmem:[#allocation5 + $0x58c] sm:$0xf]  ;;  %v5819_v9 = vpop.f32.mrf.mxu3  ;;  %v3899_v11 = vor.u32 %v5159_v3, %v3896_v5 }
 0x118   :  { %2558 = vmatpush.bf16.msrb.mxu3 %v3627_v28  ;;  %v5167_v28 = vld [vmem:[#allocation5 + $0x3cc] sm:$0xf]  ;;  %v5817_v61 = vpop.f32.mrf.mxu2 }
 0x119   :  { %2517 = vmatpush.bf16.msrb.mxu0 %v4503_v37  ;;  %v5231_v37 = vld [vmem:[#allocation5 + $0x5cc] sm:$0xf]  ;;  %v3931_v42 = vor.u32 %v5167_v28, %v3928_v30 }
 0x11a   :  { %2531 = vmatpush.bf16.msrb.mxu1 %v4631_v38  ;;  %v4184_v38 = vld [vmem:[#allocation5 + $0x5d8] sm:$0xf0]  ;;  %v5115_v55 = vld [vmem:[#allocation5 + $0x22c] sm:$0xf] }
 0x11b   :  { %2545 = vmatpush.bf16.msrb.mxu2 %v3483_v40  ;;  %v3803_v40 = vor.u32 %v5135_v25, %v3800_v26  ;;  %v4187_v50 = vor.u32 %v5231_v37, %v4184_v38  ;;  %v5219_v25 = vld [vmem:[#allocation5 + $0x56c] sm:$0xf]  ;;  %v4136_v26 = vld [vmem:[#allocation5 + $0x578] sm:$0xf0] }
 0x11c   :  { %2559 = vmatpush.bf16.msrb.mxu3 %v3611_v46  ;;  %v5131_v46 = vld [vmem:[#allocation5 + $0x2ac] sm:$0xf]  ;;  %v4139_v38 = vor.u32 %v5219_v25, %v4136_v26 }
 0x11d   :  { %2518 = vmatpush.bf16.msrb.mxu0 %v4487_v54  ;;  %v4040_v54 = vld [vmem:[#allocation5 + $0x4b8] sm:$0xf0]  ;;  %v5151_v37 = vld [vmem:[#allocation5 + $0x34c] sm:$0xf] }
 0x11e   :  { %2532 = vmatpush.bf16.msrb.mxu1 %v4615_v59  ;;  %v3787_v59 = vor.u32 %v5131_v46, %v3784_v48  ;;  %v4043_v63 = vor.u32 %v5195_v53, %v4040_v54  ;;  %v5211_v5 = vld [vmem:[#allocation5 + $0x52c] sm:$0xf] }
 0x11f   :  { %2546 = vmatpush.bf16.msrb.mxu2 %v3467_v60  ;;  %v5815_v60 = vpop.f32.mrf.mxu1  ;;  %v5827_v3 = vpop.f32.mrf.mxu3  ;;  %v5267_v26 = vld [vmem:[#allocation5 + $0x6ec] sm:$0xf] }
 0x120   :  { %2560 = vmatpush.bf16.msrb.mxu3 %v3595_v0  ;;  %v5127_v0 = vld [vmem:[#allocation5 + $0x28c] sm:$0xf]  ;;  %v5825_v48 = vpop.f32.mrf.mxu2 }
 0x121   :  { %2519 = vmatpush.bf16.msrb.mxu0 %v4471_v8  ;;  %v4152_v8 = vld [vmem:[#allocation5 + $0x598] sm:$0xf0] }
 0x122   :  { %2533 = vmatpush.bf16.msrb.mxu1 %v4599_v15  ;;  %v5123_v15 = vld [vmem:[#allocation5 + $0x26c] sm:$0xf]  ;;  %v4155_v20 = vor.u32 %v5223_v7, %v4152_v8  ;;  %v3704_v8 = vld [vmem:[#allocation5 + $0x218] sm:$0xf0] }
 0x123   :  { %2547 = vmatpush.bf16.msrb.mxu2 %v3451_v16  ;;  %v3752_v16 = vld [vmem:[#allocation5 + $0x278] sm:$0xf0]  ;;  %v5111_v7 = vld [vmem:[#allocation5 + $0x20c] sm:$0xf] }
 0x124   :  { %2561 = vmatpush.bf16.msrb.mxu3 %v3579_v21  ;;  %2520 = vmatmul.bf16.vlgmr.msrb.gmra.mxu0 %v5769_v27  ;;  %v3880_v21 = vld [vmem:[#allocation5 + $0x378] sm:$0xf0]  ;;  %v3755_v28 = vor.u32 %v5123_v15, %v3752_v16  ;;  %v5175_v16 = vld [vmem:[#allocation5 + $0x40c] sm:$0xf] }
 0x125   :  { %2568 = vmatpush.bf16.msra.mxu0 %v3819_v22  ;;  %2534 = vmatmul.bf16.vlgmr.msrb.gmra.mxu1 %v5771_v31  ;;  %v5187_v22 = vld [vmem:[#allocation5 + $0x46c] sm:$0xf]  ;;  %v3832_v15 = vld [vmem:[#allocation5 + $0x318] sm:$0xf0] }
 0x126   :  { %2582 = vmatpush.bf16.msra.mxu1 %v3947_v23  ;;  %2548 = vmatmul.bf16.vlgmr.msrb.gmra.mxu2 %v5745_v58  ;;  %v4024_v58 = vld [vmem:[#allocation5 + $0x498] sm:$0xf0] }
 0x127   :  { %2596 = vmatpush.bf16.msra.mxu2 %v4075_v24  ;;  %2562 = vmatmul.bf16.vlgmr.msrb.gmra.mxu3 %v5751_v10  ;;  %v3771_v10 = vor.u32 %v5127_v0, %v3768_v2  ;;  %v4027_v12 = vor.u32 %v5191_v6, %v4024_v58  ;;  %v4008_v23 = vld [vmem:[#allocation5 + $0x478] sm:$0xf0]  ;;  %v5821_v24 = vpop.f32.mrf.mxu0  ;;  %v5823_v46 = vpop.f32.mrf.mxu1  ;;  %v5179_v0 = vld [vmem:[#allocation5 + $0x42c] sm:$0xf]  ;;  %v3723_v58 = vor.u32 %v5115_v55, %v3720_v56 }
 0x128   :  { %2610 = vmatpush.bf16.msra.mxu3 %v4203_v29  ;;  %v3883_v29 = vor.u32 %v5155_v19, %v3880_v21  ;;  %v4011_v30 = vor.u32 %v5187_v22, %v4008_v23  ;;  %v3976_v2 = vld [vmem:[#allocation5 + $0x438] sm:$0xf0]  ;;  %v5207_v21 = vld [vmem:[#allocation5 + $0x50c] sm:$0xf]  ;;  %v5833_v25 = vpop.f32.mrf.mxu2 }
 0x129   :  { %2569 = vmatpush.bf16.msra.mxu0 %v3803_v40  ;;  %v3864_v40 = vld [vmem:[#allocation5 + $0x358] sm:$0xf0]  ;;  %v5263_v55 = vld [vmem:[#allocation5 + $0x6cc] sm:$0xf] }
 0x12a   :  { %2583 = vmatpush.bf16.msra.mxu1 %v3931_v42  ;;  %v5183_v42 = vld [vmem:[#allocation5 + $0x44c] sm:$0xf]  ;;  %v3867_v53 = vor.u32 %v5151_v37, %v3864_v40  ;;  %v4104_v6 = vld [vmem:[#allocation5 + $0x538] sm:$0xf0] }
 0x12b   :  { %2597 = vmatpush.bf16.msra.mxu2 %v4059_v45  ;;  %v3992_v45 = vld [vmem:[#allocation5 + $0x458] sm:$0xf0]  ;;  %v4107_v19 = vor.u32 %v5211_v5, %v4104_v6  ;;  %v5359_v6 = vld [vmem:[#allocation5 + $0x9cc] sm:$0xf] }
 0x12c   :  { %2611 = vmatpush.bf16.msra.mxu3 %v4187_v50  ;;  %v4120_v50 = vld [vmem:[#allocation5 + $0x558] sm:$0xf0]  ;;  %v3995_v54 = vor.u32 %v5183_v42, %v3992_v45  ;;  %v5363_v42 = vld [vmem:[#allocation5 + $0x9ec] sm:$0xf] }
 0x12d   :  { %2570 = vmatpush.bf16.msra.mxu0 %v3787_v59  ;;  %v5147_v59 = vld [vmem:[#allocation5 + $0x32c] sm:$0xf]  ;;  %v4088_v22 = vld [vmem:[#allocation5 + $0x518] sm:$0xf0] }
 0x12e   :  { %2584 = vmatpush.bf16.msra.mxu1 %v3915_v62  ;;  %v4123_v62 = vor.u32 %v5215_v49, %v4120_v50  ;;  %v4584_v37 = vld [vmem:[#allocation5 + $0x8f8] sm:$0xf0]  ;;  %v4091_v49 = vor.u32 %v5207_v21, %v4088_v22 }
 0x12f   :  { %2598 = vmatpush.bf16.msra.mxu2 %v4043_v63  ;;  %v3848_v63 = vld [vmem:[#allocation5 + $0x338] sm:$0xf0]  ;;  %v5831_v23 = vpop.f32.mrf.mxu1 }
 0x130   :  { %2612 = vmatpush.bf16.msra.mxu3 %v4171_v4  ;;  %v5829_v4 = vpop.f32.mrf.mxu0  ;;  %v4712_v45 = vld [vmem:[#allocation5 + $0x9f8] sm:$0xf0] }
 0x131   :  { %2571 = vmatpush.bf16.msra.mxu0 %v3771_v10  ;;  %v3851_v10 = vor.u32 %v5147_v59, %v3848_v63  ;;  %v4312_v56 = vld [vmem:[#allocation5 + $0x6d8] sm:$0xf0]  ;;  %v5295_v59 = vld [vmem:[#allocation5 + $0x7cc] sm:$0xf] }
 0x132   :  { %2585 = vmatpush.bf16.msra.mxu1 %v3899_v11  ;;  %v3979_v11 = vor.u32 %v5179_v0, %v3976_v2  ;;  %v4440_v63 = vld [vmem:[#allocation5 + $0x7d8] sm:$0xf0]  ;;  %v5327_v0 = vld [vmem:[#allocation5 + $0x8cc] sm:$0xf] }
 0x133   :  { %2599 = vmatpush.bf16.msra.mxu2 %v4027_v12  ;;  %v5143_v12 = vld [vmem:[#allocation5 + $0x30c] sm:$0xf]  ;;  %v4568_v2 = vld [vmem:[#allocation5 + $0x8d8] sm:$0xf0] }
 0x134   :  { %2613 = vmatpush.bf16.msra.mxu3 %v4155_v20  ;;  %v3960_v20 = vld [vmem:[#allocation5 + $0x418] sm:$0xf0] }
 0x135   :  { %2572 = vmatpush.bf16.msra.mxu0 %v3755_v28  ;;  %v4328_v28 = vld [vmem:[#allocation5 + $0x6f8] sm:$0xf0]  ;;  %v3963_v40 = vor.u32 %v5175_v16, %v3960_v20  ;;  %v5323_v20 = vld [vmem:[#allocation5 + $0x8ac] sm:$0xf] }
 0x136   :  { %2586 = vmatpush.bf16.msra.mxu1 %v3883_v29  ;;  %v5299_v29 = vld [vmem:[#allocation5 + $0x7ec] sm:$0xf]  ;;  %v4331_v50 = vor.u32 %v5267_v26, %v4328_v28  ;;  %v4552_v21 = vld [vmem:[#allocation5 + $0x8b8] sm:$0xf0]  ;;  %v5842_v26 = vpop.f32.mrf.mxu2 }
 0x137   :  { %2600 = vmatpush.bf16.msra.mxu2 %v4011_v30  ;;  %v3707_v30 = vor.u32 %v5111_v7, %v3704_v8  ;;  %v4315_v7 = vor.u32 %v5263_v55, %v4312_v56  ;;  %v4443_v8 = vor.u32 %v5295_v59, %v4440_v63  ;;  %v5840_v22 = vpop.f32.mrf.mxu1  ;;  %v5355_v28 = vld [vmem:[#allocation5 + $0x9ac] sm:$0xf]  ;;  %v4264_v63 = vld [vmem:[#allocation5 + $0x678] sm:$0xf0] }
 0x138   :  { %2614 = vmatpush.bf16.msra.mxu3 %v4139_v38  ;;  %v3835_v38 = vor.u32 %v5143_v12, %v3832_v15  ;;  %v5837_v5 = vpop.f32.mrf.mxu0  ;;  %v4296_v12 = vld [vmem:[#allocation5 + $0x6b8] sm:$0xf0]  ;;  %v5291_v15 = vld [vmem:[#allocation5 + $0x7ac] sm:$0xf] }
 0x139   :  { %2573 = vmatpush.bf16.msra.mxu0 %v3739_v52  ;;  %v5835_v52 = vpop.f32.mrf.mxu3 }
 0x13a   :  { %2587 = vmatpush.bf16.msra.mxu1 %v3867_v53  ;;  %v4459_v53 = vor.u32 %v5299_v29, %v4456_v32  ;;  %v4680_v29 = vld [vmem:[#allocation5 + $0x9b8] sm:$0xf0] }
 0x13b   :  { %2601 = vmatpush.bf16.msra.mxu2 %v3995_v54  ;;  %v4587_v54 = vor.u32 %v5331_v35, %v4584_v37  ;;  %v4555_v35 = vor.u32 %v5323_v20, %v4552_v21  ;;  %v5255_v37 = vld [vmem:[#allocation5 + $0x68c] sm:$0xf] }
 0x13c   :  { %2615 = vmatpush.bf16.msra.mxu3 %v4123_v62  ;;  %v4715_v62 = vor.u32 %v5363_v42, %v4712_v45  ;;  %v4683_v42 = vor.u32 %v5355_v28, %v4680_v29  ;;  %v5319_v45 = vld [vmem:[#allocation5 + $0x88c] sm:$0xf]  ;;  %v4248_v29 = vld [vmem:[#allocation5 + $0x658] sm:$0xf0] }
 0x13d   :  { %2574 = vmatpush.bf16.msra.mxu0 %v3723_v58  ;;  %v4696_v58 = vld [vmem:[#allocation5 + $0x9d8] sm:$0xf0]  ;;  %v5247_v28 = vld [vmem:[#allocation5 + $0x64c] sm:$0xf] }
 0x13e   :  { %2588 = vmatpush.bf16.msra.mxu1 %v3851_v10  ;;  %v4571_v10 = vor.u32 %v5327_v0, %v4568_v2  ;;  %v4699_v16 = vor.u32 %v5359_v6, %v4696_v58  ;;  %v5283_v0 = vld [vmem:[#allocation5 + $0x76c] sm:$0xf]  ;;  %v4392_v6 = vld [vmem:[#allocation5 + $0x778] sm:$0xf0] }
 0x13f   :  { %2602 = vmatpush.bf16.msra.mxu2 %v3979_v11  ;;  %v5259_v11 = vld [vmem:[#allocation5 + $0x6ac] sm:$0xf]  ;;  %v4395_v20 = vor.u32 %v5283_v0, %v4392_v6  ;;  %v4360_v0 = vld [vmem:[#allocation5 + $0x738] sm:$0xf0] }
 0x140   :  { %2616 = vmatpush.bf16.msra.mxu3 %v4107_v19  ;;  %v4424_v19 = vld [vmem:[#allocation5 + $0x7b8] sm:$0xf0]  ;;  %v5315_v58 = vld [vmem:[#allocation5 + $0x86c] sm:$0xf] }
 0x141   :  { %2575 = vmatpush.bf16.msra.mxu0 %v3707_v30  ;;  %v5846_v30 = vld [vmem:[#allocation7] sm:$0xf]  ;;  %v4427_v32 = vor.u32 %v5291_v15, %v4424_v19  ;;  %v5858_v19 = vpop.f32.mrf.mxu2  ;;  %v4488_v6 = vld [vmem:[#allocation5 + $0x838] sm:$0xf0] }
 0x142   :  { %2589 = vmatpush.bf16.msra.mxu1 %v3835_v38  ;;  %v4280_v38 = vld [vmem:[#allocation5 + $0x698] sm:$0xf0] }
 0x143   :  { %2603 = vmatpush.bf16.msra.mxu2 %v3963_v40  ;;  %v5287_v40 = vld [vmem:[#allocation5 + $0x78c] sm:$0xf]  ;;  %v4283_v55 = vor.u32 %v5255_v37, %v4280_v38  ;;  %v4504_v38 = vld [vmem:[#allocation5 + $0x858] sm:$0xf0] }
 0x144   :  { %2617 = vmatpush.bf16.msra.mxu3 %v4091_v49  ;;  %2576 = vmatmul.bf16.vlgmr.msra.gmra.mxu0 %v5747_v1  ;;  %v4299_v1 = vor.u32 %v5259_v11, %v4296_v12  ;;  %v5849_v49 = vpop.f32.mrf.mxu3  ;;  %v4648_v11 = vld [vmem:[#allocation5 + $0x978] sm:$0xf0]  ;;  %v463_v12 = vperm.slane %v5846_v30, 1  ;;  %v5311_v37 = vld [vmem:[#allocation5 + $0x84c] sm:$0xf] }
 0x145   :  { %2624 = vmatpush.bf16.msrb.mxu0 %v4331_v50  ;;  %2590 = vmatmul.bf16.vlgmr.msra.gmra.mxu1 %v5753_v17  ;;  %v4536_v17 = vld [vmem:[#allocation5 + $0x898] sm:$0xf0]  ;;  %v5851_v50 = vpop.f32.mrf.mxu0 }
 0x146   :  { %2638 = vmatpush.bf16.msrb.mxu1 %v4459_v53  ;;  %2604 = vmatmul.bf16.vlgmr.msra.gmra.mxu2 %v5757_v39  ;;  %v4408_v39 = vld [vmem:[#allocation5 + $0x798] sm:$0xf0]  ;;  %v5351_v53 = vld [vmem:[#allocation5 + $0x98c] sm:$0xf]  ;;  %v4539_v59 = vor.u32 %v5319_v45, %v4536_v17 }
 0x147   :  { %2652 = vmatpush.bf16.msrb.mxu2 %v4587_v54  ;;  %2618 = vmatmul.bf16.vlgmr.msra.gmra.mxu3 %v5761_v44  ;;  %v4664_v44 = vld [vmem:[#allocation5 + $0x998] sm:$0xf0]  ;;  %v462_v54 = vperm.slane %v5846_v30, 0  ;;  %v4411_v56 = vor.u32 %v5287_v40, %v4408_v39 }
 0x148   :  { %2666 = vmatpush.bf16.msrb.mxu3 %v4715_v62  ;;  %v5251_v62 = vld [vmem:[#allocation5 + $0x66c] sm:$0xf]  ;;  %v4667_v2 = vor.u32 %v5351_v53, %v4664_v44  ;;  %v4632_v39 = vld [vmem:[#allocation5 + $0x958] sm:$0xf0] }
 0x149   :  { %2625 = vmatpush.bf16.msrb.mxu0 %v4315_v7  ;;  %v4520_v7 = vld [vmem:[#allocation5 + $0x878] sm:$0xf0]  ;;  %v4267_v15 = vor.u32 %v5251_v62, %v4264_v63  ;;  %v2130_v40 = vadd.f32 %v5793_v18, %v462_v54  ;;  %v5275_v62 = vld [vmem:[#allocation5 + $0x72c] sm:$0xf]  ;;  %v2270_v63 = vadd.f32 %v5833_v25, %v463_v12  ;;  %v2272_v18 = vadd.f32 %v5842_v26, %v463_v12 }
 0x14a   :  { %2639 = vmatpush.bf16.msrb.mxu1 %v4443_v8  ;;  %v5854_v8 = vpop.f32.mrf.mxu1  ;;  %v4523_v21 = vor.u32 %v5315_v58, %v4520_v7  ;;  %v5339_v58 = vld [vmem:[#allocation5 + $0x92c] sm:$0xf]  ;;  %v4616_v7 = vld [vmem:[#allocation5 + $0x938] sm:$0xf0]  ;;  %v4363_v25 = vor.u32 %v5275_v62, %v4360_v0  ;;  %v4766_v0 = vld [vmem:[#allocation8 + $0x60] sm:$0xf] }
 0x14b   :  { %2653 = vmatpush.bf16.msrb.mxu2 %v4571_v10  ;;  %v5347_v10 = vld [vmem:[#allocation5 + $0x96c] sm:$0xf]  ;;  %v4216_v26 = vld [vmem:[#allocation5 + $0x618] sm:$0xf0] }
 0x14c   :  { %2667 = vmatpush.bf16.msrb.mxu3 %v4699_v16  ;;  %v2132_v16 = vadd.f32 %v5801_v57, %v462_v54  ;;  %v4251_v57 = vor.u32 %v5247_v28, %v4248_v29  ;;  %v5862_v53 = vpop.f32.mrf.mxu3  ;;  %v5271_v12 = vld [vmem:[#allocation5 + $0x70c] sm:$0xf]  ;;  %v2284_v28 = vadd.f32 %v5835_v52, %v2270_v63  ;;  %v2286_v29 = vadd.f32 %v5849_v49, %v2272_v18 }
 0x14d   :  { %2626 = vmatpush.bf16.msrb.mxu0 %v4299_v1  ;;  %v5279_v1 = vld [vmem:[#allocation5 + $0x74c] sm:$0xf]  ;;  %v2299_v17 = vpop.f32.mrf.mxu0 }
 0x14e   :  { %2640 = vmatpush.bf16.msrb.mxu1 %v4427_v32  ;;  %v4651_v32 = vor.u32 %v5347_v10, %v4648_v11  ;;  %v2146_v45 = vadd.f32 %v5803_v13, %v2132_v16  ;;  %v2144_v13 = vadd.f32 %v5795_v33, %v2130_v40  ;;  %v5239_v11 = vld [vmem:[#allocation5 + $0x60c] sm:$0xf]  ;;  %v4619_v33 = vor.u32 %v5339_v58, %v4616_v7  ;;  %v4774_v40 = vld [vmem:[#allocation8 + $0x70] sm:$0xf] }
 0x14f   :  { %2654 = vmatpush.bf16.msrb.mxu2 %v4555_v35  ;;  %v4376_v35 = vld [vmem:[#allocation5 + $0x758] sm:$0xf0] }
 0x150   :  { %2668 = vmatpush.bf16.msrb.mxu3 %v4683_v42  ;;  %v5343_v42 = vld [vmem:[#allocation5 + $0x94c] sm:$0xf]  ;;  %v4379_v44 = vor.u32 %v5279_v1, %v4376_v35 }
 0x151   :  { %2627 = vmatpush.bf16.msrb.mxu0 %v4283_v55  ;;  %v4507_v55 = vor.u32 %v5311_v37, %v4504_v38  ;;  %v4635_v54 = vor.u32 %v5343_v42, %v4632_v39  ;;  %v5303_v1 = vld [vmem:[#allocation5 + $0x80c] sm:$0xf]  ;;  %v2158_v37 = vadd.f32 %v5797_v34, %v2144_v13  ;;  %v4600_v38 = vld [vmem:[#allocation5 + $0x918] sm:$0xf0]  ;;  %v4219_v39 = vor.u32 %v5239_v11, %v4216_v26 }
 0x152   :  { %2641 = vmatpush.bf16.msrb.mxu1 %v4411_v56  ;;  %v5243_v56 = vld [vmem:[#allocation5 + $0x62c] sm:$0xf]  ;;  %v2313_v16 = vpop.f32.mrf.mxu1  ;;  %v5381_v42 = vld [vmem:[#allocation8 + $0x74] sm:$0xf0] }
 0x153   :  { %2655 = vmatpush.bf16.msrb.mxu2 %v4539_v59  ;;  %v4232_v59 = vld [vmem:[#allocation5 + $0x638] sm:$0xf0]  ;;  %v5335_v35 = vld [vmem:[#allocation5 + $0x90c] sm:$0xf]  ;;  %v4775_v62 = vor.u32 %v5381_v42, %v4774_v40  ;;  %v2172_v63 = vadd.f32 %v5799_v51, %v2158_v37  ;;  %v4806_v40 = vld [vmem:[#allocation8 + $0xb0] sm:$0xf] }
 0x154   :  { %2669 = vmatpush.bf16.msrb.mxu3 %v4667_v2  ;;  %v5307_v2 = vld [vmem:[#allocation5 + $0x82c] sm:$0xf]  ;;  %v4235_v10 = vor.u32 %v5243_v56, %v4232_v59  ;;  %v2298_v56 = vadd.f32 %v5851_v50, %v2284_v28  ;;  %v2300_v59 = vadd.f32 %v2299_v17, %v2286_v29  ;;  %v4603_v34 = vor.u32 %v5335_v35, %v4600_v38  ;;  %v2341_v18 = vpop.f32.mrf.mxu3  ;;  %v4750_v29 = vld [vmem:[#allocation8 + $0x40] sm:$0xf]  ;;  %v5373_v38 = vld [vmem:[#allocation8 + $0x34] sm:$0xf0] }
 0x155   :  { %2628 = vmatpush.bf16.msrb.mxu0 %v4267_v15  ;;  %v2160_v15 = vadd.f32 %v5805_v14, %v2146_v45  ;;  %v2327_v14 = vpop.f32.mrf.mxu2  ;;  %v5397_v45 = vld [vmem:[#allocation8 + $0xf4] sm:$0xf0]  ;;  %v5872_v52 = vpop.f32.mrf.mxu0  ;;  %v2186_v51 = vadd.f32 %v5809_v41, %v2172_v63 }
 0x156   :  { %2642 = vmatpush.bf16.msrb.mxu1 %v4395_v20  ;;  %v4491_v20 = vor.u32 %v5307_v2, %v4488_v6  ;;  %v5379_v2 = vld [vmem:[#allocation8 + $0x64] sm:$0xf0]  ;;  %v2312_v50 = vadd.f32 %v5854_v8, %v2298_v56  ;;  %v2314_v17 = vadd.f32 %v2313_v16, %v2300_v59  ;;  %v4822_v8 = vld [vmem:[#allocation8 + $0xd0] sm:$0xf]  ;;  %v5393_v16 = vld [vmem:[#allocation8 + $0xd4] sm:$0xf0] }
 0x157   :  { %2656 = vmatpush.bf16.msrb.mxu2 %v4523_v21  ;;  %v4344_v21 = vld [vmem:[#allocation5 + $0x718] sm:$0xf0]  ;;  %v5395_v6 = vld [vmem:[#allocation8 + $0xe4] sm:$0xf0]  ;;  %v4767_v7 = vor.u32 %v5379_v2, %v4766_v0  ;;  %v4734_v59 = vld [vmem:[#allocation8 + $0x20] sm:$0xf] }
 0x158   :  { %2670 = vmatpush.bf16.msrb.mxu3 %v4651_v32  ;;  %v4472_v32 = vld [vmem:[#allocation5 + $0x818] sm:$0xf0]  ;;  %v4347_v49 = vor.u32 %v5271_v12, %v4344_v21  ;;  %v2326_v41 = vadd.f32 %v5858_v19, %v2312_v50  ;;  %v5411_v0 = vld [vmem:[#allocation8 + $0x164] sm:$0xf0] }
 0x159   :  { %2629 = vmatpush.bf16.msrb.mxu0 %v4251_v57  ;;  %v4838_v57 = vld [vmem:[#allocation8 + $0xf0] sm:$0xf] }
 0x15a   :  { %2643 = vmatpush.bf16.msrb.mxu1 %v4379_v44  ;;  %v2174_v44 = vadd.f32 %v5807_v36, %v2160_v15  ;;  %v4830_v36 = vld [vmem:[#allocation8 + $0xe0] sm:$0xf]  ;;  %v5877_v58 = vpop.f32.mrf.mxu1  ;;  %v4758_v15 = vld [vmem:[#allocation8 + $0x50] sm:$0xf] }
 0x15b   :  { %2657 = vmatpush.bf16.msrb.mxu2 %v4507_v55  ;;  %v4475_v55 = vor.u32 %v5303_v1, %v4472_v32  ;;  %v4831_v11 = vor.u32 %v5395_v6, %v4830_v36  ;;  %v4814_v1 = vld [vmem:[#allocation8 + $0xc0] sm:$0xf]  ;;  %v5391_v32 = vld [vmem:[#allocation8 + $0xc4] sm:$0xf0] }
 0x15c   :  { %2671 = vmatpush.bf16.msrb.mxu3 %v4635_v54  ;;  %v4839_v54 = vor.u32 %v5397_v45, %v4838_v57  ;;  %v2188_v13 = vadd.f32 %v5821_v24, %v2174_v44  ;;  %v5377_v24 = vld [vmem:[#allocation8 + $0x54] sm:$0xf0]  ;;  %v2395_v28 = vpop.f32.mrf.mxu3  ;;  %v4902_v57 = vld [vmem:[#allocation8 + $0x170] sm:$0xf] }
 0x15d   :  { %2630 = vmatpush.bf16.msrb.mxu0 %v4235_v10  ;;  %v5881_v10 = vpop.f32.mrf.mxu2  ;;  %v4759_v26 = vor.u32 %v5377_v24, %v4758_v15  ;;  %v2355_v21 = vpop.f32.mrf.mxu0  ;;  %v5413_v45 = vld [vmem:[#allocation8 + $0x174] sm:$0xf0]  ;;  %v4886_v15 = vld [vmem:[#allocation8 + $0x150] sm:$0xf] }
 0x15e   :  { %2644 = vmatpush.bf16.msrb.mxu1 %v4363_v25  ;;  %v2328_v25 = vadd.f32 %v2327_v14, %v2314_v17  ;;  %v4742_v14 = vld [vmem:[#allocation8 + $0x30] sm:$0xf]  ;;  %v5409_v24 = vld [vmem:[#allocation8 + $0x154] sm:$0xf0] }
 0x15f   :  { %2658 = vmatpush.bf16.msrb.mxu2 %v4491_v20  ;;  %v2202_v20 = vadd.f32 %v5823_v46, %v2188_v13  ;;  %v2340_v46 = vadd.f32 %v5862_v53, %v2326_v41  ;;  %v4726_v17 = vld [vmem:[#allocation8 + $0x10] sm:$0xf]  ;;  %v4782_v41 = vld [vmem:[#allocation8 + $0x80] sm:$0xf] }
 0x160   :  { %2672 = vmatpush.bf16.msrb.mxu3 %v4619_v33  ;;  %v2342_v33 = vadd.f32 %v2341_v18, %v2328_v25  ;;  %v5387_v18 = vld [vmem:[#allocation8 + $0xa4] sm:$0xf0] }
 0x161   :  { %2631 = vmatpush.bf16.msrb.mxu0 %v4219_v39  ;;  %v2216_v12 = vadd.f32 %v5825_v48, %v2202_v20  ;;  %v4815_v48 = vor.u32 %v5391_v32, %v4814_v1  ;;  %v2354_v42 = vadd.f32 %v5872_v52, %v2340_v46  ;;  %v5389_v39 = vld [vmem:[#allocation8 + $0xb4] sm:$0xf0]  ;;  %v5367_v20 = vld [vmem:[#allocation8 + $0x4] sm:$0xf0]  ;;  %v5396_v1 = vld [vmem:[#allocation8 + $0xf4] sm:$0xf] }
 0x162   :  { %2645 = vmatpush.bf16.msrb.mxu1 %v4347_v49  ;;  %v2369_v37 = vpop.f32.mrf.mxu1  ;;  %v4903_v49 = vor.u32 %v5413_v45, %v4902_v57  ;;  %v4807_v56 = vor.u32 %v5389_v39, %v4806_v40  ;;  %v5405_v40 = vld [vmem:[#allocation8 + $0x134] sm:$0xf0]  ;;  %v5394_v39 = vld [vmem:[#allocation8 + $0xe4] sm:$0xf]  ;;  %v4832_v57 = vld [vmem:[#allocation8 + $0xe8] sm:$0xf0] }
 0x163   :  { %2659 = vmatpush.bf16.msrb.mxu2 %v4475_v55  ;;  %v2368_v52 = vadd.f32 %v5877_v58, %v2354_v42 }
 0x164   :  { %2673 = vmatpush.bf16.msrb.mxu3 %v4603_v34  ;;  %2632 = vmatmul.bf16.vlgmr.msrb.gmra.mxu0 %v5759_v43  ;;  %v2200_v43 = vadd.f32 %v5815_v60, %v2186_v51  ;;  %v2230_v60 = vadd.f32 %v5827_v3, %v2216_v12  ;;  %v5371_v34 = vld [vmem:[#allocation8 + $0x24] sm:$0xf0]  ;;  %v2397_v36 = vpop.f32.mrf.mxu3  ;;  %v4790_v51 = vld [vmem:[#allocation8 + $0x90] sm:$0xf]  ;;  %v5380_v12 = vld [vmem:[#allocation8 + $0x74] sm:$0xf] }
 0x165   :  { %3090 = vmatpush.bf16.msra.mxu0 %v4775_v62  ;;  %2646 = vmatmul.bf16.vlgmr.msrb.gmra.mxu1 %v5763_v47  ;;  %v4823_v47 = vor.u32 %v5393_v16, %v4822_v8  ;;  %v2383_v44 = vpop.f32.mrf.mxu2  ;;  %v4798_v62 = vld [vmem:[#allocation8 + $0xa0] sm:$0xf]  ;;  %v4735_v13 = vor.u32 %v5371_v34, %v4734_v59  ;;  %v4835_v34 = vor.u32 %v5394_v39, %v4832_v57 }
 0x166   :  { %3104 = vmatpush.bf16.msra.mxu1 %v4839_v54  ;;  %2660 = vmatmul.bf16.vlgmr.msrb.gmra.mxu2 %v5769_v27  ;;  %v5375_v27 = vld [vmem:[#allocation8 + $0x44] sm:$0xf0]  ;;  %v2214_v35 = vadd.f32 %v5817_v61, %v2200_v43  ;;  %v2244_v53 = vadd.f32 %v5837_v5, %v2230_v60  ;;  %v4743_v61 = vor.u32 %v5373_v38, %v4742_v14  ;;  %v4894_v54 = vld [vmem:[#allocation8 + $0x160] sm:$0xf]  ;;  %v5378_v60 = vld [vmem:[#allocation8 + $0x64] sm:$0xf] }
 0x167   :  { %2674 = vmatmul.bf16.vlgmr.msrb.gmra.mxu3 %v5771_v31  ;;  %v2356_v31 = vadd.f32 %v2355_v21, %v2342_v33  ;;  %v4751_v19 = vor.u32 %v5375_v27, %v4750_v29  ;;  %3118 = vmatpush.bf16.msra.mxu2 %v4903_v49  ;;  %v4895_v6 = vor.u32 %v5411_v0, %v4894_v54  ;;  %v5383_v43 = vld [vmem:[#allocation8 + $0x84] sm:$0xf0]  ;;  %v4776_v21 = vld [vmem:[#allocation8 + $0x78] sm:$0xf0]  ;;  %v4878_v29 = vld [vmem:[#allocation8 + $0x140] sm:$0xf]  ;;  %v2409_v49 = vpop.f32.mrf.mxu0 }
 0x168   :  { %v2228_v3 = vadd.f32 %v5819_v9, %v2214_v35  ;;  %v2258_v2 = vadd.f32 %v5840_v22, %v2244_v53  ;;  %v2382_v9 = vadd.f32 %v5881_v10, %v2368_v52  ;;  %v4799_v50 = vor.u32 %v5387_v18, %v4798_v62  ;;  %v4718_v10 = vld [vmem:[#allocation8] sm:$0xf]  ;;  %v5407_v27 = vld [vmem:[#allocation8 + $0x144] sm:$0xf0]  ;;  %v4768_v14 = vld [vmem:[#allocation8 + $0x68] sm:$0xf0] }
 0x169   :  { %3091 = vmatpush.bf16.msra.mxu0 %v4767_v7  ;;  %v2370_v55 = vadd.f32 %v2369_v37, %v2356_v31  ;;  %v5369_v7 = vld [vmem:[#allocation8 + $0x14] sm:$0xf0]  ;;  %v4887_v22 = vor.u32 %v5409_v24, %v4886_v15  ;;  %v4879_v32 = vor.u32 %v5407_v27, %v4878_v29  ;;  %v4779_v35 = vor.u32 %v5380_v12, %v4776_v21  ;;  %v4870_v38 = vld [vmem:[#allocation8 + $0x130] sm:$0xf]  ;;  %v5376_v62 = vld [vmem:[#allocation8 + $0x54] sm:$0xf] }
 0x16a   :  { %3105 = vmatpush.bf16.msra.mxu1 %v4831_v11  ;;  %v2242_v5 = vadd.f32 %v5829_v4, %v2228_v3  ;;  %v5385_v11 = vld [vmem:[#allocation8 + $0x94] sm:$0xf0]  ;;  %v2684_v25 = vmul.f32 0.01, %v2258_v2  ;;  %v2396_v8 = vadd.f32 %v2395_v28, %v2382_v9  ;;  %v4727_v16 = vor.u32 %v5369_v7, %v4726_v17  ;;  %v5403_v3 = vld [vmem:[#allocation8 + $0x124] sm:$0xf0]  ;;  %v2423_v59 = vpop.f32.mrf.mxu1 }
 0x16b   :  { %v2384_v63 = vadd.f32 %v2383_v44, %v2370_v55  ;;  %3119 = vmatpush.bf16.msra.mxu2 %v4895_v6  ;;  %v4719_v28 = vor.u32 %v5367_v20, %v4718_v10  ;;  %v4871_v45 = vor.u32 %v5405_v40, %v4870_v38  ;;  %v4771_v55 = vor.u32 %v5378_v60, %v4768_v14  ;;  %v4760_v52 = vld [vmem:[#allocation8 + $0x58] sm:$0xf0]  ;;  %v4854_v0 = vld [vmem:[#allocation8 + $0x110] sm:$0xf]  ;;  %v5374_v6 = vld [vmem:[#allocation8 + $0x44] sm:$0xf] }
 0x16c   :  { %v2256_v4 = vadd.f32 %v5831_v23, %v2242_v5  ;;  %v4840_v23 = vld [vmem:[#allocation8 + $0xf8] sm:$0xf0]  ;;  %v2681_v46 = vmul.f32 0.01, %v2396_v8  ;;  %v2692_v31 = vmax.f32 %v2258_v2, %v2684_v25  ;;  %v5401_v5 = vld [vmem:[#allocation8 + $0x114] sm:$0xf0]  ;;  %v4763_v2 = vor.u32 %v5376_v62, %v4760_v52  ;;  %v2451_v21 = vpop.f32.mrf.mxu3 }
 0x16d   :  { %3092 = vmatpush.bf16.msra.mxu0 %v4759_v26  ;;  %v2398_v58 = vadd.f32 %v2397_v36, %v2384_v63  ;;  %v4791_v26 = vor.u32 %v5385_v11, %v4790_v51  ;;  %v5392_v63 = vld [vmem:[#allocation8 + $0xd4] sm:$0xf]  ;;  %v4824_v54 = vld [vmem:[#allocation8 + $0xd8] sm:$0xf0]  ;;  %v4752_v9 = vld [vmem:[#allocation8 + $0x48] sm:$0xf0]  ;;  %v2437_v51 = vpop.f32.mrf.mxu2 }
 0x16e   :  { %3106 = vmatpush.bf16.msra.mxu1 %v4823_v47  ;;  %v2680_v33 = vmul.f32 0.01, %v2256_v4  ;;  %v2689_v53 = vmax.f32 %v2396_v8, %v2681_v46  ;;  %v4827_v36 = vor.u32 %v5392_v63, %v4824_v54  ;;  %v4816_v17 = vld [vmem:[#allocation8 + $0xc8] sm:$0xf0]  ;;  %v464_v7 = vperm.slane %v5846_v30, 2 }
 0x16f   :  { %3120 = vmatpush.bf16.msra.mxu2 %v4887_v22  ;;  %v2685_v47 = vmul.f32 0.01, %v2398_v58  ;;  %v5372_v11 = vld [vmem:[#allocation8 + $0x34] sm:$0xf]  ;;  %v4744_v15 = vld [vmem:[#allocation8 + $0x38] sm:$0xf0]  ;;  %v2411_v8 = vpop.f32.mrf.mxu0 }
 0x170   :  { %v2688_v42 = vmax.f32 %v2256_v4, %v2680_v33  ;;  %v5388_v4 = vld [vmem:[#allocation8 + $0xb4] sm:$0xf]  ;;  %v4846_v25 = vld [vmem:[#allocation8 + $0x100] sm:$0xf]  ;;  %v5399_v22 = vld [vmem:[#allocation8 + $0x104] sm:$0xf0]  ;;  %v2412_v57 = vadd.f32 %v2411_v8, %v464_v7 }
 0x171   :  { %3093 = vmatpush.bf16.msra.mxu0 %v4751_v19  ;;  %v4783_v19 = vor.u32 %v5383_v43, %v4782_v41  ;;  %v2693_v37 = vmax.f32 %v2398_v58, %v2685_v47  ;;  %v4755_v58 = vor.u32 %v5374_v6, %v4752_v9  ;;  %v4847_v10 = vor.u32 %v5399_v22, %v4846_v25  ;;  %v5412_v20 = vld [vmem:[#allocation8 + $0x174] sm:$0xf]  ;;  %v4904_v41 = vld [vmem:[#allocation8 + $0x178] sm:$0xf0]  ;;  %v5370_v27 = vld [vmem:[#allocation8 + $0x24] sm:$0xf] }
 0x172   :  { %3107 = vmatpush.bf16.msra.mxu1 %v4815_v48  ;;  %v4843_v48 = vor.u32 %v5396_v1, %v4840_v23  ;;  %v5902_v44 = vpack.c.bf16 %v2692_v31, %v2688_v42  ;;  %v2425_v43 = vpop.f32.mrf.mxu1  ;;  %v4907_v12 = vor.u32 %v5412_v20, %v4904_v41  ;;  %v4747_v47 = vor.u32 %v5372_v11, %v4744_v15  ;;  %v4736_v33 = vld [vmem:[#allocation8 + $0x28] sm:$0xf0]  ;;  %v5386_v1 = vld [vmem:[#allocation8 + $0xa4] sm:$0xf]  ;;  %v5368_v60 = vld [vmem:[#allocation8 + $0x14] sm:$0xf] }
 0x173   :  { %3121 = vmatpush.bf16.msra.mxu2 %v4879_v32  ;;  %v4800_v23 = vld [vmem:[#allocation8 + $0xa8] sm:$0xf0]  ;;  %v5410_v32 = vld [vmem:[#allocation8 + $0x164] sm:$0xf]  ;;  %v4792_v38 = vld [vmem:[#allocation8 + $0x98] sm:$0xf0] }
 0x174   :  { %v4896_v46 = vld [vmem:[#allocation8 + $0x168] sm:$0xf0]  ;;  %v5408_v40 = vld [vmem:[#allocation8 + $0x154] sm:$0xf]  ;;  %v4888_v42 = vld [vmem:[#allocation8 + $0x158] sm:$0xf0]  ;;  %v2453_v62 = vpop.f32.mrf.mxu3 }
 0x175   :  { %3094 = vmatpush.bf16.msra.mxu0 %v4743_v61  ;;  %v4862_v61 = vld [vmem:[#allocation8 + $0x120] sm:$0xf]  ;;  %v4899_v31 = vor.u32 %v5410_v32, %v4896_v46  ;;  %v2439_v14 = vpop.f32.mrf.mxu2  ;;  %v4784_v52 = vld [vmem:[#allocation8 + $0x88] sm:$0xf0]  ;;  %v5406_v63 = vld [vmem:[#allocation8 + $0x144] sm:$0xf] }
 0x176   :  { %3108 = vmatpush.bf16.msra.mxu1 %v4807_v56  ;;  %v5904_v56 = vpack.c.bf16 %v2693_v37, %v2689_v53  ;;  %v4863_v18 = vor.u32 %v5403_v3, %v4862_v61  ;;  %v4728_v37 = vld [vmem:[#allocation8 + $0x18] sm:$0xf0]  ;;  %v5366_v3 = vld [vmem:[#allocation8 + $0x4] sm:$0xf]  ;;  %v5404_v6 = vld [vmem:[#allocation8 + $0x134] sm:$0xf] }
 0x177   :  { %3122 = vmatpush.bf16.msra.mxu2 %v4871_v45  ;;  %v4891_v45 = vor.u32 %v5408_v40, %v4888_v42  ;;  %v4872_v9 = vld [vmem:[#allocation8 + $0x138] sm:$0xf0]  ;;  %v5400_v22 = vld [vmem:[#allocation8 + $0x114] sm:$0xf] }
 0x178   :  { %v4856_v8 = vld [vmem:[#allocation8 + $0x118] sm:$0xf0] }
 0x179   :  { %3095 = vmatpush.bf16.msra.mxu0 %v4735_v13  ;;  %v4855_v13 = vor.u32 %v5401_v5, %v4854_v0  ;;  %v2426_v0 = vadd.f32 %v2425_v43, %v2412_v57 }
 0x17a   :  { %3109 = vmatpush.bf16.msra.mxu1 %v4799_v50  ;;  %v5390_v50 = vld [vmem:[#allocation8 + $0xc4] sm:$0xf] }
 0x17b   :  { %3123 = vmatpush.bf16.msra.mxu2 %v4863_v18  ;;  %v4819_v24 = vor.u32 %v5390_v50, %v4816_v17  ;;  %v4880_v18 = vld [vmem:[#allocation8 + $0x148] sm:$0xf0]  ;;  %v2440_v50 = vadd.f32 %v2439_v14, %v2426_v0  ;;  %v4958_v14 = vld [vmem:[#allocation8 + $0x1e0] sm:$0xf] }
 0x17c   :  { %v4883_v5 = vor.u32 %v5406_v63, %v4880_v18  ;;  %v4926_v63 = vld [vmem:[#allocation8 + $0x1a0] sm:$0xf]  ;;  %v5419_v18 = vld [vmem:[#allocation8 + $0x1a4] sm:$0xf0] }
 0x17d   :  { %3096 = vmatpush.bf16.msra.mxu0 %v4727_v16  ;;  %v4808_v16 = vld [vmem:[#allocation8 + $0xb8] sm:$0xf0]  ;;  %v4927_v0 = vor.u32 %v5419_v18, %v4926_v63 }
 0x17e   :  { %3110 = vmatpush.bf16.msra.mxu1 %v4791_v26  ;;  %v2410_v26 = vadd.f32 %v2409_v49, %v464_v7  ;;  %v4811_v29 = vor.u32 %v5388_v4, %v4808_v16  ;;  %v4731_v49 = vor.u32 %v5368_v60, %v4728_v37  ;;  %v5402_v7 = vld [vmem:[#allocation8 + $0x124] sm:$0xf] }
 0x17f   :  { %3124 = vmatpush.bf16.msra.mxu2 %v4855_v13  ;;  %v4875_v13 = vor.u32 %v5404_v6, %v4872_v9  ;;  %v4910_v9 = vld [vmem:[#allocation8 + $0x180] sm:$0xf] }
 0x181   :  { %3097 = vmatpush.bf16.msra.mxu0 %v4719_v28  ;;  %v2424_v28 = vadd.f32 %v2423_v59, %v2410_v26  ;;  %v2465_v53 = vpop.f32.mrf.mxu0  ;;  %v4720_v59 = vld [vmem:[#allocation8 + $0x8] sm:$0xf0] }
 0x182   :  { %3111 = vmatpush.bf16.msra.mxu1 %v4783_v19  ;;  %v4739_v19 = vor.u32 %v5370_v27, %v4736_v33 }
 0x183   :  { %3125 = vmatpush.bf16.msra.mxu2 %v4847_v10  ;;  %v2438_v39 = vadd.f32 %v2437_v51, %v2424_v28  ;;  %v4864_v51 = vld [vmem:[#allocation8 + $0x128] sm:$0xf0]  ;;  %v4859_v10 = vor.u32 %v5400_v22, %v4856_v8  ;;  %v5429_v28 = vld [vmem:[#allocation8 + $0x1f4] sm:$0xf0] }
 0x184   :  { %3098 = vmatmul.bf16.vlgmr.msra.gmra.mxu0 %v5902_v44  ;;  %v4867_v15 = vor.u32 %v5402_v7, %v4864_v51  ;;  %v4968_v7 = vld [vmem:[#allocation8 + $0x1f8] sm:$0xf0]  ;;  %v465_v51 = vperm.slane %v5846_v30, 3  ;;  %v4944_v30 = vld [vmem:[#allocation8 + $0x1c8] sm:$0xf0] }
 0x185   :  { %3146 = vmatpush.bf16.msrb.mxu0 %v4779_v35  ;;  %3112 = vmatmul.bf16.vlgmr.msra.gmra.mxu1 %v5904_v56  ;;  %v4803_v35 = vor.u32 %v5386_v1, %v4800_v23  ;;  %v2452_v54 = vadd.f32 %v2451_v21, %v2438_v39  ;;  %v4848_v21 = vld [vmem:[#allocation8 + $0x108] sm:$0xf0] }
 0x186   :  { %3160 = vmatpush.bf16.msrb.mxu1 %v4843_v48  ;;  %v5384_v48 = vld [vmem:[#allocation8 + $0x94] sm:$0xf] }
 0x187   :  { %3174 = vmatpush.bf16.msrb.mxu2 %v4907_v12  ;;  %v4795_v61 = vor.u32 %v5384_v48, %v4792_v38  ;;  %v2466_v17 = vadd.f32 %v2465_v53, %v2452_v54  ;;  %v5398_v12 = vld [vmem:[#allocation8 + $0x104] sm:$0xf]  ;;  %v5427_v38 = vld [vmem:[#allocation8 + $0x1e4] sm:$0xf0]  ;;  %v5425_v53 = vld [vmem:[#allocation8 + $0x1d4] sm:$0xf0] }
 0x188   :  { %v4851_v33 = vor.u32 %v5398_v12, %v4848_v21  ;;  %v4959_v40 = vor.u32 %v5427_v38, %v4958_v14  ;;  %v5422_v12 = vld [vmem:[#allocation8 + $0x1c4] sm:$0xf]  ;;  %v5416_v38 = vld [vmem:[#allocation8 + $0x194] sm:$0xf] }
 0x189   :  { %3147 = vmatpush.bf16.msrb.mxu0 %v4771_v55  ;;  %v2479_v55 = vpop.f32.mrf.mxu1  ;;  %v2467_v11 = vpop.f32.mrf.mxu0 }
 0x18a   :  { %3161 = vmatpush.bf16.msrb.mxu1 %v4835_v34  ;;  %v5382_v34 = vld [vmem:[#allocation8 + $0x84] sm:$0xf]  ;;  %v2480_v4 = vadd.f32 %v2479_v55, %v2466_v17  ;;  %v2507_v16 = vpop.f32.mrf.mxu3  ;;  %v4942_v55 = vld [vmem:[#allocation8 + $0x1c0] sm:$0xf]  ;;  %v5428_v17 = vld [vmem:[#allocation8 + $0x1f4] sm:$0xf] }
 0x18b   :  { %3175 = vmatpush.bf16.msrb.mxu2 %v4899_v31 }
 0x18d   :  { %3148 = vmatpush.bf16.msrb.mxu0 %v4763_v2  ;;  %v4723_v2 = vor.u32 %v5366_v3, %v4720_v59 }
 0x18e   :  { %3162 = vmatpush.bf16.msrb.mxu1 %v4827_v36  ;;  %v4787_v36 = vor.u32 %v5382_v34, %v4784_v52  ;;  %v4934_v34 = vld [vmem:[#allocation8 + $0x1b0] sm:$0xf] }
 0x18f   :  { %3176 = vmatpush.bf16.msrb.mxu2 %v4891_v45  ;;  %v4950_v45 = vld [vmem:[#allocation8 + $0x1d0] sm:$0xf] }
 0x191   :  { %3149 = vmatpush.bf16.msrb.mxu0 %v4755_v58  ;;  %v2493_v58 = vpop.f32.mrf.mxu2  ;;  %v2481_v25 = vpop.f32.mrf.mxu1 }
 0x192   :  { %3163 = vmatpush.bf16.msrb.mxu1 %v4819_v24  ;;  %v2454_v24 = vadd.f32 %v2453_v62, %v2440_v50  ;;  %v2494_v20 = vadd.f32 %v2493_v58, %v2480_v4  ;;  %v2509_v23 = vpop.f32.mrf.mxu3  ;;  %v5421_v62 = vld [vmem:[#allocation8 + $0x1b4] sm:$0xf0]  ;;  %v4971_v58 = vor.u32 %v5428_v17, %v4968_v7  ;;  %v4960_v4 = vld [vmem:[#allocation8 + $0x1e8] sm:$0xf0] }
 0x193   :  { %3177 = vmatpush.bf16.msrb.mxu2 %v4883_v5  ;;  %v4935_v52 = vor.u32 %v5421_v62, %v4934_v34 }
 0x194   :  { %v2468_v41 = vadd.f32 %v2467_v11, %v2454_v24  ;;  %v5426_v24 = vld [vmem:[#allocation8 + $0x1e4] sm:$0xf] }
 0x195   :  { %3150 = vmatpush.bf16.msrb.mxu0 %v4747_v47  ;;  %v2508_v47 = vadd.f32 %v2507_v16, %v2494_v20  ;;  %v4963_v8 = vor.u32 %v5426_v24, %v4960_v4  ;;  %v4952_v20 = vld [vmem:[#allocation8 + $0x1d8] sm:$0xf0]  ;;  %v5435_v24 = vld [vmem:[#allocation11 + $0x28] sm:$0xff]  ;;  %v5434_v4 = vld [vmem:[#allocation11 + $0x20] sm:$0xff] }
 0x196   :  { %3164 = vmatpush.bf16.msrb.mxu1 %v4811_v29  ;;  %v2482_v29 = vadd.f32 %v2481_v25, %v2468_v41 }
 0x197   :  { %3178 = vmatpush.bf16.msrb.mxu2 %v4875_v13  ;;  %v5415_v13 = vld [vmem:[#allocation8 + $0x184] sm:$0xf0] }
 0x198   :  { %v4911_v50 = vor.u32 %v5415_v13, %v4910_v9 }
 0x199   :  { %3151 = vmatpush.bf16.msrb.mxu0 %v4739_v19  ;;  %v2495_v26 = vpop.f32.mrf.mxu2 }
 0x19a   :  { %3165 = vmatpush.bf16.msrb.mxu1 %v4803_v35  ;;  %v2496_v1 = vadd.f32 %v2495_v26, %v2482_v29 }
 0x19b   :  { %3179 = vmatpush.bf16.msrb.mxu2 %v4867_v15 }
 0x19c   :  { %v2510_v32 = vadd.f32 %v2509_v23, %v2496_v1  ;;  %v5420_v1 = vld [vmem:[#allocation8 + $0x1b4] sm:$0xf] }
 0x19d   :  { %3152 = vmatpush.bf16.msrb.mxu0 %v4731_v49  ;;  %v4951_v49 = vor.u32 %v5425_v53, %v4950_v45 }
 0x19e   :  { %3166 = vmatpush.bf16.msrb.mxu1 %v4795_v61  ;;  %v5423_v61 = vld [vmem:[#allocation8 + $0x1c4] sm:$0xf0] }
 0x19f   :  { %3180 = vmatpush.bf16.msrb.mxu2 %v4859_v10  ;;  %v4943_v59 = vor.u32 %v5423_v61, %v4942_v55  ;;  %v5424_v10 = vld [vmem:[#allocation8 + $0x1d4] sm:$0xf]  ;;  %v5414_v55 = vld [vmem:[#allocation8 + $0x184] sm:$0xf]  ;;  %v4912_v61 = vld [vmem:[#allocation8 + $0x188] sm:$0xf0] }
 0x1a0   :  { %v4955_v26 = vor.u32 %v5424_v10, %v4952_v20  ;;  %v5431_v10 = vld [vmem:[#allocation11 + $0x8] sm:$0xff] }
 0x1a1   :  { %3153 = vmatpush.bf16.msrb.mxu0 %v4723_v2  ;;  %v2521_v43 = vpop.f32.mrf.mxu0  ;;  %v4918_v2 = vld [vmem:[#allocation8 + $0x190] sm:$0xf] }
 0x1a2   :  { %3167 = vmatpush.bf16.msrb.mxu1 %v4787_v36  ;;  %v2535_v27 = vpop.f32.mrf.mxu1  ;;  %v5417_v36 = vld [vmem:[#allocation8 + $0x194] sm:$0xf0]  ;;  %v5443_v20 = vld [vmem:[#allocation11 + $0x68] sm:$0xff] }
 0x1a3   :  { %3181 = vmatpush.bf16.msrb.mxu2 %v4851_v33  ;;  %v4919_v6 = vor.u32 %v5417_v36, %v4918_v2 }
 0x1a4   :  { %3154 = vmatmul.bf16.vlgmr.msrb.gmra.mxu0 %v5902_v44  ;;  %v2522_v44 = vadd.f32 %v2521_v43, %v2508_v47 }
 0x1a5   :  { %3168 = vmatmul.bf16.vlgmr.msrb.gmra.mxu1 %v5904_v56  ;;  %v4966_v56 = vld [vmem:[#allocation8 + $0x1f0] sm:$0xf] }
 0x1a6   :  { %v2536_v46 = vadd.f32 %v2535_v27, %v2522_v44  ;;  %v4967_v19 = vor.u32 %v5429_v28, %v4966_v56  ;;  %v4947_v27 = vor.u32 %v5422_v12, %v4944_v30  ;;  %v4936_v44 = vld [vmem:[#allocation8 + $0x1b8] sm:$0xf0]  ;;  %v5418_v28 = vld [vmem:[#allocation8 + $0x1a4] sm:$0xf]  ;;  %v5440_v30 = vld [vmem:[#allocation11 + $0x50] sm:$0xff] }
 0x1a8   :  { %3132 = vmatpush.bf16.msra.mxu3 %v4967_v19  ;;  %v2682_v37 = vmul.f32 0.01, %v2536_v46 }
 0x1a9   :  { %v2523_v31 = vpop.f32.mrf.mxu0  ;;  %v2549_v54 = vpop.f32.mrf.mxu2 }
 0x1aa   :  { %v2524_v35 = vadd.f32 %v2523_v31, %v2510_v32  ;;  %v2537_v60 = vpop.f32.mrf.mxu1  ;;  %v2690_v39 = vmax.f32 %v2536_v46, %v2682_v37  ;;  %v2563_v5 = vpop.f32.mrf.mxu3  ;;  %v2550_v25 = vadd.f32 %v2549_v54, %v465_v51  ;;  %v4939_v46 = vor.u32 %v5420_v1, %v4936_v44  ;;  %v4928_v31 = vld [vmem:[#allocation8 + $0x1a8] sm:$0xf0] }
 0x1ac   :  { %v2538_v48 = vadd.f32 %v2537_v60, %v2524_v35  ;;  %3133 = vmatpush.bf16.msra.mxu3 %v4959_v40  ;;  %v2564_v41 = vadd.f32 %v2563_v5, %v2550_v25  ;;  %v4931_v60 = vor.u32 %v5418_v28, %v4928_v31  ;;  %v4920_v40 = vld [vmem:[#allocation8 + $0x198] sm:$0xf0] }
 0x1ad   :  { %v5433_v25 = vld [vmem:[#allocation11 + $0x18] sm:$0xff] }
 0x1ae   :  { %v2686_v42 = vmul.f32 0.01, %v2538_v48 }
 0x1b0   :  { %v2694_v57 = vmax.f32 %v2538_v48, %v2686_v42  ;;  %3134 = vmatpush.bf16.msra.mxu3 %v4951_v49 }
 0x1b1   :  { %v2551_v11 = vpop.f32.mrf.mxu2 }
 0x1b2   :  { %v2698_v3 = vpack.c.bf16 %v2694_v57, %v2690_v39  ;;  %v2565_v15 = vpop.f32.mrf.mxu3  ;;  %v2552_v21 = vadd.f32 %v2551_v11, %v465_v51  ;;  %v4923_v57 = vor.u32 %v5416_v38, %v4920_v40  ;;  %v5437_v11 = vld [vmem:[#allocation11 + $0x38] sm:$0xff] }
 0x1b3   :  { %3344 = vmatpush.bf16.msra.mxu0 %v5437_v11 }
 0x1b4   :  { %3126 = vmatmul.bf16.vlgmr.msra.gmra.mxu2 %v2698_v3  ;;  %3135 = vmatpush.bf16.msra.mxu3 %v4943_v59  ;;  %v2566_v23 = vadd.f32 %v2565_v15, %v2552_v21  ;;  %v5436_v15 = vld [vmem:[#allocation11 + $0x30] sm:$0xff]  ;;  %v2764_v21 = vld [vmem:[#allocation10] sm:$0x3] }
 0x1b5   :  { %v2767_v38 = vperm.slane %v2764_v21, 1 }
 0x1b7   :  { %3345 = vmatpush.bf16.msra.mxu0 %v5436_v15 }
 0x1b8   :  { %3136 = vmatpush.bf16.msra.mxu3 %v4935_v52 }
 0x1bb   :  { %3346 = vmatpush.bf16.msra.mxu0 %v5435_v24 }
 0x1bc   :  { %3137 = vmatpush.bf16.msra.mxu3 %v4927_v0 }
 0x1bf   :  { %3347 = vmatpush.bf16.msra.mxu0 %v5434_v4 }
 0x1c0   :  { %3138 = vmatpush.bf16.msra.mxu3 %v4919_v6 }
 0x1c1   :  { %v2577_v22 = vpop.f32.mrf.mxu0 }
 0x1c2   :  { %v2591_v16 = vpop.f32.mrf.mxu1  ;;  %v2578_v47 = vadd.f32 %v2577_v22, %v2564_v41  ;;  %v5445_v22 = vld [vmem:[#allocation11 + $0x78] sm:$0xff]  ;;  %v5430_v41 = vld [vmem:[#allocation11] sm:$0xff] }
 0x1c3   :  { %3348 = vmatpush.bf16.msra.mxu0 %v5433_v25  ;;  %3358 = vmatpush.bf16.msra.mxu1 %v5445_v22 }
 0x1c4   :  { %3182 = vmatmul.bf16.vlgmr.msrb.gmra.mxu2 %v2698_v3  ;;  %3139 = vmatpush.bf16.msra.mxu3 %v4911_v50  ;;  %v2592_v32 = vadd.f32 %v2591_v16, %v2578_v47  ;;  %v4915_v3 = vor.u32 %v5414_v55, %v4912_v61  ;;  %v5444_v16 = vld [vmem:[#allocation11 + $0x70] sm:$0xff] }
 0x1c7   :  { %3359 = vmatpush.bf16.msra.mxu1 %v5444_v16 }
 0x1c8   :  { %3188 = vmatpush.bf16.msrb.mxu3 %v4971_v58 }
 0x1c9   :  { %v2605_v43 = vpop.f32.mrf.mxu2  ;;  %v2579_v33 = vpop.f32.mrf.mxu0 }
 0x1ca   :  { %v2619_v29 = vpop.f32.mrf.mxu3  ;;  %v2593_v56 = vpop.f32.mrf.mxu1  ;;  %v2606_v19 = vadd.f32 %v2605_v43, %v2592_v32  ;;  %v2580_v35 = vadd.f32 %v2579_v33, %v2566_v23  ;;  %v5441_v43 = vld [vmem:[#allocation11 + $0x58] sm:$0xff]  ;;  %v5439_v33 = vld [vmem:[#allocation11 + $0x48] sm:$0xff]  ;;  %v5438_v23 = vld [vmem:[#allocation11 + $0x40] sm:$0xff] }
 0x1cb   :  { %3360 = vmatpush.bf16.msra.mxu1 %v5443_v20 }
 0x1cc   :  { %3189 = vmatpush.bf16.msrb.mxu3 %v4963_v8  ;;  %v2620_v42 = vadd.f32 %v2619_v29, %v2606_v19  ;;  %v2594_v39 = vadd.f32 %v2593_v56, %v2580_v35  ;;  %v5432_v8 = vld [vmem:[#allocation11 + $0x10] sm:$0xff] }
 0x1cd   :  { %3349 = vmatpush.bf16.msra.mxu0 %v5432_v8 }
 0x1d0   :  { %3190 = vmatpush.bf16.msrb.mxu3 %v4955_v26  ;;  %v5442_v26 = vld [vmem:[#allocation11 + $0x60] sm:$0xff] }
 0x1d1   :  { %v2607_v37 = vpop.f32.mrf.mxu2  ;;  %3350 = vmatpush.bf16.msra.mxu0 %v5431_v10  ;;  %3361 = vmatpush.bf16.msra.mxu1 %v5442_v26 }
 0x1d2   :  { %v2621_v48 = vpop.f32.mrf.mxu3  ;;  %v2608_v53 = vadd.f32 %v2607_v37, %v2594_v39 }
 0x1d4   :  { %3191 = vmatpush.bf16.msrb.mxu3 %v4947_v27  ;;  %v2622_v34 = vadd.f32 %v2621_v48, %v2608_v53  ;;  %v2766_v27 = vperm.slane %v2764_v21, 0 }
 0x1d5   :  { %3351 = vmatpush.bf16.msra.mxu0 %v5430_v41  ;;  %3362 = vmatpush.bf16.msra.mxu1 %v5441_v43 }
 0x1d8   :  { %3192 = vmatpush.bf16.msrb.mxu3 %v4939_v46 }
 0x1d9   :  { %3363 = vmatpush.bf16.msra.mxu1 %v5440_v30 }
 0x1dc   :  { %3193 = vmatpush.bf16.msrb.mxu3 %v4931_v60 }
 0x1dd   :  { %3364 = vmatpush.bf16.msra.mxu1 %v5439_v33 }
 0x1e0   :  { %3194 = vmatpush.bf16.msrb.mxu3 %v4923_v57 }
 0x1e1   :  { %v2633_v14 = vpop.f32.mrf.mxu0  ;;  %3365 = vmatpush.bf16.msra.mxu1 %v5438_v23 }
 0x1e2   :  { %v2647_v45 = vpop.f32.mrf.mxu1  ;;  %v2634_v49 = vadd.f32 %v2633_v14, %v2620_v42 }
 0x1e4   :  { %v2648_v62 = vadd.f32 %v2647_v45, %v2634_v49  ;;  %3195 = vmatpush.bf16.msrb.mxu3 %v4915_v3 }
 0x1e9   :  { %v2661_v59 = vpop.f32.mrf.mxu2  ;;  %v2635_v63 = vpop.f32.mrf.mxu0 }
 0x1ea   :  { %v2675_v52 = vpop.f32.mrf.mxu3  ;;  %v2662_v18 = vadd.f32 %v2661_v59, %v2648_v62  ;;  %v2636_v54 = vadd.f32 %v2635_v63, %v2622_v34  ;;  %v2649_v0 = vpop.f32.mrf.mxu1 }
 0x1ec   :  { %v2676_v5 = vadd.f32 %v2675_v52, %v2662_v18  ;;  %v2650_v2 = vadd.f32 %v2649_v0, %v2636_v54 }
 0x1ee   :  { %v2683_v13 = vmul.f32 0.01, %v2676_v5 }
 0x1f0   :  { %v2691_v7 = vmax.f32 %v2676_v5, %v2683_v13 }
 0x1f1   :  { %v2663_v36 = vpop.f32.mrf.mxu2 }
 0x1f2   :  { %v2664_v6 = vadd.f32 %v2663_v36, %v2650_v2  ;;  %v2677_v9 = vpop.f32.mrf.mxu3 }
 0x1f4   :  { %v2678_v50 = vadd.f32 %v2677_v9, %v2664_v6 }
 0x1f6   :  { %v2687_v17 = vmul.f32 0.01, %v2678_v50 }
 0x1f8   :  { %v2695_v51 = vmax.f32 %v2678_v50, %v2687_v17 }
 0x1fa   :  { %v2699_v58 = vpack.c.bf16 %v2695_v51, %v2691_v7  ;;  %v5462_v51 = vld [vmem:[#allocation13] ss:$0 sm:$0xff] }
 0x1fc   :  { %3140 = vmatmul.bf16.vlgmr.msra.gmra.mxu3 %v2699_v58 }
 0x201   :  { %v3099_v12 = vpop.f32.mrf.mxu0 }
 0x202   :  { %v3113_v29 = vpop.f32.mrf.mxu1  ;;  %v3100_v44 = vadd.f32 %v3099_v12, %v2766_v27 }
 0x204   :  { %v3114_v56 = vadd.f32 %v3113_v29, %v3100_v44 }
 0x209   :  { %v3101_v1 = vpop.f32.mrf.mxu0 }
 0x20a   :  { %v3102_v28 = vadd.f32 %v3101_v1, %v2766_v27  ;;  %v3115_v31 = vpop.f32.mrf.mxu1 }
 0x20c   :  { %3196 = vmatmul.bf16.vlgmr.msrb.gmra.mxu3 %v2699_v58  ;;  %v3116_v60 = vadd.f32 %v3115_v31, %v3102_v28 }
 0x221   :  { %v3155_v35 = vpop.f32.mrf.mxu0 }
 0x222   :  { %v3169_v39 = vpop.f32.mrf.mxu1  ;;  %v3156_v53 = vadd.f32 %v3155_v35, %v2767_v38 }
 0x224   :  { %v3170_v34 = vadd.f32 %v3169_v39, %v3156_v53 }
 0x229   :  { %v3157_v61 = vpop.f32.mrf.mxu0 }
 0x22a   :  { %v3158_v62 = vadd.f32 %v3157_v61, %v2767_v38  ;;  %v3171_v63 = vpop.f32.mrf.mxu1 }
 0x22c   :  { %v3172_v54 = vadd.f32 %v3171_v63, %v3158_v62 }
 0x237   :  { %v3127_v47 = vpop.f32.mrf.mxu2 }
 0x238   :  { %v3128_v19 = vadd.f32 %v3127_v47, %v3114_v56 }
 0x23f   :  { %v3129_v32 = vpop.f32.mrf.mxu2 }
 0x240   :  { %v3130_v48 = vadd.f32 %v3129_v32, %v3116_v60 }
 0x247   :  { %v3183_v57 = vpop.f32.mrf.mxu2 }
 0x248   :  { %v3184_v52 = vadd.f32 %v3183_v57, %v3170_v34 }
 0x24f   :  { %v3185_v18 = vpop.f32.mrf.mxu2 }
 0x250   :  { %v3186_v5 = vadd.f32 %v3185_v18, %v3172_v54 }
 0x27f   :  { %v3141_v46 = vpop.f32.mrf.mxu3 }
 0x280   :  { %v3142_v37 = vadd.f32 %v3141_v46, %v3128_v19 }
 0x282   :  { %v3202_v40 = vmul.f32 0.01, %v3142_v37 }
 0x284   :  { %v3206_v49 = vmax.f32 %v3142_v37, %v3202_v40 }
 0x287   :  { %v3143_v14 = vpop.f32.mrf.mxu3 }
 0x288   :  { %v3144_v42 = vadd.f32 %v3143_v14, %v3130_v48 }
 0x28a   :  { %v3204_v45 = vmul.f32 0.01, %v3144_v42 }
 0x28c   :  { %v3208_v55 = vmax.f32 %v3144_v42, %v3204_v45 }
 0x28e   :  { %v3210_v3 = vpack.c.bf16 %v3208_v55, %v3206_v49 }
 0x28f   :  { %v3197_v59 = vpop.f32.mrf.mxu3 }
 0x290   :  { %3352 = vmatmul.bf16.vlgmr.msra.gmra.mxu0 %v3210_v3  ;;  %v3198_v0 = vadd.f32 %v3197_v59, %v3184_v52 }
 0x292   :  { %v3203_v36 = vmul.f32 0.01, %v3198_v0 }
 0x294   :  { %v3207_v13 = vmax.f32 %v3198_v0, %v3203_v36 }
 0x297   :  { %v3199_v2 = vpop.f32.mrf.mxu3 }
 0x298   :  { %v3200_v6 = vadd.f32 %v3199_v2, %v3186_v5 }
 0x29a   :  { %v3205_v9 = vmul.f32 0.01, %v3200_v6 }
 0x29c   :  { %v3209_v50 = vmax.f32 %v3200_v6, %v3205_v9 }
 0x29e   :  { %v3211_v17 = vpack.c.bf16 %v3209_v50, %v3207_v13 }
 0x2a0   :  { %3366 = vmatmul.bf16.vlgmr.msra.gmra.mxu1 %v3211_v17 }
 0x30d   :  { %v3353_v7 = vpop.f32.mrf.mxu0 }
 0x30e   :  { %v3354_v58 = vadd.f32 %v5462_v51, %v3353_v7 }
 0x315   :  { %v3355_v24 = vpop.f32.mrf.mxu0 }
 0x316   :  { %v3356_v4 = vadd.f32 %v5462_v51, %v3355_v24 }
 0x31d   :  { %v3367_v11 = vpop.f32.mrf.mxu1 }
 0x31e   :  { %v3368_v15 = vadd.f32 %v3367_v11, %v3354_v58 }
 0x320   :  { %3372 = vst [vmem:[#allocation14] sm:$0xff] %v3368_v15 }
 0x325   :  { %v3369_v25 = vpop.f32.mrf.mxu1 }
 0x326   :  { %v3370_v22 = vadd.f32 %v3369_v25, %v3356_v4 }
 0x328   :  { %3373 = vst [vmem:[#allocation14 + $0x8] sm:$0xff] %v3370_v22 }
 0x329   :  { %3386 = dma.vmem_to_hbm [thread:$0]  %s3379_s6, 256, %s3381_s18, [#allocation4], %s5669_s13, %s5669_s13, %s5670_s14  }
 0x32a   :  { %5663 = dma.done.wait [#allocation4], 256  }
 0x32b   :  { %5664 = vsyncadd [#allocation4], 4294967040 }
 0x32c   :  { %3391 = vsyncpa [#allocation3], 1 }
 0x32d   :  { %3392 = vsyncpa [#allocation6], 1 }
 0x32e   :  { %3393 = vsyncpa [#allocation9], 1 }
 0x32f   :  { %3394 = vsyncpa [#allocation12], 1 }
 0x330   :  { %3395 = vsyncpa [#allocation4], 1 }

// kernel: tpu_custom_call.1
= control target key start
LH: loop header
LB: loop body
LE: loop exit
PB: predicated region body
PF: predicated region fallthrough
CT: control target
= control target key end

     0   :  { %12 = vsyncpa [#allocation3], 0  ;;  %s5918_s0 = inlined_call_operand.hbm [shape: bf16[16,1280], index: 0, kind: input, shape index: {}]   ;;  %s5919_s1 = inlined_call_operand.hbm [shape: bf16[1280,512], index: 1, kind: input, shape index: {}]   ;;  %s5920_s2 = inlined_call_operand.hbm [shape: f32[1,512], index: 2, kind: input, shape index: {}]   ;;  %s5921_s3 = inlined_call_operand.hbm [shape: bf16[512,256], index: 3, kind: input, shape index: {}]   ;;  %s5922_s4 = inlined_call_operand.hbm [shape: f32[1,256], index: 4, kind: input, shape index: {}]   ;;  %s5923_s5 = inlined_call_operand.hbm [shape: bf16[256,128], index: 5, kind: input, shape index: {}]   ;;  %s5924_s6 = inlined_call_operand.hbm [shape: f32[1,128], index: 6, kind: input, shape index: {}]   ;;  %s5925_s7 = inlined_call_operand.hbm [shape: f32[16,128], index: 7, kind: output, shape index: {}]  }
   0x1   :  { %13 = vsyncpa [#allocation6], 0 }
   0x2   :  { %14 = vsyncpa [#allocation9], 0 }
   0x3   :  { %15 = vsyncpa [#allocation12], 0  ;;  %s34_s26 = sshll.u32 %s5919_s1, 4  ;;  %s35_s26 = int_to_ptr.hbm [resolvable:$true] %s34_s26 }
   0x4   :  { %16 = vsyncpa [#allocation4], 0  ;;  %s5665_s27 = smov [#allocation5]   ;;  %s58_s8 = sshll.u32 %s5921_s3, 4  ;;  %s59_s8 = int_to_ptr.hbm [resolvable:$true] %s58_s8 }
   0x5   :  { %s36_s28 = sshll.u32 %s5665_s27, 4  ;;  %s5666_s9 = smov 256   ;;  %s37_s28 = int_to_ptr.vmem [resolvable:$true] %s36_s28 }
   0x6   :  { %s5667_s10 = smov 16   ;;  %s5668_s11 = smov [#allocation8]  }
   0x7   :  { %42 = dma.hbm_to_vmem [thread:$0]  %s35_s26, 40960, %s37_s28, [#allocation6], %s5666_s9, %s5666_s9, %s5667_s10  }
   0x8   :  { %s60_s12 = sshll.u32 %s5668_s11, 4  ;;  %s5669_s13 = smov 128   ;;  %s61_s12 = int_to_ptr.vmem [resolvable:$true] %s60_s12 }
   0x9   :  { %s5670_s14 = smov 8   ;;  %s82_s16 = sshll.u32 %s5923_s5, 4  ;;  %s83_s16 = int_to_ptr.hbm [resolvable:$true] %s82_s16 }
   0xa   :  { %66 = dma.hbm_to_vmem [thread:$0]  %s59_s8, 8192, %s61_s12, [#allocation9], %s5669_s13, %s5669_s13, %s5670_s14  }
   0xb   :  { %s5671_s17 = smov [#allocation11]   ;;  %s21_s20 = sshll.u32 %s5918_s0, 4  ;;  %s22_s20 = int_to_ptr.hbm [resolvable:$true] %s21_s20 }
   0xc   :  { %s84_s3 = sshll.u32 %s5671_s17, 4  ;;  %s5672_s21 = smov 64   ;;  %s85_s3 = int_to_ptr.vmem [resolvable:$true] %s84_s3 }
   0xd   :  { %s5673_s22 = smov 4   ;;  %s5674_s23 = smov [#allocation2]  }
   0xe   :  { %90 = dma.hbm_to_vmem [thread:$0]  %s83_s16, 2048, %s85_s3, [#allocation12], %s5672_s21, %s5672_s21, %s5673_s22  }
   0xf   :  { %s23_s24 = sshll.u32 %s5674_s23, 4  ;;  %s5675_s25 = smov 640   ;;  %s24_s24 = int_to_ptr.vmem [resolvable:$true] %s23_s24 }
  0x10   :  { %s5676_s26 = smov 40   ;;  %s48_s28 = sshll.u32 %s5920_s2, 4  ;;  %s49_s28 = int_to_ptr.hbm [resolvable:$true] %s48_s28 }
  0x11   :  { %29 = dma.hbm_to_vmem [thread:$0]  %s22_s20, 1280, %s24_s24, [#allocation3], %s5675_s25, %s5675_s25, %s5676_s26  }
  0x12   :  { %s5677_s29 = smov [#allocation7]   ;;  %s72_s9 = sshll.u32 %s5922_s4, 4  ;;  %s73_s9 = int_to_ptr.hbm [resolvable:$true] %s72_s9 }
  0x13   :  { %s50_s30 = sshll.u32 %s5677_s29, 4  ;;  %s5678_s10 = smov [#allocation10]   ;;  %s51_s30 = int_to_ptr.vmem [resolvable:$true] %s50_s30 }
  0x14   :  { %53 = dma.hbm_to_vmem [thread:$0]  %s49_s28, 64, %s51_s30, [#allocation6]  }
  0x15   :  { %s74_s11 = sshll.u32 %s5678_s10, 4  ;;  %s96_s15 = sshll.u32 %s5924_s6, 4  ;;  %s75_s11 = int_to_ptr.vmem [resolvable:$true] %s74_s11  ;;  %s97_s15 = int_to_ptr.hbm [resolvable:$true] %s96_s15 }
  0x16   :  { %77 = dma.hbm_to_vmem [thread:$0]  %s73_s9, 32, %s75_s11, [#allocation9]  }
  0x17   :  { %s5679_s2 = smov [#allocation13]  }
  0x18   :  { %s98_s16 = sshll.u32 %s5679_s2, 4  ;;  %s99_s16 = int_to_ptr.vmem [resolvable:$true] %s98_s16 }
  0x19   :  { %101 = dma.hbm_to_vmem [thread:$0]  %s97_s15, 16, %s99_s16, [#allocation12]  }
  0x1a   :  { %5655 = dma.done.wait [#allocation3], 1280  }
  0x1b   :  { %5656 = vsyncadd [#allocation3], 4294966016 }
  0x1c   :  { %5657 = dma.done.wait [#allocation6], 41024  }
  0x1d   :  { %5658 = vsyncadd [#allocation6], 4294926272 }
  0x1e   :  { %5659 = dma.done.wait [#allocation9], 8224  }
  0x1f   :  { %5660 = vsyncadd [#allocation9], 4294959072 }
  0x20   :  { %5661 = dma.done.wait [#allocation12], 2064  }
  0x21   :  { %5662 = vsyncadd [#allocation12], 4294965232  ;;  %v3550_v0 = vld [vmem:[#allocation5 + $0xe0] sm:$0xf]  ;;  %v5076_v1 = vld [vmem:[#allocation5 + $0xec] sm:$0xf0] }
  0x22   :  { %v3678_v2 = vld [vmem:[#allocation5 + $0x1e0] sm:$0xf]  ;;  %v3551_v3 = vor.u32 %v5076_v1, %v3550_v0  ;;  %v5108_v4 = vld [vmem:[#allocation5 + $0x1ec] sm:$0xf0]  ;;  %s5680_s4 = smov [#allocation14]   ;;  %s3380_s18 = sshll.u32 %s5925_s7, 4  ;;  %s3381_s18 = int_to_ptr.hbm [resolvable:$true] %s3380_s18 }
  0x23   :  { %v3806_v5 = vld [vmem:[#allocation5 + $0x2e0] sm:$0xf]  ;;  %v5140_v6 = vld [vmem:[#allocation5 + $0x2ec] sm:$0xf0]  ;;  %v3679_v7 = vor.u32 %v5108_v4, %v3678_v2  ;;  %s3378_s6 = sshll.u32 %s5680_s4, 4  ;;  %s3379_s6 = int_to_ptr.vmem [resolvable:$true] %s3378_s6 }
  0x24   :  { %v3807_v8 = vor.u32 %v5140_v6, %v3806_v5  ;;  %v3934_v9 = vld [vmem:[#allocation5 + $0x3e0] sm:$0xf]  ;;  %v5172_v10 = vld [vmem:[#allocation5 + $0x3ec] sm:$0xf0]  ;;  %2120 = vmatpush.bf16.msra.mxu0 %v3551_v3 }
  0x25   :  { %v3534_v11 = vld [vmem:[#allocation5 + $0xc0] sm:$0xf]  ;;  %v3935_v12 = vor.u32 %v5172_v10, %v3934_v9  ;;  %v5072_v13 = vld [vmem:[#allocation5 + $0xcc] sm:$0xf0]  ;;  %2134 = vmatpush.bf16.msra.mxu1 %v3679_v7 }
  0x26   :  { %v3662_v14 = vld [vmem:[#allocation5 + $0x1c0] sm:$0xf]  ;;  %v5104_v15 = vld [vmem:[#allocation5 + $0x1cc] sm:$0xf0]  ;;  %2148 = vmatpush.bf16.msra.mxu2 %v3807_v8  ;;  %v3535_v16 = vor.u32 %v5072_v13, %v3534_v11 }
  0x27   :  { %v3663_v17 = vor.u32 %v5104_v15, %v3662_v14  ;;  %v3790_v18 = vld [vmem:[#allocation5 + $0x2c0] sm:$0xf]  ;;  %v5136_v19 = vld [vmem:[#allocation5 + $0x2cc] sm:$0xf0]  ;;  %2162 = vmatpush.bf16.msra.mxu3 %v3935_v12 }
  0x28   :  { %v3918_v20 = vld [vmem:[#allocation5 + $0x3c0] sm:$0xf]  ;;  %v3791_v21 = vor.u32 %v5136_v19, %v3790_v18  ;;  %v5168_v22 = vld [vmem:[#allocation5 + $0x3cc] sm:$0xf0]  ;;  %2121 = vmatpush.bf16.msra.mxu0 %v3535_v16 }
  0x29   :  { %v3518_v23 = vld [vmem:[#allocation5 + $0xa0] sm:$0xf]  ;;  %v5068_v24 = vld [vmem:[#allocation5 + $0xac] sm:$0xf0]  ;;  %v3919_v25 = vor.u32 %v5168_v22, %v3918_v20  ;;  %2135 = vmatpush.bf16.msra.mxu1 %v3663_v17 }
  0x2a   :  { %v3646_v26 = vld [vmem:[#allocation5 + $0x1a0] sm:$0xf]  ;;  %v5100_v27 = vld [vmem:[#allocation5 + $0x1ac] sm:$0xf0]  ;;  %v3519_v29 = vor.u32 %v5068_v24, %v3518_v23  ;;  %2149 = vmatpush.bf16.msra.mxu2 %v3791_v21 }
  0x2b   :  { %v3774_v28 = vld [vmem:[#allocation5 + $0x2a0] sm:$0xf]  ;;  %v5132_v30 = vld [vmem:[#allocation5 + $0x2ac] sm:$0xf0]  ;;  %v3647_v33 = vor.u32 %v5100_v27, %v3646_v26  ;;  %2163 = vmatpush.bf16.msra.mxu3 %v3919_v25 }
  0x2c   :  { %v3902_v31 = vld [vmem:[#allocation5 + $0x3a0] sm:$0xf]  ;;  %v5164_v32 = vld [vmem:[#allocation5 + $0x3ac] sm:$0xf0]  ;;  %v3775_v34 = vor.u32 %v5132_v30, %v3774_v28  ;;  %2122 = vmatpush.bf16.msra.mxu0 %v3519_v29 }
  0x2d   :  { %v3502_v35 = vld [vmem:[#allocation5 + $0x80] sm:$0xf]  ;;  %v5064_v36 = vld [vmem:[#allocation5 + $0x8c] sm:$0xf0]  ;;  %v3903_v38 = vor.u32 %v5164_v32, %v3902_v31  ;;  %2136 = vmatpush.bf16.msra.mxu1 %v3647_v33 }
  0x2e   :  { %v3630_v37 = vld [vmem:[#allocation5 + $0x180] sm:$0xf]  ;;  %v5096_v39 = vld [vmem:[#allocation5 + $0x18c] sm:$0xf0]  ;;  %v3503_v44 = vor.u32 %v5064_v36, %v3502_v35  ;;  %2150 = vmatpush.bf16.msra.mxu2 %v3775_v34 }
  0x2f   :  { %v3758_v40 = vld [vmem:[#allocation5 + $0x280] sm:$0xf]  ;;  %v5128_v41 = vld [vmem:[#allocation5 + $0x28c] sm:$0xf0]  ;;  %v3631_v45 = vor.u32 %v5096_v39, %v3630_v37  ;;  %2164 = vmatpush.bf16.msra.mxu3 %v3903_v38 }
  0x30   :  { %v3886_v42 = vld [vmem:[#allocation5 + $0x380] sm:$0xf]  ;;  %v5160_v43 = vld [vmem:[#allocation5 + $0x38c] sm:$0xf0]  ;;  %v3759_v46 = vor.u32 %v5128_v41, %v3758_v40  ;;  %2123 = vmatpush.bf16.msra.mxu0 %v3503_v44 }
  0x31   :  { %v3486_v47 = vld [vmem:[#allocation5 + $0x60] sm:$0xf]  ;;  %v5060_v48 = vld [vmem:[#allocation5 + $0x6c] sm:$0xf0]  ;;  %v3887_v50 = vor.u32 %v5160_v43, %v3886_v42  ;;  %2137 = vmatpush.bf16.msra.mxu1 %v3631_v45 }
  0x32   :  { %v3614_v49 = vld [vmem:[#allocation5 + $0x160] sm:$0xf]  ;;  %v5092_v51 = vld [vmem:[#allocation5 + $0x16c] sm:$0xf0]  ;;  %v3487_v56 = vor.u32 %v5060_v48, %v3486_v47  ;;  %2151 = vmatpush.bf16.msra.mxu2 %v3759_v46 }
  0x33   :  { %v3742_v52 = vld [vmem:[#allocation5 + $0x260] sm:$0xf]  ;;  %v5124_v53 = vld [vmem:[#allocation5 + $0x26c] sm:$0xf0]  ;;  %v3615_v57 = vor.u32 %v5092_v51, %v3614_v49  ;;  %2165 = vmatpush.bf16.msra.mxu3 %v3887_v50 }
  0x34   :  { %v3870_v54 = vld [vmem:[#allocation5 + $0x360] sm:$0xf]  ;;  %v5156_v55 = vld [vmem:[#allocation5 + $0x36c] sm:$0xf0]  ;;  %v3743_v58 = vor.u32 %v5124_v53, %v3742_v52  ;;  %2124 = vmatpush.bf16.msra.mxu0 %v3487_v56  ;;  %v5041_v53 = vld [vmem:[#allocation2 + $0x24] sm:$0xf0] }
  0x35   :  { %v3470_v59 = vld [vmem:[#allocation5 + $0x40] sm:$0xf]  ;;  %v5056_v60 = vld [vmem:[#allocation5 + $0x4c] sm:$0xf0]  ;;  %v3871_v62 = vor.u32 %v5156_v55, %v3870_v54  ;;  %2138 = vmatpush.bf16.msra.mxu1 %v3615_v57  ;;  %v3406_v54 = vld [vmem:[#allocation2 + $0x8] sm:$0xf] }
  0x36   :  { %v3598_v61 = vld [vmem:[#allocation5 + $0x140] sm:$0xf]  ;;  %v5088_v63 = vld [vmem:[#allocation5 + $0x14c] sm:$0xf0]  ;;  %v3471_v4 = vor.u32 %v5056_v60, %v3470_v59  ;;  %2152 = vmatpush.bf16.msra.mxu2 %v3743_v58 }
  0x37   :  { %v3726_v0 = vld [vmem:[#allocation5 + $0x240] sm:$0xf]  ;;  %v5120_v1 = vld [vmem:[#allocation5 + $0x24c] sm:$0xf0]  ;;  %v3599_v5 = vor.u32 %v5088_v63, %v3598_v61  ;;  %2166 = vmatpush.bf16.msra.mxu3 %v3871_v62 }
  0x38   :  { %v3854_v2 = vld [vmem:[#allocation5 + $0x340] sm:$0xf]  ;;  %v5152_v3 = vld [vmem:[#allocation5 + $0x34c] sm:$0xf0]  ;;  %v3727_v6 = vor.u32 %v5120_v1, %v3726_v0  ;;  %2125 = vmatpush.bf16.msra.mxu0 %v3471_v4 }
  0x39   :  { %v3454_v7 = vld [vmem:[#allocation5 + $0x20] sm:$0xf]  ;;  %v5052_v8 = vld [vmem:[#allocation5 + $0x2c] sm:$0xf0]  ;;  %v3855_v10 = vor.u32 %v5152_v3, %v3854_v2  ;;  %2139 = vmatpush.bf16.msra.mxu1 %v3599_v5 }
  0x3a   :  { %v3582_v9 = vld [vmem:[#allocation5 + $0x120] sm:$0xf]  ;;  %v5084_v11 = vld [vmem:[#allocation5 + $0x12c] sm:$0xf0]  ;;  %v3455_v16 = vor.u32 %v5052_v8, %v3454_v7  ;;  %2153 = vmatpush.bf16.msra.mxu2 %v3727_v6  ;;  %v5036_v6 = vld [vmem:[#allocation2 + $0x4] sm:$0xf] }
  0x3b   :  { %v3710_v12 = vld [vmem:[#allocation5 + $0x220] sm:$0xf]  ;;  %v5116_v13 = vld [vmem:[#allocation5 + $0x22c] sm:$0xf0]  ;;  %v3583_v19 = vor.u32 %v5084_v11, %v3582_v9  ;;  %2167 = vmatpush.bf16.msra.mxu3 %v3855_v10  ;;  %v3400_v7 = vld [vmem:[#allocation2 + $0x28] sm:$0xf0] }
  0x3c   :  { %v3838_v14 = vld [vmem:[#allocation5 + $0x320] sm:$0xf]  ;;  %v5148_v15 = vld [vmem:[#allocation5 + $0x32c] sm:$0xf0]  ;;  %v3711_v20 = vor.u32 %v5116_v13, %v3710_v12  ;;  %2126 = vmatpush.bf16.msra.mxu0 %v3455_v16  ;;  %v5037_v8 = vld [vmem:[#allocation2 + $0xc] sm:$0xf]  ;;  %v5751_v10 = vor.u32 %v5036_v6, %v3400_v7 }
  0x3d   :  { %v3438_v17 = vld [vmem:[#allocation5] sm:$0xf]  ;;  %v5048_v18 = vld [vmem:[#allocation5 + $0xc] sm:$0xf0]  ;;  %v3839_v24 = vor.u32 %v5148_v15, %v3838_v14  ;;  %2140 = vmatpush.bf16.msra.mxu1 %v3583_v19  ;;  %v3408_v11 = vld [vmem:[#allocation2 + $0x30] sm:$0xf0] }
  0x3e   :  { %v3566_v21 = vld [vmem:[#allocation5 + $0x100] sm:$0xf]  ;;  %v5080_v22 = vld [vmem:[#allocation5 + $0x10c] sm:$0xf0]  ;;  %v3439_v31 = vor.u32 %v5048_v18, %v3438_v17  ;;  %2154 = vmatpush.bf16.msra.mxu2 %v3711_v20  ;;  %v5753_v17 = vor.u32 %v5037_v8, %v3408_v11 }
  0x3f   :  { %v3694_v23 = vld [vmem:[#allocation5 + $0x200] sm:$0xf]  ;;  %v5112_v25 = vld [vmem:[#allocation5 + $0x20c] sm:$0xf0]  ;;  %v3567_v35 = vor.u32 %v5080_v22, %v3566_v21  ;;  %2168 = vmatpush.bf16.msra.mxu3 %v3839_v24 }
  0x40   :  { %v3822_v26 = vld [vmem:[#allocation5 + $0x300] sm:$0xf]  ;;  %v5144_v27 = vld [vmem:[#allocation5 + $0x30c] sm:$0xf0]  ;;  %v3695_v36 = vor.u32 %v5112_v25, %v3694_v23  ;;  %2127 = vmatpush.bf16.msra.mxu0 %v3439_v31 }
  0x41   :  { %v4062_v28 = vld [vmem:[#allocation5 + $0x4e0] sm:$0xf]  ;;  %v5204_v29 = vld [vmem:[#allocation5 + $0x4ec] sm:$0xf0]  ;;  %v3823_v39 = vor.u32 %v5144_v27, %v3822_v26  ;;  %2141 = vmatpush.bf16.msra.mxu1 %v3567_v35 }
  0x42   :  { %v4190_v30 = vld [vmem:[#allocation5 + $0x5e0] sm:$0xf]  ;;  %v5236_v32 = vld [vmem:[#allocation5 + $0x5ec] sm:$0xf0]  ;;  %v4063_v40 = vor.u32 %v5204_v29, %v4062_v28  ;;  %2155 = vmatpush.bf16.msra.mxu2 %v3695_v36 }
  0x43   :  { %v4318_v33 = vld [vmem:[#allocation5 + $0x6e0] sm:$0xf]  ;;  %v5268_v34 = vld [vmem:[#allocation5 + $0x6ec] sm:$0xf0]  ;;  %v4191_v43 = vor.u32 %v5236_v32, %v4190_v30  ;;  %2169 = vmatpush.bf16.msra.mxu3 %v3823_v39 }
  0x44   :  { %v4446_v37 = vld [vmem:[#allocation5 + $0x7e0] sm:$0xf]  ;;  %v5300_v38 = vld [vmem:[#allocation5 + $0x7ec] sm:$0xf0]  ;;  %v4319_v44 = vor.u32 %v5268_v34, %v4318_v33  ;;  %2176 = vmatpush.bf16.msrb.mxu0 %v4063_v40  ;;  %2142 = vmatmul.bf16.vlgmr.msra.gmra.mxu1 %v5751_v10 }
  0x45   :  { %v4046_v41 = vld [vmem:[#allocation5 + $0x4c0] sm:$0xf]  ;;  %v5200_v42 = vld [vmem:[#allocation5 + $0x4cc] sm:$0xf0]  ;;  %v4447_v48 = vor.u32 %v5300_v38, %v4446_v37  ;;  %2190 = vmatpush.bf16.msrb.mxu1 %v4191_v43 }
  0x46   :  { %v4174_v45 = vld [vmem:[#allocation5 + $0x5c0] sm:$0xf]  ;;  %v5232_v46 = vld [vmem:[#allocation5 + $0x5cc] sm:$0xf0]  ;;  %v4047_v55 = vor.u32 %v5200_v42, %v4046_v41  ;;  %2204 = vmatpush.bf16.msrb.mxu2 %v4319_v44  ;;  %2170 = vmatmul.bf16.vlgmr.msra.gmra.mxu3 %v5753_v17 }
  0x47   :  { %v4302_v47 = vld [vmem:[#allocation5 + $0x6c0] sm:$0xf]  ;;  %v5264_v49 = vld [vmem:[#allocation5 + $0x6cc] sm:$0xf0]  ;;  %v4175_v60 = vor.u32 %v5232_v46, %v4174_v45  ;;  %2218 = vmatpush.bf16.msrb.mxu3 %v4447_v48 }
  0x48   :  { %v4430_v50 = vld [vmem:[#allocation5 + $0x7c0] sm:$0xf]  ;;  %v5296_v51 = vld [vmem:[#allocation5 + $0x7cc] sm:$0xf0]  ;;  %v4303_v61 = vor.u32 %v5264_v49, %v4302_v47  ;;  %2177 = vmatpush.bf16.msrb.mxu0 %v4047_v55 }
  0x49   :  { %v3398_v52 = vld [vmem:[#allocation2] sm:$0xf]  ;;  %v4030_v56 = vld [vmem:[#allocation5 + $0x4a0] sm:$0xf]  ;;  %v4431_v2 = vor.u32 %v5296_v51, %v4430_v50  ;;  %2191 = vmatpush.bf16.msrb.mxu1 %v4175_v60 }
  0x4a   :  { %v5196_v57 = vld [vmem:[#allocation5 + $0x4ac] sm:$0xf0]  ;;  %v5745_v58 = vor.u32 %v5041_v53, %v3398_v52  ;;  %v5042_v59 = vld [vmem:[#allocation2 + $0x2c] sm:$0xf0]  ;;  %2205 = vmatpush.bf16.msrb.mxu2 %v4303_v61 }
  0x4b   :  { %v4158_v62 = vld [vmem:[#allocation5 + $0x5a0] sm:$0xf]  ;;  %v5228_v63 = vld [vmem:[#allocation5 + $0x5ac] sm:$0xf0]  ;;  %v5747_v1 = vor.u32 %v5042_v59, %v3406_v54  ;;  %v4031_v9 = vor.u32 %v5196_v57, %v4030_v56  ;;  %2219 = vmatpush.bf16.msrb.mxu3 %v4431_v2 }
  0x4c   :  { %v4286_v0 = vld [vmem:[#allocation5 + $0x6a0] sm:$0xf]  ;;  %v5260_v3 = vld [vmem:[#allocation5 + $0x6ac] sm:$0xf0]  ;;  %2128 = vmatmul.bf16.vlgmr.msra.gmra.mxu0 %v5745_v58  ;;  %v4159_v12 = vor.u32 %v5228_v63, %v4158_v62 }
  0x4d   :  { %v4414_v4 = vld [vmem:[#allocation5 + $0x7a0] sm:$0xf]  ;;  %v5292_v5 = vld [vmem:[#allocation5 + $0x7ac] sm:$0xf0]  ;;  %2156 = vmatmul.bf16.vlgmr.msra.gmra.mxu2 %v5747_v1  ;;  %v4287_v13 = vor.u32 %v5260_v3, %v4286_v0  ;;  %2178 = vmatpush.bf16.msrb.mxu0 %v4031_v9 }
  0x4e   :  { %v4014_v14 = vld [vmem:[#allocation5 + $0x480] sm:$0xf]  ;;  %v5192_v15 = vld [vmem:[#allocation5 + $0x48c] sm:$0xf0]  ;;  %v4415_v18 = vor.u32 %v5292_v5, %v4414_v4  ;;  %2192 = vmatpush.bf16.msrb.mxu1 %v4159_v12 }
  0x4f   :  { %v4142_v16 = vld [vmem:[#allocation5 + $0x580] sm:$0xf]  ;;  %v5224_v19 = vld [vmem:[#allocation5 + $0x58c] sm:$0xf0]  ;;  %v4015_v24 = vor.u32 %v5192_v15, %v4014_v14  ;;  %2206 = vmatpush.bf16.msrb.mxu2 %v4287_v13  ;;  %v5074_v15 = vld [vmem:[#allocation5 + $0xe4] sm:$0xf] }
  0x50   :  { %v4270_v20 = vld [vmem:[#allocation5 + $0x680] sm:$0xf]  ;;  %v5256_v21 = vld [vmem:[#allocation5 + $0x68c] sm:$0xf0]  ;;  %v4143_v25 = vor.u32 %v5224_v19, %v4142_v16  ;;  %2220 = vmatpush.bf16.msrb.mxu3 %v4415_v18  ;;  %v3552_v16 = vld [vmem:[#allocation5 + $0xf0] sm:$0xf0] }
  0x51   :  { %v4398_v22 = vld [vmem:[#allocation5 + $0x780] sm:$0xf]  ;;  %v5288_v23 = vld [vmem:[#allocation5 + $0x78c] sm:$0xf0]  ;;  %v4271_v26 = vor.u32 %v5256_v21, %v4270_v20  ;;  %2179 = vmatpush.bf16.msrb.mxu0 %v4015_v24  ;;  %v5106_v18 = vld [vmem:[#allocation5 + $0x1e4] sm:$0xf] }
  0x52   :  { %v3998_v27 = vld [vmem:[#allocation5 + $0x460] sm:$0xf]  ;;  %v5188_v28 = vld [vmem:[#allocation5 + $0x46c] sm:$0xf0]  ;;  %v4399_v30 = vor.u32 %v5288_v23, %v4398_v22  ;;  %2193 = vmatpush.bf16.msrb.mxu1 %v4143_v25  ;;  %v3680_v20 = vld [vmem:[#allocation5 + $0x1f0] sm:$0xf0] }
  0x53   :  { %v4126_v29 = vld [vmem:[#allocation5 + $0x560] sm:$0xf]  ;;  %v5220_v31 = vld [vmem:[#allocation5 + $0x56c] sm:$0xf0]  ;;  %v3999_v36 = vor.u32 %v5188_v28, %v3998_v27  ;;  %2207 = vmatpush.bf16.msrb.mxu2 %v4271_v26  ;;  %v5043_v22 = vld [vmem:[#allocation2 + $0x34] sm:$0xf0] }
  0x54   :  { %v4254_v32 = vld [vmem:[#allocation5 + $0x660] sm:$0xf]  ;;  %v5252_v33 = vld [vmem:[#allocation5 + $0x66c] sm:$0xf0]  ;;  %v4127_v37 = vor.u32 %v5220_v31, %v4126_v29  ;;  %2221 = vmatpush.bf16.msrb.mxu3 %v4399_v30  ;;  %v3422_v25 = vld [vmem:[#allocation2 + $0x18] sm:$0xf] }
  0x55   :  { %v4382_v34 = vld [vmem:[#allocation5 + $0x760] sm:$0xf]  ;;  %v5284_v35 = vld [vmem:[#allocation5 + $0x76c] sm:$0xf0]  ;;  %v4255_v38 = vor.u32 %v5252_v33, %v4254_v32  ;;  %2180 = vmatpush.bf16.msrb.mxu0 %v3999_v36  ;;  %v5038_v27 = vld [vmem:[#allocation2 + $0x14] sm:$0xf] }
  0x56   :  { %v3982_v39 = vld [vmem:[#allocation5 + $0x440] sm:$0xf]  ;;  %v5184_v40 = vld [vmem:[#allocation5 + $0x44c] sm:$0xf0]  ;;  %v4383_v42 = vor.u32 %v5284_v35, %v4382_v34  ;;  %2194 = vmatpush.bf16.msrb.mxu1 %v4127_v37  ;;  %v3416_v30 = vld [vmem:[#allocation2 + $0x38] sm:$0xf0]  ;;  %v3555_v34 = vor.u32 %v5074_v15, %v3552_v16 }
  0x57   :  { %v4110_v41 = vld [vmem:[#allocation5 + $0x540] sm:$0xf]  ;;  %v5216_v43 = vld [vmem:[#allocation5 + $0x54c] sm:$0xf0]  ;;  %v3983_v48 = vor.u32 %v5184_v40, %v3982_v39  ;;  %2208 = vmatpush.bf16.msrb.mxu2 %v4255_v38  ;;  %v5039_v31 = vld [vmem:[#allocation2 + $0x1c] sm:$0xf]  ;;  %v3683_v38 = vor.u32 %v5106_v18, %v3680_v20 }
  0x58   :  { %v4238_v44 = vld [vmem:[#allocation5 + $0x640] sm:$0xf]  ;;  %v5248_v45 = vld [vmem:[#allocation5 + $0x64c] sm:$0xf0]  ;;  %v4111_v50 = vor.u32 %v5216_v43, %v4110_v41  ;;  %2222 = vmatpush.bf16.msrb.mxu3 %v4383_v42  ;;  %v3424_v32 = vld [vmem:[#allocation2 + $0x40] sm:$0xf0] }
  0x59   :  { %v4366_v46 = vld [vmem:[#allocation5 + $0x740] sm:$0xf]  ;;  %v5280_v47 = vld [vmem:[#allocation5 + $0x74c] sm:$0xf0]  ;;  %v4239_v51 = vor.u32 %v5248_v45, %v4238_v44  ;;  %2181 = vmatpush.bf16.msrb.mxu0 %v3983_v48  ;;  %v5070_v41 = vld [vmem:[#allocation5 + $0xc4] sm:$0xf]  ;;  %v5761_v44 = vor.u32 %v5038_v27, %v3416_v30 }
  0x5a   :  { %v3966_v49 = vld [vmem:[#allocation5 + $0x420] sm:$0xf]  ;;  %v5180_v52 = vld [vmem:[#allocation5 + $0x42c] sm:$0xf0]  ;;  %v4367_v55 = vor.u32 %v5280_v47, %v4366_v46  ;;  %2195 = vmatpush.bf16.msrb.mxu1 %v4111_v50  ;;  %v3536_v42 = vld [vmem:[#allocation5 + $0xd0] sm:$0xf0]  ;;  %v5763_v47 = vor.u32 %v5039_v31, %v3424_v32 }
  0x5b   :  { %v4094_v53 = vld [vmem:[#allocation5 + $0x520] sm:$0xf]  ;;  %v5212_v54 = vld [vmem:[#allocation5 + $0x52c] sm:$0xf0]  ;;  %v3967_v63 = vor.u32 %v5180_v52, %v3966_v49  ;;  %2209 = vmatpush.bf16.msrb.mxu2 %v4239_v51  ;;  %v5102_v45 = vld [vmem:[#allocation5 + $0x1c4] sm:$0xf]  ;;  %v3539_v50 = vor.u32 %v5070_v41, %v3536_v42 }
  0x5c   :  { %v4222_v56 = vld [vmem:[#allocation5 + $0x620] sm:$0xf]  ;;  %v5244_v57 = vld [vmem:[#allocation5 + $0x62c] sm:$0xf0]  ;;  %v4095_v5 = vor.u32 %v5212_v54, %v4094_v53  ;;  %2223 = vmatpush.bf16.msrb.mxu3 %v4367_v55  ;;  %v3664_v46 = vld [vmem:[#allocation5 + $0x1d0] sm:$0xf0] }
  0x5d   :  { %v4350_v59 = vld [vmem:[#allocation5 + $0x720] sm:$0xf]  ;;  %v5276_v60 = vld [vmem:[#allocation5 + $0x72c] sm:$0xf0]  ;;  %v4223_v6 = vor.u32 %v5244_v57, %v4222_v56  ;;  %2182 = vmatpush.bf16.msrb.mxu0 %v3967_v63  ;;  %v3667_v54 = vor.u32 %v5102_v45, %v3664_v46  ;;  %v5066_v56 = vld [vmem:[#allocation5 + $0xa4] sm:$0xf] }
  0x5e   :  { %v3950_v61 = vld [vmem:[#allocation5 + $0x400] sm:$0xf]  ;;  %v5176_v62 = vld [vmem:[#allocation5 + $0x40c] sm:$0xf0]  ;;  %v4351_v11 = vor.u32 %v5276_v60, %v4350_v59  ;;  %2196 = vmatpush.bf16.msrb.mxu1 %v4095_v5  ;;  %v3520_v57 = vld [vmem:[#allocation5 + $0xb0] sm:$0xf0] }
  0x5f   :  { %v4078_v0 = vld [vmem:[#allocation5 + $0x500] sm:$0xf]  ;;  %v5208_v2 = vld [vmem:[#allocation5 + $0x50c] sm:$0xf0]  ;;  %v3951_v19 = vor.u32 %v5176_v62, %v3950_v61  ;;  %2210 = vmatpush.bf16.msrb.mxu2 %v4223_v6  ;;  %v5098_v59 = vld [vmem:[#allocation5 + $0x1a4] sm:$0xf]  ;;  %v3523_v63 = vor.u32 %v5066_v56, %v3520_v57 }
  0x60   :  { %v4206_v3 = vld [vmem:[#allocation5 + $0x600] sm:$0xf]  ;;  %v5240_v4 = vld [vmem:[#allocation5 + $0x60c] sm:$0xf0]  ;;  %v4079_v23 = vor.u32 %v5208_v2, %v4078_v0  ;;  %2224 = vmatpush.bf16.msrb.mxu3 %v4351_v11  ;;  %v3648_v60 = vld [vmem:[#allocation5 + $0x1b0] sm:$0xf0] }
  0x61   :  { %v4334_v7 = vld [vmem:[#allocation5 + $0x700] sm:$0xf]  ;;  %v5272_v8 = vld [vmem:[#allocation5 + $0x70c] sm:$0xf0]  ;;  %v4207_v24 = vor.u32 %v5240_v4, %v4206_v3  ;;  %2183 = vmatpush.bf16.msrb.mxu0 %v3951_v19  ;;  %v3651_v4 = vor.u32 %v5098_v59, %v3648_v60  ;;  %v5062_v6 = vld [vmem:[#allocation5 + $0x84] sm:$0xf] }
  0x62   :  { %v4574_v9 = vld [vmem:[#allocation5 + $0x8e0] sm:$0xf]  ;;  %v5332_v12 = vld [vmem:[#allocation5 + $0x8ec] sm:$0xf0]  ;;  %v4335_v28 = vor.u32 %v5272_v8, %v4334_v7  ;;  %2197 = vmatpush.bf16.msrb.mxu1 %v4079_v23  ;;  %v3504_v7 = vld [vmem:[#allocation5 + $0x90] sm:$0xf0] }
  0x63   :  { %v4702_v13 = vld [vmem:[#allocation5 + $0x9e0] sm:$0xf]  ;;  %v5364_v14 = vld [vmem:[#allocation5 + $0x9ec] sm:$0xf0]  ;;  %v4575_v29 = vor.u32 %v5332_v12, %v4574_v9  ;;  %2211 = vmatpush.bf16.msrb.mxu2 %v4207_v24  ;;  %v5094_v8 = vld [vmem:[#allocation5 + $0x184] sm:$0xf] }
  0x64   :  { %v3414_v21 = vld [vmem:[#allocation2 + $0x10] sm:$0xf]  ;;  %v5044_v26 = vld [vmem:[#allocation2 + $0x3c] sm:$0xf0]  ;;  %v4703_v33 = vor.u32 %v5364_v14, %v4702_v13  ;;  %2225 = vmatpush.bf16.msrb.mxu3 %v4335_v28  ;;  %v3632_v9 = vld [vmem:[#allocation5 + $0x190] sm:$0xf0]  ;;  %v3507_v13 = vor.u32 %v5062_v6, %v3504_v7 }
  0x65   :  { %v4558_v35 = vld [vmem:[#allocation5 + $0x8c0] sm:$0xf]  ;;  %v5328_v36 = vld [vmem:[#allocation5 + $0x8cc] sm:$0xf0]  ;;  %v5757_v39 = vor.u32 %v5043_v22, %v3414_v21  ;;  %v5759_v43 = vor.u32 %v5044_v26, %v3422_v25  ;;  %2232 = vmatpush.bf16.msra.mxu0 %v4575_v29  ;;  %2198 = vmatmul.bf16.vlgmr.msrb.gmra.mxu1 %v5761_v44  ;;  %v3635_v18 = vor.u32 %v5094_v8, %v3632_v9  ;;  %v5058_v20 = vld [vmem:[#allocation5 + $0x64] sm:$0xf] }
  0x66   :  { %v4686_v37 = vld [vmem:[#allocation5 + $0x9c0] sm:$0xf]  ;;  %v5360_v40 = vld [vmem:[#allocation5 + $0x9cc] sm:$0xf0]  ;;  %v4559_v48 = vor.u32 %v5328_v36, %v4558_v35  ;;  %2246 = vmatpush.bf16.msra.mxu1 %v4703_v33  ;;  %v3488_v21 = vld [vmem:[#allocation5 + $0x70] sm:$0xf0] }
  0x67   :  { %2260 = vmatpush.bf16.msra.mxu2 %v3555_v34  ;;  %v4687_v49 = vor.u32 %v5360_v40, %v4686_v37  ;;  %v4542_v51 = vld [vmem:[#allocation5 + $0x8a0] sm:$0xf]  ;;  %v5324_v52 = vld [vmem:[#allocation5 + $0x8ac] sm:$0xf0]  ;;  %2184 = vmatmul.bf16.vlgmr.msrb.gmra.mxu0 %v5757_v39  ;;  %v5090_v22 = vld [vmem:[#allocation5 + $0x164] sm:$0xf]  ;;  %v3491_v26 = vor.u32 %v5058_v20, %v3488_v21 }
  0x68   :  { %v4670_v53 = vld [vmem:[#allocation5 + $0x9a0] sm:$0xf]  ;;  %2274 = vmatpush.bf16.msra.mxu3 %v3683_v38  ;;  %v5356_v55 = vld [vmem:[#allocation5 + $0x9ac] sm:$0xf0]  ;;  %2212 = vmatmul.bf16.vlgmr.msrb.gmra.mxu2 %v5759_v43  ;;  %v4543_v61 = vor.u32 %v5324_v52, %v4542_v51  ;;  %v3616_v23 = vld [vmem:[#allocation5 + $0x170] sm:$0xf0] }
  0x69   :  { %2226 = vmatmul.bf16.vlgmr.msrb.gmra.mxu3 %v5763_v47  ;;  %2233 = vmatpush.bf16.msra.mxu0 %v4559_v48  ;;  %v4671_v62 = vor.u32 %v5356_v55, %v4670_v53  ;;  %v4526_v0 = vld [vmem:[#allocation5 + $0x880] sm:$0xf]  ;;  %v5320_v2 = vld [vmem:[#allocation5 + $0x88c] sm:$0xf0]  ;;  %v3619_v30 = vor.u32 %v5090_v22, %v3616_v23  ;;  %v5054_v32 = vld [vmem:[#allocation5 + $0x44] sm:$0xf] }
  0x6a   :  { %2247 = vmatpush.bf16.msra.mxu1 %v4687_v49  ;;  %v4654_v3 = vld [vmem:[#allocation5 + $0x980] sm:$0xf]  ;;  %v5352_v5 = vld [vmem:[#allocation5 + $0x98c] sm:$0xf0]  ;;  %v4527_v11 = vor.u32 %v5320_v2, %v4526_v0  ;;  %v3472_v33 = vld [vmem:[#allocation5 + $0x50] sm:$0xf0] }
  0x6b   :  { %2261 = vmatpush.bf16.msra.mxu2 %v3539_v50  ;;  %v4655_v12 = vor.u32 %v5352_v5, %v4654_v3  ;;  %v4510_v14 = vld [vmem:[#allocation5 + $0x860] sm:$0xf]  ;;  %v5316_v15 = vld [vmem:[#allocation5 + $0x86c] sm:$0xf0]  ;;  %v5086_v34 = vld [vmem:[#allocation5 + $0x144] sm:$0xf]  ;;  %v3475_v38 = vor.u32 %v5054_v32, %v3472_v33 }
  0x6c   :  { %2275 = vmatpush.bf16.msra.mxu3 %v3667_v54  ;;  %v4638_v16 = vld [vmem:[#allocation5 + $0x960] sm:$0xf]  ;;  %v5348_v19 = vld [vmem:[#allocation5 + $0x96c] sm:$0xf0]  ;;  %v4511_v24 = vor.u32 %v5316_v15, %v4510_v14  ;;  %v3600_v35 = vld [vmem:[#allocation5 + $0x150] sm:$0xf0] }
  0x6d   :  { %2234 = vmatpush.bf16.msra.mxu0 %v4543_v61  ;;  %v4639_v25 = vor.u32 %v5348_v19, %v4638_v16  ;;  %v4494_v27 = vld [vmem:[#allocation5 + $0x840] sm:$0xf]  ;;  %v5312_v28 = vld [vmem:[#allocation5 + $0x84c] sm:$0xf0]  ;;  %v3603_v45 = vor.u32 %v5086_v34, %v3600_v35  ;;  %v5050_v48 = vld [vmem:[#allocation5 + $0x24] sm:$0xf] }
  0x6e   :  { %2248 = vmatpush.bf16.msra.mxu1 %v4671_v62  ;;  %v4622_v29 = vld [vmem:[#allocation5 + $0x940] sm:$0xf]  ;;  %v5344_v31 = vld [vmem:[#allocation5 + $0x94c] sm:$0xf0]  ;;  %v4495_v36 = vor.u32 %v5312_v28, %v4494_v27  ;;  %v3456_v49 = vld [vmem:[#allocation5 + $0x30] sm:$0xf0] }
  0x6f   :  { %2262 = vmatpush.bf16.msra.mxu2 %v3523_v63  ;;  %v4623_v37 = vor.u32 %v5344_v31, %v4622_v29  ;;  %v4478_v40 = vld [vmem:[#allocation5 + $0x820] sm:$0xf]  ;;  %v5308_v41 = vld [vmem:[#allocation5 + $0x82c] sm:$0xf0]  ;;  %v5082_v50 = vld [vmem:[#allocation5 + $0x124] sm:$0xf]  ;;  %v3459_v57 = vor.u32 %v5050_v48, %v3456_v49 }
  0x70   :  { %2276 = vmatpush.bf16.msra.mxu3 %v3651_v4  ;;  %v4606_v42 = vld [vmem:[#allocation5 + $0x920] sm:$0xf]  ;;  %v5340_v46 = vld [vmem:[#allocation5 + $0x92c] sm:$0xf0]  ;;  %v3584_v51 = vld [vmem:[#allocation5 + $0x130] sm:$0xf0]  ;;  %v4479_v52 = vor.u32 %v5308_v41, %v4478_v40 }
  0x71   :  { %2235 = vmatpush.bf16.msra.mxu0 %v4527_v11  ;;  %v4462_v53 = vld [vmem:[#allocation5 + $0x800] sm:$0xf]  ;;  %v5304_v54 = vld [vmem:[#allocation5 + $0x80c] sm:$0xf0]  ;;  %v4607_v56 = vor.u32 %v5340_v46, %v4606_v42  ;;  %v5046_v60 = vld [vmem:[#allocation5 + $0x4] sm:$0xf]  ;;  %v3587_v62 = vor.u32 %v5082_v50, %v3584_v51 }
  0x72   :  { %2249 = vmatpush.bf16.msra.mxu1 %v4655_v12  ;;  %v4590_v55 = vld [vmem:[#allocation5 + $0x900] sm:$0xf]  ;;  %v5336_v59 = vld [vmem:[#allocation5 + $0x90c] sm:$0xf0]  ;;  %v3440_v61 = vld [vmem:[#allocation5 + $0x10] sm:$0xf0]  ;;  %v4463_v6 = vor.u32 %v5304_v54, %v4462_v53 }
  0x73   :  { %2263 = vmatpush.bf16.msra.mxu2 %v3507_v13  ;;  %v5078_v63 = vld [vmem:[#allocation5 + $0x104] sm:$0xf]  ;;  %v3568_v0 = vld [vmem:[#allocation5 + $0x110] sm:$0xf0]  ;;  %v4591_v11 = vor.u32 %v5336_v59, %v4590_v55  ;;  %v3443_v12 = vor.u32 %v5046_v60, %v3440_v61  ;;  %v3430_v14 = vld [vmem:[#allocation2 + $0x20] sm:$0xf] }
  0x74   :  { %2277 = vmatpush.bf16.msra.mxu3 %v3635_v18  ;;  %v5138_v2 = vld [vmem:[#allocation5 + $0x2e4] sm:$0xf]  ;;  %v3808_v3 = vld [vmem:[#allocation5 + $0x2f0] sm:$0xf0]  ;;  %v5045_v15 = vld [vmem:[#allocation2 + $0x44] sm:$0xf0]  ;;  %v3571_v16 = vor.u32 %v5078_v63, %v3568_v0 }
  0x75   :  { %2236 = vmatpush.bf16.msra.mxu0 %v4511_v24  ;;  %v5170_v4 = vld [vmem:[#allocation5 + $0x3e4] sm:$0xf]  ;;  %v3936_v5 = vld [vmem:[#allocation5 + $0x3f0] sm:$0xf0]  ;;  %v3811_v18 = vor.u32 %v5138_v2, %v3808_v3  ;;  %v3432_v20 = vld [vmem:[#allocation2 + $0x48] sm:$0xf0]  ;;  %v5769_v27 = vor.u32 %v5045_v15, %v3430_v14 }
  0x76   :  { %2250 = vmatpush.bf16.msra.mxu1 %v4639_v25  ;;  %v5202_v7 = vld [vmem:[#allocation5 + $0x4e4] sm:$0xf]  ;;  %v4064_v8 = vld [vmem:[#allocation5 + $0x4f0] sm:$0xf0]  ;;  %v3939_v21 = vor.u32 %v5170_v4, %v3936_v5 }
  0x77   :  { %2264 = vmatpush.bf16.msra.mxu2 %v3491_v26  ;;  %v5234_v9 = vld [vmem:[#allocation5 + $0x5e4] sm:$0xf]  ;;  %v4192_v13 = vld [vmem:[#allocation5 + $0x5f0] sm:$0xf0]  ;;  %v4067_v22 = vor.u32 %v5202_v7, %v4064_v8 }
  0x78   :  { %2278 = vmatpush.bf16.msra.mxu3 %v3619_v30  ;;  %v5040_v19 = vld [vmem:[#allocation2 + $0x24] sm:$0xf]  ;;  %v5134_v23 = vld [vmem:[#allocation5 + $0x2c4] sm:$0xf]  ;;  %v4195_v26 = vor.u32 %v5234_v9, %v4192_v13 }
  0x79   :  { %2237 = vmatpush.bf16.msra.mxu0 %v4495_v36  ;;  %v3792_v24 = vld [vmem:[#allocation5 + $0x2d0] sm:$0xf0]  ;;  %v5166_v25 = vld [vmem:[#allocation5 + $0x3c4] sm:$0xf]  ;;  %v5771_v31 = vor.u32 %v5040_v19, %v3432_v20 }
  0x7a   :  { %2251 = vmatpush.bf16.msra.mxu1 %v4623_v37  ;;  %v3920_v28 = vld [vmem:[#allocation5 + $0x3d0] sm:$0xf0]  ;;  %v5198_v29 = vld [vmem:[#allocation5 + $0x4c4] sm:$0xf]  ;;  %v3795_v34 = vor.u32 %v5134_v23, %v3792_v24 }
  0x7b   :  { %2265 = vmatpush.bf16.msra.mxu2 %v3475_v38  ;;  %v4048_v30 = vld [vmem:[#allocation5 + $0x4d0] sm:$0xf0]  ;;  %v5230_v32 = vld [vmem:[#allocation5 + $0x5c4] sm:$0xf]  ;;  %v3923_v35 = vor.u32 %v5166_v25, %v3920_v28 }
  0x7c   :  { %2279 = vmatpush.bf16.msra.mxu3 %v3603_v45  ;;  %v4176_v33 = vld [vmem:[#allocation5 + $0x5d0] sm:$0xf0]  ;;  %v4051_v36 = vor.u32 %v5198_v29, %v4048_v30  ;;  %v5130_v37 = vld [vmem:[#allocation5 + $0x2a4] sm:$0xf] }
  0x7d   :  { %2238 = vmatpush.bf16.msra.mxu0 %v4479_v52  ;;  %v3776_v38 = vld [vmem:[#allocation5 + $0x2b0] sm:$0xf0]  ;;  %v5162_v40 = vld [vmem:[#allocation5 + $0x3a4] sm:$0xf]  ;;  %v4179_v41 = vor.u32 %v5230_v32, %v4176_v33 }
  0x7e   :  { %2252 = vmatpush.bf16.msra.mxu1 %v4607_v56  ;;  %v3904_v42 = vld [vmem:[#allocation5 + $0x3b0] sm:$0xf0]  ;;  %v5194_v45 = vld [vmem:[#allocation5 + $0x4a4] sm:$0xf]  ;;  %v3779_v50 = vor.u32 %v5130_v37, %v3776_v38 }
  0x7f   :  { %2266 = vmatpush.bf16.msra.mxu2 %v3459_v57  ;;  %v4032_v46 = vld [vmem:[#allocation5 + $0x4b0] sm:$0xf0]  ;;  %v5226_v48 = vld [vmem:[#allocation5 + $0x5a4] sm:$0xf]  ;;  %v3907_v51 = vor.u32 %v5162_v40, %v3904_v42 }
  0x80   :  { %2280 = vmatpush.bf16.msra.mxu3 %v3587_v62  ;;  %v4160_v49 = vld [vmem:[#allocation5 + $0x5b0] sm:$0xf0]  ;;  %v4035_v52 = vor.u32 %v5194_v45, %v4032_v46  ;;  %v5126_v53 = vld [vmem:[#allocation5 + $0x284] sm:$0xf] }
  0x81   :  { %2239 = vmatpush.bf16.msra.mxu0 %v4463_v6  ;;  %v3760_v54 = vld [vmem:[#allocation5 + $0x290] sm:$0xf0]  ;;  %v5158_v55 = vld [vmem:[#allocation5 + $0x384] sm:$0xf]  ;;  %v4163_v56 = vor.u32 %v5226_v48, %v4160_v49 }
  0x82   :  { %2253 = vmatpush.bf16.msra.mxu1 %v4591_v11  ;;  %v3888_v57 = vld [vmem:[#allocation5 + $0x390] sm:$0xf0]  ;;  %v5190_v59 = vld [vmem:[#allocation5 + $0x484] sm:$0xf]  ;;  %v3763_v63 = vor.u32 %v5126_v53, %v3760_v54 }
  0x83   :  { %2267 = vmatpush.bf16.msra.mxu2 %v3443_v12  ;;  %v4016_v60 = vld [vmem:[#allocation5 + $0x490] sm:$0xf0]  ;;  %v5222_v61 = vld [vmem:[#allocation5 + $0x584] sm:$0xf]  ;;  %v3891_v0 = vor.u32 %v5158_v55, %v3888_v57 }
  0x84   :  { %2281 = vmatpush.bf16.msra.mxu3 %v3571_v16  ;;  %2240 = vmatmul.bf16.vlgmr.msra.gmra.mxu0 %v5769_v27  ;;  %v4144_v62 = vld [vmem:[#allocation5 + $0x590] sm:$0xf0]  ;;  %v4019_v2 = vor.u32 %v5190_v59, %v4016_v60  ;;  %v5122_v3 = vld [vmem:[#allocation5 + $0x264] sm:$0xf] }
  0x85   :  { %2288 = vmatpush.bf16.msrb.mxu0 %v3811_v18  ;;  %2254 = vmatmul.bf16.vlgmr.msra.gmra.mxu1 %v5771_v31  ;;  %v3744_v4 = vld [vmem:[#allocation5 + $0x270] sm:$0xf0]  ;;  %v5154_v5 = vld [vmem:[#allocation5 + $0x364] sm:$0xf]  ;;  %v4147_v6 = vor.u32 %v5222_v61, %v4144_v62 }
  0x86   :  { %2302 = vmatpush.bf16.msrb.mxu1 %v3939_v21  ;;  %2268 = vmatmul.bf16.vlgmr.msra.gmra.mxu2 %v5745_v58  ;;  %v3872_v7 = vld [vmem:[#allocation5 + $0x370] sm:$0xf0]  ;;  %v5186_v8 = vld [vmem:[#allocation5 + $0x464] sm:$0xf]  ;;  %v3747_v13 = vor.u32 %v5122_v3, %v3744_v4 }
  0x87   :  { %2316 = vmatpush.bf16.msrb.mxu2 %v4067_v22  ;;  %2282 = vmatmul.bf16.vlgmr.msra.gmra.mxu3 %v5751_v10  ;;  %v4000_v9 = vld [vmem:[#allocation5 + $0x470] sm:$0xf0]  ;;  %v5218_v11 = vld [vmem:[#allocation5 + $0x564] sm:$0xf]  ;;  %v3875_v14 = vor.u32 %v5154_v5, %v3872_v7 }
  0x88   :  { %2330 = vmatpush.bf16.msrb.mxu3 %v4195_v26  ;;  %v4128_v12 = vld [vmem:[#allocation5 + $0x570] sm:$0xf0]  ;;  %v4003_v15 = vor.u32 %v5186_v8, %v4000_v9  ;;  %v5118_v16 = vld [vmem:[#allocation5 + $0x244] sm:$0xf] }
  0x89   :  { %2289 = vmatpush.bf16.msrb.mxu0 %v3795_v34  ;;  %v3728_v18 = vld [vmem:[#allocation5 + $0x250] sm:$0xf0]  ;;  %v5150_v19 = vld [vmem:[#allocation5 + $0x344] sm:$0xf]  ;;  %v4131_v20 = vor.u32 %v5218_v11, %v4128_v12 }
  0x8a   :  { %2303 = vmatpush.bf16.msrb.mxu1 %v3923_v35  ;;  %v3856_v21 = vld [vmem:[#allocation5 + $0x350] sm:$0xf0]  ;;  %v5182_v22 = vld [vmem:[#allocation5 + $0x444] sm:$0xf]  ;;  %v3731_v26 = vor.u32 %v5118_v16, %v3728_v18 }
  0x8b   :  { %2317 = vmatpush.bf16.msrb.mxu2 %v4051_v36  ;;  %v3984_v23 = vld [vmem:[#allocation5 + $0x450] sm:$0xf0]  ;;  %v5214_v24 = vld [vmem:[#allocation5 + $0x544] sm:$0xf]  ;;  %v3859_v28 = vor.u32 %v5150_v19, %v3856_v21 }
  0x8c   :  { %2331 = vmatpush.bf16.msrb.mxu3 %v4179_v41  ;;  %v4112_v25 = vld [vmem:[#allocation5 + $0x550] sm:$0xf0]  ;;  %v3987_v29 = vor.u32 %v5182_v22, %v3984_v23  ;;  %v5114_v30 = vld [vmem:[#allocation5 + $0x224] sm:$0xf] }
  0x8d   :  { %2290 = vmatpush.bf16.msrb.mxu0 %v3779_v50  ;;  %v3712_v32 = vld [vmem:[#allocation5 + $0x230] sm:$0xf0]  ;;  %v5146_v33 = vld [vmem:[#allocation5 + $0x324] sm:$0xf]  ;;  %v4115_v34 = vor.u32 %v5214_v24, %v4112_v25 }
  0x8e   :  { %2304 = vmatpush.bf16.msrb.mxu1 %v3907_v51  ;;  %v3840_v35 = vld [vmem:[#allocation5 + $0x330] sm:$0xf0]  ;;  %v5178_v36 = vld [vmem:[#allocation5 + $0x424] sm:$0xf]  ;;  %v3715_v41 = vor.u32 %v5114_v30, %v3712_v32 }
  0x8f   :  { %2318 = vmatpush.bf16.msrb.mxu2 %v4035_v52  ;;  %v3968_v37 = vld [vmem:[#allocation5 + $0x430] sm:$0xf0]  ;;  %v5210_v38 = vld [vmem:[#allocation5 + $0x524] sm:$0xf]  ;;  %v3843_v46 = vor.u32 %v5146_v33, %v3840_v35 }
  0x90   :  { %2332 = vmatpush.bf16.msrb.mxu3 %v4163_v56  ;;  %v4096_v40 = vld [vmem:[#allocation5 + $0x530] sm:$0xf0]  ;;  %v5110_v42 = vld [vmem:[#allocation5 + $0x204] sm:$0xf]  ;;  %v3971_v48 = vor.u32 %v5178_v36, %v3968_v37 }
  0x91   :  { %2291 = vmatpush.bf16.msrb.mxu0 %v3763_v63  ;;  %v3696_v45 = vld [vmem:[#allocation5 + $0x210] sm:$0xf0]  ;;  %v5142_v49 = vld [vmem:[#allocation5 + $0x304] sm:$0xf]  ;;  %v4099_v52 = vor.u32 %v5210_v38, %v4096_v40 }
  0x92   :  { %2305 = vmatpush.bf16.msrb.mxu1 %v3891_v0  ;;  %v3824_v50 = vld [vmem:[#allocation5 + $0x310] sm:$0xf0]  ;;  %v5174_v51 = vld [vmem:[#allocation5 + $0x404] sm:$0xf]  ;;  %v3699_v60 = vor.u32 %v5110_v42, %v3696_v45 }
  0x93   :  { %2319 = vmatpush.bf16.msrb.mxu2 %v4019_v2  ;;  %v3952_v53 = vld [vmem:[#allocation5 + $0x410] sm:$0xf0]  ;;  %v5206_v54 = vld [vmem:[#allocation5 + $0x504] sm:$0xf]  ;;  %v3827_v0 = vor.u32 %v5142_v49, %v3824_v50 }
  0x94   :  { %2333 = vmatpush.bf16.msrb.mxu3 %v4147_v6  ;;  %v4080_v55 = vld [vmem:[#allocation5 + $0x510] sm:$0xf0]  ;;  %v5266_v56 = vld [vmem:[#allocation5 + $0x6e4] sm:$0xf]  ;;  %v3955_v2 = vor.u32 %v5174_v51, %v3952_v53 }
  0x95   :  { %2292 = vmatpush.bf16.msrb.mxu0 %v3747_v13  ;;  %v4320_v57 = vld [vmem:[#allocation5 + $0x6f0] sm:$0xf0]  ;;  %v5298_v59 = vld [vmem:[#allocation5 + $0x7e4] sm:$0xf]  ;;  %v4083_v5 = vor.u32 %v5206_v54, %v4080_v55 }
  0x96   :  { %2306 = vmatpush.bf16.msrb.mxu1 %v3875_v14  ;;  %v4448_v61 = vld [vmem:[#allocation5 + $0x7f0] sm:$0xf0]  ;;  %v5330_v62 = vld [vmem:[#allocation5 + $0x8e4] sm:$0xf]  ;;  %v4323_v6 = vor.u32 %v5266_v56, %v4320_v57 }
  0x97   :  { %2320 = vmatpush.bf16.msrb.mxu2 %v4003_v15  ;;  %v4576_v63 = vld [vmem:[#allocation5 + $0x8f0] sm:$0xf0]  ;;  %v5362_v3 = vld [vmem:[#allocation5 + $0x9e4] sm:$0xf]  ;;  %v4451_v7 = vor.u32 %v5298_v59, %v4448_v61 }
  0x98   :  { %2334 = vmatpush.bf16.msrb.mxu3 %v4131_v20  ;;  %v4704_v4 = vld [vmem:[#allocation5 + $0x9f0] sm:$0xf0]  ;;  %v4579_v8 = vor.u32 %v5330_v62, %v4576_v63  ;;  %v5262_v9 = vld [vmem:[#allocation5 + $0x6c4] sm:$0xf] }
  0x99   :  { %2293 = vmatpush.bf16.msrb.mxu0 %v3731_v26  ;;  %v4304_v11 = vld [vmem:[#allocation5 + $0x6d0] sm:$0xf0]  ;;  %v5294_v12 = vld [vmem:[#allocation5 + $0x7c4] sm:$0xf]  ;;  %v4707_v13 = vor.u32 %v5362_v3, %v4704_v4 }
  0x9a   :  { %2307 = vmatpush.bf16.msrb.mxu1 %v3859_v28  ;;  %v4432_v14 = vld [vmem:[#allocation5 + $0x7d0] sm:$0xf0]  ;;  %v5326_v15 = vld [vmem:[#allocation5 + $0x8c4] sm:$0xf]  ;;  %v4307_v20 = vor.u32 %v5262_v9, %v4304_v11 }
  0x9b   :  { %2321 = vmatpush.bf16.msrb.mxu2 %v3987_v29  ;;  %v4560_v16 = vld [vmem:[#allocation5 + $0x8d0] sm:$0xf0]  ;;  %v5358_v18 = vld [vmem:[#allocation5 + $0x9c4] sm:$0xf]  ;;  %v4435_v21 = vor.u32 %v5294_v12, %v4432_v14 }
  0x9c   :  { %2335 = vmatpush.bf16.msrb.mxu3 %v4115_v34  ;;  %v4688_v19 = vld [vmem:[#allocation5 + $0x9d0] sm:$0xf0]  ;;  %v4563_v22 = vor.u32 %v5326_v15, %v4560_v16  ;;  %v5258_v23 = vld [vmem:[#allocation5 + $0x6a4] sm:$0xf] }
  0x9d   :  { %2294 = vmatpush.bf16.msrb.mxu0 %v3715_v41  ;;  %v4288_v24 = vld [vmem:[#allocation5 + $0x6b0] sm:$0xf0]  ;;  %v5290_v25 = vld [vmem:[#allocation5 + $0x7a4] sm:$0xf]  ;;  %v4691_v26 = vor.u32 %v5358_v18, %v4688_v19 }
  0x9e   :  { %2308 = vmatpush.bf16.msrb.mxu1 %v3843_v46  ;;  %v4416_v28 = vld [vmem:[#allocation5 + $0x7b0] sm:$0xf0]  ;;  %v5322_v29 = vld [vmem:[#allocation5 + $0x8a4] sm:$0xf]  ;;  %v4291_v34 = vor.u32 %v5258_v23, %v4288_v24 }
  0x9f   :  { %2322 = vmatpush.bf16.msrb.mxu2 %v3971_v48  ;;  %v4544_v30 = vld [vmem:[#allocation5 + $0x8b0] sm:$0xf0]  ;;  %v5354_v32 = vld [vmem:[#allocation5 + $0x9a4] sm:$0xf]  ;;  %v4419_v35 = vor.u32 %v5290_v25, %v4416_v28 }
  0xa0   :  { %2336 = vmatpush.bf16.msrb.mxu3 %v4099_v52  ;;  %v4672_v33 = vld [vmem:[#allocation5 + $0x9b0] sm:$0xf0]  ;;  %v4547_v36 = vor.u32 %v5322_v29, %v4544_v30  ;;  %v5254_v37 = vld [vmem:[#allocation5 + $0x684] sm:$0xf] }
  0xa1   :  { %2295 = vmatpush.bf16.msrb.mxu0 %v3699_v60  ;;  %v4272_v38 = vld [vmem:[#allocation5 + $0x690] sm:$0xf0]  ;;  %v5286_v40 = vld [vmem:[#allocation5 + $0x784] sm:$0xf]  ;;  %v4675_v41 = vor.u32 %v5354_v32, %v4672_v33 }
  0xa2   :  { %2309 = vmatpush.bf16.msrb.mxu1 %v3827_v0  ;;  %v4400_v42 = vld [vmem:[#allocation5 + $0x790] sm:$0xf0]  ;;  %v5318_v45 = vld [vmem:[#allocation5 + $0x884] sm:$0xf]  ;;  %v4275_v50 = vor.u32 %v5254_v37, %v4272_v38 }
  0xa3   :  { %2323 = vmatpush.bf16.msrb.mxu2 %v3955_v2  ;;  %v4528_v46 = vld [vmem:[#allocation5 + $0x890] sm:$0xf0]  ;;  %v5350_v48 = vld [vmem:[#allocation5 + $0x984] sm:$0xf]  ;;  %v4403_v51 = vor.u32 %v5286_v40, %v4400_v42  ;;  %v5077_v42 = vld [vmem:[#allocation5 + $0xf4] sm:$0xf0] }
  0xa4   :  { %2337 = vmatpush.bf16.msrb.mxu3 %v4083_v5  ;;  %2296 = vmatmul.bf16.vlgmr.msrb.gmra.mxu0 %v5747_v1  ;;  %v4656_v49 = vld [vmem:[#allocation5 + $0x990] sm:$0xf0]  ;;  %v4531_v52 = vor.u32 %v5318_v45, %v4528_v46  ;;  %v5250_v53 = vld [vmem:[#allocation5 + $0x664] sm:$0xf]  ;;  %v3686_v45 = vld [vmem:[#allocation5 + $0x1e8] sm:$0xf] }
  0xa5   :  { %2344 = vmatpush.bf16.msra.mxu0 %v4323_v6  ;;  %2310 = vmatmul.bf16.vlgmr.msrb.gmra.mxu1 %v5753_v17  ;;  %v4256_v54 = vld [vmem:[#allocation5 + $0x670] sm:$0xf0]  ;;  %v5282_v55 = vld [vmem:[#allocation5 + $0x764] sm:$0xf]  ;;  %v4659_v56 = vor.u32 %v5350_v48, %v4656_v49  ;;  %v5109_v48 = vld [vmem:[#allocation5 + $0x1f4] sm:$0xf0] }
  0xa6   :  { %2358 = vmatpush.bf16.msra.mxu1 %v4451_v7  ;;  %2324 = vmatmul.bf16.vlgmr.msrb.gmra.mxu2 %v5757_v39  ;;  %v4384_v57 = vld [vmem:[#allocation5 + $0x770] sm:$0xf0]  ;;  %v5314_v59 = vld [vmem:[#allocation5 + $0x864] sm:$0xf]  ;;  %v4259_v63 = vor.u32 %v5250_v53, %v4256_v54  ;;  %v3814_v49 = vld [vmem:[#allocation5 + $0x2e8] sm:$0xf] }
  0xa7   :  { %2372 = vmatpush.bf16.msra.mxu2 %v4579_v8  ;;  %2338 = vmatmul.bf16.vlgmr.msrb.gmra.mxu3 %v5761_v44  ;;  %v4512_v60 = vld [vmem:[#allocation5 + $0x870] sm:$0xf0]  ;;  %v5346_v61 = vld [vmem:[#allocation5 + $0x964] sm:$0xf]  ;;  %v4387_v0 = vor.u32 %v5282_v55, %v4384_v57  ;;  %v3942_v53 = vld [vmem:[#allocation5 + $0x3e8] sm:$0xf]  ;;  %v3687_v57 = vor.u32 %v5109_v48, %v3686_v45 }
  0xa8   :  { %2386 = vmatpush.bf16.msra.mxu3 %v4707_v13  ;;  %v4640_v62 = vld [vmem:[#allocation5 + $0x970] sm:$0xf0]  ;;  %v4515_v2 = vor.u32 %v5314_v59, %v4512_v60  ;;  %v5246_v3 = vld [vmem:[#allocation5 + $0x644] sm:$0xf]  ;;  %v5173_v54 = vld [vmem:[#allocation5 + $0x3f4] sm:$0xf0] }
  0xa9   :  { %2345 = vmatpush.bf16.msra.mxu0 %v4307_v20  ;;  %v4240_v4 = vld [vmem:[#allocation5 + $0x650] sm:$0xf0]  ;;  %v5278_v5 = vld [vmem:[#allocation5 + $0x744] sm:$0xf]  ;;  %v4643_v6 = vor.u32 %v5346_v61, %v4640_v62  ;;  %v3542_v60 = vld [vmem:[#allocation5 + $0xc8] sm:$0xf] }
  0xaa   :  { %2359 = vmatpush.bf16.msra.mxu1 %v4435_v21  ;;  %v4368_v7 = vld [vmem:[#allocation5 + $0x750] sm:$0xf0]  ;;  %v5310_v8 = vld [vmem:[#allocation5 + $0x844] sm:$0xf]  ;;  %v4243_v13 = vor.u32 %v5246_v3, %v4240_v4  ;;  %v5073_v61 = vld [vmem:[#allocation5 + $0xd4] sm:$0xf0] }
  0xab   :  { %2373 = vmatpush.bf16.msra.mxu2 %v4563_v22  ;;  %v4496_v9 = vld [vmem:[#allocation5 + $0x850] sm:$0xf0]  ;;  %v5342_v11 = vld [vmem:[#allocation5 + $0x944] sm:$0xf]  ;;  %v4371_v14 = vor.u32 %v5278_v5, %v4368_v7  ;;  %v3670_v62 = vld [vmem:[#allocation5 + $0x1c8] sm:$0xf] }
  0xac   :  { %2387 = vmatpush.bf16.msra.mxu3 %v4691_v26  ;;  %v4624_v12 = vld [vmem:[#allocation5 + $0x950] sm:$0xf0]  ;;  %v4499_v15 = vor.u32 %v5310_v8, %v4496_v9  ;;  %v5242_v16 = vld [vmem:[#allocation5 + $0x624] sm:$0xf]  ;;  %v5137_v3 = vld [vmem:[#allocation5 + $0x2d4] sm:$0xf0] }
  0xad   :  { %2346 = vmatpush.bf16.msra.mxu0 %v4291_v34  ;;  %v4224_v18 = vld [vmem:[#allocation5 + $0x630] sm:$0xf0]  ;;  %v5274_v19 = vld [vmem:[#allocation5 + $0x724] sm:$0xf]  ;;  %v4627_v20 = vor.u32 %v5342_v11, %v4624_v12  ;;  %v3926_v4 = vld [vmem:[#allocation5 + $0x3c8] sm:$0xf] }
  0xae   :  { %2360 = vmatpush.bf16.msra.mxu1 %v4419_v35  ;;  %v4352_v21 = vld [vmem:[#allocation5 + $0x730] sm:$0xf0]  ;;  %v5306_v22 = vld [vmem:[#allocation5 + $0x824] sm:$0xf]  ;;  %v4227_v26 = vor.u32 %v5242_v16, %v4224_v18  ;;  %v5169_v5 = vld [vmem:[#allocation5 + $0x3d4] sm:$0xf0] }
  0xaf   :  { %2374 = vmatpush.bf16.msra.mxu2 %v4547_v36  ;;  %v4480_v23 = vld [vmem:[#allocation5 + $0x830] sm:$0xf0]  ;;  %v5338_v24 = vld [vmem:[#allocation5 + $0x924] sm:$0xf]  ;;  %v4355_v30 = vor.u32 %v5274_v19, %v4352_v21  ;;  %v3526_v9 = vld [vmem:[#allocation5 + $0xa8] sm:$0xf] }
  0xb0   :  { %2388 = vmatpush.bf16.msra.mxu3 %v4675_v41  ;;  %v4608_v25 = vld [vmem:[#allocation5 + $0x930] sm:$0xf0]  ;;  %v5238_v28 = vld [vmem:[#allocation5 + $0x604] sm:$0xf]  ;;  %v4483_v32 = vor.u32 %v5306_v22, %v4480_v23  ;;  %v3558_v41 = vld [vmem:[#allocation5 + $0xe8] sm:$0xf] }
  0xb1   :  { %2347 = vmatpush.bf16.msra.mxu0 %v4275_v50  ;;  %v4208_v29 = vld [vmem:[#allocation5 + $0x610] sm:$0xf0]  ;;  %v5270_v33 = vld [vmem:[#allocation5 + $0x704] sm:$0xf]  ;;  %v4611_v36 = vor.u32 %v5338_v24, %v4608_v25  ;;  %v5141_v50 = vld [vmem:[#allocation5 + $0x2f4] sm:$0xf0] }
  0xb2   :  { %2361 = vmatpush.bf16.msra.mxu1 %v4403_v51  ;;  %v4336_v34 = vld [vmem:[#allocation5 + $0x710] sm:$0xf0]  ;;  %v5302_v35 = vld [vmem:[#allocation5 + $0x804] sm:$0xf]  ;;  %v4211_v46 = vor.u32 %v5238_v28, %v4208_v29  ;;  %v3815_v59 = vor.u32 %v5141_v50, %v3814_v49  ;;  %v5069_v11 = vld [vmem:[#allocation5 + $0xb4] sm:$0xf0] }
  0xb3   :  { %2375 = vmatpush.bf16.msra.mxu2 %v4531_v52  ;;  %v4464_v37 = vld [vmem:[#allocation5 + $0x810] sm:$0xf0]  ;;  %v5334_v38 = vld [vmem:[#allocation5 + $0x904] sm:$0xf]  ;;  %v4339_v51 = vor.u32 %v5270_v33, %v4336_v34  ;;  %v3654_v12 = vld [vmem:[#allocation5 + $0x1a8] sm:$0xf] }
  0xb4   :  { %2389 = vmatpush.bf16.msra.mxu3 %v4659_v56  ;;  %v4592_v40 = vld [vmem:[#allocation5 + $0x910] sm:$0xf0]  ;;  %v4467_v52 = vor.u32 %v5302_v35, %v4464_v37  ;;  %v3559_v56 = vor.u32 %v5077_v42, %v3558_v41  ;;  %v5133_v16 = vld [vmem:[#allocation5 + $0x2b4] sm:$0xf0]  ;;  %v3910_v18 = vld [vmem:[#allocation5 + $0x3a8] sm:$0xf] }
  0xb5   :  { %2348 = vmatpush.bf16.msra.mxu0 %v4259_v63  ;;  %v4595_v55 = vor.u32 %v5334_v38, %v4592_v40  ;;  %v3943_v63 = vor.u32 %v5173_v54, %v3942_v53  ;;  %v5165_v19 = vld [vmem:[#allocation5 + $0x3b4] sm:$0xf0]  ;;  %v3510_v23 = vld [vmem:[#allocation5 + $0x88] sm:$0xf] }
  0xb6   :  { %2362 = vmatpush.bf16.msra.mxu1 %v4387_v0  ;;  %v5105_v0 = vld [vmem:[#allocation5 + $0x1d4] sm:$0xf0]  ;;  %v3638_v25 = vld [vmem:[#allocation5 + $0x188] sm:$0xf] }
  0xb7   :  { %2376 = vmatpush.bf16.msra.mxu2 %v4515_v2  ;;  %v3798_v2 = vld [vmem:[#allocation5 + $0x2c8] sm:$0xf]  ;;  %v3671_v7 = vor.u32 %v5105_v0, %v3670_v62  ;;  %v5065_v24 = vld [vmem:[#allocation5 + $0x94] sm:$0xf0] }
  0xb8   :  { %2390 = vmatpush.bf16.msra.mxu3 %v4643_v6  ;;  %v3543_v6 = vor.u32 %v5073_v61, %v3542_v60  ;;  %v3799_v8 = vor.u32 %v5137_v3, %v3798_v2  ;;  %v5097_v28 = vld [vmem:[#allocation5 + $0x194] sm:$0xf0]  ;;  %v3766_v29 = vld [vmem:[#allocation5 + $0x288] sm:$0xf]  ;;  %v3511_v34 = vor.u32 %v5065_v24, %v3510_v23 }
  0xb9   :  { %2349 = vmatpush.bf16.msra.mxu0 %v4243_v13  ;;  %v3927_v13 = vor.u32 %v5169_v5, %v3926_v4  ;;  %v5161_v33 = vld [vmem:[#allocation5 + $0x394] sm:$0xf0]  ;;  %v3639_v35 = vor.u32 %v5097_v28, %v3638_v25  ;;  %v3494_v37 = vld [vmem:[#allocation5 + $0x68] sm:$0xf] }
  0xba   :  { %2363 = vmatpush.bf16.msra.mxu1 %v4371_v14  ;;  %v5101_v14 = vld [vmem:[#allocation5 + $0x1b4] sm:$0xf0]  ;;  %v3622_v40 = vld [vmem:[#allocation5 + $0x168] sm:$0xf] }
  0xbb   :  { %2377 = vmatpush.bf16.msra.mxu2 %v4499_v15  ;;  %v3782_v15 = vld [vmem:[#allocation5 + $0x2a8] sm:$0xf]  ;;  %v3655_v21 = vor.u32 %v5101_v14, %v3654_v12  ;;  %v5061_v38 = vld [vmem:[#allocation5 + $0x74] sm:$0xf0] }
  0xbc   :  { %2391 = vmatpush.bf16.msra.mxu3 %v4627_v20  ;;  %v3527_v20 = vor.u32 %v5069_v11, %v3526_v9  ;;  %v3783_v22 = vor.u32 %v5133_v16, %v3782_v15  ;;  %v5093_v42 = vld [vmem:[#allocation5 + $0x174] sm:$0xf0]  ;;  %v3750_v45 = vld [vmem:[#allocation5 + $0x268] sm:$0xf]  ;;  %v3495_v50 = vor.u32 %v5061_v38, %v3494_v37 }
  0xbd   :  { %2350 = vmatpush.bf16.msra.mxu0 %v4227_v26  ;;  %v3911_v26 = vor.u32 %v5165_v19, %v3910_v18  ;;  %v3878_v48 = vld [vmem:[#allocation5 + $0x368] sm:$0xf]  ;;  %v5157_v49 = vld [vmem:[#allocation5 + $0x374] sm:$0xf0] }
  0xbe   :  { %2364 = vmatpush.bf16.msra.mxu1 %v4355_v30  ;;  %v5129_v30 = vld [vmem:[#allocation5 + $0x294] sm:$0xf0]  ;;  %v3478_v53 = vld [vmem:[#allocation5 + $0x48] sm:$0xf] }
  0xbf   :  { %2378 = vmatpush.bf16.msra.mxu2 %v4483_v32  ;;  %v3894_v32 = vld [vmem:[#allocation5 + $0x388] sm:$0xf]  ;;  %v5057_v54 = vld [vmem:[#allocation5 + $0x54] sm:$0xf0] }
  0xc0   :  { %2392 = vmatpush.bf16.msra.mxu3 %v4611_v36  ;;  %v3767_v36 = vor.u32 %v5129_v30, %v3766_v29  ;;  %v3895_v41 = vor.u32 %v5161_v33, %v3894_v32  ;;  %v5121_v60 = vld [vmem:[#allocation5 + $0x254] sm:$0xf0]  ;;  %v3862_v61 = vld [vmem:[#allocation5 + $0x348] sm:$0xf] }
  0xc1   :  { %2351 = vmatpush.bf16.msra.mxu0 %v4211_v46  ;;  %v5125_v46 = vld [vmem:[#allocation5 + $0x274] sm:$0xf0]  ;;  %v3462_v3 = vld [vmem:[#allocation5 + $0x28] sm:$0xf] }
  0xc2   :  { %2365 = vmatpush.bf16.msra.mxu1 %v4339_v51  ;;  %v3623_v51 = vor.u32 %v5093_v42, %v3622_v40  ;;  %v5153_v62 = vld [vmem:[#allocation5 + $0x354] sm:$0xf0]  ;;  %v3590_v5 = vld [vmem:[#allocation5 + $0x128] sm:$0xf] }
  0xc3   :  { %2379 = vmatpush.bf16.msra.mxu2 %v4467_v52  ;;  %v3751_v52 = vor.u32 %v5125_v46, %v3750_v45  ;;  %v5053_v4 = vld [vmem:[#allocation5 + $0x34] sm:$0xf0]  ;;  %v3846_v11 = vld [vmem:[#allocation5 + $0x328] sm:$0xf] }
  0xc4   :  { %2393 = vmatpush.bf16.msra.mxu3 %v4595_v55  ;;  %2352 = vmatmul.bf16.vlgmr.msra.gmra.mxu0 %v5759_v43  ;;  %v3606_v55 = vld [vmem:[#allocation5 + $0x148] sm:$0xf]  ;;  %v5117_v9 = vld [vmem:[#allocation5 + $0x234] sm:$0xf0] }
  0xc5   :  { %2400 = vmatpush.bf16.msrb.mxu0 %v3559_v56  ;;  %2366 = vmatmul.bf16.vlgmr.msra.gmra.mxu1 %v5763_v47  ;;  %v3879_v56 = vor.u32 %v5157_v49, %v3878_v48  ;;  %v5149_v12 = vld [vmem:[#allocation5 + $0x334] sm:$0xf0]  ;;  %v3446_v14 = vld [vmem:[#allocation5 + $0x8] sm:$0xf] }
  0xc6   :  { %2414 = vmatpush.bf16.msrb.mxu1 %v3687_v57  ;;  %2380 = vmatmul.bf16.vlgmr.msra.gmra.mxu2 %v5769_v27  ;;  %v5089_v57 = vld [vmem:[#allocation5 + $0x154] sm:$0xf0]  ;;  %v3574_v19 = vld [vmem:[#allocation5 + $0x108] sm:$0xf] }
  0xc7   :  { %2428 = vmatpush.bf16.msrb.mxu2 %v3815_v59  ;;  %2394 = vmatmul.bf16.vlgmr.msra.gmra.mxu3 %v5771_v31  ;;  %v3734_v59 = vld [vmem:[#allocation5 + $0x248] sm:$0xf]  ;;  %v3607_v0 = vor.u32 %v5089_v57, %v3606_v55  ;;  %v5049_v15 = vld [vmem:[#allocation5 + $0x14] sm:$0xf0] }
  0xc8   :  { %2442 = vmatpush.bf16.msrb.mxu3 %v3943_v63  ;;  %v3479_v63 = vor.u32 %v5057_v54, %v3478_v53  ;;  %v3735_v2 = vor.u32 %v5121_v60, %v3734_v59  ;;  %v5113_v23 = vld [vmem:[#allocation5 + $0x214] sm:$0xf0]  ;;  %v3830_v24 = vld [vmem:[#allocation5 + $0x308] sm:$0xf]  ;;  %v3447_v30 = vor.u32 %v5049_v15, %v3446_v14 }
  0xc9   :  { %2401 = vmatpush.bf16.msrb.mxu0 %v3543_v6  ;;  %v3863_v6 = vor.u32 %v5153_v62, %v3862_v61  ;;  %v5145_v25 = vld [vmem:[#allocation5 + $0x314] sm:$0xf0]  ;;  %v4198_v29 = vld [vmem:[#allocation5 + $0x5e8] sm:$0xf] }
  0xca   :  { %2415 = vmatpush.bf16.msrb.mxu1 %v3671_v7  ;;  %v5085_v7 = vld [vmem:[#allocation5 + $0x134] sm:$0xf0]  ;;  %v4326_v33 = vld [vmem:[#allocation5 + $0x6e8] sm:$0xf]  ;;  %v3831_v40 = vor.u32 %v5145_v25, %v3830_v24 }
  0xcb   :  { %2429 = vmatpush.bf16.msrb.mxu2 %v3799_v8  ;;  %v3718_v8 = vld [vmem:[#allocation5 + $0x228] sm:$0xf]  ;;  %v3591_v16 = vor.u32 %v5085_v7, %v3590_v5  ;;  %v5205_v28 = vld [vmem:[#allocation5 + $0x4f4] sm:$0xf0] }
  0xcc   :  { %2443 = vmatpush.bf16.msrb.mxu3 %v3927_v13  ;;  %v3463_v13 = vor.u32 %v5053_v4, %v3462_v3  ;;  %v3719_v18 = vor.u32 %v5117_v9, %v3718_v8  ;;  %v5237_v32 = vld [vmem:[#allocation5 + $0x5f4] sm:$0xf0]  ;;  %v4454_v37 = vld [vmem:[#allocation5 + $0x7e8] sm:$0xf] }
  0xcd   :  { %2402 = vmatpush.bf16.msrb.mxu0 %v3527_v20  ;;  %v5081_v20 = vld [vmem:[#allocation5 + $0x114] sm:$0xf0]  ;;  %v4199_v42 = vor.u32 %v5237_v32, %v4198_v29  ;;  %v4054_v46 = vld [vmem:[#allocation5 + $0x4c8] sm:$0xf] }
  0xce   :  { %2416 = vmatpush.bf16.msrb.mxu1 %v3655_v21  ;;  %v3702_v21 = vld [vmem:[#allocation5 + $0x208] sm:$0xf]  ;;  %v5301_v38 = vld [vmem:[#allocation5 + $0x7f4] sm:$0xf0] }
  0xcf   :  { %2430 = vmatpush.bf16.msrb.mxu2 %v3783_v22  ;;  %v3847_v22 = vor.u32 %v5149_v12, %v3846_v11  ;;  %v5201_v48 = vld [vmem:[#allocation5 + $0x4d4] sm:$0xf0]  ;;  %v4182_v49 = vld [vmem:[#allocation5 + $0x5c8] sm:$0xf] }
  0xd0   :  { %2444 = vmatpush.bf16.msrb.mxu3 %v3911_v26  ;;  %v4070_v26 = vld [vmem:[#allocation5 + $0x4e8] sm:$0xf]  ;;  %v5265_v53 = vld [vmem:[#allocation5 + $0x6d4] sm:$0xf0] }
  0xd1   :  { %2403 = vmatpush.bf16.msrb.mxu0 %v3511_v34  ;;  %v5269_v34 = vld [vmem:[#allocation5 + $0x6f4] sm:$0xf0]  ;;  %v4438_v54 = vld [vmem:[#allocation5 + $0x7c8] sm:$0xf] }
  0xd2   :  { %2417 = vmatpush.bf16.msrb.mxu1 %v3639_v35  ;;  %v3575_v35 = vor.u32 %v5081_v20, %v3574_v19  ;;  %v4327_v45 = vor.u32 %v5269_v34, %v4326_v33  ;;  %v5297_v55 = vld [vmem:[#allocation5 + $0x7d4] sm:$0xf0]  ;;  %v4038_v60 = vld [vmem:[#allocation5 + $0x4a8] sm:$0xf] }
  0xd3   :  { %2431 = vmatpush.bf16.msrb.mxu2 %v3767_v36  ;;  %v3703_v36 = vor.u32 %v5113_v23, %v3702_v21  ;;  %v5197_v61 = vld [vmem:[#allocation5 + $0x4b4] sm:$0xf0]  ;;  %v4166_v62 = vld [vmem:[#allocation5 + $0x5a8] sm:$0xf] }
  0xd4   :  { %2445 = vmatpush.bf16.msrb.mxu3 %v3895_v41  ;;  %v4071_v41 = vor.u32 %v5205_v28, %v4070_v26  ;;  %v5261_v3 = vld [vmem:[#allocation5 + $0x6b4] sm:$0xf0]  ;;  %v4422_v4 = vld [vmem:[#allocation5 + $0x7a8] sm:$0xf] }
  0xd5   :  { %2404 = vmatpush.bf16.msrb.mxu0 %v3495_v50  ;;  %v4455_v50 = vor.u32 %v5301_v38, %v4454_v37  ;;  %v5293_v5 = vld [vmem:[#allocation5 + $0x7b4] sm:$0xf0]  ;;  %v4022_v9 = vld [vmem:[#allocation5 + $0x488] sm:$0xf] }
  0xd6   :  { %2418 = vmatpush.bf16.msrb.mxu1 %v3623_v51  ;;  %v5233_v51 = vld [vmem:[#allocation5 + $0x5d4] sm:$0xf0]  ;;  %v4150_v12 = vld [vmem:[#allocation5 + $0x588] sm:$0xf] }
  0xd7   :  { %2432 = vmatpush.bf16.msrb.mxu2 %v3751_v52  ;;  %v4310_v52 = vld [vmem:[#allocation5 + $0x6c8] sm:$0xf]  ;;  %v4183_v57 = vor.u32 %v5233_v51, %v4182_v49  ;;  %v5193_v11 = vld [vmem:[#allocation5 + $0x494] sm:$0xf0] }
  0xd8   :  { %2446 = vmatpush.bf16.msrb.mxu3 %v3879_v56  ;;  %v4055_v56 = vor.u32 %v5201_v48, %v4054_v46  ;;  %v4311_v59 = vor.u32 %v5265_v53, %v4310_v52  ;;  %v5225_v14 = vld [vmem:[#allocation5 + $0x594] sm:$0xf0]  ;;  %v4278_v15 = vld [vmem:[#allocation5 + $0x688] sm:$0xf]  ;;  %v4023_v20 = vor.u32 %v5193_v11, %v4022_v9 }
  0xd9   :  { %2405 = vmatpush.bf16.msrb.mxu0 %v3479_v63  ;;  %v4439_v63 = vor.u32 %v5297_v55, %v4438_v54  ;;  %v5289_v19 = vld [vmem:[#allocation5 + $0x794] sm:$0xf0]  ;;  %v4151_v21 = vor.u32 %v5225_v14, %v4150_v12  ;;  %v4006_v23 = vld [vmem:[#allocation5 + $0x468] sm:$0xf] }
  0xda   :  { %2419 = vmatpush.bf16.msrb.mxu1 %v3607_v0  ;;  %v5229_v0 = vld [vmem:[#allocation5 + $0x5b4] sm:$0xf0]  ;;  %v4134_v25 = vld [vmem:[#allocation5 + $0x568] sm:$0xf] }
  0xdb   :  { %2433 = vmatpush.bf16.msrb.mxu2 %v3735_v2  ;;  %v4294_v2 = vld [vmem:[#allocation5 + $0x6a8] sm:$0xf]  ;;  %v4167_v7 = vor.u32 %v5229_v0, %v4166_v62  ;;  %v5189_v24 = vld [vmem:[#allocation5 + $0x474] sm:$0xf0] }
  0xdc   :  { %2447 = vmatpush.bf16.msrb.mxu3 %v3863_v6  ;;  %v4039_v6 = vor.u32 %v5197_v61, %v4038_v60  ;;  %v4295_v8 = vor.u32 %v5261_v3, %v4294_v2  ;;  %v5221_v28 = vld [vmem:[#allocation5 + $0x574] sm:$0xf0]  ;;  %v4262_v29 = vld [vmem:[#allocation5 + $0x668] sm:$0xf]  ;;  %v4007_v34 = vor.u32 %v5189_v24, %v4006_v23  ;;  %v5107_v23 = vld [vmem:[#allocation5 + $0x1ec] sm:$0xf] }
  0xdd   :  { %2406 = vmatpush.bf16.msrb.mxu0 %v3463_v13  ;;  %v4423_v13 = vor.u32 %v5293_v5, %v4422_v4  ;;  %v4390_v32 = vld [vmem:[#allocation5 + $0x768] sm:$0xf]  ;;  %v5285_v33 = vld [vmem:[#allocation5 + $0x774] sm:$0xf0]  ;;  %v3688_v24 = vld [vmem:[#allocation5 + $0x1f8] sm:$0xf0] }
  0xde   :  { %2420 = vmatpush.bf16.msrb.mxu1 %v3591_v16  ;;  %v5257_v16 = vld [vmem:[#allocation5 + $0x694] sm:$0xf0]  ;;  %v3990_v37 = vld [vmem:[#allocation5 + $0x448] sm:$0xf] }
  0xdf   :  { %2434 = vmatpush.bf16.msrb.mxu2 %v3719_v18  ;;  %v4406_v18 = vld [vmem:[#allocation5 + $0x788] sm:$0xf]  ;;  %v5185_v38 = vld [vmem:[#allocation5 + $0x454] sm:$0xf0] }
  0xe0   :  { %2448 = vmatpush.bf16.msrb.mxu3 %v3847_v22  ;;  %v4279_v22 = vor.u32 %v5257_v16, %v4278_v15  ;;  %v4407_v26 = vor.u32 %v5289_v19, %v4406_v18  ;;  %v5249_v46 = vld [vmem:[#allocation5 + $0x654] sm:$0xf0]  ;;  %v4374_v48 = vld [vmem:[#allocation5 + $0x748] sm:$0xf]  ;;  %v5075_v19 = vld [vmem:[#allocation5 + $0xec] sm:$0xf] }
  0xe1   :  { %2407 = vmatpush.bf16.msrb.mxu0 %v3447_v30  ;;  %v5253_v30 = vld [vmem:[#allocation5 + $0x674] sm:$0xf0]  ;;  %v3974_v53 = vld [vmem:[#allocation5 + $0x428] sm:$0xf] }
  0xe2   :  { %2421 = vmatpush.bf16.msrb.mxu1 %v3575_v35  ;;  %v4135_v35 = vor.u32 %v5221_v28, %v4134_v25  ;;  %v5281_v49 = vld [vmem:[#allocation5 + $0x754] sm:$0xf0]  ;;  %v4102_v55 = vld [vmem:[#allocation5 + $0x528] sm:$0xf] }
  0xe3   :  { %2435 = vmatpush.bf16.msrb.mxu2 %v3703_v36  ;;  %v4263_v36 = vor.u32 %v5253_v30, %v4262_v29  ;;  %v5181_v54 = vld [vmem:[#allocation5 + $0x434] sm:$0xf0]  ;;  %v4358_v61 = vld [vmem:[#allocation5 + $0x728] sm:$0xf] }
  0xe4   :  { %2449 = vmatpush.bf16.msrb.mxu3 %v3831_v40  ;;  %2408 = vmatmul.bf16.vlgmr.msrb.gmra.mxu0 %v5745_v58  ;;  %v4118_v40 = vld [vmem:[#allocation5 + $0x548] sm:$0xf]  ;;  %v5245_v60 = vld [vmem:[#allocation5 + $0x634] sm:$0xf0] }
  0xe5   :  { %2456 = vmatpush.bf16.msra.mxu0 %v4071_v41  ;;  %2422 = vmatmul.bf16.vlgmr.msrb.gmra.mxu1 %v5751_v10  ;;  %v4391_v41 = vor.u32 %v5285_v33, %v4390_v32  ;;  %v5277_v62 = vld [vmem:[#allocation5 + $0x734] sm:$0xf0]  ;;  %v3958_v0 = vld [vmem:[#allocation5 + $0x408] sm:$0xf] }
  0xe6   :  { %2470 = vmatpush.bf16.msra.mxu1 %v4199_v42  ;;  %2436 = vmatmul.bf16.vlgmr.msrb.gmra.mxu2 %v5747_v1  ;;  %v5217_v42 = vld [vmem:[#allocation5 + $0x554] sm:$0xf0]  ;;  %v4086_v5 = vld [vmem:[#allocation5 + $0x508] sm:$0xf] }
  0xe7   :  { %2484 = vmatpush.bf16.msra.mxu2 %v4327_v45  ;;  %2450 = vmatmul.bf16.vlgmr.msrb.gmra.mxu3 %v5753_v17  ;;  %v4246_v45 = vld [vmem:[#allocation5 + $0x648] sm:$0xf]  ;;  %v4119_v51 = vor.u32 %v5217_v42, %v4118_v40  ;;  %v5177_v2 = vld [vmem:[#allocation5 + $0x414] sm:$0xf0]  ;;  %v3672_v40 = vld [vmem:[#allocation5 + $0x1d8] sm:$0xf0] }
  0xe8   :  { %2498 = vmatpush.bf16.msra.mxu3 %v4455_v50  ;;  %v3991_v50 = vor.u32 %v5185_v38, %v3990_v37  ;;  %v4247_v52 = vor.u32 %v5249_v46, %v4246_v45  ;;  %v5241_v9 = vld [vmem:[#allocation5 + $0x614] sm:$0xf0]  ;;  %v4342_v11 = vld [vmem:[#allocation5 + $0x708] sm:$0xf]  ;;  %v3959_v16 = vor.u32 %v5177_v2, %v3958_v0  ;;  %v3544_v37 = vld [vmem:[#allocation5 + $0xd8] sm:$0xf0] }
  0xe9   :  { %2457 = vmatpush.bf16.msra.mxu0 %v4055_v56  ;;  %v4375_v56 = vor.u32 %v5281_v49, %v4374_v48  ;;  %v5273_v12 = vld [vmem:[#allocation5 + $0x714] sm:$0xf0]  ;;  %v4710_v15 = vld [vmem:[#allocation5 + $0x9e8] sm:$0xf]  ;;  %v5103_v38 = vld [vmem:[#allocation5 + $0x1cc] sm:$0xf] }
  0xea   :  { %2471 = vmatpush.bf16.msra.mxu1 %v4183_v57  ;;  %v5213_v57 = vld [vmem:[#allocation5 + $0x534] sm:$0xf0]  ;;  %v4343_v25 = vor.u32 %v5273_v12, %v4342_v11  ;;  %v4566_v30 = vld [vmem:[#allocation5 + $0x8c8] sm:$0xf]  ;;  %v5063_v2 = vld [vmem:[#allocation5 + $0x8c] sm:$0xf] }
  0xeb   :  { %2485 = vmatpush.bf16.msra.mxu2 %v4311_v59  ;;  %v4230_v59 = vld [vmem:[#allocation5 + $0x628] sm:$0xf]  ;;  %v4103_v3 = vor.u32 %v5213_v57, %v4102_v55  ;;  %v5333_v14 = vld [vmem:[#allocation5 + $0x8f4] sm:$0xf0]  ;;  %v3656_v55 = vld [vmem:[#allocation5 + $0x1b8] sm:$0xf0] }
  0xec   :  { %2499 = vmatpush.bf16.msra.mxu3 %v4439_v63  ;;  %v3975_v63 = vor.u32 %v5181_v54, %v3974_v53  ;;  %v4231_v4 = vor.u32 %v5245_v60, %v4230_v59  ;;  %v5365_v18 = vld [vmem:[#allocation5 + $0x9f4] sm:$0xf0]  ;;  %v4694_v33 = vld [vmem:[#allocation5 + $0x9c8] sm:$0xf]  ;;  %v3528_v53 = vld [vmem:[#allocation5 + $0xb8] sm:$0xf0] }
  0xed   :  { %2458 = vmatpush.bf16.msra.mxu0 %v4039_v6  ;;  %v5209_v6 = vld [vmem:[#allocation5 + $0x514] sm:$0xf0]  ;;  %v4711_v28 = vor.u32 %v5365_v18, %v4710_v15  ;;  %v4550_v46 = vld [vmem:[#allocation5 + $0x8a8] sm:$0xf]  ;;  %v5099_v54 = vld [vmem:[#allocation5 + $0x1ac] sm:$0xf]  ;;  %v5793_v18 = vpop.f32.mrf.mxu0 }
  0xee   :  { %2472 = vmatpush.bf16.msra.mxu1 %v4167_v7  ;;  %v4214_v7 = vld [vmem:[#allocation5 + $0x608] sm:$0xf]  ;;  %v5329_v32 = vld [vmem:[#allocation5 + $0x8d4] sm:$0xf0]  ;;  %v5059_v15 = vld [vmem:[#allocation5 + $0x6c] sm:$0xf] }
  0xef   :  { %2486 = vmatpush.bf16.msra.mxu2 %v4295_v8  ;;  %v4359_v8 = vor.u32 %v5277_v62, %v4358_v61  ;;  %v5325_v48 = vld [vmem:[#allocation5 + $0x8b4] sm:$0xf0]  ;;  %v4678_v49 = vld [vmem:[#allocation5 + $0x9a8] sm:$0xf] }
  0xf0   :  { %2500 = vmatpush.bf16.msra.mxu3 %v4423_v13  ;;  %v4582_v13 = vld [vmem:[#allocation5 + $0x8e8] sm:$0xf]  ;;  %v5321_v61 = vld [vmem:[#allocation5 + $0x894] sm:$0xf0] }
  0xf1   :  { %2459 = vmatpush.bf16.msra.mxu0 %v4023_v20  ;;  %v3560_v20 = vld [vmem:[#allocation5 + $0xf8] sm:$0xf0]  ;;  %v4534_v60 = vld [vmem:[#allocation5 + $0x888] sm:$0xf]  ;;  %v5353_v0 = vld [vmem:[#allocation5 + $0x994] sm:$0xf0] }
  0xf2   :  { %2473 = vmatpush.bf16.msra.mxu1 %v4151_v21  ;;  %v4087_v21 = vor.u32 %v5209_v6, %v4086_v5  ;;  %v3563_v29 = vor.u32 %v5075_v19, %v3560_v20  ;;  %v4662_v62 = vld [vmem:[#allocation5 + $0x988] sm:$0xf]  ;;  %v3640_v5 = vld [vmem:[#allocation5 + $0x198] sm:$0xf0]  ;;  %v4535_v6 = vor.u32 %v5321_v61, %v4534_v60  ;;  %v5317_v11 = vld [vmem:[#allocation5 + $0x874] sm:$0xf0] }
  0xf3   :  { %2487 = vmatpush.bf16.msra.mxu2 %v4279_v22  ;;  %v4215_v22 = vor.u32 %v5241_v9, %v4214_v7  ;;  %v4663_v7 = vor.u32 %v5353_v0, %v4662_v62  ;;  %v4518_v9 = vld [vmem:[#allocation5 + $0x868] sm:$0xf]  ;;  %v5091_v19 = vld [vmem:[#allocation5 + $0x16c] sm:$0xf]  ;;  %v3624_v20 = vld [vmem:[#allocation5 + $0x178] sm:$0xf0] }
  0xf4   :  { %2501 = vmatpush.bf16.msra.mxu3 %v4407_v26  ;;  %v4583_v26 = vor.u32 %v5333_v14, %v4582_v13  ;;  %v4646_v12 = vld [vmem:[#allocation5 + $0x968] sm:$0xf]  ;;  %v5349_v14 = vld [vmem:[#allocation5 + $0x974] sm:$0xf0] }
  0xf5   :  { %2460 = vmatpush.bf16.msra.mxu0 %v4007_v34  ;;  %v3691_v34 = vor.u32 %v5107_v23, %v3688_v24  ;;  %v4502_v24 = vld [vmem:[#allocation5 + $0x848] sm:$0xf]  ;;  %v5337_v62 = vld [vmem:[#allocation5 + $0x914] sm:$0xf0] }
  0xf6   :  { %2474 = vmatpush.bf16.msra.mxu1 %v4135_v35  ;;  %v5361_v35 = vld [vmem:[#allocation5 + $0x9d4] sm:$0xf0]  ;;  %v4598_v61 = vld [vmem:[#allocation5 + $0x908] sm:$0xf] }
  0xf7   :  { %2488 = vmatpush.bf16.msra.mxu2 %v4263_v36  ;;  %v5071_v36 = vld [vmem:[#allocation5 + $0xcc] sm:$0xf]  ;;  %v4695_v42 = vor.u32 %v5361_v35, %v4694_v33  ;;  %v5795_v33 = vpop.f32.mrf.mxu1 }
  0xf8   :  { %2502 = vmatpush.bf16.msra.mxu3 %v4391_v41  ;;  %v4567_v41 = vor.u32 %v5329_v32, %v4566_v30  ;;  %v3547_v45 = vor.u32 %v5071_v36, %v3544_v37  ;;  %v5055_v30 = vld [vmem:[#allocation5 + $0x4c] sm:$0xf]  ;;  %v3480_v32 = vld [vmem:[#allocation5 + $0x58] sm:$0xf0] }
  0xf9   :  { %2461 = vmatpush.bf16.msra.mxu0 %v3991_v50  ;;  %v3675_v50 = vor.u32 %v5103_v38, %v3672_v40  ;;  %v5087_v35 = vld [vmem:[#allocation5 + $0x14c] sm:$0xf]  ;;  %v3608_v36 = vld [vmem:[#allocation5 + $0x158] sm:$0xf0]  ;;  %v3483_v40 = vor.u32 %v5055_v30, %v3480_v32 }
  0xfa   :  { %2475 = vmatpush.bf16.msra.mxu1 %v4119_v51  ;;  %v5357_v51 = vld [vmem:[#allocation5 + $0x9b4] sm:$0xf0]  ;;  %v3928_v30 = vld [vmem:[#allocation5 + $0x3d8] sm:$0xf0]  ;;  %v5199_v32 = vld [vmem:[#allocation5 + $0x4cc] sm:$0xf] }
  0xfb   :  { %2489 = vmatpush.bf16.msra.mxu2 %v4247_v52  ;;  %v5067_v52 = vld [vmem:[#allocation5 + $0xac] sm:$0xf]  ;;  %v4679_v57 = vor.u32 %v5357_v51, %v4678_v49  ;;  %v5799_v51 = vpop.f32.mrf.mxu3 }
  0xfc   :  { %2503 = vmatpush.bf16.msra.mxu3 %v4375_v56  ;;  %v4551_v56 = vor.u32 %v5325_v48, %v4550_v46  ;;  %v3531_v59 = vor.u32 %v5067_v52, %v3528_v53  ;;  %v3611_v46 = vor.u32 %v5087_v35, %v3608_v36  ;;  %v5341_v48 = vld [vmem:[#allocation5 + $0x934] sm:$0xf0]  ;;  %v5051_v49 = vld [vmem:[#allocation5 + $0x2c] sm:$0xf]  ;;  %v3592_v53 = vld [vmem:[#allocation5 + $0x138] sm:$0xf0] }
  0xfd   :  { %2462 = vmatpush.bf16.msra.mxu0 %v3975_v63  ;;  %v3659_v63 = vor.u32 %v5099_v54, %v3656_v55  ;;  %v5083_v52 = vld [vmem:[#allocation5 + $0x12c] sm:$0xf]  ;;  %v4470_v55 = vld [vmem:[#allocation5 + $0x808] sm:$0xf]  ;;  %v4056_v35 = vld [vmem:[#allocation5 + $0x4d8] sm:$0xf0] }
  0xfe   :  { %2476 = vmatpush.bf16.msra.mxu1 %v4103_v3  ;;  %v3512_v3 = vld [vmem:[#allocation5 + $0x98] sm:$0xf0]  ;;  %v3595_v0 = vor.u32 %v5083_v52, %v3592_v53  ;;  %v5195_v53 = vld [vmem:[#allocation5 + $0x4ac] sm:$0xf] }
  0xff   :  { %2490 = vmatpush.bf16.msra.mxu2 %v4231_v4  ;;  %v5095_v4 = vld [vmem:[#allocation5 + $0x18c] sm:$0xf]  ;;  %v3912_v52 = vld [vmem:[#allocation5 + $0x3b8] sm:$0xf0] }
 0x100   :  { %2504 = vmatpush.bf16.msra.mxu3 %v4359_v8  ;;  %v3515_v8 = vor.u32 %v5063_v2, %v3512_v3  ;;  %v3643_v13 = vor.u32 %v5095_v4, %v3640_v5  ;;  %v3448_v2 = vld [vmem:[#allocation5 + $0x18] sm:$0xf0]  ;;  %v5079_v3 = vld [vmem:[#allocation5 + $0x10c] sm:$0xf] }
 0x101   :  { %2463 = vmatpush.bf16.msra.mxu0 %v3959_v16  ;;  %v3496_v16 = vld [vmem:[#allocation5 + $0x78] sm:$0xf0]  ;;  %v5139_v5 = vld [vmem:[#allocation5 + $0x2ec] sm:$0xf] }
 0x102   :  { %2477 = vmatpush.bf16.msra.mxu1 %v4087_v21  ;;  %v4519_v21 = vor.u32 %v5317_v11, %v4518_v9  ;;  %v3499_v23 = vor.u32 %v5059_v15, %v3496_v16  ;;  %v3576_v4 = vld [vmem:[#allocation5 + $0x118] sm:$0xf0]  ;;  %v5203_v11 = vld [vmem:[#allocation5 + $0x4ec] sm:$0xf]  ;;  %v4599_v15 = vor.u32 %v5337_v62, %v4598_v61 }
 0x103   :  { %2491 = vmatpush.bf16.msra.mxu2 %v4215_v22  ;;  %v4647_v22 = vor.u32 %v5349_v14, %v4646_v12  ;;  %v3944_v9 = vld [vmem:[#allocation5 + $0x3f8] sm:$0xf0]  ;;  %v5807_v36 = vpop.f32.mrf.mxu3 }
 0x104   :  { %2505 = vmatpush.bf16.msra.mxu3 %v4343_v25  ;;  %2464 = vmatmul.bf16.vlgmr.msra.gmra.mxu0 %v5757_v39  ;;  %v5313_v25 = vld [vmem:[#allocation5 + $0x854] sm:$0xf0]  ;;  %v4072_v12 = vld [vmem:[#allocation5 + $0x4f8] sm:$0xf0] }
 0x105   :  { %2512 = vmatpush.bf16.msrb.mxu0 %v4583_v26  ;;  %2478 = vmatmul.bf16.vlgmr.msra.gmra.mxu1 %v5761_v44  ;;  %v4630_v26 = vld [vmem:[#allocation5 + $0x948] sm:$0xf]  ;;  %v4503_v37 = vor.u32 %v5313_v25, %v4502_v24  ;;  %v4075_v24 = vor.u32 %v5203_v11, %v4072_v12  ;;  %v5135_v25 = vld [vmem:[#allocation5 + $0x2cc] sm:$0xf] }
 0x106   :  { %2526 = vmatpush.bf16.msrb.mxu1 %v4711_v28  ;;  %2492 = vmatmul.bf16.vlgmr.msra.gmra.mxu2 %v5759_v43  ;;  %v3627_v28 = vor.u32 %v5091_v19, %v3624_v20  ;;  %v5235_v19 = vld [vmem:[#allocation5 + $0x5ec] sm:$0xf]  ;;  %v4200_v20 = vld [vmem:[#allocation5 + $0x5f8] sm:$0xf0] }
 0x107   :  { %2540 = vmatpush.bf16.msrb.mxu2 %v3563_v29  ;;  %2506 = vmatmul.bf16.vlgmr.msra.gmra.mxu3 %v5763_v47  ;;  %v5345_v29 = vld [vmem:[#allocation5 + $0x954] sm:$0xf0] }
 0x108   :  { %2554 = vmatpush.bf16.msrb.mxu3 %v3691_v34  ;;  %v5797_v34 = vpop.f32.mrf.mxu2  ;;  %v4631_v38 = vor.u32 %v5345_v29, %v4630_v26  ;;  %v3800_v26 = vld [vmem:[#allocation5 + $0x2d8] sm:$0xf0]  ;;  %v4203_v29 = vor.u32 %v5235_v19, %v4200_v20  ;;  %v5155_v19 = vld [vmem:[#allocation5 + $0x36c] sm:$0xf] }
 0x109   :  { %2513 = vmatpush.bf16.msrb.mxu0 %v4567_v41  ;;  %v4486_v41 = vld [vmem:[#allocation5 + $0x828] sm:$0xf] }
 0x10a   :  { %2527 = vmatpush.bf16.msrb.mxu1 %v4695_v42  ;;  %v5309_v42 = vld [vmem:[#allocation5 + $0x834] sm:$0xf0] }
 0x10b   :  { %2541 = vmatpush.bf16.msrb.mxu2 %v3547_v45  ;;  %v4614_v45 = vld [vmem:[#allocation5 + $0x928] sm:$0xf]  ;;  %v4487_v54 = vor.u32 %v5309_v42, %v4486_v41 }
 0x10c   :  { %2555 = vmatpush.bf16.msrb.mxu3 %v3675_v50  ;;  %v3464_v50 = vld [vmem:[#allocation5 + $0x38] sm:$0xf0] }
 0x10d   :  { %2514 = vmatpush.bf16.msrb.mxu0 %v4551_v56  ;;  %v5305_v56 = vld [vmem:[#allocation5 + $0x814] sm:$0xf0]  ;;  %v3467_v60 = vor.u32 %v5051_v49, %v3464_v50  ;;  %v5163_v49 = vld [vmem:[#allocation5 + $0x3ac] sm:$0xf] }
 0x10e   :  { %2528 = vmatpush.bf16.msrb.mxu1 %v4679_v57  ;;  %v5801_v57 = vpop.f32.mrf.mxu0  ;;  %v3915_v62 = vor.u32 %v5163_v49, %v3912_v52  ;;  %v5215_v49 = vld [vmem:[#allocation5 + $0x54c] sm:$0xf] }
 0x10f   :  { %2542 = vmatpush.bf16.msrb.mxu2 %v3531_v59  ;;  %v4615_v59 = vor.u32 %v5341_v48, %v4614_v45  ;;  %v4059_v45 = vor.u32 %v5199_v32, %v4056_v35  ;;  %v3784_v48 = vld [vmem:[#allocation5 + $0x2b8] sm:$0xf0]  ;;  %v5119_v32 = vld [vmem:[#allocation5 + $0x24c] sm:$0xf] }
 0x110   :  { %2556 = vmatpush.bf16.msrb.mxu3 %v3659_v63  ;;  %v5047_v63 = vld [vmem:[#allocation5 + $0xc] sm:$0xf]  ;;  %v5805_v14 = vpop.f32.mrf.mxu2  ;;  %v3736_v35 = vld [vmem:[#allocation5 + $0x258] sm:$0xf0] }
 0x111   :  { %2515 = vmatpush.bf16.msrb.mxu0 %v4535_v6  ;;  %v3816_v6 = vld [vmem:[#allocation5 + $0x2f8] sm:$0xf0]  ;;  %v3451_v16 = vor.u32 %v5047_v63, %v3448_v2  ;;  %v3739_v52 = vor.u32 %v5119_v32, %v3736_v35  ;;  %v5331_v35 = vld [vmem:[#allocation5 + $0x8ec] sm:$0xf] }
 0x112   :  { %2529 = vmatpush.bf16.msrb.mxu1 %v4663_v7  ;;  %v5171_v7 = vld [vmem:[#allocation5 + $0x3ec] sm:$0xf]  ;;  %v3768_v2 = vld [vmem:[#allocation5 + $0x298] sm:$0xf0] }
 0x113   :  { %2543 = vmatpush.bf16.msrb.mxu2 %v3515_v8  ;;  %v4471_v8 = vor.u32 %v5305_v56, %v4470_v55  ;;  %v5227_v55 = vld [vmem:[#allocation5 + $0x5ac] sm:$0xf]  ;;  %v4168_v56 = vld [vmem:[#allocation5 + $0x5b8] sm:$0xf0] }
 0x114   :  { %2557 = vmatpush.bf16.msrb.mxu3 %v3643_v13  ;;  %v5803_v13 = vpop.f32.mrf.mxu1  ;;  %v4456_v32 = vld [vmem:[#allocation5 + $0x7f8] sm:$0xf0] }
 0x115   :  { %2516 = vmatpush.bf16.msrb.mxu0 %v4519_v21  ;;  %v3579_v21 = vor.u32 %v5079_v3, %v3576_v4  ;;  %v5159_v3 = vld [vmem:[#allocation5 + $0x38c] sm:$0xf]  ;;  %v4171_v4 = vor.u32 %v5227_v55, %v4168_v56  ;;  %v3720_v56 = vld [vmem:[#allocation5 + $0x238] sm:$0xf0] }
 0x116   :  { %2530 = vmatpush.bf16.msrb.mxu1 %v4647_v22  ;;  %v3819_v22 = vor.u32 %v5139_v5, %v3816_v6  ;;  %v5809_v41 = vpop.f32.mrf.mxu0  ;;  %v3896_v5 = vld [vmem:[#allocation5 + $0x398] sm:$0xf0]  ;;  %v5191_v6 = vld [vmem:[#allocation5 + $0x48c] sm:$0xf] }
 0x117   :  { %2544 = vmatpush.bf16.msrb.mxu2 %v3499_v23  ;;  %v3947_v23 = vor.u32 %v5171_v7, %v3944_v9  ;;  %v5223_v7 = vld [vmem:[#allocation5 + $0x58c] sm:$0xf]  ;;  %v5819_v9 = vpop.f32.mrf.mxu3  ;;  %v3899_v11 = vor.u32 %v5159_v3, %v3896_v5 }
 0x118   :  { %2558 = vmatpush.bf16.msrb.mxu3 %v3627_v28  ;;  %v5167_v28 = vld [vmem:[#allocation5 + $0x3cc] sm:$0xf]  ;;  %v5817_v61 = vpop.f32.mrf.mxu2 }
 0x119   :  { %2517 = vmatpush.bf16.msrb.mxu0 %v4503_v37  ;;  %v5231_v37 = vld [vmem:[#allocation5 + $0x5cc] sm:$0xf]  ;;  %v3931_v42 = vor.u32 %v5167_v28, %v3928_v30 }
 0x11a   :  { %2531 = vmatpush.bf16.msrb.mxu1 %v4631_v38  ;;  %v4184_v38 = vld [vmem:[#allocation5 + $0x5d8] sm:$0xf0]  ;;  %v5115_v55 = vld [vmem:[#allocation5 + $0x22c] sm:$0xf] }
 0x11b   :  { %2545 = vmatpush.bf16.msrb.mxu2 %v3483_v40  ;;  %v3803_v40 = vor.u32 %v5135_v25, %v3800_v26  ;;  %v4187_v50 = vor.u32 %v5231_v37, %v4184_v38  ;;  %v5219_v25 = vld [vmem:[#allocation5 + $0x56c] sm:$0xf]  ;;  %v4136_v26 = vld [vmem:[#allocation5 + $0x578] sm:$0xf0] }
 0x11c   :  { %2559 = vmatpush.bf16.msrb.mxu3 %v3611_v46  ;;  %v5131_v46 = vld [vmem:[#allocation5 + $0x2ac] sm:$0xf]  ;;  %v4139_v38 = vor.u32 %v5219_v25, %v4136_v26 }
 0x11d   :  { %2518 = vmatpush.bf16.msrb.mxu0 %v4487_v54  ;;  %v4040_v54 = vld [vmem:[#allocation5 + $0x4b8] sm:$0xf0]  ;;  %v5151_v37 = vld [vmem:[#allocation5 + $0x34c] sm:$0xf] }
 0x11e   :  { %2532 = vmatpush.bf16.msrb.mxu1 %v4615_v59  ;;  %v3787_v59 = vor.u32 %v5131_v46, %v3784_v48  ;;  %v4043_v63 = vor.u32 %v5195_v53, %v4040_v54  ;;  %v5211_v5 = vld [vmem:[#allocation5 + $0x52c] sm:$0xf] }
 0x11f   :  { %2546 = vmatpush.bf16.msrb.mxu2 %v3467_v60  ;;  %v5815_v60 = vpop.f32.mrf.mxu1  ;;  %v5827_v3 = vpop.f32.mrf.mxu3  ;;  %v5267_v26 = vld [vmem:[#allocation5 + $0x6ec] sm:$0xf] }
 0x120   :  { %2560 = vmatpush.bf16.msrb.mxu3 %v3595_v0  ;;  %v5127_v0 = vld [vmem:[#allocation5 + $0x28c] sm:$0xf]  ;;  %v5825_v48 = vpop.f32.mrf.mxu2 }
 0x121   :  { %2519 = vmatpush.bf16.msrb.mxu0 %v4471_v8  ;;  %v4152_v8 = vld [vmem:[#allocation5 + $0x598] sm:$0xf0] }
 0x122   :  { %2533 = vmatpush.bf16.msrb.mxu1 %v4599_v15  ;;  %v5123_v15 = vld [vmem:[#allocation5 + $0x26c] sm:$0xf]  ;;  %v4155_v20 = vor.u32 %v5223_v7, %v4152_v8  ;;  %v3704_v8 = vld [vmem:[#allocation5 + $0x218] sm:$0xf0] }
 0x123   :  { %2547 = vmatpush.bf16.msrb.mxu2 %v3451_v16  ;;  %v3752_v16 = vld [vmem:[#allocation5 + $0x278] sm:$0xf0]  ;;  %v5111_v7 = vld [vmem:[#allocation5 + $0x20c] sm:$0xf] }
 0x124   :  { %2561 = vmatpush.bf16.msrb.mxu3 %v3579_v21  ;;  %2520 = vmatmul.bf16.vlgmr.msrb.gmra.mxu0 %v5769_v27  ;;  %v3880_v21 = vld [vmem:[#allocation5 + $0x378] sm:$0xf0]  ;;  %v3755_v28 = vor.u32 %v5123_v15, %v3752_v16  ;;  %v5175_v16 = vld [vmem:[#allocation5 + $0x40c] sm:$0xf] }
 0x125   :  { %2568 = vmatpush.bf16.msra.mxu0 %v3819_v22  ;;  %2534 = vmatmul.bf16.vlgmr.msrb.gmra.mxu1 %v5771_v31  ;;  %v5187_v22 = vld [vmem:[#allocation5 + $0x46c] sm:$0xf]  ;;  %v3832_v15 = vld [vmem:[#allocation5 + $0x318] sm:$0xf0] }
 0x126   :  { %2582 = vmatpush.bf16.msra.mxu1 %v3947_v23  ;;  %2548 = vmatmul.bf16.vlgmr.msrb.gmra.mxu2 %v5745_v58  ;;  %v4024_v58 = vld [vmem:[#allocation5 + $0x498] sm:$0xf0] }
 0x127   :  { %2596 = vmatpush.bf16.msra.mxu2 %v4075_v24  ;;  %2562 = vmatmul.bf16.vlgmr.msrb.gmra.mxu3 %v5751_v10  ;;  %v3771_v10 = vor.u32 %v5127_v0, %v3768_v2  ;;  %v4027_v12 = vor.u32 %v5191_v6, %v4024_v58  ;;  %v4008_v23 = vld [vmem:[#allocation5 + $0x478] sm:$0xf0]  ;;  %v5821_v24 = vpop.f32.mrf.mxu0  ;;  %v5823_v46 = vpop.f32.mrf.mxu1  ;;  %v5179_v0 = vld [vmem:[#allocation5 + $0x42c] sm:$0xf]  ;;  %v3723_v58 = vor.u32 %v5115_v55, %v3720_v56 }
 0x128   :  { %2610 = vmatpush.bf16.msra.mxu3 %v4203_v29  ;;  %v3883_v29 = vor.u32 %v5155_v19, %v3880_v21  ;;  %v4011_v30 = vor.u32 %v5187_v22, %v4008_v23  ;;  %v3976_v2 = vld [vmem:[#allocation5 + $0x438] sm:$0xf0]  ;;  %v5207_v21 = vld [vmem:[#allocation5 + $0x50c] sm:$0xf]  ;;  %v5833_v25 = vpop.f32.mrf.mxu2 }
 0x129   :  { %2569 = vmatpush.bf16.msra.mxu0 %v3803_v40  ;;  %v3864_v40 = vld [vmem:[#allocation5 + $0x358] sm:$0xf0]  ;;  %v5263_v55 = vld [vmem:[#allocation5 + $0x6cc] sm:$0xf] }
 0x12a   :  { %2583 = vmatpush.bf16.msra.mxu1 %v3931_v42  ;;  %v5183_v42 = vld [vmem:[#allocation5 + $0x44c] sm:$0xf]  ;;  %v3867_v53 = vor.u32 %v5151_v37, %v3864_v40  ;;  %v4104_v6 = vld [vmem:[#allocation5 + $0x538] sm:$0xf0] }
 0x12b   :  { %2597 = vmatpush.bf16.msra.mxu2 %v4059_v45  ;;  %v3992_v45 = vld [vmem:[#allocation5 + $0x458] sm:$0xf0]  ;;  %v4107_v19 = vor.u32 %v5211_v5, %v4104_v6  ;;  %v5359_v6 = vld [vmem:[#allocation5 + $0x9cc] sm:$0xf] }
 0x12c   :  { %2611 = vmatpush.bf16.msra.mxu3 %v4187_v50  ;;  %v4120_v50 = vld [vmem:[#allocation5 + $0x558] sm:$0xf0]  ;;  %v3995_v54 = vor.u32 %v5183_v42, %v3992_v45  ;;  %v5363_v42 = vld [vmem:[#allocation5 + $0x9ec] sm:$0xf] }
 0x12d   :  { %2570 = vmatpush.bf16.msra.mxu0 %v3787_v59  ;;  %v5147_v59 = vld [vmem:[#allocation5 + $0x32c] sm:$0xf]  ;;  %v4088_v22 = vld [vmem:[#allocation5 + $0x518] sm:$0xf0] }
 0x12e   :  { %2584 = vmatpush.bf16.msra.mxu1 %v3915_v62  ;;  %v4123_v62 = vor.u32 %v5215_v49, %v4120_v50  ;;  %v4584_v37 = vld [vmem:[#allocation5 + $0x8f8] sm:$0xf0]  ;;  %v4091_v49 = vor.u32 %v5207_v21, %v4088_v22 }
 0x12f   :  { %2598 = vmatpush.bf16.msra.mxu2 %v4043_v63  ;;  %v3848_v63 = vld [vmem:[#allocation5 + $0x338] sm:$0xf0]  ;;  %v5831_v23 = vpop.f32.mrf.mxu1 }
 0x130   :  { %2612 = vmatpush.bf16.msra.mxu3 %v4171_v4  ;;  %v5829_v4 = vpop.f32.mrf.mxu0  ;;  %v4712_v45 = vld [vmem:[#allocation5 + $0x9f8] sm:$0xf0] }
 0x131   :  { %2571 = vmatpush.bf16.msra.mxu0 %v3771_v10  ;;  %v3851_v10 = vor.u32 %v5147_v59, %v3848_v63  ;;  %v4312_v56 = vld [vmem:[#allocation5 + $0x6d8] sm:$0xf0]  ;;  %v5295_v59 = vld [vmem:[#allocation5 + $0x7cc] sm:$0xf] }
 0x132   :  { %2585 = vmatpush.bf16.msra.mxu1 %v3899_v11  ;;  %v3979_v11 = vor.u32 %v5179_v0, %v3976_v2  ;;  %v4440_v63 = vld [vmem:[#allocation5 + $0x7d8] sm:$0xf0]  ;;  %v5327_v0 = vld [vmem:[#allocation5 + $0x8cc] sm:$0xf] }
 0x133   :  { %2599 = vmatpush.bf16.msra.mxu2 %v4027_v12  ;;  %v5143_v12 = vld [vmem:[#allocation5 + $0x30c] sm:$0xf]  ;;  %v4568_v2 = vld [vmem:[#allocation5 + $0x8d8] sm:$0xf0] }
 0x134   :  { %2613 = vmatpush.bf16.msra.mxu3 %v4155_v20  ;;  %v3960_v20 = vld [vmem:[#allocation5 + $0x418] sm:$0xf0] }
 0x135   :  { %2572 = vmatpush.bf16.msra.mxu0 %v3755_v28  ;;  %v4328_v28 = vld [vmem:[#allocation5 + $0x6f8] sm:$0xf0]  ;;  %v3963_v40 = vor.u32 %v5175_v16, %v3960_v20  ;;  %v5323_v20 = vld [vmem:[#allocation5 + $0x8ac] sm:$0xf] }
 0x136   :  { %2586 = vmatpush.bf16.msra.mxu1 %v3883_v29  ;;  %v5299_v29 = vld [vmem:[#allocation5 + $0x7ec] sm:$0xf]  ;;  %v4331_v50 = vor.u32 %v5267_v26, %v4328_v28  ;;  %v4552_v21 = vld [vmem:[#allocation5 + $0x8b8] sm:$0xf0]  ;;  %v5842_v26 = vpop.f32.mrf.mxu2 }
 0x137   :  { %2600 = vmatpush.bf16.msra.mxu2 %v4011_v30  ;;  %v3707_v30 = vor.u32 %v5111_v7, %v3704_v8  ;;  %v4315_v7 = vor.u32 %v5263_v55, %v4312_v56  ;;  %v4443_v8 = vor.u32 %v5295_v59, %v4440_v63  ;;  %v5840_v22 = vpop.f32.mrf.mxu1  ;;  %v5355_v28 = vld [vmem:[#allocation5 + $0x9ac] sm:$0xf]  ;;  %v4264_v63 = vld [vmem:[#allocation5 + $0x678] sm:$0xf0] }
 0x138   :  { %2614 = vmatpush.bf16.msra.mxu3 %v4139_v38  ;;  %v3835_v38 = vor.u32 %v5143_v12, %v3832_v15  ;;  %v5837_v5 = vpop.f32.mrf.mxu0  ;;  %v4296_v12 = vld [vmem:[#allocation5 + $0x6b8] sm:$0xf0]  ;;  %v5291_v15 = vld [vmem:[#allocation5 + $0x7ac] sm:$0xf] }
 0x139   :  { %2573 = vmatpush.bf16.msra.mxu0 %v3739_v52  ;;  %v5835_v52 = vpop.f32.mrf.mxu3 }
 0x13a   :  { %2587 = vmatpush.bf16.msra.mxu1 %v3867_v53  ;;  %v4459_v53 = vor.u32 %v5299_v29, %v4456_v32  ;;  %v4680_v29 = vld [vmem:[#allocation5 + $0x9b8] sm:$0xf0] }
 0x13b   :  { %2601 = vmatpush.bf16.msra.mxu2 %v3995_v54  ;;  %v4587_v54 = vor.u32 %v5331_v35, %v4584_v37  ;;  %v4555_v35 = vor.u32 %v5323_v20, %v4552_v21  ;;  %v5255_v37 = vld [vmem:[#allocation5 + $0x68c] sm:$0xf] }
 0x13c   :  { %2615 = vmatpush.bf16.msra.mxu3 %v4123_v62  ;;  %v4715_v62 = vor.u32 %v5363_v42, %v4712_v45  ;;  %v4683_v42 = vor.u32 %v5355_v28, %v4680_v29  ;;  %v5319_v45 = vld [vmem:[#allocation5 + $0x88c] sm:$0xf]  ;;  %v4248_v29 = vld [vmem:[#allocation5 + $0x658] sm:$0xf0] }
 0x13d   :  { %2574 = vmatpush.bf16.msra.mxu0 %v3723_v58  ;;  %v4696_v58 = vld [vmem:[#allocation5 + $0x9d8] sm:$0xf0]  ;;  %v5247_v28 = vld [vmem:[#allocation5 + $0x64c] sm:$0xf] }
 0x13e   :  { %2588 = vmatpush.bf16.msra.mxu1 %v3851_v10  ;;  %v4571_v10 = vor.u32 %v5327_v0, %v4568_v2  ;;  %v4699_v16 = vor.u32 %v5359_v6, %v4696_v58  ;;  %v5283_v0 = vld [vmem:[#allocation5 + $0x76c] sm:$0xf]  ;;  %v4392_v6 = vld [vmem:[#allocation5 + $0x778] sm:$0xf0] }
 0x13f   :  { %2602 = vmatpush.bf16.msra.mxu2 %v3979_v11  ;;  %v5259_v11 = vld [vmem:[#allocation5 + $0x6ac] sm:$0xf]  ;;  %v4395_v20 = vor.u32 %v5283_v0, %v4392_v6  ;;  %v4360_v0 = vld [vmem:[#allocation5 + $0x738] sm:$0xf0] }
 0x140   :  { %2616 = vmatpush.bf16.msra.mxu3 %v4107_v19  ;;  %v4424_v19 = vld [vmem:[#allocation5 + $0x7b8] sm:$0xf0]  ;;  %v5315_v58 = vld [vmem:[#allocation5 + $0x86c] sm:$0xf] }
 0x141   :  { %2575 = vmatpush.bf16.msra.mxu0 %v3707_v30  ;;  %v5846_v30 = vld [vmem:[#allocation7] sm:$0xf]  ;;  %v4427_v32 = vor.u32 %v5291_v15, %v4424_v19  ;;  %v5858_v19 = vpop.f32.mrf.mxu2  ;;  %v4488_v6 = vld [vmem:[#allocation5 + $0x838] sm:$0xf0] }
 0x142   :  { %2589 = vmatpush.bf16.msra.mxu1 %v3835_v38  ;;  %v4280_v38 = vld [vmem:[#allocation5 + $0x698] sm:$0xf0] }
 0x143   :  { %2603 = vmatpush.bf16.msra.mxu2 %v3963_v40  ;;  %v5287_v40 = vld [vmem:[#allocation5 + $0x78c] sm:$0xf]  ;;  %v4283_v55 = vor.u32 %v5255_v37, %v4280_v38  ;;  %v4504_v38 = vld [vmem:[#allocation5 + $0x858] sm:$0xf0] }
 0x144   :  { %2617 = vmatpush.bf16.msra.mxu3 %v4091_v49  ;;  %2576 = vmatmul.bf16.vlgmr.msra.gmra.mxu0 %v5747_v1  ;;  %v4299_v1 = vor.u32 %v5259_v11, %v4296_v12  ;;  %v5849_v49 = vpop.f32.mrf.mxu3  ;;  %v4648_v11 = vld [vmem:[#allocation5 + $0x978] sm:$0xf0]  ;;  %v463_v12 = vperm.slane %v5846_v30, 1  ;;  %v5311_v37 = vld [vmem:[#allocation5 + $0x84c] sm:$0xf] }
 0x145   :  { %2624 = vmatpush.bf16.msrb.mxu0 %v4331_v50  ;;  %2590 = vmatmul.bf16.vlgmr.msra.gmra.mxu1 %v5753_v17  ;;  %v4536_v17 = vld [vmem:[#allocation5 + $0x898] sm:$0xf0]  ;;  %v5851_v50 = vpop.f32.mrf.mxu0 }
 0x146   :  { %2638 = vmatpush.bf16.msrb.mxu1 %v4459_v53  ;;  %2604 = vmatmul.bf16.vlgmr.msra.gmra.mxu2 %v5757_v39  ;;  %v4408_v39 = vld [vmem:[#allocation5 + $0x798] sm:$0xf0]  ;;  %v5351_v53 = vld [vmem:[#allocation5 + $0x98c] sm:$0xf]  ;;  %v4539_v59 = vor.u32 %v5319_v45, %v4536_v17 }
 0x147   :  { %2652 = vmatpush.bf16.msrb.mxu2 %v4587_v54  ;;  %2618 = vmatmul.bf16.vlgmr.msra.gmra.mxu3 %v5761_v44  ;;  %v4664_v44 = vld [vmem:[#allocation5 + $0x998] sm:$0xf0]  ;;  %v462_v54 = vperm.slane %v5846_v30, 0  ;;  %v4411_v56 = vor.u32 %v5287_v40, %v4408_v39 }
 0x148   :  { %2666 = vmatpush.bf16.msrb.mxu3 %v4715_v62  ;;  %v5251_v62 = vld [vmem:[#allocation5 + $0x66c] sm:$0xf]  ;;  %v4667_v2 = vor.u32 %v5351_v53, %v4664_v44  ;;  %v4632_v39 = vld [vmem:[#allocation5 + $0x958] sm:$0xf0] }
 0x149   :  { %2625 = vmatpush.bf16.msrb.mxu0 %v4315_v7  ;;  %v4520_v7 = vld [vmem:[#allocation5 + $0x878] sm:$0xf0]  ;;  %v4267_v15 = vor.u32 %v5251_v62, %v4264_v63  ;;  %v2130_v40 = vadd.f32 %v5793_v18, %v462_v54  ;;  %v5275_v62 = vld [vmem:[#allocation5 + $0x72c] sm:$0xf]  ;;  %v2270_v63 = vadd.f32 %v5833_v25, %v463_v12  ;;  %v2272_v18 = vadd.f32 %v5842_v26, %v463_v12 }
 0x14a   :  { %2639 = vmatpush.bf16.msrb.mxu1 %v4443_v8  ;;  %v5854_v8 = vpop.f32.mrf.mxu1  ;;  %v4523_v21 = vor.u32 %v5315_v58, %v4520_v7  ;;  %v5339_v58 = vld [vmem:[#allocation5 + $0x92c] sm:$0xf]  ;;  %v4616_v7 = vld [vmem:[#allocation5 + $0x938] sm:$0xf0]  ;;  %v4363_v25 = vor.u32 %v5275_v62, %v4360_v0  ;;  %v4766_v0 = vld [vmem:[#allocation8 + $0x60] sm:$0xf] }
 0x14b   :  { %2653 = vmatpush.bf16.msrb.mxu2 %v4571_v10  ;;  %v5347_v10 = vld [vmem:[#allocation5 + $0x96c] sm:$0xf]  ;;  %v4216_v26 = vld [vmem:[#allocation5 + $0x618] sm:$0xf0] }
 0x14c   :  { %2667 = vmatpush.bf16.msrb.mxu3 %v4699_v16  ;;  %v2132_v16 = vadd.f32 %v5801_v57, %v462_v54  ;;  %v4251_v57 = vor.u32 %v5247_v28, %v4248_v29  ;;  %v5862_v53 = vpop.f32.mrf.mxu3  ;;  %v5271_v12 = vld [vmem:[#allocation5 + $0x70c] sm:$0xf]  ;;  %v2284_v28 = vadd.f32 %v5835_v52, %v2270_v63  ;;  %v2286_v29 = vadd.f32 %v5849_v49, %v2272_v18 }
 0x14d   :  { %2626 = vmatpush.bf16.msrb.mxu0 %v4299_v1  ;;  %v5279_v1 = vld [vmem:[#allocation5 + $0x74c] sm:$0xf]  ;;  %v2299_v17 = vpop.f32.mrf.mxu0 }
 0x14e   :  { %2640 = vmatpush.bf16.msrb.mxu1 %v4427_v32  ;;  %v4651_v32 = vor.u32 %v5347_v10, %v4648_v11  ;;  %v2146_v45 = vadd.f32 %v5803_v13, %v2132_v16  ;;  %v2144_v13 = vadd.f32 %v5795_v33, %v2130_v40  ;;  %v5239_v11 = vld [vmem:[#allocation5 + $0x60c] sm:$0xf]  ;;  %v4619_v33 = vor.u32 %v5339_v58, %v4616_v7  ;;  %v4774_v40 = vld [vmem:[#allocation8 + $0x70] sm:$0xf] }
 0x14f   :  { %2654 = vmatpush.bf16.msrb.mxu2 %v4555_v35  ;;  %v4376_v35 = vld [vmem:[#allocation5 + $0x758] sm:$0xf0] }
 0x150   :  { %2668 = vmatpush.bf16.msrb.mxu3 %v4683_v42  ;;  %v5343_v42 = vld [vmem:[#allocation5 + $0x94c] sm:$0xf]  ;;  %v4379_v44 = vor.u32 %v5279_v1, %v4376_v35 }
 0x151   :  { %2627 = vmatpush.bf16.msrb.mxu0 %v4283_v55  ;;  %v4507_v55 = vor.u32 %v5311_v37, %v4504_v38  ;;  %v4635_v54 = vor.u32 %v5343_v42, %v4632_v39  ;;  %v5303_v1 = vld [vmem:[#allocation5 + $0x80c] sm:$0xf]  ;;  %v2158_v37 = vadd.f32 %v5797_v34, %v2144_v13  ;;  %v4600_v38 = vld [vmem:[#allocation5 + $0x918] sm:$0xf0]  ;;  %v4219_v39 = vor.u32 %v5239_v11, %v4216_v26 }
 0x152   :  { %2641 = vmatpush.bf16.msrb.mxu1 %v4411_v56  ;;  %v5243_v56 = vld [vmem:[#allocation5 + $0x62c] sm:$0xf]  ;;  %v2313_v16 = vpop.f32.mrf.mxu1  ;;  %v5381_v42 = vld [vmem:[#allocation8 + $0x74] sm:$0xf0] }
 0x153   :  { %2655 = vmatpush.bf16.msrb.mxu2 %v4539_v59  ;;  %v4232_v59 = vld [vmem:[#allocation5 + $0x638] sm:$0xf0]  ;;  %v5335_v35 = vld [vmem:[#allocation5 + $0x90c] sm:$0xf]  ;;  %v4775_v62 = vor.u32 %v5381_v42, %v4774_v40  ;;  %v2172_v63 = vadd.f32 %v5799_v51, %v2158_v37  ;;  %v4806_v40 = vld [vmem:[#allocation8 + $0xb0] sm:$0xf] }
 0x154   :  { %2669 = vmatpush.bf16.msrb.mxu3 %v4667_v2  ;;  %v5307_v2 = vld [vmem:[#allocation5 + $0x82c] sm:$0xf]  ;;  %v4235_v10 = vor.u32 %v5243_v56, %v4232_v59  ;;  %v2298_v56 = vadd.f32 %v5851_v50, %v2284_v28  ;;  %v2300_v59 = vadd.f32 %v2299_v17, %v2286_v29  ;;  %v4603_v34 = vor.u32 %v5335_v35, %v4600_v38  ;;  %v2341_v18 = vpop.f32.mrf.mxu3  ;;  %v4750_v29 = vld [vmem:[#allocation8 + $0x40] sm:$0xf]  ;;  %v5373_v38 = vld [vmem:[#allocation8 + $0x34] sm:$0xf0] }
 0x155   :  { %2628 = vmatpush.bf16.msrb.mxu0 %v4267_v15  ;;  %v2160_v15 = vadd.f32 %v5805_v14, %v2146_v45  ;;  %v2327_v14 = vpop.f32.mrf.mxu2  ;;  %v5397_v45 = vld [vmem:[#allocation8 + $0xf4] sm:$0xf0]  ;;  %v5872_v52 = vpop.f32.mrf.mxu0  ;;  %v2186_v51 = vadd.f32 %v5809_v41, %v2172_v63 }
 0x156   :  { %2642 = vmatpush.bf16.msrb.mxu1 %v4395_v20  ;;  %v4491_v20 = vor.u32 %v5307_v2, %v4488_v6  ;;  %v5379_v2 = vld [vmem:[#allocation8 + $0x64] sm:$0xf0]  ;;  %v2312_v50 = vadd.f32 %v5854_v8, %v2298_v56  ;;  %v2314_v17 = vadd.f32 %v2313_v16, %v2300_v59  ;;  %v4822_v8 = vld [vmem:[#allocation8 + $0xd0] sm:$0xf]  ;;  %v5393_v16 = vld [vmem:[#allocation8 + $0xd4] sm:$0xf0] }
 0x157   :  { %2656 = vmatpush.bf16.msrb.mxu2 %v4523_v21  ;;  %v4344_v21 = vld [vmem:[#allocation5 + $0x718] sm:$0xf0]  ;;  %v5395_v6 = vld [vmem:[#allocation8 + $0xe4] sm:$0xf0]  ;;  %v4767_v7 = vor.u32 %v5379_v2, %v4766_v0  ;;  %v4734_v59 = vld [vmem:[#allocation8 + $0x20] sm:$0xf] }
 0x158   :  { %2670 = vmatpush.bf16.msrb.mxu3 %v4651_v32  ;;  %v4472_v32 = vld [vmem:[#allocation5 + $0x818] sm:$0xf0]  ;;  %v4347_v49 = vor.u32 %v5271_v12, %v4344_v21  ;;  %v2326_v41 = vadd.f32 %v5858_v19, %v2312_v50  ;;  %v5411_v0 = vld [vmem:[#allocation8 + $0x164] sm:$0xf0] }
 0x159   :  { %2629 = vmatpush.bf16.msrb.mxu0 %v4251_v57  ;;  %v4838_v57 = vld [vmem:[#allocation8 + $0xf0] sm:$0xf] }
 0x15a   :  { %2643 = vmatpush.bf16.msrb.mxu1 %v4379_v44  ;;  %v2174_v44 = vadd.f32 %v5807_v36, %v2160_v15  ;;  %v4830_v36 = vld [vmem:[#allocation8 + $0xe0] sm:$0xf]  ;;  %v5877_v58 = vpop.f32.mrf.mxu1  ;;  %v4758_v15 = vld [vmem:[#allocation8 + $0x50] sm:$0xf] }
 0x15b   :  { %2657 = vmatpush.bf16.msrb.mxu2 %v4507_v55  ;;  %v4475_v55 = vor.u32 %v5303_v1, %v4472_v32  ;;  %v4831_v11 = vor.u32 %v5395_v6, %v4830_v36  ;;  %v4814_v1 = vld [vmem:[#allocation8 + $0xc0] sm:$0xf]  ;;  %v5391_v32 = vld [vmem:[#allocation8 + $0xc4] sm:$0xf0] }
 0x15c   :  { %2671 = vmatpush.bf16.msrb.mxu3 %v4635_v54  ;;  %v4839_v54 = vor.u32 %v5397_v45, %v4838_v57  ;;  %v2188_v13 = vadd.f32 %v5821_v24, %v2174_v44  ;;  %v5377_v24 = vld [vmem:[#allocation8 + $0x54] sm:$0xf0]  ;;  %v2395_v28 = vpop.f32.mrf.mxu3  ;;  %v4902_v57 = vld [vmem:[#allocation8 + $0x170] sm:$0xf] }
 0x15d   :  { %2630 = vmatpush.bf16.msrb.mxu0 %v4235_v10  ;;  %v5881_v10 = vpop.f32.mrf.mxu2  ;;  %v4759_v26 = vor.u32 %v5377_v24, %v4758_v15  ;;  %v2355_v21 = vpop.f32.mrf.mxu0  ;;  %v5413_v45 = vld [vmem:[#allocation8 + $0x174] sm:$0xf0]  ;;  %v4886_v15 = vld [vmem:[#allocation8 + $0x150] sm:$0xf] }
 0x15e   :  { %2644 = vmatpush.bf16.msrb.mxu1 %v4363_v25  ;;  %v2328_v25 = vadd.f32 %v2327_v14, %v2314_v17  ;;  %v4742_v14 = vld [vmem:[#allocation8 + $0x30] sm:$0xf]  ;;  %v5409_v24 = vld [vmem:[#allocation8 + $0x154] sm:$0xf0] }
 0x15f   :  { %2658 = vmatpush.bf16.msrb.mxu2 %v4491_v20  ;;  %v2202_v20 = vadd.f32 %v5823_v46, %v2188_v13  ;;  %v2340_v46 = vadd.f32 %v5862_v53, %v2326_v41  ;;  %v4726_v17 = vld [vmem:[#allocation8 + $0x10] sm:$0xf]  ;;  %v4782_v41 = vld [vmem:[#allocation8 + $0x80] sm:$0xf] }
 0x160   :  { %2672 = vmatpush.bf16.msrb.mxu3 %v4619_v33  ;;  %v2342_v33 = vadd.f32 %v2341_v18, %v2328_v25  ;;  %v5387_v18 = vld [vmem:[#allocation8 + $0xa4] sm:$0xf0] }
 0x161   :  { %2631 = vmatpush.bf16.msrb.mxu0 %v4219_v39  ;;  %v2216_v12 = vadd.f32 %v5825_v48, %v2202_v20  ;;  %v4815_v48 = vor.u32 %v5391_v32, %v4814_v1  ;;  %v2354_v42 = vadd.f32 %v5872_v52, %v2340_v46  ;;  %v5389_v39 = vld [vmem:[#allocation8 + $0xb4] sm:$0xf0]  ;;  %v5367_v20 = vld [vmem:[#allocation8 + $0x4] sm:$0xf0]  ;;  %v5396_v1 = vld [vmem:[#allocation8 + $0xf4] sm:$0xf] }
 0x162   :  { %2645 = vmatpush.bf16.msrb.mxu1 %v4347_v49  ;;  %v2369_v37 = vpop.f32.mrf.mxu1  ;;  %v4903_v49 = vor.u32 %v5413_v45, %v4902_v57  ;;  %v4807_v56 = vor.u32 %v5389_v39, %v4806_v40  ;;  %v5405_v40 = vld [vmem:[#allocation8 + $0x134] sm:$0xf0]  ;;  %v5394_v39 = vld [vmem:[#allocation8 + $0xe4] sm:$0xf]  ;;  %v4832_v57 = vld [vmem:[#allocation8 + $0xe8] sm:$0xf0] }
 0x163   :  { %2659 = vmatpush.bf16.msrb.mxu2 %v4475_v55  ;;  %v2368_v52 = vadd.f32 %v5877_v58, %v2354_v42 }
 0x164   :  { %2673 = vmatpush.bf16.msrb.mxu3 %v4603_v34  ;;  %2632 = vmatmul.bf16.vlgmr.msrb.gmra.mxu0 %v5759_v43  ;;  %v2200_v43 = vadd.f32 %v5815_v60, %v2186_v51  ;;  %v2230_v60 = vadd.f32 %v5827_v3, %v2216_v12  ;;  %v5371_v34 = vld [vmem:[#allocation8 + $0x24] sm:$0xf0]  ;;  %v2397_v36 = vpop.f32.mrf.mxu3  ;;  %v4790_v51 = vld [vmem:[#allocation8 + $0x90] sm:$0xf]  ;;  %v5380_v12 = vld [vmem:[#allocation8 + $0x74] sm:$0xf] }
 0x165   :  { %3090 = vmatpush.bf16.msra.mxu0 %v4775_v62  ;;  %2646 = vmatmul.bf16.vlgmr.msrb.gmra.mxu1 %v5763_v47  ;;  %v4823_v47 = vor.u32 %v5393_v16, %v4822_v8  ;;  %v2383_v44 = vpop.f32.mrf.mxu2  ;;  %v4798_v62 = vld [vmem:[#allocation8 + $0xa0] sm:$0xf]  ;;  %v4735_v13 = vor.u32 %v5371_v34, %v4734_v59  ;;  %v4835_v34 = vor.u32 %v5394_v39, %v4832_v57 }
 0x166   :  { %3104 = vmatpush.bf16.msra.mxu1 %v4839_v54  ;;  %2660 = vmatmul.bf16.vlgmr.msrb.gmra.mxu2 %v5769_v27  ;;  %v5375_v27 = vld [vmem:[#allocation8 + $0x44] sm:$0xf0]  ;;  %v2214_v35 = vadd.f32 %v5817_v61, %v2200_v43  ;;  %v2244_v53 = vadd.f32 %v5837_v5, %v2230_v60  ;;  %v4743_v61 = vor.u32 %v5373_v38, %v4742_v14  ;;  %v4894_v54 = vld [vmem:[#allocation8 + $0x160] sm:$0xf]  ;;  %v5378_v60 = vld [vmem:[#allocation8 + $0x64] sm:$0xf] }
 0x167   :  { %2674 = vmatmul.bf16.vlgmr.msrb.gmra.mxu3 %v5771_v31  ;;  %v2356_v31 = vadd.f32 %v2355_v21, %v2342_v33  ;;  %v4751_v19 = vor.u32 %v5375_v27, %v4750_v29  ;;  %3118 = vmatpush.bf16.msra.mxu2 %v4903_v49  ;;  %v4895_v6 = vor.u32 %v5411_v0, %v4894_v54  ;;  %v5383_v43 = vld [vmem:[#allocation8 + $0x84] sm:$0xf0]  ;;  %v4776_v21 = vld [vmem:[#allocation8 + $0x78] sm:$0xf0]  ;;  %v4878_v29 = vld [vmem:[#allocation8 + $0x140] sm:$0xf]  ;;  %v2409_v49 = vpop.f32.mrf.mxu0 }
 0x168   :  { %v2228_v3 = vadd.f32 %v5819_v9, %v2214_v35  ;;  %v2258_v2 = vadd.f32 %v5840_v22, %v2244_v53  ;;  %v2382_v9 = vadd.f32 %v5881_v10, %v2368_v52  ;;  %v4799_v50 = vor.u32 %v5387_v18, %v4798_v62  ;;  %v4718_v10 = vld [vmem:[#allocation8] sm:$0xf]  ;;  %v5407_v27 = vld [vmem:[#allocation8 + $0x144] sm:$0xf0]  ;;  %v4768_v14 = vld [vmem:[#allocation8 + $0x68] sm:$0xf0] }
 0x169   :  { %3091 = vmatpush.bf16.msra.mxu0 %v4767_v7  ;;  %v2370_v55 = vadd.f32 %v2369_v37, %v2356_v31  ;;  %v5369_v7 = vld [vmem:[#allocation8 + $0x14] sm:$0xf0]  ;;  %v4887_v22 = vor.u32 %v5409_v24, %v4886_v15  ;;  %v4879_v32 = vor.u32 %v5407_v27, %v4878_v29  ;;  %v4779_v35 = vor.u32 %v5380_v12, %v4776_v21  ;;  %v4870_v38 = vld [vmem:[#allocation8 + $0x130] sm:$0xf]  ;;  %v5376_v62 = vld [vmem:[#allocation8 + $0x54] sm:$0xf] }
 0x16a   :  { %3105 = vmatpush.bf16.msra.mxu1 %v4831_v11  ;;  %v2242_v5 = vadd.f32 %v5829_v4, %v2228_v3  ;;  %v5385_v11 = vld [vmem:[#allocation8 + $0x94] sm:$0xf0]  ;;  %v2684_v25 = vmul.f32 0.01, %v2258_v2  ;;  %v2396_v8 = vadd.f32 %v2395_v28, %v2382_v9  ;;  %v4727_v16 = vor.u32 %v5369_v7, %v4726_v17  ;;  %v5403_v3 = vld [vmem:[#allocation8 + $0x124] sm:$0xf0]  ;;  %v2423_v59 = vpop.f32.mrf.mxu1 }
 0x16b   :  { %v2384_v63 = vadd.f32 %v2383_v44, %v2370_v55  ;;  %3119 = vmatpush.bf16.msra.mxu2 %v4895_v6  ;;  %v4719_v28 = vor.u32 %v5367_v20, %v4718_v10  ;;  %v4871_v45 = vor.u32 %v5405_v40, %v4870_v38  ;;  %v4771_v55 = vor.u32 %v5378_v60, %v4768_v14  ;;  %v4760_v52 = vld [vmem:[#allocation8 + $0x58] sm:$0xf0]  ;;  %v4854_v0 = vld [vmem:[#allocation8 + $0x110] sm:$0xf]  ;;  %v5374_v6 = vld [vmem:[#allocation8 + $0x44] sm:$0xf] }
 0x16c   :  { %v2256_v4 = vadd.f32 %v5831_v23, %v2242_v5  ;;  %v4840_v23 = vld [vmem:[#allocation8 + $0xf8] sm:$0xf0]  ;;  %v2681_v46 = vmul.f32 0.01, %v2396_v8  ;;  %v2692_v31 = vmax.f32 %v2258_v2, %v2684_v25  ;;  %v5401_v5 = vld [vmem:[#allocation8 + $0x114] sm:$0xf0]  ;;  %v4763_v2 = vor.u32 %v5376_v62, %v4760_v52  ;;  %v2451_v21 = vpop.f32.mrf.mxu3 }
 0x16d   :  { %3092 = vmatpush.bf16.msra.mxu0 %v4759_v26  ;;  %v2398_v58 = vadd.f32 %v2397_v36, %v2384_v63  ;;  %v4791_v26 = vor.u32 %v5385_v11, %v4790_v51  ;;  %v5392_v63 = vld [vmem:[#allocation8 + $0xd4] sm:$0xf]  ;;  %v4824_v54 = vld [vmem:[#allocation8 + $0xd8] sm:$0xf0]  ;;  %v4752_v9 = vld [vmem:[#allocation8 + $0x48] sm:$0xf0]  ;;  %v2437_v51 = vpop.f32.mrf.mxu2 }
 0x16e   :  { %3106 = vmatpush.bf16.msra.mxu1 %v4823_v47  ;;  %v2680_v33 = vmul.f32 0.01, %v2256_v4  ;;  %v2689_v53 = vmax.f32 %v2396_v8, %v2681_v46  ;;  %v4827_v36 = vor.u32 %v5392_v63, %v4824_v54  ;;  %v4816_v17 = vld [vmem:[#allocation8 + $0xc8] sm:$0xf0]  ;;  %v464_v7 = vperm.slane %v5846_v30, 2 }
 0x16f   :  { %3120 = vmatpush.bf16.msra.mxu2 %v4887_v22  ;;  %v2685_v47 = vmul.f32 0.01, %v2398_v58  ;;  %v5372_v11 = vld [vmem:[#allocation8 + $0x34] sm:$0xf]  ;;  %v4744_v15 = vld [vmem:[#allocation8 + $0x38] sm:$0xf0]  ;;  %v2411_v8 = vpop.f32.mrf.mxu0 }
 0x170   :  { %v2688_v42 = vmax.f32 %v2256_v4, %v2680_v33  ;;  %v5388_v4 = vld [vmem:[#allocation8 + $0xb4] sm:$0xf]  ;;  %v4846_v25 = vld [vmem:[#allocation8 + $0x100] sm:$0xf]  ;;  %v5399_v22 = vld [vmem:[#allocation8 + $0x104] sm:$0xf0]  ;;  %v2412_v57 = vadd.f32 %v2411_v8, %v464_v7 }
 0x171   :  { %3093 = vmatpush.bf16.msra.mxu0 %v4751_v19  ;;  %v4783_v19 = vor.u32 %v5383_v43, %v4782_v41  ;;  %v2693_v37 = vmax.f32 %v2398_v58, %v2685_v47  ;;  %v4755_v58 = vor.u32 %v5374_v6, %v4752_v9  ;;  %v4847_v10 = vor.u32 %v5399_v22, %v4846_v25  ;;  %v5412_v20 = vld [vmem:[#allocation8 + $0x174] sm:$0xf]  ;;  %v4904_v41 = vld [vmem:[#allocation8 + $0x178] sm:$0xf0]  ;;  %v5370_v27 = vld [vmem:[#allocation8 + $0x24] sm:$0xf] }
 0x172   :  { %3107 = vmatpush.bf16.msra.mxu1 %v4815_v48  ;;  %v4843_v48 = vor.u32 %v5396_v1, %v4840_v23  ;;  %v5902_v44 = vpack.c.bf16 %v2692_v31, %v2688_v42  ;;  %v2425_v43 = vpop.f32.mrf.mxu1  ;;  %v4907_v12 = vor.u32 %v5412_v20, %v4904_v41  ;;  %v4747_v47 = vor.u32 %v5372_v11, %v4744_v15  ;;  %v4736_v33 = vld [vmem:[#allocation8 + $0x28] sm:$0xf0]  ;;  %v5386_v1 = vld [vmem:[#allocation8 + $0xa4] sm:$0xf]  ;;  %v5368_v60 = vld [vmem:[#allocation8 + $0x14] sm:$0xf] }
 0x173   :  { %3121 = vmatpush.bf16.msra.mxu2 %v4879_v32  ;;  %v4800_v23 = vld [vmem:[#allocation8 + $0xa8] sm:$0xf0]  ;;  %v5410_v32 = vld [vmem:[#allocation8 + $0x164] sm:$0xf]  ;;  %v4792_v38 = vld [vmem:[#allocation8 + $0x98] sm:$0xf0] }
 0x174   :  { %v4896_v46 = vld [vmem:[#allocation8 + $0x168] sm:$0xf0]  ;;  %v5408_v40 = vld [vmem:[#allocation8 + $0x154] sm:$0xf]  ;;  %v4888_v42 = vld [vmem:[#allocation8 + $0x158] sm:$0xf0]  ;;  %v2453_v62 = vpop.f32.mrf.mxu3 }
 0x175   :  { %3094 = vmatpush.bf16.msra.mxu0 %v4743_v61  ;;  %v4862_v61 = vld [vmem:[#allocation8 + $0x120] sm:$0xf]  ;;  %v4899_v31 = vor.u32 %v5410_v32, %v4896_v46  ;;  %v2439_v14 = vpop.f32.mrf.mxu2  ;;  %v4784_v52 = vld [vmem:[#allocation8 + $0x88] sm:$0xf0]  ;;  %v5406_v63 = vld [vmem:[#allocation8 + $0x144] sm:$0xf] }
 0x176   :  { %3108 = vmatpush.bf16.msra.mxu1 %v4807_v56  ;;  %v5904_v56 = vpack.c.bf16 %v2693_v37, %v2689_v53  ;;  %v4863_v18 = vor.u32 %v5403_v3, %v4862_v61  ;;  %v4728_v37 = vld [vmem:[#allocation8 + $0x18] sm:$0xf0]  ;;  %v5366_v3 = vld [vmem:[#allocation8 + $0x4] sm:$0xf]  ;;  %v5404_v6 = vld [vmem:[#allocation8 + $0x134] sm:$0xf] }
 0x177   :  { %3122 = vmatpush.bf16.msra.mxu2 %v4871_v45  ;;  %v4891_v45 = vor.u32 %v5408_v40, %v4888_v42  ;;  %v4872_v9 = vld [vmem:[#allocation8 + $0x138] sm:$0xf0]  ;;  %v5400_v22 = vld [vmem:[#allocation8 + $0x114] sm:$0xf] }
 0x178   :  { %v4856_v8 = vld [vmem:[#allocation8 + $0x118] sm:$0xf0] }
 0x179   :  { %3095 = vmatpush.bf16.msra.mxu0 %v4735_v13  ;;  %v4855_v13 = vor.u32 %v5401_v5, %v4854_v0  ;;  %v2426_v0 = vadd.f32 %v2425_v43, %v2412_v57 }
 0x17a   :  { %3109 = vmatpush.bf16.msra.mxu1 %v4799_v50  ;;  %v5390_v50 = vld [vmem:[#allocation8 + $0xc4] sm:$0xf] }
 0x17b   :  { %3123 = vmatpush.bf16.msra.mxu2 %v4863_v18  ;;  %v4819_v24 = vor.u32 %v5390_v50, %v4816_v17  ;;  %v4880_v18 = vld [vmem:[#allocation8 + $0x148] sm:$0xf0]  ;;  %v2440_v50 = vadd.f32 %v2439_v14, %v2426_v0  ;;  %v4958_v14 = vld [vmem:[#allocation8 + $0x1e0] sm:$0xf] }
 0x17c   :  { %v4883_v5 = vor.u32 %v5406_v63, %v4880_v18  ;;  %v4926_v63 = vld [vmem:[#allocation8 + $0x1a0] sm:$0xf]  ;;  %v5419_v18 = vld [vmem:[#allocation8 + $0x1a4] sm:$0xf0] }
 0x17d   :  { %3096 = vmatpush.bf16.msra.mxu0 %v4727_v16  ;;  %v4808_v16 = vld [vmem:[#allocation8 + $0xb8] sm:$0xf0]  ;;  %v4927_v0 = vor.u32 %v5419_v18, %v4926_v63 }
 0x17e   :  { %3110 = vmatpush.bf16.msra.mxu1 %v4791_v26  ;;  %v2410_v26 = vadd.f32 %v2409_v49, %v464_v7  ;;  %v4811_v29 = vor.u32 %v5388_v4, %v4808_v16  ;;  %v4731_v49 = vor.u32 %v5368_v60, %v4728_v37  ;;  %v5402_v7 = vld [vmem:[#allocation8 + $0x124] sm:$0xf] }
 0x17f   :  { %3124 = vmatpush.bf16.msra.mxu2 %v4855_v13  ;;  %v4875_v13 = vor.u32 %v5404_v6, %v4872_v9  ;;  %v4910_v9 = vld [vmem:[#allocation8 + $0x180] sm:$0xf] }
 0x181   :  { %3097 = vmatpush.bf16.msra.mxu0 %v4719_v28  ;;  %v2424_v28 = vadd.f32 %v2423_v59, %v2410_v26  ;;  %v2465_v53 = vpop.f32.mrf.mxu0  ;;  %v4720_v59 = vld [vmem:[#allocation8 + $0x8] sm:$0xf0] }
 0x182   :  { %3111 = vmatpush.bf16.msra.mxu1 %v4783_v19  ;;  %v4739_v19 = vor.u32 %v5370_v27, %v4736_v33 }
 0x183   :  { %3125 = vmatpush.bf16.msra.mxu2 %v4847_v10  ;;  %v2438_v39 = vadd.f32 %v2437_v51, %v2424_v28  ;;  %v4864_v51 = vld [vmem:[#allocation8 + $0x128] sm:$0xf0]  ;;  %v4859_v10 = vor.u32 %v5400_v22, %v4856_v8  ;;  %v5429_v28 = vld [vmem:[#allocation8 + $0x1f4] sm:$0xf0] }
 0x184   :  { %3098 = vmatmul.bf16.vlgmr.msra.gmra.mxu0 %v5902_v44  ;;  %v4867_v15 = vor.u32 %v5402_v7, %v4864_v51  ;;  %v4968_v7 = vld [vmem:[#allocation8 + $0x1f8] sm:$0xf0]  ;;  %v465_v51 = vperm.slane %v5846_v30, 3  ;;  %v4944_v30 = vld [vmem:[#allocation8 + $0x1c8] sm:$0xf0] }
 0x185   :  { %3146 = vmatpush.bf16.msrb.mxu0 %v4779_v35  ;;  %3112 = vmatmul.bf16.vlgmr.msra.gmra.mxu1 %v5904_v56  ;;  %v4803_v35 = vor.u32 %v5386_v1, %v4800_v23  ;;  %v2452_v54 = vadd.f32 %v2451_v21, %v2438_v39  ;;  %v4848_v21 = vld [vmem:[#allocation8 + $0x108] sm:$0xf0] }
 0x186   :  { %3160 = vmatpush.bf16.msrb.mxu1 %v4843_v48  ;;  %v5384_v48 = vld [vmem:[#allocation8 + $0x94] sm:$0xf] }
 0x187   :  { %3174 = vmatpush.bf16.msrb.mxu2 %v4907_v12  ;;  %v4795_v61 = vor.u32 %v5384_v48, %v4792_v38  ;;  %v2466_v17 = vadd.f32 %v2465_v53, %v2452_v54  ;;  %v5398_v12 = vld [vmem:[#allocation8 + $0x104] sm:$0xf]  ;;  %v5427_v38 = vld [vmem:[#allocation8 + $0x1e4] sm:$0xf0]  ;;  %v5425_v53 = vld [vmem:[#allocation8 + $0x1d4] sm:$0xf0] }
 0x188   :  { %v4851_v33 = vor.u32 %v5398_v12, %v4848_v21  ;;  %v4959_v40 = vor.u32 %v5427_v38, %v4958_v14  ;;  %v5422_v12 = vld [vmem:[#allocation8 + $0x1c4] sm:$0xf]  ;;  %v5416_v38 = vld [vmem:[#allocation8 + $0x194] sm:$0xf] }
 0x189   :  { %3147 = vmatpush.bf16.msrb.mxu0 %v4771_v55  ;;  %v2479_v55 = vpop.f32.mrf.mxu1  ;;  %v2467_v11 = vpop.f32.mrf.mxu0 }
 0x18a   :  { %3161 = vmatpush.bf16.msrb.mxu1 %v4835_v34  ;;  %v5382_v34 = vld [vmem:[#allocation8 + $0x84] sm:$0xf]  ;;  %v2480_v4 = vadd.f32 %v2479_v55, %v2466_v17  ;;  %v2507_v16 = vpop.f32.mrf.mxu3  ;;  %v4942_v55 = vld [vmem:[#allocation8 + $0x1c0] sm:$0xf]  ;;  %v5428_v17 = vld [vmem:[#allocation8 + $0x1f4] sm:$0xf] }
 0x18b   :  { %3175 = vmatpush.bf16.msrb.mxu2 %v4899_v31 }
 0x18d   :  { %3148 = vmatpush.bf16.msrb.mxu0 %v4763_v2  ;;  %v4723_v2 = vor.u32 %v5366_v3, %v4720_v59 }
 0x18e   :  { %3162 = vmatpush.bf16.msrb.mxu1 %v4827_v36  ;;  %v4787_v36 = vor.u32 %v5382_v34, %v4784_v52  ;;  %v4934_v34 = vld [vmem:[#allocation8 + $0x1b0] sm:$0xf] }
 0x18f   :  { %3176 = vmatpush.bf16.msrb.mxu2 %v4891_v45  ;;  %v4950_v45 = vld [vmem:[#allocation8 + $0x1d0] sm:$0xf] }
 0x191   :  { %3149 = vmatpush.bf16.msrb.mxu0 %v4755_v58  ;;  %v2493_v58 = vpop.f32.mrf.mxu2  ;;  %v2481_v25 = vpop.f32.mrf.mxu1 }
 0x192   :  { %3163 = vmatpush.bf16.msrb.mxu1 %v4819_v24  ;;  %v2454_v24 = vadd.f32 %v2453_v62, %v2440_v50  ;;  %v2494_v20 = vadd.f32 %v2493_v58, %v2480_v4  ;;  %v2509_v23 = vpop.f32.mrf.mxu3  ;;  %v5421_v62 = vld [vmem:[#allocation8 + $0x1b4] sm:$0xf0]  ;;  %v4971_v58 = vor.u32 %v5428_v17, %v4968_v7  ;;  %v4960_v4 = vld [vmem:[#allocation8 + $0x1e8] sm:$0xf0] }
 0x193   :  { %3177 = vmatpush.bf16.msrb.mxu2 %v4883_v5  ;;  %v4935_v52 = vor.u32 %v5421_v62, %v4934_v34 }
 0x194   :  { %v2468_v41 = vadd.f32 %v2467_v11, %v2454_v24  ;;  %v5426_v24 = vld [vmem:[#allocation8 + $0x1e4] sm:$0xf] }
 0x195   :  { %3150 = vmatpush.bf16.msrb.mxu0 %v4747_v47  ;;  %v2508_v47 = vadd.f32 %v2507_v16, %v2494_v20  ;;  %v4963_v8 = vor.u32 %v5426_v24, %v4960_v4  ;;  %v4952_v20 = vld [vmem:[#allocation8 + $0x1d8] sm:$0xf0]  ;;  %v5435_v24 = vld [vmem:[#allocation11 + $0x28] sm:$0xff]  ;;  %v5434_v4 = vld [vmem:[#allocation11 + $0x20] sm:$0xff] }
 0x196   :  { %3164 = vmatpush.bf16.msrb.mxu1 %v4811_v29  ;;  %v2482_v29 = vadd.f32 %v2481_v25, %v2468_v41 }
 0x197   :  { %3178 = vmatpush.bf16.msrb.mxu2 %v4875_v13  ;;  %v5415_v13 = vld [vmem:[#allocation8 + $0x184] sm:$0xf0] }
 0x198   :  { %v4911_v50 = vor.u32 %v5415_v13, %v4910_v9 }
 0x199   :  { %3151 = vmatpush.bf16.msrb.mxu0 %v4739_v19  ;;  %v2495_v26 = vpop.f32.mrf.mxu2 }
 0x19a   :  { %3165 = vmatpush.bf16.msrb.mxu1 %v4803_v35  ;;  %v2496_v1 = vadd.f32 %v2495_v26, %v2482_v29 }
 0x19b   :  { %3179 = vmatpush.bf16.msrb.mxu2 %v4867_v15 }
 0x19c   :  { %v2510_v32 = vadd.f32 %v2509_v23, %v2496_v1  ;;  %v5420_v1 = vld [vmem:[#allocation8 + $0x1b4] sm:$0xf] }
 0x19d   :  { %3152 = vmatpush.bf16.msrb.mxu0 %v4731_v49  ;;  %v4951_v49 = vor.u32 %v5425_v53, %v4950_v45 }
 0x19e   :  { %3166 = vmatpush.bf16.msrb.mxu1 %v4795_v61  ;;  %v5423_v61 = vld [vmem:[#allocation8 + $0x1c4] sm:$0xf0] }
 0x19f   :  { %3180 = vmatpush.bf16.msrb.mxu2 %v4859_v10  ;;  %v4943_v59 = vor.u32 %v5423_v61, %v4942_v55  ;;  %v5424_v10 = vld [vmem:[#allocation8 + $0x1d4] sm:$0xf]  ;;  %v5414_v55 = vld [vmem:[#allocation8 + $0x184] sm:$0xf]  ;;  %v4912_v61 = vld [vmem:[#allocation8 + $0x188] sm:$0xf0] }
 0x1a0   :  { %v4955_v26 = vor.u32 %v5424_v10, %v4952_v20  ;;  %v5431_v10 = vld [vmem:[#allocation11 + $0x8] sm:$0xff] }
 0x1a1   :  { %3153 = vmatpush.bf16.msrb.mxu0 %v4723_v2  ;;  %v2521_v43 = vpop.f32.mrf.mxu0  ;;  %v4918_v2 = vld [vmem:[#allocation8 + $0x190] sm:$0xf] }
 0x1a2   :  { %3167 = vmatpush.bf16.msrb.mxu1 %v4787_v36  ;;  %v2535_v27 = vpop.f32.mrf.mxu1  ;;  %v5417_v36 = vld [vmem:[#allocation8 + $0x194] sm:$0xf0]  ;;  %v5443_v20 = vld [vmem:[#allocation11 + $0x68] sm:$0xff] }
 0x1a3   :  { %3181 = vmatpush.bf16.msrb.mxu2 %v4851_v33  ;;  %v4919_v6 = vor.u32 %v5417_v36, %v4918_v2 }
 0x1a4   :  { %3154 = vmatmul.bf16.vlgmr.msrb.gmra.mxu0 %v5902_v44  ;;  %v2522_v44 = vadd.f32 %v2521_v43, %v2508_v47 }
 0x1a5   :  { %3168 = vmatmul.bf16.vlgmr.msrb.gmra.mxu1 %v5904_v56  ;;  %v4966_v56 = vld [vmem:[#allocation8 + $0x1f0] sm:$0xf] }
 0x1a6   :  { %v2536_v46 = vadd.f32 %v2535_v27, %v2522_v44  ;;  %v4967_v19 = vor.u32 %v5429_v28, %v4966_v56  ;;  %v4947_v27 = vor.u32 %v5422_v12, %v4944_v30  ;;  %v4936_v44 = vld [vmem:[#allocation8 + $0x1b8] sm:$0xf0]  ;;  %v5418_v28 = vld [vmem:[#allocation8 + $0x1a4] sm:$0xf]  ;;  %v5440_v30 = vld [vmem:[#allocation11 + $0x50] sm:$0xff] }
 0x1a8   :  { %3132 = vmatpush.bf16.msra.mxu3 %v4967_v19  ;;  %v2682_v37 = vmul.f32 0.01, %v2536_v46 }
 0x1a9   :  { %v2523_v31 = vpop.f32.mrf.mxu0  ;;  %v2549_v54 = vpop.f32.mrf.mxu2 }
 0x1aa   :  { %v2524_v35 = vadd.f32 %v2523_v31, %v2510_v32  ;;  %v2537_v60 = vpop.f32.mrf.mxu1  ;;  %v2690_v39 = vmax.f32 %v2536_v46, %v2682_v37  ;;  %v2563_v5 = vpop.f32.mrf.mxu3  ;;  %v2550_v25 = vadd.f32 %v2549_v54, %v465_v51  ;;  %v4939_v46 = vor.u32 %v5420_v1, %v4936_v44  ;;  %v4928_v31 = vld [vmem:[#allocation8 + $0x1a8] sm:$0xf0] }
 0x1ac   :  { %v2538_v48 = vadd.f32 %v2537_v60, %v2524_v35  ;;  %3133 = vmatpush.bf16.msra.mxu3 %v4959_v40  ;;  %v2564_v41 = vadd.f32 %v2563_v5, %v2550_v25  ;;  %v4931_v60 = vor.u32 %v5418_v28, %v4928_v31  ;;  %v4920_v40 = vld [vmem:[#allocation8 + $0x198] sm:$0xf0] }
 0x1ad   :  { %v5433_v25 = vld [vmem:[#allocation11 + $0x18] sm:$0xff] }
 0x1ae   :  { %v2686_v42 = vmul.f32 0.01, %v2538_v48 }
 0x1b0   :  { %v2694_v57 = vmax.f32 %v2538_v48, %v2686_v42  ;;  %3134 = vmatpush.bf16.msra.mxu3 %v4951_v49 }
 0x1b1   :  { %v2551_v11 = vpop.f32.mrf.mxu2 }
 0x1b2   :  { %v2698_v3 = vpack.c.bf16 %v2694_v57, %v2690_v39  ;;  %v2565_v15 = vpop.f32.mrf.mxu3  ;;  %v2552_v21 = vadd.f32 %v2551_v11, %v465_v51  ;;  %v4923_v57 = vor.u32 %v5416_v38, %v4920_v40  ;;  %v5437_v11 = vld [vmem:[#allocation11 + $0x38] sm:$0xff] }
 0x1b3   :  { %3344 = vmatpush.bf16.msra.mxu0 %v5437_v11 }
 0x1b4   :  { %3126 = vmatmul.bf16.vlgmr.msra.gmra.mxu2 %v2698_v3  ;;  %3135 = vmatpush.bf16.msra.mxu3 %v4943_v59  ;;  %v2566_v23 = vadd.f32 %v2565_v15, %v2552_v21  ;;  %v5436_v15 = vld [vmem:[#allocation11 + $0x30] sm:$0xff]  ;;  %v2764_v21 = vld [vmem:[#allocation10] sm:$0x3] }
 0x1b5   :  { %v2767_v38 = vperm.slane %v2764_v21, 1 }
 0x1b7   :  { %3345 = vmatpush.bf16.msra.mxu0 %v5436_v15 }
 0x1b8   :  { %3136 = vmatpush.bf16.msra.mxu3 %v4935_v52 }
 0x1bb   :  { %3346 = vmatpush.bf16.msra.mxu0 %v5435_v24 }
 0x1bc   :  { %3137 = vmatpush.bf16.msra.mxu3 %v4927_v0 }
 0x1bf   :  { %3347 = vmatpush.bf16.msra.mxu0 %v5434_v4 }
 0x1c0   :  { %3138 = vmatpush.bf16.msra.mxu3 %v4919_v6 }
 0x1c1   :  { %v2577_v22 = vpop.f32.mrf.mxu0 }
 0x1c2   :  { %v2591_v16 = vpop.f32.mrf.mxu1  ;;  %v2578_v47 = vadd.f32 %v2577_v22, %v2564_v41  ;;  %v5445_v22 = vld [vmem:[#allocation11 + $0x78] sm:$0xff]  ;;  %v5430_v41 = vld [vmem:[#allocation11] sm:$0xff] }
 0x1c3   :  { %3348 = vmatpush.bf16.msra.mxu0 %v5433_v25  ;;  %3358 = vmatpush.bf16.msra.mxu1 %v5445_v22 }
 0x1c4   :  { %3182 = vmatmul.bf16.vlgmr.msrb.gmra.mxu2 %v2698_v3  ;;  %3139 = vmatpush.bf16.msra.mxu3 %v4911_v50  ;;  %v2592_v32 = vadd.f32 %v2591_v16, %v2578_v47  ;;  %v4915_v3 = vor.u32 %v5414_v55, %v4912_v61  ;;  %v5444_v16 = vld [vmem:[#allocation11 + $0x70] sm:$0xff] }
 0x1c7   :  { %3359 = vmatpush.bf16.msra.mxu1 %v5444_v16 }
 0x1c8   :  { %3188 = vmatpush.bf16.msrb.mxu3 %v4971_v58 }
 0x1c9   :  { %v2605_v43 = vpop.f32.mrf.mxu2  ;;  %v2579_v33 = vpop.f32.mrf.mxu0 }
 0x1ca   :  { %v2619_v29 = vpop.f32.mrf.mxu3  ;;  %v2593_v56 = vpop.f32.mrf.mxu1  ;;  %v2606_v19 = vadd.f32 %v2605_v43, %v2592_v32  ;;  %v2580_v35 = vadd.f32 %v2579_v33, %v2566_v23  ;;  %v5441_v43 = vld [vmem:[#allocation11 + $0x58] sm:$0xff]  ;;  %v5439_v33 = vld [vmem:[#allocation11 + $0x48] sm:$0xff]  ;;  %v5438_v23 = vld [vmem:[#allocation11 + $0x40] sm:$0xff] }
 0x1cb   :  { %3360 = vmatpush.bf16.msra.mxu1 %v5443_v20 }
 0x1cc   :  { %3189 = vmatpush.bf16.msrb.mxu3 %v4963_v8  ;;  %v2620_v42 = vadd.f32 %v2619_v29, %v2606_v19  ;;  %v2594_v39 = vadd.f32 %v2593_v56, %v2580_v35  ;;  %v5432_v8 = vld [vmem:[#allocation11 + $0x10] sm:$0xff] }
 0x1cd   :  { %3349 = vmatpush.bf16.msra.mxu0 %v5432_v8 }
 0x1d0   :  { %3190 = vmatpush.bf16.msrb.mxu3 %v4955_v26  ;;  %v5442_v26 = vld [vmem:[#allocation11 + $0x60] sm:$0xff] }
 0x1d1   :  { %v2607_v37 = vpop.f32.mrf.mxu2  ;;  %3350 = vmatpush.bf16.msra.mxu0 %v5431_v10  ;;  %3361 = vmatpush.bf16.msra.mxu1 %v5442_v26 }
 0x1d2   :  { %v2621_v48 = vpop.f32.mrf.mxu3  ;;  %v2608_v53 = vadd.f32 %v2607_v37, %v2594_v39 }
 0x1d4   :  { %3191 = vmatpush.bf16.msrb.mxu3 %v4947_v27  ;;  %v2622_v34 = vadd.f32 %v2621_v48, %v2608_v53  ;;  %v2766_v27 = vperm.slane %v2764_v21, 0 }
 0x1d5   :  { %3351 = vmatpush.bf16.msra.mxu0 %v5430_v41  ;;  %3362 = vmatpush.bf16.msra.mxu1 %v5441_v43 }
 0x1d8   :  { %3192 = vmatpush.bf16.msrb.mxu3 %v4939_v46 }
 0x1d9   :  { %3363 = vmatpush.bf16.msra.mxu1 %v5440_v30 }
 0x1dc   :  { %3193 = vmatpush.bf16.msrb.mxu3 %v4931_v60 }
 0x1dd   :  { %3364 = vmatpush.bf16.msra.mxu1 %v5439_v33 }
 0x1e0   :  { %3194 = vmatpush.bf16.msrb.mxu3 %v4923_v57 }
 0x1e1   :  { %v2633_v14 = vpop.f32.mrf.mxu0  ;;  %3365 = vmatpush.bf16.msra.mxu1 %v5438_v23 }
 0x1e2   :  { %v2647_v45 = vpop.f32.mrf.mxu1  ;;  %v2634_v49 = vadd.f32 %v2633_v14, %v2620_v42 }
 0x1e4   :  { %v2648_v62 = vadd.f32 %v2647_v45, %v2634_v49  ;;  %3195 = vmatpush.bf16.msrb.mxu3 %v4915_v3 }
 0x1e9   :  { %v2661_v59 = vpop.f32.mrf.mxu2  ;;  %v2635_v63 = vpop.f32.mrf.mxu0 }
 0x1ea   :  { %v2675_v52 = vpop.f32.mrf.mxu3  ;;  %v2662_v18 = vadd.f32 %v2661_v59, %v2648_v62  ;;  %v2636_v54 = vadd.f32 %v2635_v63, %v2622_v34  ;;  %v2649_v0 = vpop.f32.mrf.mxu1 }
 0x1ec   :  { %v2676_v5 = vadd.f32 %v2675_v52, %v2662_v18  ;;  %v2650_v2 = vadd.f32 %v2649_v0, %v2636_v54 }
 0x1ee   :  { %v2683_v13 = vmul.f32 0.01, %v2676_v5 }
 0x1f0   :  { %v2691_v7 = vmax.f32 %v2676_v5, %v2683_v13 }
 0x1f1   :  { %v2663_v36 = vpop.f32.mrf.mxu2 }
 0x1f2   :  { %v2664_v6 = vadd.f32 %v2663_v36, %v2650_v2  ;;  %v2677_v9 = vpop.f32.mrf.mxu3 }
 0x1f4   :  { %v2678_v50 = vadd.f32 %v2677_v9, %v2664_v6 }
 0x1f6   :  { %v2687_v17 = vmul.f32 0.01, %v2678_v50 }
 0x1f8   :  { %v2695_v51 = vmax.f32 %v2678_v50, %v2687_v17 }
 0x1fa   :  { %v2699_v58 = vpack.c.bf16 %v2695_v51, %v2691_v7  ;;  %v5462_v51 = vld [vmem:[#allocation13] ss:$0 sm:$0xff] }
 0x1fc   :  { %3140 = vmatmul.bf16.vlgmr.msra.gmra.mxu3 %v2699_v58 }
 0x201   :  { %v3099_v12 = vpop.f32.mrf.mxu0 }
 0x202   :  { %v3113_v29 = vpop.f32.mrf.mxu1  ;;  %v3100_v44 = vadd.f32 %v3099_v12, %v2766_v27 }
 0x204   :  { %v3114_v56 = vadd.f32 %v3113_v29, %v3100_v44 }
 0x209   :  { %v3101_v1 = vpop.f32.mrf.mxu0 }
 0x20a   :  { %v3102_v28 = vadd.f32 %v3101_v1, %v2766_v27  ;;  %v3115_v31 = vpop.f32.mrf.mxu1 }
 0x20c   :  { %3196 = vmatmul.bf16.vlgmr.msrb.gmra.mxu3 %v2699_v58  ;;  %v3116_v60 = vadd.f32 %v3115_v31, %v3102_v28 }
 0x221   :  { %v3155_v35 = vpop.f32.mrf.mxu0 }
 0x222   :  { %v3169_v39 = vpop.f32.mrf.mxu1  ;;  %v3156_v53 = vadd.f32 %v3155_v35, %v2767_v38 }
 0x224   :  { %v3170_v34 = vadd.f32 %v3169_v39, %v3156_v53 }
 0x229   :  { %v3157_v61 = vpop.f32.mrf.mxu0 }
 0x22a   :  { %v3158_v62 = vadd.f32 %v3157_v61, %v2767_v38  ;;  %v3171_v63 = vpop.f32.mrf.mxu1 }
 0x22c   :  { %v3172_v54 = vadd.f32 %v3171_v63, %v3158_v62 }
 0x237   :  { %v3127_v47 = vpop.f32.mrf.mxu2 }
 0x238   :  { %v3128_v19 = vadd.f32 %v3127_v47, %v3114_v56 }
 0x23f   :  { %v3129_v32 = vpop.f32.mrf.mxu2 }
 0x240   :  { %v3130_v48 = vadd.f32 %v3129_v32, %v3116_v60 }
 0x247   :  { %v3183_v57 = vpop.f32.mrf.mxu2 }
 0x248   :  { %v3184_v52 = vadd.f32 %v3183_v57, %v3170_v34 }
 0x24f   :  { %v3185_v18 = vpop.f32.mrf.mxu2 }
 0x250   :  { %v3186_v5 = vadd.f32 %v3185_v18, %v3172_v54 }
 0x27f   :  { %v3141_v46 = vpop.f32.mrf.mxu3 }
 0x280   :  { %v3142_v37 = vadd.f32 %v3141_v46, %v3128_v19 }
 0x282   :  { %v3202_v40 = vmul.f32 0.01, %v3142_v37 }
 0x284   :  { %v3206_v49 = vmax.f32 %v3142_v37, %v3202_v40 }
 0x287   :  { %v3143_v14 = vpop.f32.mrf.mxu3 }
 0x288   :  { %v3144_v42 = vadd.f32 %v3143_v14, %v3130_v48 }
 0x28a   :  { %v3204_v45 = vmul.f32 0.01, %v3144_v42 }
 0x28c   :  { %v3208_v55 = vmax.f32 %v3144_v42, %v3204_v45 }
 0x28e   :  { %v3210_v3 = vpack.c.bf16 %v3208_v55, %v3206_v49 }
 0x28f   :  { %v3197_v59 = vpop.f32.mrf.mxu3 }
 0x290   :  { %3352 = vmatmul.bf16.vlgmr.msra.gmra.mxu0 %v3210_v3  ;;  %v3198_v0 = vadd.f32 %v3197_v59, %v3184_v52 }
 0x292   :  { %v3203_v36 = vmul.f32 0.01, %v3198_v0 }
 0x294   :  { %v3207_v13 = vmax.f32 %v3198_v0, %v3203_v36 }
 0x297   :  { %v3199_v2 = vpop.f32.mrf.mxu3 }
 0x298   :  { %v3200_v6 = vadd.f32 %v3199_v2, %v3186_v5 }
 0x29a   :  { %v3205_v9 = vmul.f32 0.01, %v3200_v6 }
 0x29c   :  { %v3209_v50 = vmax.f32 %v3200_v6, %v3205_v9 }
 0x29e   :  { %v3211_v17 = vpack.c.bf16 %v3209_v50, %v3207_v13 }
 0x2a0   :  { %3366 = vmatmul.bf16.vlgmr.msra.gmra.mxu1 %v3211_v17 }
 0x30d   :  { %v3353_v7 = vpop.f32.mrf.mxu0 }
 0x30e   :  { %v3354_v58 = vadd.f32 %v5462_v51, %v3353_v7 }
 0x315   :  { %v3355_v24 = vpop.f32.mrf.mxu0 }
 0x316   :  { %v3356_v4 = vadd.f32 %v5462_v51, %v3355_v24 }
 0x31d   :  { %v3367_v11 = vpop.f32.mrf.mxu1 }
 0x31e   :  { %v3368_v15 = vadd.f32 %v3367_v11, %v3354_v58 }
 0x320   :  { %3372 = vst [vmem:[#allocation14] sm:$0xff] %v3368_v15 }
 0x325   :  { %v3369_v25 = vpop.f32.mrf.mxu1 }
 0x326   :  { %v3370_v22 = vadd.f32 %v3369_v25, %v3356_v4 }
 0x328   :  { %3373 = vst [vmem:[#allocation14 + $0x8] sm:$0xff] %v3370_v22 }
 0x329   :  { %3386 = dma.vmem_to_hbm [thread:$0]  %s3379_s6, 256, %s3381_s18, [#allocation4], %s5669_s13, %s5669_s13, %s5670_s14  }
 0x32a   :  { %5663 = dma.done.wait [#allocation4], 256  }
 0x32b   :  { %5664 = vsyncadd [#allocation4], 4294967040 }
 0x32c   :  { %3391 = vsyncpa [#allocation3], 1 }
 0x32d   :  { %3392 = vsyncpa [#allocation6], 1 }
 0x32e   :  { %3393 = vsyncpa [#allocation9], 1 }
 0x32f   :  { %3394 = vsyncpa [#allocation12], 1 }
 0x330   :  { %3395 = vsyncpa [#allocation4], 1 }

</bundles_post_ra>
